<compile_context>
chip_gen: v7x
topology: tpu7x:2x2x1
jax: 0.10.0
libtpu: 0.0.40
codegen_flags: <defaults>
</compile_context>

<pallas_src>
import numpy as np

import jax
import jax.numpy as jnp
from jax.experimental import pallas as pl
from jax.experimental.pallas import tpu as pltpu


# --------------------------------------------------------------------------- #
# Configuration (mirrors the PyTorch __init__ arguments) and fixed geometry.
# The kernel is specialised to an (N, 2, 8, 8, 8) input volume.
# --------------------------------------------------------------------------- #
IN_CHANNELS = 2
EXTRACTOR_CHANNELS = (4, 8)
DECODER_CHANNELS = (8, 4)
DECODER_BASE_SHAPE = (8, 2, 2)            # channels unused; spatial = (2, 2)
DECODER_OUTPUT_SHAPES = {
    "latent": (6,),                       # Linear(8 -> 6)
    "seg": (3, 2, 2),                     # level-0 head: Conv2d(8 -> 3, k3, p1) + ReLU
    "mask": (1, 4, 4),                    # level-1 head: Conv2d(4 -> 1, k3, p1) + ReLU
}
LATENT_DIM, SEG_CH, MASK_CH = 6, 3, 1

# geometry A : 8^3 interior, zero-padded to 10^3, flattened row-major (d,h,w)
P_A, M_A = 1000, 111                      # padded size, max |tap offset| (100+10+1)
CW_A = P_A - 2 * M_A                      # 778 central width (covers every interior voxel)
XMARG, XW = 128, 1280                     # lane margin (>= M_A, 128-aligned) / padded input width
# geometry B : 4^3 interior, padded to 6^3
P_B, M_B = 216, 43
CW_B = P_B - 2 * M_B                      # 130
# geometry C : 2^2 interior, padded to 4^2  (decoder level 0)
P_C, M_C = 16, 5
CW_C = P_C - 2 * M_C                      # 6
CW_CX = P_C + 2 * M_C                     # 26   margined level-0 input width
# dilated geometry for the transposed conv : 7x7
P_DIL, UPW = 49, 25
# geometry E : 4^2 interior, padded to 6^2  (decoder level 1)
P_E, M_E = 36, 7
CW_E = P_E - 2 * M_E                      # 22
CW_EX = P_E + 2 * M_E                     # 50   margined level-1 input width

# kernel-tap flat offsets (order must match the tap-weight layout in prepare_params)
OFFS_A = [(kd - 1) * 100 + (kh - 1) * 10 + (kw - 1)
          for kd in range(3) for kh in range(3) for kw in range(3)]
OFFS_B = [(kd - 1) * 36 + (kh - 1) * 6 + (kw - 1)
          for kd in range(3) for kh in range(3) for kw in range(3)]
OFFS_C = [(ky - 1) * 4 + (kx - 1) for ky in range(3) for kx in range(3)]
OFFS_E = [(ky - 1) * 6 + (kx - 1) for ky in range(3) for kx in range(3)]
OFFS_UP = [i * 7 + j for i in range(4) for j in range(4)]


# --------------------------------------------------------------------------- #
# Parameter initialisation (PyTorch layouts, same as the reference module).
# --------------------------------------------------------------------------- #
def init_params(key):
    ks = iter(jax.random.split(key, 32))

    def w(shape, scale=0.1):
        return (scale * jax.random.normal(next(ks), shape)).astype(jnp.float32)

    def b(n):
        return (0.01 * jax.random.normal(next(ks), (n,))).astype(jnp.float32)

    c0, c1 = EXTRACTOR_CHANNELS
    d0, d1 = DECODER_CHANNELS
    bh, bw = DECODER_BASE_SHAPE[1:]
    return {
        # feature extractor
        "ext_block0_w": w((c0, IN_CHANNELS, 3, 3, 3)), "ext_block0_b": b(c0),
        "ext_pool0_w":  w((c1, c0, 3, 3, 3)),          "ext_pool0_b":  b(c1),
        "ext_block1_w": w((c1, c1, 3, 3, 3)),          "ext_block1_b": b(c1),
        # linear output head
        "lin_latent_w": w((LATENT_DIM, c1)),           "lin_latent_b": b(LATENT_DIM),
        # decoder
        "dec_in_w":     w((c1, d0, bh, bw)),           "dec_in_b":     b(d0),
        "dec_block0_w": w((d0, d0, 3, 3)),             "dec_block0_b": b(d0),
        "dec_up0_w":    w((d0, d1, 4, 4)),             "dec_up0_b":    b(d1),
        "dec_block1_w": w((d1, d1, 3, 3)),             "dec_block1_b": b(d1),
        # conv output heads
        "out_seg_w":    w((SEG_CH, d0, 3, 3)),         "out_seg_b":    b(SEG_CH),
        "out_mask_w":   w((MASK_CH, d1, 3, 3)),        "out_mask_b":   b(MASK_CH),
    }


# --------------------------------------------------------------------------- #
# One-time host-side preparation: tap-weight re-layout, interior masks,
# selection/scatter matrices.  Pure numpy, done once, not on the per-call path.
# --------------------------------------------------------------------------- #
def prepare_params(params):
    f32 = np.float32
    c0, c1 = EXTRACTOR_CHANNELS
    d0ch, d1ch = DECODER_CHANNELS

    def taps3(w):   # (O, C, 3, 3, 3) -> (27, O, C)  (tap order == OFFS_A/OFFS_B)
        w = np.asarray(w, f32)
        return np.transpose(w, (2, 3, 4, 0, 1)).reshape(27, w.shape[0], w.shape[1])

    def taps2(w):   # (O, C, 3, 3) -> (9, O, C)      (tap order == OFFS_C/OFFS_E)
        w = np.asarray(w, f32)
        return np.transpose(w, (2, 3, 0, 1)).reshape(9, w.shape[0], w.shape[1])

    def col(v):
        return np.asarray(v, f32).reshape(-1, 1)

    # interior (non-halo) masks of each padded geometry
    maskA = np.zeros((1, P_A), f32)
    for d in range(1, 9):
        for h in range(1, 9):
            maskA[0, d * 100 + h * 10 + 1: d * 100 + h * 10 + 9] = 1.0
    maskB = np.zeros((1, P_B), f32)
    for d in range(1, 5):
        for h in range(1, 5):
            maskB[0, d * 36 + h * 6 + 1: d * 36 + h * 6 + 5] = 1.0
    maskC = np.zeros((1, P_C), f32)
    maskC[0, [5, 6, 9, 10]] = 1.0
    maskE = np.zeros((1, P_E), f32)
    for y in range(1, 5):
        maskE[0, y * 6 + 1: y * 6 + 5] = 1.0

    # stride-2 subsample: central-A columns -> padded-B columns (interior only)
    sel1 = np.zeros((CW_A, P_B), f32)
    for do in range(4):
        for ho in range(4):
            for wo in range(4):
                src = (2 * do + 1) * 100 + (2 * ho + 1) * 10 + (2 * wo + 1) - M_A
                dst = (do + 1) * 36 + (ho + 1) * 6 + (wo + 1)
                sel1[src, dst] = 1.0

    # global-average-pool weights (1/64 at interior-B, laid out on central-B columns)
    gap = np.zeros((1, CW_B), f32)
    for d in range(1, 5):
        for h in range(1, 5):
            gap[0, d * 36 + h * 6 + 1 - M_B: d * 36 + h * 6 + 5 - M_B] = 1.0 / 64.0

    # decoder_in_conv (ConvTranspose2d on a 1x1 input) laid out on margined level-0 geometry
    wdin_pt = np.asarray(params["dec_in_w"], f32)            # (c1, d0, 2, 2)
    wdin = np.zeros((c1, d0ch, CW_CX), f32)
    bdinp = np.zeros((d0ch, CW_CX), f32)
    for i in range(2):
        for j in range(2):
            cc = M_C + (1 + i) * 4 + (1 + j)
            wdin[:, :, cc] = wdin_pt[:, :, i, j]
            bdinp[:, cc] = np.asarray(params["dec_in_b"], f32)

    # level-0 interior -> dense 2x2 gather (seg head output)
    selC = np.zeros((CW_C, 4), f32)
    for i in range(2):
        for j in range(2):
            selC[(1 + i) * 4 + (1 + j) - M_C, i * 2 + j] = 1.0

    # transposed conv: scatter level-0 interior pixels onto the dilated+padded 7x7 grid
    scat = np.zeros((P_C, P_DIL), f32)
    for p in range(2):
        for q in range(2):
            scat[(1 + p) * 4 + (1 + q), (2 + 2 * p) * 7 + (2 + 2 * q)] = 1.0

    # transposed-conv taps: flipped 4x4 kernel, (16, d1, d0), tap order == OFFS_UP
    wup_pt = np.asarray(params["dec_up0_w"], f32)            # (d0, d1, 4, 4)
    wup = np.transpose(wup_pt[:, :, ::-1, ::-1], (2, 3, 1, 0)).reshape(16, d1ch, d0ch)

    # transposed-conv valid outputs -> margined level-1 geometry (+ bias plane)
    selup = np.zeros((UPW, CW_EX), f32)
    bupp = np.zeros((d1ch, CW_EX), f32)
    for y in range(4):
        for x in range(4):
            cc = M_E + (1 + y) * 6 + (1 + x)
            selup[7 * y + x, cc] = 1.0
            bupp[:, cc] = np.asarray(params["dec_up0_b"], f32)

    # level-1 interior -> dense 4x4 gather (mask head output)
    selE = np.zeros((CW_E, 16), f32)
    for y in range(4):
        for x in range(4):
            selE[(1 + y) * 6 + (1 + x) - M_E, 4 * y + x] = 1.0

    # pooling-conv bias plane (bias only at interior-B so halo stays zero)
    b2p = col(params["ext_pool0_b"]) * maskB

    consts = [
        taps3(params["ext_block0_w"]), col(params["ext_block0_b"]), maskA,
        taps3(params["ext_pool0_w"]), b2p, sel1,
        taps3(params["ext_block1_w"]), col(params["ext_block1_b"]), gap,
        np.asarray(params["lin_latent_w"], f32), col(params["lin_latent_b"]),
        wdin, bdinp,
        taps2(params["dec_block0_w"]), col(params["dec_block0_b"]), maskC,
        taps2(params["out_seg_w"]), col(params["out_seg_b"]), selC,
        scat, wup, selup, bupp,
        taps2(params["dec_block1_w"]), col(params["dec_block1_b"]), maskE,
        taps2(params["out_mask_w"]), col(params["out_mask_b"]), selE,
    ]
    return [jnp.asarray(c) for c in consts]


# --------------------------------------------------------------------------- #
# The fused kernel: one grid step == one batch element, full network in VMEM.
# --------------------------------------------------------------------------- #
def _decoder_fused_kernel(
    x_ref,
    w1_ref, b1_ref, maska_ref,
    w2_ref, b2p_ref, sel1_ref,
    w3_ref, b3_ref, gap_ref,
    wlat_ref, blat_ref,
    wdin_ref, bdinp_ref,
    wb0_ref, bb0_ref, maskc_ref,
    wseg_ref, bseg_ref, selc_ref,
    scat_ref, wup_ref, selup_ref, bupp_ref,
    wb1_ref, bb1_ref, maske_ref,
    wmask_ref, bmask_ref, sele_ref,
    out_latent_ref, out_seg_ref, out_mask_ref,
):
    f32 = jnp.float32
    relu = lambda v: jnp.maximum(v, 0.0)
    c0, c1 = EXTRACTOR_CHANNELS
    d0ch, d1ch = DECODER_CHANNELS

    xa = x_ref[0]                                                     # (Cin, XW)

    # ---- extractor block_0 : Conv3d(k3,p1) + ReLU, full geometry A ----------
    acc = jnp.zeros((c0, P_A), f32)
    for t, off in enumerate(OFFS_A):
        acc = acc + jnp.dot(w1_ref[t], xa[:, XMARG + off: XMARG + off + P_A],
                            preferred_element_type=f32)
    h1 = maska_ref[...] * relu(acc + b1_ref[...])                     # zero halo

    # ---- extractor pool_0 : Conv3d(k3,s2,p1) == stride-1 conv + subsample ---
    acc = jnp.zeros((c1, CW_A), f32)
    for t, off in enumerate(OFFS_A):
        acc = acc + jnp.dot(w2_ref[t], h1[:, M_A + off: M_A + off + CW_A],
                            preferred_element_type=f32)
    h2 = jnp.dot(acc, sel1_ref[...], preferred_element_type=f32) + b2p_ref[...]   # (c1, P_B)

    # ---- extractor block_1 : Conv3d(k3,p1) + ReLU, central of geometry B ----
    acc = jnp.zeros((c1, CW_B), f32)
    for t, off in enumerate(OFFS_B):
        acc = acc + jnp.dot(w3_ref[t], h2[:, M_B + off: M_B + off + CW_B],
                            preferred_element_type=f32)
    h3 = relu(acc + b3_ref[...])                                      # (c1, CW_B)

    # ---- global average pool (fused, lane-wide reduction) -------------------
    feat = jnp.sum(h3 * gap_ref[...], axis=1, keepdims=True)          # (c1, 1)

    # ---- latent linear head (pool folded in to keep the matmul lane-wide) ---
    lat = jnp.sum(jnp.dot(wlat_ref[...], h3, preferred_element_type=f32)
                  * gap_ref[...], axis=1, keepdims=True) + blat_ref[...]
    out_latent_ref[0] = lat                                           # (6, 1)

    # ---- decoder_in_conv (ConvTranspose2d on the 1x1 feature map) -----------
    dec = bdinp_ref[...]                                              # (d0, CW_CX)
    for c in range(c1):
        dec = dec + feat[c:c + 1, 0:1] * wdin_ref[c]

    # ---- decoder block 0 : Conv2d(k3,p1) + ReLU, full geometry C ------------
    acc = jnp.zeros((d0ch, P_C), f32)
    for t, off in enumerate(OFFS_C):
        acc = acc + jnp.dot(wb0_ref[t], dec[:, M_C + off: M_C + off + P_C],
                            preferred_element_type=f32)
    f0 = maskc_ref[...] * relu(acc + bb0_ref[...])                    # zero halo

    # ---- 'seg' head : Conv2d(8->3,k3,p1) + ReLU on level-0 features ---------
    acc = jnp.zeros((SEG_CH, CW_C), f32)
    for t, off in enumerate(OFFS_C):
        acc = acc + jnp.dot(wseg_ref[t], f0[:, M_C + off: M_C + off + CW_C],
                            preferred_element_type=f32)
    out_seg_ref[0] = jnp.dot(relu(acc + bseg_ref[...]), selc_ref[...],
                             preferred_element_type=f32)              # (3, 4)

    # ---- upsampling ConvTranspose2d(k4,s2,p1): dilation-scatter + 16 taps ---
    dil = jnp.dot(f0, scat_ref[...], preferred_element_type=f32)      # (d0, 49)
    acc = jnp.zeros((d1ch, UPW), f32)
    for t, off in enumerate(OFFS_UP):
        acc = acc + jnp.dot(wup_ref[t], dil[:, off: off + UPW],
                            preferred_element_type=f32)
    d1 = jnp.dot(acc, selup_ref[...], preferred_element_type=f32) + bupp_ref[...]  # (d1, CW_EX)

    # ---- decoder block 1 : Conv2d(k3,p1) + ReLU, full geometry E ------------
    acc = jnp.zeros((d1ch, P_E), f32)
    for t, off in enumerate(OFFS_E):
        acc = acc + jnp.dot(wb1_ref[t], d1[:, M_E + off: M_E + off + P_E],
                            preferred_element_type=f32)
    f1 = maske_ref[...] * relu(acc + bb1_ref[...])                    # zero halo

    # ---- 'mask' head : Conv2d(4->1,k3,p1) + ReLU on level-1 features --------
    acc = jnp.zeros((MASK_CH, CW_E), f32)
    for t, off in enumerate(OFFS_E):
        acc = acc + jnp.dot(wmask_ref[t], f1[:, M_E + off: M_E + off + CW_E],
                            preferred_element_type=f32)
    out_mask_ref[0] = jnp.dot(relu(acc + bmask_ref[...]), sele_ref[...],
                              preferred_element_type=f32)             # (1, 16)


def _const_index_map(ndim):
    def imap(b):
        return (0,) * ndim
    return imap


# --------------------------------------------------------------------------- #
# Forward wrapper: minimal host glue + one pallas_call.
# --------------------------------------------------------------------------- #
def convolutional_decoder_forward(consts, x):
    n = x.shape[0]
    # input volume -> zero-padded (pad=1), flattened spatial, with a 128-lane margin
    xp = jnp.pad(x.astype(jnp.float32), ((0, 0), (0, 0), (1, 1), (1, 1), (1, 1)))
    xe = jnp.pad(xp.reshape(n, IN_CHANNELS, P_A),
                 ((0, 0), (0, 0), (XMARG, XW - XMARG - P_A)))

    in_specs = [pl.BlockSpec((1, IN_CHANNELS, XW), lambda b: (b, 0, 0))]
    in_specs += [pl.BlockSpec(c.shape, _const_index_map(c.ndim)) for c in consts]

    out_shape = (
        jax.ShapeDtypeStruct((n, LATENT_DIM, 1), jnp.float32),
        jax.ShapeDtypeStruct((n, SEG_CH, 4), jnp.float32),
        jax.ShapeDtypeStruct((n, MASK_CH, 16), jnp.float32),
    )
    out_specs = [
        pl.BlockSpec((1, LATENT_DIM, 1), lambda b: (b, 0, 0)),
        pl.BlockSpec((1, SEG_CH, 4), lambda b: (b, 0, 0)),
        pl.BlockSpec((1, MASK_CH, 16), lambda b: (b, 0, 0)),
    ]

    lat, seg, msk = pl.pallas_call(
        _decoder_fused_kernel,
        out_shape=out_shape,
        grid_spec=pltpu.PrefetchScalarGridSpec(
            num_scalar_prefetch=0,
            grid=(n,),
            in_specs=in_specs,
            out_specs=out_specs,
        ),
        compiler_params=pltpu.CompilerParams(
            dimension_semantics=("parallel",)),   # batch across v7x's two TensorCores
    )(xe, *consts)

    return {
        "latent": lat[:, :, 0],
        "seg": seg.reshape(n, SEG_CH, 2, 2),
        "mask": msk.reshape(n, MASK_CH, 4, 4),
    }


if __name__ == "__main__":
    key = jax.random.PRNGKey(0)
    pkey, xkey = jax.random.split(key)
    params = init_params(pkey)
    consts = prepare_params(params)

    # Input volume: (batch=2, channels=2, D=8, H=8, W=8), NCDHW
    x = jax.random.normal(xkey, (2, IN_CHANNELS, 8, 8, 8), dtype=jnp.float32)

    fwd = jax.jit(convolutional_decoder_forward)
    outputs = fwd(consts, x)
    outputs = jax.tree_util.tree_map(jax.block_until_ready, outputs)

    assert outputs["latent"].shape == (2, LATENT_DIM)
    assert outputs["seg"].shape == (2, SEG_CH, 2, 2)
    assert outputs["mask"].shape == (2, MASK_CH, 4, 4)
    assert all(bool(jnp.all(jnp.isfinite(v))) for v in outputs.values())
    print("KERNEL_OK")
</pallas_src>

<mosaic_0001>
module attributes {stable_mosaic.version = 11 : i64} {
  func.func @_decoder_fused_kernel(%arg0: i32, %arg1: memref<1x2x1280xf32, #tpu.memory_space<vmem>>, %arg2: memref<27x4x2xf32, #tpu.memory_space<vmem>>, %arg3: memref<4x1xf32, #tpu.memory_space<vmem>>, %arg4: memref<1x1000xf32, #tpu.memory_space<vmem>>, %arg5: memref<27x8x4xf32, #tpu.memory_space<vmem>>, %arg6: memref<8x216xf32, #tpu.memory_space<vmem>>, %arg7: memref<778x216xf32, #tpu.memory_space<vmem>>, %arg8: memref<27x8x8xf32, #tpu.memory_space<vmem>>, %arg9: memref<8x1xf32, #tpu.memory_space<vmem>>, %arg10: memref<1x130xf32, #tpu.memory_space<vmem>>, %arg11: memref<6x8xf32, #tpu.memory_space<vmem>>, %arg12: memref<6x1xf32, #tpu.memory_space<vmem>>, %arg13: memref<8x8x26xf32, #tpu.memory_space<vmem>>, %arg14: memref<8x26xf32, #tpu.memory_space<vmem>>, %arg15: memref<9x8x8xf32, #tpu.memory_space<vmem>>, %arg16: memref<8x1xf32, #tpu.memory_space<vmem>>, %arg17: memref<1x16xf32, #tpu.memory_space<vmem>>, %arg18: memref<9x3x8xf32, #tpu.memory_space<vmem>>, %arg19: memref<3x1xf32, #tpu.memory_space<vmem>>, %arg20: memref<6x4xf32, #tpu.memory_space<vmem>>, %arg21: memref<16x49xf32, #tpu.memory_space<vmem>>, %arg22: memref<16x4x8xf32, #tpu.memory_space<vmem>>, %arg23: memref<25x50xf32, #tpu.memory_space<vmem>>, %arg24: memref<4x50xf32, #tpu.memory_space<vmem>>, %arg25: memref<9x4x4xf32, #tpu.memory_space<vmem>>, %arg26: memref<4x1xf32, #tpu.memory_space<vmem>>, %arg27: memref<1x36xf32, #tpu.memory_space<vmem>>, %arg28: memref<9x1x4xf32, #tpu.memory_space<vmem>>, %arg29: memref<1x1xf32, #tpu.memory_space<vmem>>, %arg30: memref<22x16xf32, #tpu.memory_space<vmem>>, %arg31: memref<1x6x1xf32, #tpu.memory_space<vmem>>, %arg32: memref<1x3x4xf32, #tpu.memory_space<vmem>>, %arg33: memref<1x1x16xf32, #tpu.memory_space<vmem>>) attributes {dimension_semantics = [#tpu.dimension_semantics<parallel>], iteration_bounds = array<i64: 2>, scalar_prefetch = 0 : i64, scratch_operands = 0 : i64, tpu.core_type = #tpu.core_type<tc>, window_params = [{transform_indices = @transform_0, window_bounds = array<i64: 1, 2, 1280>}, {pipeline_mode = #tpu.pipeline_mode<synchronous>, transform_indices = @transform_1, window_bounds = array<i64: 27, 4, 2>}, {pipeline_mode = #tpu.pipeline_mode<synchronous>, transform_indices = @transform_2, window_bounds = array<i64: 4, 1>}, {pipeline_mode = #tpu.pipeline_mode<synchronous>, transform_indices = @transform_3, window_bounds = array<i64: 1, 1000>}, {pipeline_mode = #tpu.pipeline_mode<synchronous>, transform_indices = @transform_4, window_bounds = array<i64: 27, 8, 4>}, {pipeline_mode = #tpu.pipeline_mode<synchronous>, transform_indices = @transform_5, window_bounds = array<i64: 8, 216>}, {pipeline_mode = #tpu.pipeline_mode<synchronous>, transform_indices = @transform_6, window_bounds = array<i64: 778, 216>}, {pipeline_mode = #tpu.pipeline_mode<synchronous>, transform_indices = @transform_7, window_bounds = array<i64: 27, 8, 8>}, {pipeline_mode = #tpu.pipeline_mode<synchronous>, transform_indices = @transform_8, window_bounds = array<i64: 8, 1>}, {pipeline_mode = #tpu.pipeline_mode<synchronous>, transform_indices = @transform_9, window_bounds = array<i64: 1, 130>}, {pipeline_mode = #tpu.pipeline_mode<synchronous>, transform_indices = @transform_10, window_bounds = array<i64: 6, 8>}, {pipeline_mode = #tpu.pipeline_mode<synchronous>, transform_indices = @transform_11, window_bounds = array<i64: 6, 1>}, {pipeline_mode = #tpu.pipeline_mode<synchronous>, transform_indices = @transform_12, window_bounds = array<i64: 8, 8, 26>}, {pipeline_mode = #tpu.pipeline_mode<synchronous>, transform_indices = @transform_13, window_bounds = array<i64: 8, 26>}, {pipeline_mode = #tpu.pipeline_mode<synchronous>, transform_indices = @transform_14, window_bounds = array<i64: 9, 8, 8>}, {pipeline_mode = #tpu.pipeline_mode<synchronous>, transform_indices = @transform_15, window_bounds = array<i64: 8, 1>}, {pipeline_mode = #tpu.pipeline_mode<synchronous>, transform_indices = @transform_16, window_bounds = array<i64: 1, 16>}, {pipeline_mode = #tpu.pipeline_mode<synchronous>, transform_indices = @transform_17, window_bounds = array<i64: 9, 3, 8>}, {pipeline_mode = #tpu.pipeline_mode<synchronous>, transform_indices = @transform_18, window_bounds = array<i64: 3, 1>}, {pipeline_mode = #tpu.pipeline_mode<synchronous>, transform_indices = @transform_19, window_bounds = array<i64: 6, 4>}, {pipeline_mode = #tpu.pipeline_mode<synchronous>, transform_indices = @transform_20, window_bounds = array<i64: 16, 49>}, {pipeline_mode = #tpu.pipeline_mode<synchronous>, transform_indices = @transform_21, window_bounds = array<i64: 16, 4, 8>}, {pipeline_mode = #tpu.pipeline_mode<synchronous>, transform_indices = @transform_22, window_bounds = array<i64: 25, 50>}, {pipeline_mode = #tpu.pipeline_mode<synchronous>, transform_indices = @transform_23, window_bounds = array<i64: 4, 50>}, {pipeline_mode = #tpu.pipeline_mode<synchronous>, transform_indices = @transform_24, window_bounds = array<i64: 9, 4, 4>}, {pipeline_mode = #tpu.pipeline_mode<synchronous>, transform_indices = @transform_25, window_bounds = array<i64: 4, 1>}, {pipeline_mode = #tpu.pipeline_mode<synchronous>, transform_indices = @transform_26, window_bounds = array<i64: 1, 36>}, {pipeline_mode = #tpu.pipeline_mode<synchronous>, transform_indices = @transform_27, window_bounds = array<i64: 9, 1, 4>}, {pipeline_mode = #tpu.pipeline_mode<synchronous>, transform_indices = @transform_28, window_bounds = array<i64: 1, 1>}, {pipeline_mode = #tpu.pipeline_mode<synchronous>, transform_indices = @transform_29, window_bounds = array<i64: 22, 16>}, {transform_indices = @transform_30, window_bounds = array<i64: 1, 6, 1>}, {transform_indices = @transform_31, window_bounds = array<i64: 1, 3, 4>}, {transform_indices = @transform_32, window_bounds = array<i64: 1, 1, 16>}]} {
    %c0 = arith.constant 0 : index
    %c0_0 = arith.constant 0 : index
    %c0_1 = arith.constant 0 : index
    %0 = vector.load %arg1[%c0, %c0_0, %c0_1] : memref<1x2x1280xf32, #tpu.memory_space<vmem>>, vector<1x2x1280xf32>
    %1 = vector.shape_cast %0 : vector<1x2x1280xf32> to vector<2x1280xf32>
    %cst = arith.constant 0.000000e+00 : f32
    %2 = vector.broadcast %cst : f32 to vector<4x1000xf32>
    %c0_2 = arith.constant 0 : index
    %c0_3 = arith.constant 0 : index
    %c0_4 = arith.constant 0 : index
    %3 = vector.load %arg2[%c0_2, %c0_3, %c0_4] : memref<27x4x2xf32, #tpu.memory_space<vmem>>, vector<1x4x2xf32>
    %4 = vector.shape_cast %3 : vector<1x4x2xf32> to vector<4x2xf32>
    %5 = vector.extract_strided_slice %1 {offsets = [0, 17], sizes = [2, 1000], strides = [1, 1]} : vector<2x1280xf32> to vector<2x1000xf32>
    %cst_5 = arith.constant dense<0.000000e+00> : vector<4x1000xf32>
    %6 = tpu.matmul %4, %5, %cst_5 {dimension_numbers = #tpu.dot_dimension_numbers<[1], [0], [0], [1], [0, 0, 1, 1], [], []>} : vector<4x2xf32>, vector<2x1000xf32>, vector<4x1000xf32> -> vector<4x1000xf32>
    %7 = arith.addf %2, %6 : vector<4x1000xf32>
    %c1 = arith.constant 1 : index
    %c0_6 = arith.constant 0 : index
    %c0_7 = arith.constant 0 : index
    %8 = vector.load %arg2[%c1, %c0_6, %c0_7] : memref<27x4x2xf32, #tpu.memory_space<vmem>>, vector<1x4x2xf32>
    %9 = vector.shape_cast %8 : vector<1x4x2xf32> to vector<4x2xf32>
    %10 = vector.extract_strided_slice %1 {offsets = [0, 18], sizes = [2, 1000], strides = [1, 1]} : vector<2x1280xf32> to vector<2x1000xf32>
    %cst_8 = arith.constant dense<0.000000e+00> : vector<4x1000xf32>
    %11 = tpu.matmul %9, %10, %cst_8 {dimension_numbers = #tpu.dot_dimension_numbers<[1], [0], [0], [1], [0, 0, 1, 1], [], []>} : vector<4x2xf32>, vector<2x1000xf32>, vector<4x1000xf32> -> vector<4x1000xf32>
    %12 = arith.addf %7, %11 : vector<4x1000xf32>
    %c2 = arith.constant 2 : index
    %c0_9 = arith.constant 0 : index
    %c0_10 = arith.constant 0 : index
    %13 = vector.load %arg2[%c2, %c0_9, %c0_10] : memref<27x4x2xf32, #tpu.memory_space<vmem>>, vector<1x4x2xf32>
    %14 = vector.shape_cast %13 : vector<1x4x2xf32> to vector<4x2xf32>
    %15 = vector.extract_strided_slice %1 {offsets = [0, 19], sizes = [2, 1000], strides = [1, 1]} : vector<2x1280xf32> to vector<2x1000xf32>
    %cst_11 = arith.constant dense<0.000000e+00> : vector<4x1000xf32>
    %16 = tpu.matmul %14, %15, %cst_11 {dimension_numbers = #tpu.dot_dimension_numbers<[1], [0], [0], [1], [0, 0, 1, 1], [], []>} : vector<4x2xf32>, vector<2x1000xf32>, vector<4x1000xf32> -> vector<4x1000xf32>
    %17 = arith.addf %12, %16 : vector<4x1000xf32>
    %c3 = arith.constant 3 : index
    %c0_12 = arith.constant 0 : index
    %c0_13 = arith.constant 0 : index
    %18 = vector.load %arg2[%c3, %c0_12, %c0_13] : memref<27x4x2xf32, #tpu.memory_space<vmem>>, vector<1x4x2xf32>
    %19 = vector.shape_cast %18 : vector<1x4x2xf32> to vector<4x2xf32>
    %20 = vector.extract_strided_slice %1 {offsets = [0, 27], sizes = [2, 1000], strides = [1, 1]} : vector<2x1280xf32> to vector<2x1000xf32>
    %cst_14 = arith.constant dense<0.000000e+00> : vector<4x1000xf32>
    %21 = tpu.matmul %19, %20, %cst_14 {dimension_numbers = #tpu.dot_dimension_numbers<[1], [0], [0], [1], [0, 0, 1, 1], [], []>} : vector<4x2xf32>, vector<2x1000xf32>, vector<4x1000xf32> -> vector<4x1000xf32>
    %22 = arith.addf %17, %21 : vector<4x1000xf32>
    %c4 = arith.constant 4 : index
    %c0_15 = arith.constant 0 : index
    %c0_16 = arith.constant 0 : index
    %23 = vector.load %arg2[%c4, %c0_15, %c0_16] : memref<27x4x2xf32, #tpu.memory_space<vmem>>, vector<1x4x2xf32>
    %24 = vector.shape_cast %23 : vector<1x4x2xf32> to vector<4x2xf32>
    %25 = vector.extract_strided_slice %1 {offsets = [0, 28], sizes = [2, 1000], strides = [1, 1]} : vector<2x1280xf32> to vector<2x1000xf32>
    %cst_17 = arith.constant dense<0.000000e+00> : vector<4x1000xf32>
    %26 = tpu.matmul %24, %25, %cst_17 {dimension_numbers = #tpu.dot_dimension_numbers<[1], [0], [0], [1], [0, 0, 1, 1], [], []>} : vector<4x2xf32>, vector<2x1000xf32>, vector<4x1000xf32> -> vector<4x1000xf32>
    %27 = arith.addf %22, %26 : vector<4x1000xf32>
    %c5 = arith.constant 5 : index
    %c0_18 = arith.constant 0 : index
    %c0_19 = arith.constant 0 : index
    %28 = vector.load %arg2[%c5, %c0_18, %c0_19] : memref<27x4x2xf32, #tpu.memory_space<vmem>>, vector<1x4x2xf32>
    %29 = vector.shape_cast %28 : vector<1x4x2xf32> to vector<4x2xf32>
    %30 = vector.extract_strided_slice %1 {offsets = [0, 29], sizes = [2, 1000], strides = [1, 1]} : vector<2x1280xf32> to vector<2x1000xf32>
    %cst_20 = arith.constant dense<0.000000e+00> : vector<4x1000xf32>
    %31 = tpu.matmul %29, %30, %cst_20 {dimension_numbers = #tpu.dot_dimension_numbers<[1], [0], [0], [1], [0, 0, 1, 1], [], []>} : vector<4x2xf32>, vector<2x1000xf32>, vector<4x1000xf32> -> vector<4x1000xf32>
    %32 = arith.addf %27, %31 : vector<4x1000xf32>
    %c6 = arith.constant 6 : index
    %c0_21 = arith.constant 0 : index
    %c0_22 = arith.constant 0 : index
    %33 = vector.load %arg2[%c6, %c0_21, %c0_22] : memref<27x4x2xf32, #tpu.memory_space<vmem>>, vector<1x4x2xf32>
    %34 = vector.shape_cast %33 : vector<1x4x2xf32> to vector<4x2xf32>
    %35 = vector.extract_strided_slice %1 {offsets = [0, 37], sizes = [2, 1000], strides = [1, 1]} : vector<2x1280xf32> to vector<2x1000xf32>
    %cst_23 = arith.constant dense<0.000000e+00> : vector<4x1000xf32>
    %36 = tpu.matmul %34, %35, %cst_23 {dimension_numbers = #tpu.dot_dimension_numbers<[1], [0], [0], [1], [0, 0, 1, 1], [], []>} : vector<4x2xf32>, vector<2x1000xf32>, vector<4x1000xf32> -> vector<4x1000xf32>
    %37 = arith.addf %32, %36 : vector<4x1000xf32>
    %c7 = arith.constant 7 : index
    %c0_24 = arith.constant 0 : index
    %c0_25 = arith.constant 0 : index
    %38 = vector.load %arg2[%c7, %c0_24, %c0_25] : memref<27x4x2xf32, #tpu.memory_space<vmem>>, vector<1x4x2xf32>
    %39 = vector.shape_cast %38 : vector<1x4x2xf32> to vector<4x2xf32>
    %40 = vector.extract_strided_slice %1 {offsets = [0, 38], sizes = [2, 1000], strides = [1, 1]} : vector<2x1280xf32> to vector<2x1000xf32>
    %cst_26 = arith.constant dense<0.000000e+00> : vector<4x1000xf32>
    %41 = tpu.matmul %39, %40, %cst_26 {dimension_numbers = #tpu.dot_dimension_numbers<[1], [0], [0], [1], [0, 0, 1, 1], [], []>} : vector<4x2xf32>, vector<2x1000xf32>, vector<4x1000xf32> -> vector<4x1000xf32>
    %42 = arith.addf %37, %41 : vector<4x1000xf32>
    %c8 = arith.constant 8 : index
    %c0_27 = arith.constant 0 : index
    %c0_28 = arith.constant 0 : index
    %43 = vector.load %arg2[%c8, %c0_27, %c0_28] : memref<27x4x2xf32, #tpu.memory_space<vmem>>, vector<1x4x2xf32>
    %44 = vector.shape_cast %43 : vector<1x4x2xf32> to vector<4x2xf32>
    %45 = vector.extract_strided_slice %1 {offsets = [0, 39], sizes = [2, 1000], strides = [1, 1]} : vector<2x1280xf32> to vector<2x1000xf32>
    %cst_29 = arith.constant dense<0.000000e+00> : vector<4x1000xf32>
    %46 = tpu.matmul %44, %45, %cst_29 {dimension_numbers = #tpu.dot_dimension_numbers<[1], [0], [0], [1], [0, 0, 1, 1], [], []>} : vector<4x2xf32>, vector<2x1000xf32>, vector<4x1000xf32> -> vector<4x1000xf32>
    %47 = arith.addf %42, %46 : vector<4x1000xf32>
    %c9 = arith.constant 9 : index
    %c0_30 = arith.constant 0 : index
    %c0_31 = arith.constant 0 : index
    %48 = vector.load %arg2[%c9, %c0_30, %c0_31] : memref<27x4x2xf32, #tpu.memory_space<vmem>>, vector<1x4x2xf32>
    %49 = vector.shape_cast %48 : vector<1x4x2xf32> to vector<4x2xf32>
    %50 = vector.extract_strided_slice %1 {offsets = [0, 117], sizes = [2, 1000], strides = [1, 1]} : vector<2x1280xf32> to vector<2x1000xf32>
    %cst_32 = arith.constant dense<0.000000e+00> : vector<4x1000xf32>
    %51 = tpu.matmul %49, %50, %cst_32 {dimension_numbers = #tpu.dot_dimension_numbers<[1], [0], [0], [1], [0, 0, 1, 1], [], []>} : vector<4x2xf32>, vector<2x1000xf32>, vector<4x1000xf32> -> vector<4x1000xf32>
    %52 = arith.addf %47, %51 : vector<4x1000xf32>
    %c10 = arith.constant 10 : index
    %c0_33 = arith.constant 0 : index
    %c0_34 = arith.constant 0 : index
    %53 = vector.load %arg2[%c10, %c0_33, %c0_34] : memref<27x4x2xf32, #tpu.memory_space<vmem>>, vector<1x4x2xf32>
    %54 = vector.shape_cast %53 : vector<1x4x2xf32> to vector<4x2xf32>
    %55 = vector.extract_strided_slice %1 {offsets = [0, 118], sizes = [2, 1000], strides = [1, 1]} : vector<2x1280xf32> to vector<2x1000xf32>
    %cst_35 = arith.constant dense<0.000000e+00> : vector<4x1000xf32>
    %56 = tpu.matmul %54, %55, %cst_35 {dimension_numbers = #tpu.dot_dimension_numbers<[1], [0], [0], [1], [0, 0, 1, 1], [], []>} : vector<4x2xf32>, vector<2x1000xf32>, vector<4x1000xf32> -> vector<4x1000xf32>
    %57 = arith.addf %52, %56 : vector<4x1000xf32>
    %c11 = arith.constant 11 : index
    %c0_36 = arith.constant 0 : index
    %c0_37 = arith.constant 0 : index
    %58 = vector.load %arg2[%c11, %c0_36, %c0_37] : memref<27x4x2xf32, #tpu.memory_space<vmem>>, vector<1x4x2xf32>
    %59 = vector.shape_cast %58 : vector<1x4x2xf32> to vector<4x2xf32>
    %60 = vector.extract_strided_slice %1 {offsets = [0, 119], sizes = [2, 1000], strides = [1, 1]} : vector<2x1280xf32> to vector<2x1000xf32>
    %cst_38 = arith.constant dense<0.000000e+00> : vector<4x1000xf32>
    %61 = tpu.matmul %59, %60, %cst_38 {dimension_numbers = #tpu.dot_dimension_numbers<[1], [0], [0], [1], [0, 0, 1, 1], [], []>} : vector<4x2xf32>, vector<2x1000xf32>, vector<4x1000xf32> -> vector<4x1000xf32>
    %62 = arith.addf %57, %61 : vector<4x1000xf32>
    %c12 = arith.constant 12 : index
    %c0_39 = arith.constant 0 : index
    %c0_40 = arith.constant 0 : index
    %63 = vector.load %arg2[%c12, %c0_39, %c0_40] : memref<27x4x2xf32, #tpu.memory_space<vmem>>, vector<1x4x2xf32>
    %64 = vector.shape_cast %63 : vector<1x4x2xf32> to vector<4x2xf32>
    %65 = vector.extract_strided_slice %1 {offsets = [0, 127], sizes = [2, 1000], strides = [1, 1]} : vector<2x1280xf32> to vector<2x1000xf32>
    %cst_41 = arith.constant dense<0.000000e+00> : vector<4x1000xf32>
    %66 = tpu.matmul %64, %65, %cst_41 {dimension_numbers = #tpu.dot_dimension_numbers<[1], [0], [0], [1], [0, 0, 1, 1], [], []>} : vector<4x2xf32>, vector<2x1000xf32>, vector<4x1000xf32> -> vector<4x1000xf32>
    %67 = arith.addf %62, %66 : vector<4x1000xf32>
    %c13 = arith.constant 13 : index
    %c0_42 = arith.constant 0 : index
    %c0_43 = arith.constant 0 : index
    %68 = vector.load %arg2[%c13, %c0_42, %c0_43] : memref<27x4x2xf32, #tpu.memory_space<vmem>>, vector<1x4x2xf32>
    %69 = vector.shape_cast %68 : vector<1x4x2xf32> to vector<4x2xf32>
    %70 = vector.extract_strided_slice %1 {offsets = [0, 128], sizes = [2, 1000], strides = [1, 1]} : vector<2x1280xf32> to vector<2x1000xf32>
    %cst_44 = arith.constant dense<0.000000e+00> : vector<4x1000xf32>
    %71 = tpu.matmul %69, %70, %cst_44 {dimension_numbers = #tpu.dot_dimension_numbers<[1], [0], [0], [1], [0, 0, 1, 1], [], []>} : vector<4x2xf32>, vector<2x1000xf32>, vector<4x1000xf32> -> vector<4x1000xf32>
    %72 = arith.addf %67, %71 : vector<4x1000xf32>
    %c14 = arith.constant 14 : index
    %c0_45 = arith.constant 0 : index
    %c0_46 = arith.constant 0 : index
    %73 = vector.load %arg2[%c14, %c0_45, %c0_46] : memref<27x4x2xf32, #tpu.memory_space<vmem>>, vector<1x4x2xf32>
    %74 = vector.shape_cast %73 : vector<1x4x2xf32> to vector<4x2xf32>
    %75 = vector.extract_strided_slice %1 {offsets = [0, 129], sizes = [2, 1000], strides = [1, 1]} : vector<2x1280xf32> to vector<2x1000xf32>
    %cst_47 = arith.constant dense<0.000000e+00> : vector<4x1000xf32>
    %76 = tpu.matmul %74, %75, %cst_47 {dimension_numbers = #tpu.dot_dimension_numbers<[1], [0], [0], [1], [0, 0, 1, 1], [], []>} : vector<4x2xf32>, vector<2x1000xf32>, vector<4x1000xf32> -> vector<4x1000xf32>
    %77 = arith.addf %72, %76 : vector<4x1000xf32>
    %c15 = arith.constant 15 : index
    %c0_48 = arith.constant 0 : index
    %c0_49 = arith.constant 0 : index
    %78 = vector.load %arg2[%c15, %c0_48, %c0_49] : memref<27x4x2xf32, #tpu.memory_space<vmem>>, vector<1x4x2xf32>
    %79 = vector.shape_cast %78 : vector<1x4x2xf32> to vector<4x2xf32>
    %80 = vector.extract_strided_slice %1 {offsets = [0, 137], sizes = [2, 1000], strides = [1, 1]} : vector<2x1280xf32> to vector<2x1000xf32>
    %cst_50 = arith.constant dense<0.000000e+00> : vector<4x1000xf32>
    %81 = tpu.matmul %79, %80, %cst_50 {dimension_numbers = #tpu.dot_dimension_numbers<[1], [0], [0], [1], [0, 0, 1, 1], [], []>} : vector<4x2xf32>, vector<2x1000xf32>, vector<4x1000xf32> -> vector<4x1000xf32>
    %82 = arith.addf %77, %81 : vector<4x1000xf32>
    %c16 = arith.constant 16 : index
    %c0_51 = arith.constant 0 : index
    %c0_52 = arith.constant 0 : index
    %83 = vector.load %arg2[%c16, %c0_51, %c0_52] : memref<27x4x2xf32, #tpu.memory_space<vmem>>, vector<1x4x2xf32>
    %84 = vector.shape_cast %83 : vector<1x4x2xf32> to vector<4x2xf32>
    %85 = vector.extract_strided_slice %1 {offsets = [0, 138], sizes = [2, 1000], strides = [1, 1]} : vector<2x1280xf32> to vector<2x1000xf32>
    %cst_53 = arith.constant dense<0.000000e+00> : vector<4x1000xf32>
    %86 = tpu.matmul %84, %85, %cst_53 {dimension_numbers = #tpu.dot_dimension_numbers<[1], [0], [0], [1], [0, 0, 1, 1], [], []>} : vector<4x2xf32>, vector<2x1000xf32>, vector<4x1000xf32> -> vector<4x1000xf32>
    %87 = arith.addf %82, %86 : vector<4x1000xf32>
    %c17 = arith.constant 17 : index
    %c0_54 = arith.constant 0 : index
    %c0_55 = arith.constant 0 : index
    %88 = vector.load %arg2[%c17, %c0_54, %c0_55] : memref<27x4x2xf32, #tpu.memory_space<vmem>>, vector<1x4x2xf32>
    %89 = vector.shape_cast %88 : vector<1x4x2xf32> to vector<4x2xf32>
    %90 = vector.extract_strided_slice %1 {offsets = [0, 139], sizes = [2, 1000], strides = [1, 1]} : vector<2x1280xf32> to vector<2x1000xf32>
    %cst_56 = arith.constant dense<0.000000e+00> : vector<4x1000xf32>
    %91 = tpu.matmul %89, %90, %cst_56 {dimension_numbers = #tpu.dot_dimension_numbers<[1], [0], [0], [1], [0, 0, 1, 1], [], []>} : vector<4x2xf32>, vector<2x1000xf32>, vector<4x1000xf32> -> vector<4x1000xf32>
    %92 = arith.addf %87, %91 : vector<4x1000xf32>
    %c18 = arith.constant 18 : index
    %c0_57 = arith.constant 0 : index
    %c0_58 = arith.constant 0 : index
    %93 = vector.load %arg2[%c18, %c0_57, %c0_58] : memref<27x4x2xf32, #tpu.memory_space<vmem>>, vector<1x4x2xf32>
    %94 = vector.shape_cast %93 : vector<1x4x2xf32> to vector<4x2xf32>
    %95 = vector.extract_strided_slice %1 {offsets = [0, 217], sizes = [2, 1000], strides = [1, 1]} : vector<2x1280xf32> to vector<2x1000xf32>
    %cst_59 = arith.constant dense<0.000000e+00> : vector<4x1000xf32>
    %96 = tpu.matmul %94, %95, %cst_59 {dimension_numbers = #tpu.dot_dimension_numbers<[1], [0], [0], [1], [0, 0, 1, 1], [], []>} : vector<4x2xf32>, vector<2x1000xf32>, vector<4x1000xf32> -> vector<4x1000xf32>
    %97 = arith.addf %92, %96 : vector<4x1000xf32>
    %c19 = arith.constant 19 : index
    %c0_60 = arith.constant 0 : index
    %c0_61 = arith.constant 0 : index
    %98 = vector.load %arg2[%c19, %c0_60, %c0_61] : memref<27x4x2xf32, #tpu.memory_space<vmem>>, vector<1x4x2xf32>
    %99 = vector.shape_cast %98 : vector<1x4x2xf32> to vector<4x2xf32>
    %100 = vector.extract_strided_slice %1 {offsets = [0, 218], sizes = [2, 1000], strides = [1, 1]} : vector<2x1280xf32> to vector<2x1000xf32>
    %cst_62 = arith.constant dense<0.000000e+00> : vector<4x1000xf32>
    %101 = tpu.matmul %99, %100, %cst_62 {dimension_numbers = #tpu.dot_dimension_numbers<[1], [0], [0], [1], [0, 0, 1, 1], [], []>} : vector<4x2xf32>, vector<2x1000xf32>, vector<4x1000xf32> -> vector<4x1000xf32>
    %102 = arith.addf %97, %101 : vector<4x1000xf32>
    %c20 = arith.constant 20 : index
    %c0_63 = arith.constant 0 : index
    %c0_64 = arith.constant 0 : index
    %103 = vector.load %arg2[%c20, %c0_63, %c0_64] : memref<27x4x2xf32, #tpu.memory_space<vmem>>, vector<1x4x2xf32>
    %104 = vector.shape_cast %103 : vector<1x4x2xf32> to vector<4x2xf32>
    %105 = vector.extract_strided_slice %1 {offsets = [0, 219], sizes = [2, 1000], strides = [1, 1]} : vector<2x1280xf32> to vector<2x1000xf32>
    %cst_65 = arith.constant dense<0.000000e+00> : vector<4x1000xf32>
    %106 = tpu.matmul %104, %105, %cst_65 {dimension_numbers = #tpu.dot_dimension_numbers<[1], [0], [0], [1], [0, 0, 1, 1], [], []>} : vector<4x2xf32>, vector<2x1000xf32>, vector<4x1000xf32> -> vector<4x1000xf32>
    %107 = arith.addf %102, %106 : vector<4x1000xf32>
    %c21 = arith.constant 21 : index
    %c0_66 = arith.constant 0 : index
    %c0_67 = arith.constant 0 : index
    %108 = vector.load %arg2[%c21, %c0_66, %c0_67] : memref<27x4x2xf32, #tpu.memory_space<vmem>>, vector<1x4x2xf32>
    %109 = vector.shape_cast %108 : vector<1x4x2xf32> to vector<4x2xf32>
    %110 = vector.extract_strided_slice %1 {offsets = [0, 227], sizes = [2, 1000], strides = [1, 1]} : vector<2x1280xf32> to vector<2x1000xf32>
    %cst_68 = arith.constant dense<0.000000e+00> : vector<4x1000xf32>
    %111 = tpu.matmul %109, %110, %cst_68 {dimension_numbers = #tpu.dot_dimension_numbers<[1], [0], [0], [1], [0, 0, 1, 1], [], []>} : vector<4x2xf32>, vector<2x1000xf32>, vector<4x1000xf32> -> vector<4x1000xf32>
    %112 = arith.addf %107, %111 : vector<4x1000xf32>
    %c22 = arith.constant 22 : index
    %c0_69 = arith.constant 0 : index
    %c0_70 = arith.constant 0 : index
    %113 = vector.load %arg2[%c22, %c0_69, %c0_70] : memref<27x4x2xf32, #tpu.memory_space<vmem>>, vector<1x4x2xf32>
    %114 = vector.shape_cast %113 : vector<1x4x2xf32> to vector<4x2xf32>
    %115 = vector.extract_strided_slice %1 {offsets = [0, 228], sizes = [2, 1000], strides = [1, 1]} : vector<2x1280xf32> to vector<2x1000xf32>
    %cst_71 = arith.constant dense<0.000000e+00> : vector<4x1000xf32>
    %116 = tpu.matmul %114, %115, %cst_71 {dimension_numbers = #tpu.dot_dimension_numbers<[1], [0], [0], [1], [0, 0, 1, 1], [], []>} : vector<4x2xf32>, vector<2x1000xf32>, vector<4x1000xf32> -> vector<4x1000xf32>
    %117 = arith.addf %112, %116 : vector<4x1000xf32>
    %c23 = arith.constant 23 : index
    %c0_72 = arith.constant 0 : index
    %c0_73 = arith.constant 0 : index
    %118 = vector.load %arg2[%c23, %c0_72, %c0_73] : memref<27x4x2xf32, #tpu.memory_space<vmem>>, vector<1x4x2xf32>
    %119 = vector.shape_cast %118 : vector<1x4x2xf32> to vector<4x2xf32>
    %120 = vector.extract_strided_slice %1 {offsets = [0, 229], sizes = [2, 1000], strides = [1, 1]} : vector<2x1280xf32> to vector<2x1000xf32>
    %cst_74 = arith.constant dense<0.000000e+00> : vector<4x1000xf32>
    %121 = tpu.matmul %119, %120, %cst_74 {dimension_numbers = #tpu.dot_dimension_numbers<[1], [0], [0], [1], [0, 0, 1, 1], [], []>} : vector<4x2xf32>, vector<2x1000xf32>, vector<4x1000xf32> -> vector<4x1000xf32>
    %122 = arith.addf %117, %121 : vector<4x1000xf32>
    %c24 = arith.constant 24 : index
    %c0_75 = arith.constant 0 : index
    %c0_76 = arith.constant 0 : index
    %123 = vector.load %arg2[%c24, %c0_75, %c0_76] : memref<27x4x2xf32, #tpu.memory_space<vmem>>, vector<1x4x2xf32>
    %124 = vector.shape_cast %123 : vector<1x4x2xf32> to vector<4x2xf32>
    %125 = vector.extract_strided_slice %1 {offsets = [0, 237], sizes = [2, 1000], strides = [1, 1]} : vector<2x1280xf32> to vector<2x1000xf32>
    %cst_77 = arith.constant dense<0.000000e+00> : vector<4x1000xf32>
    %126 = tpu.matmul %124, %125, %cst_77 {dimension_numbers = #tpu.dot_dimension_numbers<[1], [0], [0], [1], [0, 0, 1, 1], [], []>} : vector<4x2xf32>, vector<2x1000xf32>, vector<4x1000xf32> -> vector<4x1000xf32>
    %127 = arith.addf %122, %126 : vector<4x1000xf32>
    %c25 = arith.constant 25 : index
    %c0_78 = arith.constant 0 : index
    %c0_79 = arith.constant 0 : index
    %128 = vector.load %arg2[%c25, %c0_78, %c0_79] : memref<27x4x2xf32, #tpu.memory_space<vmem>>, vector<1x4x2xf32>
    %129 = vector.shape_cast %128 : vector<1x4x2xf32> to vector<4x2xf32>
    %130 = vector.extract_strided_slice %1 {offsets = [0, 238], sizes = [2, 1000], strides = [1, 1]} : vector<2x1280xf32> to vector<2x1000xf32>
    %cst_80 = arith.constant dense<0.000000e+00> : vector<4x1000xf32>
    %131 = tpu.matmul %129, %130, %cst_80 {dimension_numbers = #tpu.dot_dimension_numbers<[1], [0], [0], [1], [0, 0, 1, 1], [], []>} : vector<4x2xf32>, vector<2x1000xf32>, vector<4x1000xf32> -> vector<4x1000xf32>
    %132 = arith.addf %127, %131 : vector<4x1000xf32>
    %c26 = arith.constant 26 : index
    %c0_81 = arith.constant 0 : index
    %c0_82 = arith.constant 0 : index
    %133 = vector.load %arg2[%c26, %c0_81, %c0_82] : memref<27x4x2xf32, #tpu.memory_space<vmem>>, vector<1x4x2xf32>
    %134 = vector.shape_cast %133 : vector<1x4x2xf32> to vector<4x2xf32>
    %135 = vector.extract_strided_slice %1 {offsets = [0, 239], sizes = [2, 1000], strides = [1, 1]} : vector<2x1280xf32> to vector<2x1000xf32>
    %cst_83 = arith.constant dense<0.000000e+00> : vector<4x1000xf32>
    %136 = tpu.matmul %134, %135, %cst_83 {dimension_numbers = #tpu.dot_dimension_numbers<[1], [0], [0], [1], [0, 0, 1, 1], [], []>} : vector<4x2xf32>, vector<2x1000xf32>, vector<4x1000xf32> -> vector<4x1000xf32>
    %137 = arith.addf %132, %136 : vector<4x1000xf32>
    %c0_84 = arith.constant 0 : index
    %c0_85 = arith.constant 0 : index
    %138 = vector.load %arg4[%c0_84, %c0_85] : memref<1x1000xf32, #tpu.memory_space<vmem>>, vector<1x1000xf32>
    %c0_86 = arith.constant 0 : index
    %c0_87 = arith.constant 0 : index
    %139 = vector.load %arg3[%c0_86, %c0_87] : memref<4x1xf32, #tpu.memory_space<vmem>>, vector<4x1xf32>
    %140 = vector.broadcast %139 : vector<4x1xf32> to vector<4x1000xf32>
    %141 = arith.addf %137, %140 : vector<4x1000xf32>
    %cst_88 = arith.constant 0.000000e+00 : f32
    %142 = vector.broadcast %cst_88 : f32 to vector<4x1000xf32>
    %143 = arith.maximumf %141, %142 : vector<4x1000xf32>
    %144 = vector.broadcast %138 : vector<1x1000xf32> to vector<4x1000xf32>
    %145 = arith.mulf %144, %143 : vector<4x1000xf32>
    %cst_89 = arith.constant 0.000000e+00 : f32
    %146 = vector.broadcast %cst_89 : f32 to vector<8x778xf32>
    %c0_90 = arith.constant 0 : index
    %c0_91 = arith.constant 0 : index
    %c0_92 = arith.constant 0 : index
    %147 = vector.load %arg5[%c0_90, %c0_91, %c0_92] : memref<27x8x4xf32, #tpu.memory_space<vmem>>, vector<1x8x4xf32>
    %148 = vector.shape_cast %147 : vector<1x8x4xf32> to vector<8x4xf32>
    %149 = vector.extract_strided_slice %145 {offsets = [0, 0], sizes = [4, 778], strides = [1, 1]} : vector<4x1000xf32> to vector<4x778xf32>
    %cst_93 = arith.constant dense<0.000000e+00> : vector<8x778xf32>
    %150 = tpu.matmul %148, %149, %cst_93 {dimension_numbers = #tpu.dot_dimension_numbers<[1], [0], [0], [1], [0, 0, 1, 1], [], []>} : vector<8x4xf32>, vector<4x778xf32>, vector<8x778xf32> -> vector<8x778xf32>
    %151 = arith.addf %146, %150 : vector<8x778xf32>
    %c1_94 = arith.constant 1 : index
    %c0_95 = arith.constant 0 : index
    %c0_96 = arith.constant 0 : index
    %152 = vector.load %arg5[%c1_94, %c0_95, %c0_96] : memref<27x8x4xf32, #tpu.memory_space<vmem>>, vector<1x8x4xf32>
    %153 = vector.shape_cast %152 : vector<1x8x4xf32> to vector<8x4xf32>
    %154 = vector.extract_strided_slice %145 {offsets = [0, 1], sizes = [4, 778], strides = [1, 1]} : vector<4x1000xf32> to vector<4x778xf32>
    %cst_97 = arith.constant dense<0.000000e+00> : vector<8x778xf32>
    %155 = tpu.matmul %153, %154, %cst_97 {dimension_numbers = #tpu.dot_dimension_numbers<[1], [0], [0], [1], [0, 0, 1, 1], [], []>} : vector<8x4xf32>, vector<4x778xf32>, vector<8x778xf32> -> vector<8x778xf32>
    %156 = arith.addf %151, %155 : vector<8x778xf32>
    %c2_98 = arith.constant 2 : index
    %c0_99 = arith.constant 0 : index
    %c0_100 = arith.constant 0 : index
    %157 = vector.load %arg5[%c2_98, %c0_99, %c0_100] : memref<27x8x4xf32, #tpu.memory_space<vmem>>, vector<1x8x4xf32>
    %158 = vector.shape_cast %157 : vector<1x8x4xf32> to vector<8x4xf32>
    %159 = vector.extract_strided_slice %145 {offsets = [0, 2], sizes = [4, 778], strides = [1, 1]} : vector<4x1000xf32> to vector<4x778xf32>
    %cst_101 = arith.constant dense<0.000000e+00> : vector<8x778xf32>
    %160 = tpu.matmul %158, %159, %cst_101 {dimension_numbers = #tpu.dot_dimension_numbers<[1], [0], [0], [1], [0, 0, 1, 1], [], []>} : vector<8x4xf32>, vector<4x778xf32>, vector<8x778xf32> -> vector<8x778xf32>
    %161 = arith.addf %156, %160 : vector<8x778xf32>
    %c3_102 = arith.constant 3 : index
    %c0_103 = arith.constant 0 : index
    %c0_104 = arith.constant 0 : index
    %162 = vector.load %arg5[%c3_102, %c0_103, %c0_104] : memref<27x8x4xf32, #tpu.memory_space<vmem>>, vector<1x8x4xf32>
    %163 = vector.shape_cast %162 : vector<1x8x4xf32> to vector<8x4xf32>
    %164 = vector.extract_strided_slice %145 {offsets = [0, 10], sizes = [4, 778], strides = [1, 1]} : vector<4x1000xf32> to vector<4x778xf32>
    %cst_105 = arith.constant dense<0.000000e+00> : vector<8x778xf32>
    %165 = tpu.matmul %163, %164, %cst_105 {dimension_numbers = #tpu.dot_dimension_numbers<[1], [0], [0], [1], [0, 0, 1, 1], [], []>} : vector<8x4xf32>, vector<4x778xf32>, vector<8x778xf32> -> vector<8x778xf32>
    %166 = arith.addf %161, %165 : vector<8x778xf32>
    %c4_106 = arith.constant 4 : index
    %c0_107 = arith.constant 0 : index
    %c0_108 = arith.constant 0 : index
    %167 = vector.load %arg5[%c4_106, %c0_107, %c0_108] : memref<27x8x4xf32, #tpu.memory_space<vmem>>, vector<1x8x4xf32>
    %168 = vector.shape_cast %167 : vector<1x8x4xf32> to vector<8x4xf32>
    %169 = vector.extract_strided_slice %145 {offsets = [0, 11], sizes = [4, 778], strides = [1, 1]} : vector<4x1000xf32> to vector<4x778xf32>
    %cst_109 = arith.constant dense<0.000000e+00> : vector<8x778xf32>
    %170 = tpu.matmul %168, %169, %cst_109 {dimension_numbers = #tpu.dot_dimension_numbers<[1], [0], [0], [1], [0, 0, 1, 1], [], []>} : vector<8x4xf32>, vector<4x778xf32>, vector<8x778xf32> -> vector<8x778xf32>
    %171 = arith.addf %166, %170 : vector<8x778xf32>
    %c5_110 = arith.constant 5 : index
    %c0_111 = arith.constant 0 : index
    %c0_112 = arith.constant 0 : index
    %172 = vector.load %arg5[%c5_110, %c0_111, %c0_112] : memref<27x8x4xf32, #tpu.memory_space<vmem>>, vector<1x8x4xf32>
    %173 = vector.shape_cast %172 : vector<1x8x4xf32> to vector<8x4xf32>
    %174 = vector.extract_strided_slice %145 {offsets = [0, 12], sizes = [4, 778], strides = [1, 1]} : vector<4x1000xf32> to vector<4x778xf32>
    %cst_113 = arith.constant dense<0.000000e+00> : vector<8x778xf32>
    %175 = tpu.matmul %173, %174, %cst_113 {dimension_numbers = #tpu.dot_dimension_numbers<[1], [0], [0], [1], [0, 0, 1, 1], [], []>} : vector<8x4xf32>, vector<4x778xf32>, vector<8x778xf32> -> vector<8x778xf32>
    %176 = arith.addf %171, %175 : vector<8x778xf32>
    %c6_114 = arith.constant 6 : index
    %c0_115 = arith.constant 0 : index
    %c0_116 = arith.constant 0 : index
    %177 = vector.load %arg5[%c6_114, %c0_115, %c0_116] : memref<27x8x4xf32, #tpu.memory_space<vmem>>, vector<1x8x4xf32>
    %178 = vector.shape_cast %177 : vector<1x8x4xf32> to vector<8x4xf32>
    %179 = vector.extract_strided_slice %145 {offsets = [0, 20], sizes = [4, 778], strides = [1, 1]} : vector<4x1000xf32> to vector<4x778xf32>
    %cst_117 = arith.constant dense<0.000000e+00> : vector<8x778xf32>
    %180 = tpu.matmul %178, %179, %cst_117 {dimension_numbers = #tpu.dot_dimension_numbers<[1], [0], [0], [1], [0, 0, 1, 1], [], []>} : vector<8x4xf32>, vector<4x778xf32>, vector<8x778xf32> -> vector<8x778xf32>
    %181 = arith.addf %176, %180 : vector<8x778xf32>
    %c7_118 = arith.constant 7 : index
    %c0_119 = arith.constant 0 : index
    %c0_120 = arith.constant 0 : index
    %182 = vector.load %arg5[%c7_118, %c0_119, %c0_120] : memref<27x8x4xf32, #tpu.memory_space<vmem>>, vector<1x8x4xf32>
    %183 = vector.shape_cast %182 : vector<1x8x4xf32> to vector<8x4xf32>
    %184 = vector.extract_strided_slice %145 {offsets = [0, 21], sizes = [4, 778], strides = [1, 1]} : vector<4x1000xf32> to vector<4x778xf32>
    %cst_121 = arith.constant dense<0.000000e+00> : vector<8x778xf32>
    %185 = tpu.matmul %183, %184, %cst_121 {dimension_numbers = #tpu.dot_dimension_numbers<[1], [0], [0], [1], [0, 0, 1, 1], [], []>} : vector<8x4xf32>, vector<4x778xf32>, vector<8x778xf32> -> vector<8x778xf32>
    %186 = arith.addf %181, %185 : vector<8x778xf32>
    %c8_122 = arith.constant 8 : index
    %c0_123 = arith.constant 0 : index
    %c0_124 = arith.constant 0 : index
    %187 = vector.load %arg5[%c8_122, %c0_123, %c0_124] : memref<27x8x4xf32, #tpu.memory_space<vmem>>, vector<1x8x4xf32>
    %188 = vector.shape_cast %187 : vector<1x8x4xf32> to vector<8x4xf32>
    %189 = vector.extract_strided_slice %145 {offsets = [0, 22], sizes = [4, 778], strides = [1, 1]} : vector<4x1000xf32> to vector<4x778xf32>
    %cst_125 = arith.constant dense<0.000000e+00> : vector<8x778xf32>
    %190 = tpu.matmul %188, %189, %cst_125 {dimension_numbers = #tpu.dot_dimension_numbers<[1], [0], [0], [1], [0, 0, 1, 1], [], []>} : vector<8x4xf32>, vector<4x778xf32>, vector<8x778xf32> -> vector<8x778xf32>
    %191 = arith.addf %186, %190 : vector<8x778xf32>
    %c9_126 = arith.constant 9 : index
    %c0_127 = arith.constant 0 : index
    %c0_128 = arith.constant 0 : index
    %192 = vector.load %arg5[%c9_126, %c0_127, %c0_128] : memref<27x8x4xf32, #tpu.memory_space<vmem>>, vector<1x8x4xf32>
    %193 = vector.shape_cast %192 : vector<1x8x4xf32> to vector<8x4xf32>
    %194 = vector.extract_strided_slice %145 {offsets = [0, 100], sizes = [4, 778], strides = [1, 1]} : vector<4x1000xf32> to vector<4x778xf32>
    %cst_129 = arith.constant dense<0.000000e+00> : vector<8x778xf32>
    %195 = tpu.matmul %193, %194, %cst_129 {dimension_numbers = #tpu.dot_dimension_numbers<[1], [0], [0], [1], [0, 0, 1, 1], [], []>} : vector<8x4xf32>, vector<4x778xf32>, vector<8x778xf32> -> vector<8x778xf32>
    %196 = arith.addf %191, %195 : vector<8x778xf32>
    %c10_130 = arith.constant 10 : index
    %c0_131 = arith.constant 0 : index
    %c0_132 = arith.constant 0 : index
    %197 = vector.load %arg5[%c10_130, %c0_131, %c0_132] : memref<27x8x4xf32, #tpu.memory_space<vmem>>, vector<1x8x4xf32>
    %198 = vector.shape_cast %197 : vector<1x8x4xf32> to vector<8x4xf32>
    %199 = vector.extract_strided_slice %145 {offsets = [0, 101], sizes = [4, 778], strides = [1, 1]} : vector<4x1000xf32> to vector<4x778xf32>
    %cst_133 = arith.constant dense<0.000000e+00> : vector<8x778xf32>
    %200 = tpu.matmul %198, %199, %cst_133 {dimension_numbers = #tpu.dot_dimension_numbers<[1], [0], [0], [1], [0, 0, 1, 1], [], []>} : vector<8x4xf32>, vector<4x778xf32>, vector<8x778xf32> -> vector<8x778xf32>
    %201 = arith.addf %196, %200 : vector<8x778xf32>
    %c11_134 = arith.constant 11 : index
    %c0_135 = arith.constant 0 : index
    %c0_136 = arith.constant 0 : index
    %202 = vector.load %arg5[%c11_134, %c0_135, %c0_136] : memref<27x8x4xf32, #tpu.memory_space<vmem>>, vector<1x8x4xf32>
    %203 = vector.shape_cast %202 : vector<1x8x4xf32> to vector<8x4xf32>
    %204 = vector.extract_strided_slice %145 {offsets = [0, 102], sizes = [4, 778], strides = [1, 1]} : vector<4x1000xf32> to vector<4x778xf32>
    %cst_137 = arith.constant dense<0.000000e+00> : vector<8x778xf32>
    %205 = tpu.matmul %203, %204, %cst_137 {dimension_numbers = #tpu.dot_dimension_numbers<[1], [0], [0], [1], [0, 0, 1, 1], [], []>} : vector<8x4xf32>, vector<4x778xf32>, vector<8x778xf32> -> vector<8x778xf32>
    %206 = arith.addf %201, %205 : vector<8x778xf32>
    %c12_138 = arith.constant 12 : index
    %c0_139 = arith.constant 0 : index
    %c0_140 = arith.constant 0 : index
    %207 = vector.load %arg5[%c12_138, %c0_139, %c0_140] : memref<27x8x4xf32, #tpu.memory_space<vmem>>, vector<1x8x4xf32>
    %208 = vector.shape_cast %207 : vector<1x8x4xf32> to vector<8x4xf32>
    %209 = vector.extract_strided_slice %145 {offsets = [0, 110], sizes = [4, 778], strides = [1, 1]} : vector<4x1000xf32> to vector<4x778xf32>
    %cst_141 = arith.constant dense<0.000000e+00> : vector<8x778xf32>
    %210 = tpu.matmul %208, %209, %cst_141 {dimension_numbers = #tpu.dot_dimension_numbers<[1], [0], [0], [1], [0, 0, 1, 1], [], []>} : vector<8x4xf32>, vector<4x778xf32>, vector<8x778xf32> -> vector<8x778xf32>
    %211 = arith.addf %206, %210 : vector<8x778xf32>
    %c13_142 = arith.constant 13 : index
    %c0_143 = arith.constant 0 : index
    %c0_144 = arith.constant 0 : index
    %212 = vector.load %arg5[%c13_142, %c0_143, %c0_144] : memref<27x8x4xf32, #tpu.memory_space<vmem>>, vector<1x8x4xf32>
    %213 = vector.shape_cast %212 : vector<1x8x4xf32> to vector<8x4xf32>
    %214 = vector.extract_strided_slice %145 {offsets = [0, 111], sizes = [4, 778], strides = [1, 1]} : vector<4x1000xf32> to vector<4x778xf32>
    %cst_145 = arith.constant dense<0.000000e+00> : vector<8x778xf32>
    %215 = tpu.matmul %213, %214, %cst_145 {dimension_numbers = #tpu.dot_dimension_numbers<[1], [0], [0], [1], [0, 0, 1, 1], [], []>} : vector<8x4xf32>, vector<4x778xf32>, vector<8x778xf32> -> vector<8x778xf32>
    %216 = arith.addf %211, %215 : vector<8x778xf32>
    %c14_146 = arith.constant 14 : index
    %c0_147 = arith.constant 0 : index
    %c0_148 = arith.constant 0 : index
    %217 = vector.load %arg5[%c14_146, %c0_147, %c0_148] : memref<27x8x4xf32, #tpu.memory_space<vmem>>, vector<1x8x4xf32>
    %218 = vector.shape_cast %217 : vector<1x8x4xf32> to vector<8x4xf32>
    %219 = vector.extract_strided_slice %145 {offsets = [0, 112], sizes = [4, 778], strides = [1, 1]} : vector<4x1000xf32> to vector<4x778xf32>
    %cst_149 = arith.constant dense<0.000000e+00> : vector<8x778xf32>
    %220 = tpu.matmul %218, %219, %cst_149 {dimension_numbers = #tpu.dot_dimension_numbers<[1], [0], [0], [1], [0, 0, 1, 1], [], []>} : vector<8x4xf32>, vector<4x778xf32>, vector<8x778xf32> -> vector<8x778xf32>
    %221 = arith.addf %216, %220 : vector<8x778xf32>
    %c15_150 = arith.constant 15 : index
    %c0_151 = arith.constant 0 : index
    %c0_152 = arith.constant 0 : index
    %222 = vector.load %arg5[%c15_150, %c0_151, %c0_152] : memref<27x8x4xf32, #tpu.memory_space<vmem>>, vector<1x8x4xf32>
    %223 = vector.shape_cast %222 : vector<1x8x4xf32> to vector<8x4xf32>
    %224 = vector.extract_strided_slice %145 {offsets = [0, 120], sizes = [4, 778], strides = [1, 1]} : vector<4x1000xf32> to vector<4x778xf32>
    %cst_153 = arith.constant dense<0.000000e+00> : vector<8x778xf32>
    %225 = tpu.matmul %223, %224, %cst_153 {dimension_numbers = #tpu.dot_dimension_numbers<[1], [0], [0], [1], [0, 0, 1, 1], [], []>} : vector<8x4xf32>, vector<4x778xf32>, vector<8x778xf32> -> vector<8x778xf32>
    %226 = arith.addf %221, %225 : vector<8x778xf32>
    %c16_154 = arith.constant 16 : index
    %c0_155 = arith.constant 0 : index
    %c0_156 = arith.constant 0 : index
    %227 = vector.load %arg5[%c16_154, %c0_155, %c0_156] : memref<27x8x4xf32, #tpu.memory_space<vmem>>, vector<1x8x4xf32>
    %228 = vector.shape_cast %227 : vector<1x8x4xf32> to vector<8x4xf32>
    %229 = vector.extract_strided_slice %145 {offsets = [0, 121], sizes = [4, 778], strides = [1, 1]} : vector<4x1000xf32> to vector<4x778xf32>
    %cst_157 = arith.constant dense<0.000000e+00> : vector<8x778xf32>
    %230 = tpu.matmul %228, %229, %cst_157 {dimension_numbers = #tpu.dot_dimension_numbers<[1], [0], [0], [1], [0, 0, 1, 1], [], []>} : vector<8x4xf32>, vector<4x778xf32>, vector<8x778xf32> -> vector<8x778xf32>
    %231 = arith.addf %226, %230 : vector<8x778xf32>
    %c17_158 = arith.constant 17 : index
    %c0_159 = arith.constant 0 : index
    %c0_160 = arith.constant 0 : index
    %232 = vector.load %arg5[%c17_158, %c0_159, %c0_160] : memref<27x8x4xf32, #tpu.memory_space<vmem>>, vector<1x8x4xf32>
    %233 = vector.shape_cast %232 : vector<1x8x4xf32> to vector<8x4xf32>
    %234 = vector.extract_strided_slice %145 {offsets = [0, 122], sizes = [4, 778], strides = [1, 1]} : vector<4x1000xf32> to vector<4x778xf32>
    %cst_161 = arith.constant dense<0.000000e+00> : vector<8x778xf32>
    %235 = tpu.matmul %233, %234, %cst_161 {dimension_numbers = #tpu.dot_dimension_numbers<[1], [0], [0], [1], [0, 0, 1, 1], [], []>} : vector<8x4xf32>, vector<4x778xf32>, vector<8x778xf32> -> vector<8x778xf32>
    %236 = arith.addf %231, %235 : vector<8x778xf32>
    %c18_162 = arith.constant 18 : index
    %c0_163 = arith.constant 0 : index
    %c0_164 = arith.constant 0 : index
    %237 = vector.load %arg5[%c18_162, %c0_163, %c0_164] : memref<27x8x4xf32, #tpu.memory_space<vmem>>, vector<1x8x4xf32>
    %238 = vector.shape_cast %237 : vector<1x8x4xf32> to vector<8x4xf32>
    %239 = vector.extract_strided_slice %145 {offsets = [0, 200], sizes = [4, 778], strides = [1, 1]} : vector<4x1000xf32> to vector<4x778xf32>
    %cst_165 = arith.constant dense<0.000000e+00> : vector<8x778xf32>
    %240 = tpu.matmul %238, %239, %cst_165 {dimension_numbers = #tpu.dot_dimension_numbers<[1], [0], [0], [1], [0, 0, 1, 1], [], []>} : vector<8x4xf32>, vector<4x778xf32>, vector<8x778xf32> -> vector<8x778xf32>
    %241 = arith.addf %236, %240 : vector<8x778xf32>
    %c19_166 = arith.constant 19 : index
    %c0_167 = arith.constant 0 : index
    %c0_168 = arith.constant 0 : index
    %242 = vector.load %arg5[%c19_166, %c0_167, %c0_168] : memref<27x8x4xf32, #tpu.memory_space<vmem>>, vector<1x8x4xf32>
    %243 = vector.shape_cast %242 : vector<1x8x4xf32> to vector<8x4xf32>
    %244 = vector.extract_strided_slice %145 {offsets = [0, 201], sizes = [4, 778], strides = [1, 1]} : vector<4x1000xf32> to vector<4x778xf32>
    %cst_169 = arith.constant dense<0.000000e+00> : vector<8x778xf32>
    %245 = tpu.matmul %243, %244, %cst_169 {dimension_numbers = #tpu.dot_dimension_numbers<[1], [0], [0], [1], [0, 0, 1, 1], [], []>} : vector<8x4xf32>, vector<4x778xf32>, vector<8x778xf32> -> vector<8x778xf32>
    %246 = arith.addf %241, %245 : vector<8x778xf32>
    %c20_170 = arith.constant 20 : index
    %c0_171 = arith.constant 0 : index
    %c0_172 = arith.constant 0 : index
    %247 = vector.load %arg5[%c20_170, %c0_171, %c0_172] : memref<27x8x4xf32, #tpu.memory_space<vmem>>, vector<1x8x4xf32>
    %248 = vector.shape_cast %247 : vector<1x8x4xf32> to vector<8x4xf32>
    %249 = vector.extract_strided_slice %145 {offsets = [0, 202], sizes = [4, 778], strides = [1, 1]} : vector<4x1000xf32> to vector<4x778xf32>
    %cst_173 = arith.constant dense<0.000000e+00> : vector<8x778xf32>
    %250 = tpu.matmul %248, %249, %cst_173 {dimension_numbers = #tpu.dot_dimension_numbers<[1], [0], [0], [1], [0, 0, 1, 1], [], []>} : vector<8x4xf32>, vector<4x778xf32>, vector<8x778xf32> -> vector<8x778xf32>
    %251 = arith.addf %246, %250 : vector<8x778xf32>
    %c21_174 = arith.constant 21 : index
    %c0_175 = arith.constant 0 : index
    %c0_176 = arith.constant 0 : index
    %252 = vector.load %arg5[%c21_174, %c0_175, %c0_176] : memref<27x8x4xf32, #tpu.memory_space<vmem>>, vector<1x8x4xf32>
    %253 = vector.shape_cast %252 : vector<1x8x4xf32> to vector<8x4xf32>
    %254 = vector.extract_strided_slice %145 {offsets = [0, 210], sizes = [4, 778], strides = [1, 1]} : vector<4x1000xf32> to vector<4x778xf32>
    %cst_177 = arith.constant dense<0.000000e+00> : vector<8x778xf32>
    %255 = tpu.matmul %253, %254, %cst_177 {dimension_numbers = #tpu.dot_dimension_numbers<[1], [0], [0], [1], [0, 0, 1, 1], [], []>} : vector<8x4xf32>, vector<4x778xf32>, vector<8x778xf32> -> vector<8x778xf32>
    %256 = arith.addf %251, %255 : vector<8x778xf32>
    %c22_178 = arith.constant 22 : index
    %c0_179 = arith.constant 0 : index
    %c0_180 = arith.constant 0 : index
    %257 = vector.load %arg5[%c22_178, %c0_179, %c0_180] : memref<27x8x4xf32, #tpu.memory_space<vmem>>, vector<1x8x4xf32>
    %258 = vector.shape_cast %257 : vector<1x8x4xf32> to vector<8x4xf32>
    %259 = vector.extract_strided_slice %145 {offsets = [0, 211], sizes = [4, 778], strides = [1, 1]} : vector<4x1000xf32> to vector<4x778xf32>
    %cst_181 = arith.constant dense<0.000000e+00> : vector<8x778xf32>
    %260 = tpu.matmul %258, %259, %cst_181 {dimension_numbers = #tpu.dot_dimension_numbers<[1], [0], [0], [1], [0, 0, 1, 1], [], []>} : vector<8x4xf32>, vector<4x778xf32>, vector<8x778xf32> -> vector<8x778xf32>
    %261 = arith.addf %256, %260 : vector<8x778xf32>
    %c23_182 = arith.constant 23 : index
    %c0_183 = arith.constant 0 : index
    %c0_184 = arith.constant 0 : index
    %262 = vector.load %arg5[%c23_182, %c0_183, %c0_184] : memref<27x8x4xf32, #tpu.memory_space<vmem>>, vector<1x8x4xf32>
    %263 = vector.shape_cast %262 : vector<1x8x4xf32> to vector<8x4xf32>
    %264 = vector.extract_strided_slice %145 {offsets = [0, 212], sizes = [4, 778], strides = [1, 1]} : vector<4x1000xf32> to vector<4x778xf32>
    %cst_185 = arith.constant dense<0.000000e+00> : vector<8x778xf32>
    %265 = tpu.matmul %263, %264, %cst_185 {dimension_numbers = #tpu.dot_dimension_numbers<[1], [0], [0], [1], [0, 0, 1, 1], [], []>} : vector<8x4xf32>, vector<4x778xf32>, vector<8x778xf32> -> vector<8x778xf32>
    %266 = arith.addf %261, %265 : vector<8x778xf32>
    %c24_186 = arith.constant 24 : index
    %c0_187 = arith.constant 0 : index
    %c0_188 = arith.constant 0 : index
    %267 = vector.load %arg5[%c24_186, %c0_187, %c0_188] : memref<27x8x4xf32, #tpu.memory_space<vmem>>, vector<1x8x4xf32>
    %268 = vector.shape_cast %267 : vector<1x8x4xf32> to vector<8x4xf32>
    %269 = vector.extract_strided_slice %145 {offsets = [0, 220], sizes = [4, 778], strides = [1, 1]} : vector<4x1000xf32> to vector<4x778xf32>
    %cst_189 = arith.constant dense<0.000000e+00> : vector<8x778xf32>
    %270 = tpu.matmul %268, %269, %cst_189 {dimension_numbers = #tpu.dot_dimension_numbers<[1], [0], [0], [1], [0, 0, 1, 1], [], []>} : vector<8x4xf32>, vector<4x778xf32>, vector<8x778xf32> -> vector<8x778xf32>
    %271 = arith.addf %266, %270 : vector<8x778xf32>
    %c25_190 = arith.constant 25 : index
    %c0_191 = arith.constant 0 : index
    %c0_192 = arith.constant 0 : index
    %272 = vector.load %arg5[%c25_190, %c0_191, %c0_192] : memref<27x8x4xf32, #tpu.memory_space<vmem>>, vector<1x8x4xf32>
    %273 = vector.shape_cast %272 : vector<1x8x4xf32> to vector<8x4xf32>
    %274 = vector.extract_strided_slice %145 {offsets = [0, 221], sizes = [4, 778], strides = [1, 1]} : vector<4x1000xf32> to vector<4x778xf32>
    %cst_193 = arith.constant dense<0.000000e+00> : vector<8x778xf32>
    %275 = tpu.matmul %273, %274, %cst_193 {dimension_numbers = #tpu.dot_dimension_numbers<[1], [0], [0], [1], [0, 0, 1, 1], [], []>} : vector<8x4xf32>, vector<4x778xf32>, vector<8x778xf32> -> vector<8x778xf32>
    %276 = arith.addf %271, %275 : vector<8x778xf32>
    %c26_194 = arith.constant 26 : index
    %c0_195 = arith.constant 0 : index
    %c0_196 = arith.constant 0 : index
    %277 = vector.load %arg5[%c26_194, %c0_195, %c0_196] : memref<27x8x4xf32, #tpu.memory_space<vmem>>, vector<1x8x4xf32>
    %278 = vector.shape_cast %277 : vector<1x8x4xf32> to vector<8x4xf32>
    %279 = vector.extract_strided_slice %145 {offsets = [0, 222], sizes = [4, 778], strides = [1, 1]} : vector<4x1000xf32> to vector<4x778xf32>
    %cst_197 = arith.constant dense<0.000000e+00> : vector<8x778xf32>
    %280 = tpu.matmul %278, %279, %cst_197 {dimension_numbers = #tpu.dot_dimension_numbers<[1], [0], [0], [1], [0, 0, 1, 1], [], []>} : vector<8x4xf32>, vector<4x778xf32>, vector<8x778xf32> -> vector<8x778xf32>
    %281 = arith.addf %276, %280 : vector<8x778xf32>
    %c0_198 = arith.constant 0 : index
    %c0_199 = arith.constant 0 : index
    %282 = vector.load %arg7[%c0_198, %c0_199] : memref<778x216xf32, #tpu.memory_space<vmem>>, vector<778x216xf32>
    %cst_200 = arith.constant dense<0.000000e+00> : vector<8x216xf32>
    %283 = tpu.matmul %281, %282, %cst_200 {dimension_numbers = #tpu.dot_dimension_numbers<[1], [0], [0], [1], [0, 0, 1, 1], [], []>} : vector<8x778xf32>, vector<778x216xf32>, vector<8x216xf32> -> vector<8x216xf32>
    %c0_201 = arith.constant 0 : index
    %c0_202 = arith.constant 0 : index
    %284 = vector.load %arg6[%c0_201, %c0_202] : memref<8x216xf32, #tpu.memory_space<vmem>>, vector<8x216xf32>
    %285 = arith.addf %283, %284 : vector<8x216xf32>
    %cst_203 = arith.constant 0.000000e+00 : f32
    %286 = vector.broadcast %cst_203 : f32 to vector<8x130xf32>
    %c0_204 = arith.constant 0 : index
    %c0_205 = arith.constant 0 : index
    %c0_206 = arith.constant 0 : index
    %287 = vector.load %arg8[%c0_204, %c0_205, %c0_206] : memref<27x8x8xf32, #tpu.memory_space<vmem>>, vector<1x8x8xf32>
    %288 = vector.shape_cast %287 : vector<1x8x8xf32> to vector<8x8xf32>
    %289 = vector.extract_strided_slice %285 {offsets = [0, 0], sizes = [8, 130], strides = [1, 1]} : vector<8x216xf32> to vector<8x130xf32>
    %cst_207 = arith.constant dense<0.000000e+00> : vector<8x130xf32>
    %290 = tpu.matmul %288, %289, %cst_207 {dimension_numbers = #tpu.dot_dimension_numbers<[1], [0], [0], [1], [0, 0, 1, 1], [], []>} : vector<8x8xf32>, vector<8x130xf32>, vector<8x130xf32> -> vector<8x130xf32>
    %291 = arith.addf %286, %290 : vector<8x130xf32>
    %c1_208 = arith.constant 1 : index
    %c0_209 = arith.constant 0 : index
    %c0_210 = arith.constant 0 : index
    %292 = vector.load %arg8[%c1_208, %c0_209, %c0_210] : memref<27x8x8xf32, #tpu.memory_space<vmem>>, vector<1x8x8xf32>
    %293 = vector.shape_cast %292 : vector<1x8x8xf32> to vector<8x8xf32>
    %294 = vector.extract_strided_slice %285 {offsets = [0, 1], sizes = [8, 130], strides = [1, 1]} : vector<8x216xf32> to vector<8x130xf32>
    %cst_211 = arith.constant dense<0.000000e+00> : vector<8x130xf32>
    %295 = tpu.matmul %293, %294, %cst_211 {dimension_numbers = #tpu.dot_dimension_numbers<[1], [0], [0], [1], [0, 0, 1, 1], [], []>} : vector<8x8xf32>, vector<8x130xf32>, vector<8x130xf32> -> vector<8x130xf32>
    %296 = arith.addf %291, %295 : vector<8x130xf32>
    %c2_212 = arith.constant 2 : index
    %c0_213 = arith.constant 0 : index
    %c0_214 = arith.constant 0 : index
    %297 = vector.load %arg8[%c2_212, %c0_213, %c0_214] : memref<27x8x8xf32, #tpu.memory_space<vmem>>, vector<1x8x8xf32>
    %298 = vector.shape_cast %297 : vector<1x8x8xf32> to vector<8x8xf32>
    %299 = vector.extract_strided_slice %285 {offsets = [0, 2], sizes = [8, 130], strides = [1, 1]} : vector<8x216xf32> to vector<8x130xf32>
    %cst_215 = arith.constant dense<0.000000e+00> : vector<8x130xf32>
    %300 = tpu.matmul %298, %299, %cst_215 {dimension_numbers = #tpu.dot_dimension_numbers<[1], [0], [0], [1], [0, 0, 1, 1], [], []>} : vector<8x8xf32>, vector<8x130xf32>, vector<8x130xf32> -> vector<8x130xf32>
    %301 = arith.addf %296, %300 : vector<8x130xf32>
    %c3_216 = arith.constant 3 : index
    %c0_217 = arith.constant 0 : index
    %c0_218 = arith.constant 0 : index
    %302 = vector.load %arg8[%c3_216, %c0_217, %c0_218] : memref<27x8x8xf32, #tpu.memory_space<vmem>>, vector<1x8x8xf32>
    %303 = vector.shape_cast %302 : vector<1x8x8xf32> to vector<8x8xf32>
    %304 = vector.extract_strided_slice %285 {offsets = [0, 6], sizes = [8, 130], strides = [1, 1]} : vector<8x216xf32> to vector<8x130xf32>
    %cst_219 = arith.constant dense<0.000000e+00> : vector<8x130xf32>
    %305 = tpu.matmul %303, %304, %cst_219 {dimension_numbers = #tpu.dot_dimension_numbers<[1], [0], [0], [1], [0, 0, 1, 1], [], []>} : vector<8x8xf32>, vector<8x130xf32>, vector<8x130xf32> -> vector<8x130xf32>
    %306 = arith.addf %301, %305 : vector<8x130xf32>
    %c4_220 = arith.constant 4 : index
    %c0_221 = arith.constant 0 : index
    %c0_222 = arith.constant 0 : index
    %307 = vector.load %arg8[%c4_220, %c0_221, %c0_222] : memref<27x8x8xf32, #tpu.memory_space<vmem>>, vector<1x8x8xf32>
    %308 = vector.shape_cast %307 : vector<1x8x8xf32> to vector<8x8xf32>
    %309 = vector.extract_strided_slice %285 {offsets = [0, 7], sizes = [8, 130], strides = [1, 1]} : vector<8x216xf32> to vector<8x130xf32>
    %cst_223 = arith.constant dense<0.000000e+00> : vector<8x130xf32>
    %310 = tpu.matmul %308, %309, %cst_223 {dimension_numbers = #tpu.dot_dimension_numbers<[1], [0], [0], [1], [0, 0, 1, 1], [], []>} : vector<8x8xf32>, vector<8x130xf32>, vector<8x130xf32> -> vector<8x130xf32>
    %311 = arith.addf %306, %310 : vector<8x130xf32>
    %c5_224 = arith.constant 5 : index
    %c0_225 = arith.constant 0 : index
    %c0_226 = arith.constant 0 : index
    %312 = vector.load %arg8[%c5_224, %c0_225, %c0_226] : memref<27x8x8xf32, #tpu.memory_space<vmem>>, vector<1x8x8xf32>
    %313 = vector.shape_cast %312 : vector<1x8x8xf32> to vector<8x8xf32>
    %314 = vector.extract_strided_slice %285 {offsets = [0, 8], sizes = [8, 130], strides = [1, 1]} : vector<8x216xf32> to vector<8x130xf32>
    %cst_227 = arith.constant dense<0.000000e+00> : vector<8x130xf32>
    %315 = tpu.matmul %313, %314, %cst_227 {dimension_numbers = #tpu.dot_dimension_numbers<[1], [0], [0], [1], [0, 0, 1, 1], [], []>} : vector<8x8xf32>, vector<8x130xf32>, vector<8x130xf32> -> vector<8x130xf32>
    %316 = arith.addf %311, %315 : vector<8x130xf32>
    %c6_228 = arith.constant 6 : index
    %c0_229 = arith.constant 0 : index
    %c0_230 = arith.constant 0 : index
    %317 = vector.load %arg8[%c6_228, %c0_229, %c0_230] : memref<27x8x8xf32, #tpu.memory_space<vmem>>, vector<1x8x8xf32>
    %318 = vector.shape_cast %317 : vector<1x8x8xf32> to vector<8x8xf32>
    %319 = vector.extract_strided_slice %285 {offsets = [0, 12], sizes = [8, 130], strides = [1, 1]} : vector<8x216xf32> to vector<8x130xf32>
    %cst_231 = arith.constant dense<0.000000e+00> : vector<8x130xf32>
    %320 = tpu.matmul %318, %319, %cst_231 {dimension_numbers = #tpu.dot_dimension_numbers<[1], [0], [0], [1], [0, 0, 1, 1], [], []>} : vector<8x8xf32>, vector<8x130xf32>, vector<8x130xf32> -> vector<8x130xf32>
    %321 = arith.addf %316, %320 : vector<8x130xf32>
    %c7_232 = arith.constant 7 : index
    %c0_233 = arith.constant 0 : index
    %c0_234 = arith.constant 0 : index
    %322 = vector.load %arg8[%c7_232, %c0_233, %c0_234] : memref<27x8x8xf32, #tpu.memory_space<vmem>>, vector<1x8x8xf32>
    %323 = vector.shape_cast %322 : vector<1x8x8xf32> to vector<8x8xf32>
    %324 = vector.extract_strided_slice %285 {offsets = [0, 13], sizes = [8, 130], strides = [1, 1]} : vector<8x216xf32> to vector<8x130xf32>
    %cst_235 = arith.constant dense<0.000000e+00> : vector<8x130xf32>
    %325 = tpu.matmul %323, %324, %cst_235 {dimension_numbers = #tpu.dot_dimension_numbers<[1], [0], [0], [1], [0, 0, 1, 1], [], []>} : vector<8x8xf32>, vector<8x130xf32>, vector<8x130xf32> -> vector<8x130xf32>
    %326 = arith.addf %321, %325 : vector<8x130xf32>
    %c8_236 = arith.constant 8 : index
    %c0_237 = arith.constant 0 : index
    %c0_238 = arith.constant 0 : index
    %327 = vector.load %arg8[%c8_236, %c0_237, %c0_238] : memref<27x8x8xf32, #tpu.memory_space<vmem>>, vector<1x8x8xf32>
    %328 = vector.shape_cast %327 : vector<1x8x8xf32> to vector<8x8xf32>
    %329 = vector.extract_strided_slice %285 {offsets = [0, 14], sizes = [8, 130], strides = [1, 1]} : vector<8x216xf32> to vector<8x130xf32>
    %cst_239 = arith.constant dense<0.000000e+00> : vector<8x130xf32>
    %330 = tpu.matmul %328, %329, %cst_239 {dimension_numbers = #tpu.dot_dimension_numbers<[1], [0], [0], [1], [0, 0, 1, 1], [], []>} : vector<8x8xf32>, vector<8x130xf32>, vector<8x130xf32> -> vector<8x130xf32>
    %331 = arith.addf %326, %330 : vector<8x130xf32>
    %c9_240 = arith.constant 9 : index
    %c0_241 = arith.constant 0 : index
    %c0_242 = arith.constant 0 : index
    %332 = vector.load %arg8[%c9_240, %c0_241, %c0_242] : memref<27x8x8xf32, #tpu.memory_space<vmem>>, vector<1x8x8xf32>
    %333 = vector.shape_cast %332 : vector<1x8x8xf32> to vector<8x8xf32>
    %334 = vector.extract_strided_slice %285 {offsets = [0, 36], sizes = [8, 130], strides = [1, 1]} : vector<8x216xf32> to vector<8x130xf32>
    %cst_243 = arith.constant dense<0.000000e+00> : vector<8x130xf32>
    %335 = tpu.matmul %333, %334, %cst_243 {dimension_numbers = #tpu.dot_dimension_numbers<[1], [0], [0], [1], [0, 0, 1, 1], [], []>} : vector<8x8xf32>, vector<8x130xf32>, vector<8x130xf32> -> vector<8x130xf32>
    %336 = arith.addf %331, %335 : vector<8x130xf32>
    %c10_244 = arith.constant 10 : index
    %c0_245 = arith.constant 0 : index
    %c0_246 = arith.constant 0 : index
    %337 = vector.load %arg8[%c10_244, %c0_245, %c0_246] : memref<27x8x8xf32, #tpu.memory_space<vmem>>, vector<1x8x8xf32>
    %338 = vector.shape_cast %337 : vector<1x8x8xf32> to vector<8x8xf32>
    %339 = vector.extract_strided_slice %285 {offsets = [0, 37], sizes = [8, 130], strides = [1, 1]} : vector<8x216xf32> to vector<8x130xf32>
    %cst_247 = arith.constant dense<0.000000e+00> : vector<8x130xf32>
    %340 = tpu.matmul %338, %339, %cst_247 {dimension_numbers = #tpu.dot_dimension_numbers<[1], [0], [0], [1], [0, 0, 1, 1], [], []>} : vector<8x8xf32>, vector<8x130xf32>, vector<8x130xf32> -> vector<8x130xf32>
    %341 = arith.addf %336, %340 : vector<8x130xf32>
    %c11_248 = arith.constant 11 : index
    %c0_249 = arith.constant 0 : index
    %c0_250 = arith.constant 0 : index
    %342 = vector.load %arg8[%c11_248, %c0_249, %c0_250] : memref<27x8x8xf32, #tpu.memory_space<vmem>>, vector<1x8x8xf32>
    %343 = vector.shape_cast %342 : vector<1x8x8xf32> to vector<8x8xf32>
    %344 = vector.extract_strided_slice %285 {offsets = [0, 38], sizes = [8, 130], strides = [1, 1]} : vector<8x216xf32> to vector<8x130xf32>
    %cst_251 = arith.constant dense<0.000000e+00> : vector<8x130xf32>
    %345 = tpu.matmul %343, %344, %cst_251 {dimension_numbers = #tpu.dot_dimension_numbers<[1], [0], [0], [1], [0, 0, 1, 1], [], []>} : vector<8x8xf32>, vector<8x130xf32>, vector<8x130xf32> -> vector<8x130xf32>
    %346 = arith.addf %341, %345 : vector<8x130xf32>
    %c12_252 = arith.constant 12 : index
    %c0_253 = arith.constant 0 : index
    %c0_254 = arith.constant 0 : index
    %347 = vector.load %arg8[%c12_252, %c0_253, %c0_254] : memref<27x8x8xf32, #tpu.memory_space<vmem>>, vector<1x8x8xf32>
    %348 = vector.shape_cast %347 : vector<1x8x8xf32> to vector<8x8xf32>
    %349 = vector.extract_strided_slice %285 {offsets = [0, 42], sizes = [8, 130], strides = [1, 1]} : vector<8x216xf32> to vector<8x130xf32>
    %cst_255 = arith.constant dense<0.000000e+00> : vector<8x130xf32>
    %350 = tpu.matmul %348, %349, %cst_255 {dimension_numbers = #tpu.dot_dimension_numbers<[1], [0], [0], [1], [0, 0, 1, 1], [], []>} : vector<8x8xf32>, vector<8x130xf32>, vector<8x130xf32> -> vector<8x130xf32>
    %351 = arith.addf %346, %350 : vector<8x130xf32>
    %c13_256 = arith.constant 13 : index
    %c0_257 = arith.constant 0 : index
    %c0_258 = arith.constant 0 : index
    %352 = vector.load %arg8[%c13_256, %c0_257, %c0_258] : memref<27x8x8xf32, #tpu.memory_space<vmem>>, vector<1x8x8xf32>
    %353 = vector.shape_cast %352 : vector<1x8x8xf32> to vector<8x8xf32>
    %354 = vector.extract_strided_slice %285 {offsets = [0, 43], sizes = [8, 130], strides = [1, 1]} : vector<8x216xf32> to vector<8x130xf32>
    %cst_259 = arith.constant dense<0.000000e+00> : vector<8x130xf32>
    %355 = tpu.matmul %353, %354, %cst_259 {dimension_numbers = #tpu.dot_dimension_numbers<[1], [0], [0], [1], [0, 0, 1, 1], [], []>} : vector<8x8xf32>, vector<8x130xf32>, vector<8x130xf32> -> vector<8x130xf32>
    %356 = arith.addf %351, %355 : vector<8x130xf32>
    %c14_260 = arith.constant 14 : index
    %c0_261 = arith.constant 0 : index
    %c0_262 = arith.constant 0 : index
    %357 = vector.load %arg8[%c14_260, %c0_261, %c0_262] : memref<27x8x8xf32, #tpu.memory_space<vmem>>, vector<1x8x8xf32>
    %358 = vector.shape_cast %357 : vector<1x8x8xf32> to vector<8x8xf32>
    %359 = vector.extract_strided_slice %285 {offsets = [0, 44], sizes = [8, 130], strides = [1, 1]} : vector<8x216xf32> to vector<8x130xf32>
    %cst_263 = arith.constant dense<0.000000e+00> : vector<8x130xf32>
    %360 = tpu.matmul %358, %359, %cst_263 {dimension_numbers = #tpu.dot_dimension_numbers<[1], [0], [0], [1], [0, 0, 1, 1], [], []>} : vector<8x8xf32>, vector<8x130xf32>, vector<8x130xf32> -> vector<8x130xf32>
    %361 = arith.addf %356, %360 : vector<8x130xf32>
    %c15_264 = arith.constant 15 : index
    %c0_265 = arith.constant 0 : index
    %c0_266 = arith.constant 0 : index
    %362 = vector.load %arg8[%c15_264, %c0_265, %c0_266] : memref<27x8x8xf32, #tpu.memory_space<vmem>>, vector<1x8x8xf32>
    %363 = vector.shape_cast %362 : vector<1x8x8xf32> to vector<8x8xf32>
    %364 = vector.extract_strided_slice %285 {offsets = [0, 48], sizes = [8, 130], strides = [1, 1]} : vector<8x216xf32> to vector<8x130xf32>
    %cst_267 = arith.constant dense<0.000000e+00> : vector<8x130xf32>
    %365 = tpu.matmul %363, %364, %cst_267 {dimension_numbers = #tpu.dot_dimension_numbers<[1], [0], [0], [1], [0, 0, 1, 1], [], []>} : vector<8x8xf32>, vector<8x130xf32>, vector<8x130xf32> -> vector<8x130xf32>
    %366 = arith.addf %361, %365 : vector<8x130xf32>
    %c16_268 = arith.constant 16 : index
    %c0_269 = arith.constant 0 : index
    %c0_270 = arith.constant 0 : index
    %367 = vector.load %arg8[%c16_268, %c0_269, %c0_270] : memref<27x8x8xf32, #tpu.memory_space<vmem>>, vector<1x8x8xf32>
    %368 = vector.shape_cast %367 : vector<1x8x8xf32> to vector<8x8xf32>
    %369 = vector.extract_strided_slice %285 {offsets = [0, 49], sizes = [8, 130], strides = [1, 1]} : vector<8x216xf32> to vector<8x130xf32>
    %cst_271 = arith.constant dense<0.000000e+00> : vector<8x130xf32>
    %370 = tpu.matmul %368, %369, %cst_271 {dimension_numbers = #tpu.dot_dimension_numbers<[1], [0], [0], [1], [0, 0, 1, 1], [], []>} : vector<8x8xf32>, vector<8x130xf32>, vector<8x130xf32> -> vector<8x130xf32>
    %371 = arith.addf %366, %370 : vector<8x130xf32>
    %c17_272 = arith.constant 17 : index
    %c0_273 = arith.constant 0 : index
    %c0_274 = arith.constant 0 : index
    %372 = vector.load %arg8[%c17_272, %c0_273, %c0_274] : memref<27x8x8xf32, #tpu.memory_space<vmem>>, vector<1x8x8xf32>
    %373 = vector.shape_cast %372 : vector<1x8x8xf32> to vector<8x8xf32>
    %374 = vector.extract_strided_slice %285 {offsets = [0, 50], sizes = [8, 130], strides = [1, 1]} : vector<8x216xf32> to vector<8x130xf32>
    %cst_275 = arith.constant dense<0.000000e+00> : vector<8x130xf32>
    %375 = tpu.matmul %373, %374, %cst_275 {dimension_numbers = #tpu.dot_dimension_numbers<[1], [0], [0], [1], [0, 0, 1, 1], [], []>} : vector<8x8xf32>, vector<8x130xf32>, vector<8x130xf32> -> vector<8x130xf32>
    %376 = arith.addf %371, %375 : vector<8x130xf32>
    %c18_276 = arith.constant 18 : index
    %c0_277 = arith.constant 0 : index
    %c0_278 = arith.constant 0 : index
    %377 = vector.load %arg8[%c18_276, %c0_277, %c0_278] : memref<27x8x8xf32, #tpu.memory_space<vmem>>, vector<1x8x8xf32>
    %378 = vector.shape_cast %377 : vector<1x8x8xf32> to vector<8x8xf32>
    %379 = vector.extract_strided_slice %285 {offsets = [0, 72], sizes = [8, 130], strides = [1, 1]} : vector<8x216xf32> to vector<8x130xf32>
    %cst_279 = arith.constant dense<0.000000e+00> : vector<8x130xf32>
    %380 = tpu.matmul %378, %379, %cst_279 {dimension_numbers = #tpu.dot_dimension_numbers<[1], [0], [0], [1], [0, 0, 1, 1], [], []>} : vector<8x8xf32>, vector<8x130xf32>, vector<8x130xf32> -> vector<8x130xf32>
    %381 = arith.addf %376, %380 : vector<8x130xf32>
    %c19_280 = arith.constant 19 : index
    %c0_281 = arith.constant 0 : index
    %c0_282 = arith.constant 0 : index
    %382 = vector.load %arg8[%c19_280, %c0_281, %c0_282] : memref<27x8x8xf32, #tpu.memory_space<vmem>>, vector<1x8x8xf32>
    %383 = vector.shape_cast %382 : vector<1x8x8xf32> to vector<8x8xf32>
    %384 = vector.extract_strided_slice %285 {offsets = [0, 73], sizes = [8, 130], strides = [1, 1]} : vector<8x216xf32> to vector<8x130xf32>
    %cst_283 = arith.constant dense<0.000000e+00> : vector<8x130xf32>
    %385 = tpu.matmul %383, %384, %cst_283 {dimension_numbers = #tpu.dot_dimension_numbers<[1], [0], [0], [1], [0, 0, 1, 1], [], []>} : vector<8x8xf32>, vector<8x130xf32>, vector<8x130xf32> -> vector<8x130xf32>
    %386 = arith.addf %381, %385 : vector<8x130xf32>
    %c20_284 = arith.constant 20 : index
    %c0_285 = arith.constant 0 : index
    %c0_286 = arith.constant 0 : index
    %387 = vector.load %arg8[%c20_284, %c0_285, %c0_286] : memref<27x8x8xf32, #tpu.memory_space<vmem>>, vector<1x8x8xf32>
    %388 = vector.shape_cast %387 : vector<1x8x8xf32> to vector<8x8xf32>
    %389 = vector.extract_strided_slice %285 {offsets = [0, 74], sizes = [8, 130], strides = [1, 1]} : vector<8x216xf32> to vector<8x130xf32>
    %cst_287 = arith.constant dense<0.000000e+00> : vector<8x130xf32>
    %390 = tpu.matmul %388, %389, %cst_287 {dimension_numbers = #tpu.dot_dimension_numbers<[1], [0], [0], [1], [0, 0, 1, 1], [], []>} : vector<8x8xf32>, vector<8x130xf32>, vector<8x130xf32> -> vector<8x130xf32>
    %391 = arith.addf %386, %390 : vector<8x130xf32>
    %c21_288 = arith.constant 21 : index
    %c0_289 = arith.constant 0 : index
    %c0_290 = arith.constant 0 : index
    %392 = vector.load %arg8[%c21_288, %c0_289, %c0_290] : memref<27x8x8xf32, #tpu.memory_space<vmem>>, vector<1x8x8xf32>
    %393 = vector.shape_cast %392 : vector<1x8x8xf32> to vector<8x8xf32>
    %394 = vector.extract_strided_slice %285 {offsets = [0, 78], sizes = [8, 130], strides = [1, 1]} : vector<8x216xf32> to vector<8x130xf32>
    %cst_291 = arith.constant dense<0.000000e+00> : vector<8x130xf32>
    %395 = tpu.matmul %393, %394, %cst_291 {dimension_numbers = #tpu.dot_dimension_numbers<[1], [0], [0], [1], [0, 0, 1, 1], [], []>} : vector<8x8xf32>, vector<8x130xf32>, vector<8x130xf32> -> vector<8x130xf32>
    %396 = arith.addf %391, %395 : vector<8x130xf32>
    %c22_292 = arith.constant 22 : index
    %c0_293 = arith.constant 0 : index
    %c0_294 = arith.constant 0 : index
    %397 = vector.load %arg8[%c22_292, %c0_293, %c0_294] : memref<27x8x8xf32, #tpu.memory_space<vmem>>, vector<1x8x8xf32>
    %398 = vector.shape_cast %397 : vector<1x8x8xf32> to vector<8x8xf32>
    %399 = vector.extract_strided_slice %285 {offsets = [0, 79], sizes = [8, 130], strides = [1, 1]} : vector<8x216xf32> to vector<8x130xf32>
    %cst_295 = arith.constant dense<0.000000e+00> : vector<8x130xf32>
    %400 = tpu.matmul %398, %399, %cst_295 {dimension_numbers = #tpu.dot_dimension_numbers<[1], [0], [0], [1], [0, 0, 1, 1], [], []>} : vector<8x8xf32>, vector<8x130xf32>, vector<8x130xf32> -> vector<8x130xf32>
    %401 = arith.addf %396, %400 : vector<8x130xf32>
    %c23_296 = arith.constant 23 : index
    %c0_297 = arith.constant 0 : index
    %c0_298 = arith.constant 0 : index
    %402 = vector.load %arg8[%c23_296, %c0_297, %c0_298] : memref<27x8x8xf32, #tpu.memory_space<vmem>>, vector<1x8x8xf32>
    %403 = vector.shape_cast %402 : vector<1x8x8xf32> to vector<8x8xf32>
    %404 = vector.extract_strided_slice %285 {offsets = [0, 80], sizes = [8, 130], strides = [1, 1]} : vector<8x216xf32> to vector<8x130xf32>
    %cst_299 = arith.constant dense<0.000000e+00> : vector<8x130xf32>
    %405 = tpu.matmul %403, %404, %cst_299 {dimension_numbers = #tpu.dot_dimension_numbers<[1], [0], [0], [1], [0, 0, 1, 1], [], []>} : vector<8x8xf32>, vector<8x130xf32>, vector<8x130xf32> -> vector<8x130xf32>
    %406 = arith.addf %401, %405 : vector<8x130xf32>
    %c24_300 = arith.constant 24 : index
    %c0_301 = arith.constant 0 : index
    %c0_302 = arith.constant 0 : index
    %407 = vector.load %arg8[%c24_300, %c0_301, %c0_302] : memref<27x8x8xf32, #tpu.memory_space<vmem>>, vector<1x8x8xf32>
    %408 = vector.shape_cast %407 : vector<1x8x8xf32> to vector<8x8xf32>
    %409 = vector.extract_strided_slice %285 {offsets = [0, 84], sizes = [8, 130], strides = [1, 1]} : vector<8x216xf32> to vector<8x130xf32>
    %cst_303 = arith.constant dense<0.000000e+00> : vector<8x130xf32>
    %410 = tpu.matmul %408, %409, %cst_303 {dimension_numbers = #tpu.dot_dimension_numbers<[1], [0], [0], [1], [0, 0, 1, 1], [], []>} : vector<8x8xf32>, vector<8x130xf32>, vector<8x130xf32> -> vector<8x130xf32>
    %411 = arith.addf %406, %410 : vector<8x130xf32>
    %c25_304 = arith.constant 25 : index
    %c0_305 = arith.constant 0 : index
    %c0_306 = arith.constant 0 : index
    %412 = vector.load %arg8[%c25_304, %c0_305, %c0_306] : memref<27x8x8xf32, #tpu.memory_space<vmem>>, vector<1x8x8xf32>
    %413 = vector.shape_cast %412 : vector<1x8x8xf32> to vector<8x8xf32>
    %414 = vector.extract_strided_slice %285 {offsets = [0, 85], sizes = [8, 130], strides = [1, 1]} : vector<8x216xf32> to vector<8x130xf32>
    %cst_307 = arith.constant dense<0.000000e+00> : vector<8x130xf32>
    %415 = tpu.matmul %413, %414, %cst_307 {dimension_numbers = #tpu.dot_dimension_numbers<[1], [0], [0], [1], [0, 0, 1, 1], [], []>} : vector<8x8xf32>, vector<8x130xf32>, vector<8x130xf32> -> vector<8x130xf32>
    %416 = arith.addf %411, %415 : vector<8x130xf32>
    %c26_308 = arith.constant 26 : index
    %c0_309 = arith.constant 0 : index
    %c0_310 = arith.constant 0 : index
    %417 = vector.load %arg8[%c26_308, %c0_309, %c0_310] : memref<27x8x8xf32, #tpu.memory_space<vmem>>, vector<1x8x8xf32>
    %418 = vector.shape_cast %417 : vector<1x8x8xf32> to vector<8x8xf32>
    %419 = vector.extract_strided_slice %285 {offsets = [0, 86], sizes = [8, 130], strides = [1, 1]} : vector<8x216xf32> to vector<8x130xf32>
    %cst_311 = arith.constant dense<0.000000e+00> : vector<8x130xf32>
    %420 = tpu.matmul %418, %419, %cst_311 {dimension_numbers = #tpu.dot_dimension_numbers<[1], [0], [0], [1], [0, 0, 1, 1], [], []>} : vector<8x8xf32>, vector<8x130xf32>, vector<8x130xf32> -> vector<8x130xf32>
    %421 = arith.addf %416, %420 : vector<8x130xf32>
    %c0_312 = arith.constant 0 : index
    %c0_313 = arith.constant 0 : index
    %422 = vector.load %arg9[%c0_312, %c0_313] : memref<8x1xf32, #tpu.memory_space<vmem>>, vector<8x1xf32>
    %423 = vector.broadcast %422 : vector<8x1xf32> to vector<8x130xf32>
    %424 = arith.addf %421, %423 : vector<8x130xf32>
    %cst_314 = arith.constant 0.000000e+00 : f32
    %425 = vector.broadcast %cst_314 : f32 to vector<8x130xf32>
    %426 = arith.maximumf %424, %425 : vector<8x130xf32>
    %c0_315 = arith.constant 0 : index
    %c0_316 = arith.constant 0 : index
    %427 = vector.load %arg10[%c0_315, %c0_316] : memref<1x130xf32, #tpu.memory_space<vmem>>, vector<1x130xf32>
    %428 = vector.broadcast %427 : vector<1x130xf32> to vector<8x130xf32>
    %429 = arith.mulf %426, %428 : vector<8x130xf32>
    %cst_317 = arith.constant dense<0.000000e+00> : vector<8xf32>
    %430 = vector.multi_reduction <add>, %429, %cst_317 [1] : vector<8x130xf32> to vector<8xf32>
    %431 = vector.shape_cast %430 : vector<8xf32> to vector<8x1xf32>
    %c0_318 = arith.constant 0 : index
    %c0_319 = arith.constant 0 : index
    %432 = vector.load %arg11[%c0_318, %c0_319] : memref<6x8xf32, #tpu.memory_space<vmem>>, vector<6x8xf32>
    %cst_320 = arith.constant dense<0.000000e+00> : vector<6x130xf32>
    %433 = tpu.matmul %432, %426, %cst_320 {dimension_numbers = #tpu.dot_dimension_numbers<[1], [0], [0], [1], [0, 0, 1, 1], [], []>} : vector<6x8xf32>, vector<8x130xf32>, vector<6x130xf32> -> vector<6x130xf32>
    %c0_321 = arith.constant 0 : index
    %c0_322 = arith.constant 0 : index
    %434 = vector.load %arg10[%c0_321, %c0_322] : memref<1x130xf32, #tpu.memory_space<vmem>>, vector<1x130xf32>
    %435 = vector.broadcast %434 : vector<1x130xf32> to vector<6x130xf32>
    %436 = arith.mulf %433, %435 : vector<6x130xf32>
    %cst_323 = arith.constant dense<0.000000e+00> : vector<6xf32>
    %437 = vector.multi_reduction <add>, %436, %cst_323 [1] : vector<6x130xf32> to vector<6xf32>
    %438 = vector.shape_cast %437 : vector<6xf32> to vector<6x1xf32>
    %c0_324 = arith.constant 0 : index
    %c0_325 = arith.constant 0 : index
    %439 = vector.load %arg12[%c0_324, %c0_325] : memref<6x1xf32, #tpu.memory_space<vmem>>, vector<6x1xf32>
    %440 = arith.addf %438, %439 : vector<6x1xf32>
    %c0_326 = arith.constant 0 : index
    %c0_327 = arith.constant 0 : index
    %c0_328 = arith.constant 0 : index
    %441 = vector.load %arg31[%c0_326, %c0_327, %c0_328] : memref<1x6x1xf32, #tpu.memory_space<vmem>>, vector<1x6x1xf32>
    %442 = vector.shape_cast %441 : vector<1x6x1xf32> to vector<6x1xf32>
    %443 = vector.shape_cast %440 : vector<6x1xf32> to vector<1x6x1xf32>
    tpu.vector_store %arg31[%c0_326, %c0_327, %c0_328], %443 {strides = array<i32>} : memref<1x6x1xf32, #tpu.memory_space<vmem>>, vector<1x6x1xf32>,
    %c0_329 = arith.constant 0 : index
    %c0_330 = arith.constant 0 : index
    %444 = vector.load %arg14[%c0_329, %c0_330] : memref<8x26xf32, #tpu.memory_space<vmem>>, vector<8x26xf32>
    %445 = vector.extract_strided_slice %431 {offsets = [0, 0], sizes = [1, 1], strides = [1, 1]} : vector<8x1xf32> to vector<1x1xf32>
    %c0_331 = arith.constant 0 : index
    %c0_332 = arith.constant 0 : index
    %c0_333 = arith.constant 0 : index
    %446 = vector.load %arg13[%c0_331, %c0_332, %c0_333] : memref<8x8x26xf32, #tpu.memory_space<vmem>>, vector<1x8x26xf32>
    %447 = vector.shape_cast %446 : vector<1x8x26xf32> to vector<8x26xf32>
    %448 = vector.broadcast %445 : vector<1x1xf32> to vector<8x26xf32>
    %449 = arith.mulf %448, %447 : vector<8x26xf32>
    %450 = arith.addf %444, %449 : vector<8x26xf32>
    %451 = vector.extract_strided_slice %431 {offsets = [1, 0], sizes = [1, 1], strides = [1, 1]} : vector<8x1xf32> to vector<1x1xf32>
    %c1_334 = arith.constant 1 : index
    %c0_335 = arith.constant 0 : index
    %c0_336 = arith.constant 0 : index
    %452 = vector.load %arg13[%c1_334, %c0_335, %c0_336] : memref<8x8x26xf32, #tpu.memory_space<vmem>>, vector<1x8x26xf32>
    %453 = vector.shape_cast %452 : vector<1x8x26xf32> to vector<8x26xf32>
    %454 = vector.broadcast %451 : vector<1x1xf32> to vector<8x26xf32>
    %455 = arith.mulf %454, %453 : vector<8x26xf32>
    %456 = arith.addf %450, %455 : vector<8x26xf32>
    %457 = vector.extract_strided_slice %431 {offsets = [2, 0], sizes = [1, 1], strides = [1, 1]} : vector<8x1xf32> to vector<1x1xf32>
    %c2_337 = arith.constant 2 : index
    %c0_338 = arith.constant 0 : index
    %c0_339 = arith.constant 0 : index
    %458 = vector.load %arg13[%c2_337, %c0_338, %c0_339] : memref<8x8x26xf32, #tpu.memory_space<vmem>>, vector<1x8x26xf32>
    %459 = vector.shape_cast %458 : vector<1x8x26xf32> to vector<8x26xf32>
    %460 = vector.broadcast %457 : vector<1x1xf32> to vector<8x26xf32>
    %461 = arith.mulf %460, %459 : vector<8x26xf32>
    %462 = arith.addf %456, %461 : vector<8x26xf32>
    %463 = vector.extract_strided_slice %431 {offsets = [3, 0], sizes = [1, 1], strides = [1, 1]} : vector<8x1xf32> to vector<1x1xf32>
    %c3_340 = arith.constant 3 : index
    %c0_341 = arith.constant 0 : index
    %c0_342 = arith.constant 0 : index
    %464 = vector.load %arg13[%c3_340, %c0_341, %c0_342] : memref<8x8x26xf32, #tpu.memory_space<vmem>>, vector<1x8x26xf32>
    %465 = vector.shape_cast %464 : vector<1x8x26xf32> to vector<8x26xf32>
    %466 = vector.broadcast %463 : vector<1x1xf32> to vector<8x26xf32>
    %467 = arith.mulf %466, %465 : vector<8x26xf32>
    %468 = arith.addf %462, %467 : vector<8x26xf32>
    %469 = vector.extract_strided_slice %431 {offsets = [4, 0], sizes = [1, 1], strides = [1, 1]} : vector<8x1xf32> to vector<1x1xf32>
    %c4_343 = arith.constant 4 : index
    %c0_344 = arith.constant 0 : index
    %c0_345 = arith.constant 0 : index
    %470 = vector.load %arg13[%c4_343, %c0_344, %c0_345] : memref<8x8x26xf32, #tpu.memory_space<vmem>>, vector<1x8x26xf32>
    %471 = vector.shape_cast %470 : vector<1x8x26xf32> to vector<8x26xf32>
    %472 = vector.broadcast %469 : vector<1x1xf32> to vector<8x26xf32>
    %473 = arith.mulf %472, %471 : vector<8x26xf32>
    %474 = arith.addf %468, %473 : vector<8x26xf32>
    %475 = vector.extract_strided_slice %431 {offsets = [5, 0], sizes = [1, 1], strides = [1, 1]} : vector<8x1xf32> to vector<1x1xf32>
    %c5_346 = arith.constant 5 : index
    %c0_347 = arith.constant 0 : index
    %c0_348 = arith.constant 0 : index
    %476 = vector.load %arg13[%c5_346, %c0_347, %c0_348] : memref<8x8x26xf32, #tpu.memory_space<vmem>>, vector<1x8x26xf32>
    %477 = vector.shape_cast %476 : vector<1x8x26xf32> to vector<8x26xf32>
    %478 = vector.broadcast %475 : vector<1x1xf32> to vector<8x26xf32>
    %479 = arith.mulf %478, %477 : vector<8x26xf32>
    %480 = arith.addf %474, %479 : vector<8x26xf32>
    %481 = vector.extract_strided_slice %431 {offsets = [6, 0], sizes = [1, 1], strides = [1, 1]} : vector<8x1xf32> to vector<1x1xf32>
    %c6_349 = arith.constant 6 : index
    %c0_350 = arith.constant 0 : index
    %c0_351 = arith.constant 0 : index
    %482 = vector.load %arg13[%c6_349, %c0_350, %c0_351] : memref<8x8x26xf32, #tpu.memory_space<vmem>>, vector<1x8x26xf32>
    %483 = vector.shape_cast %482 : vector<1x8x26xf32> to vector<8x26xf32>
    %484 = vector.broadcast %481 : vector<1x1xf32> to vector<8x26xf32>
    %485 = arith.mulf %484, %483 : vector<8x26xf32>
    %486 = arith.addf %480, %485 : vector<8x26xf32>
    %487 = vector.extract_strided_slice %431 {offsets = [7, 0], sizes = [1, 1], strides = [1, 1]} : vector<8x1xf32> to vector<1x1xf32>
    %c7_352 = arith.constant 7 : index
    %c0_353 = arith.constant 0 : index
    %c0_354 = arith.constant 0 : index
    %488 = vector.load %arg13[%c7_352, %c0_353, %c0_354] : memref<8x8x26xf32, #tpu.memory_space<vmem>>, vector<1x8x26xf32>
    %489 = vector.shape_cast %488 : vector<1x8x26xf32> to vector<8x26xf32>
    %490 = vector.broadcast %487 : vector<1x1xf32> to vector<8x26xf32>
    %491 = arith.mulf %490, %489 : vector<8x26xf32>
    %492 = arith.addf %486, %491 : vector<8x26xf32>
    %cst_355 = arith.constant 0.000000e+00 : f32
    %493 = vector.broadcast %cst_355 : f32 to vector<8x16xf32>
    %c0_356 = arith.constant 0 : index
    %c0_357 = arith.constant 0 : index
    %c0_358 = arith.constant 0 : index
    %494 = vector.load %arg15[%c0_356, %c0_357, %c0_358] : memref<9x8x8xf32, #tpu.memory_space<vmem>>, vector<1x8x8xf32>
    %495 = vector.shape_cast %494 : vector<1x8x8xf32> to vector<8x8xf32>
    %496 = vector.extract_strided_slice %492 {offsets = [0, 0], sizes = [8, 16], strides = [1, 1]} : vector<8x26xf32> to vector<8x16xf32>
    %cst_359 = arith.constant dense<0.000000e+00> : vector<8x16xf32>
    %497 = tpu.matmul %495, %496, %cst_359 {dimension_numbers = #tpu.dot_dimension_numbers<[1], [0], [0], [1], [0, 0, 1, 1], [], []>} : vector<8x8xf32>, vector<8x16xf32>, vector<8x16xf32> -> vector<8x16xf32>
    %498 = arith.addf %493, %497 : vector<8x16xf32>
    %c1_360 = arith.constant 1 : index
    %c0_361 = arith.constant 0 : index
    %c0_362 = arith.constant 0 : index
    %499 = vector.load %arg15[%c1_360, %c0_361, %c0_362] : memref<9x8x8xf32, #tpu.memory_space<vmem>>, vector<1x8x8xf32>
    %500 = vector.shape_cast %499 : vector<1x8x8xf32> to vector<8x8xf32>
    %501 = vector.extract_strided_slice %492 {offsets = [0, 1], sizes = [8, 16], strides = [1, 1]} : vector<8x26xf32> to vector<8x16xf32>
    %cst_363 = arith.constant dense<0.000000e+00> : vector<8x16xf32>
    %502 = tpu.matmul %500, %501, %cst_363 {dimension_numbers = #tpu.dot_dimension_numbers<[1], [0], [0], [1], [0, 0, 1, 1], [], []>} : vector<8x8xf32>, vector<8x16xf32>, vector<8x16xf32> -> vector<8x16xf32>
    %503 = arith.addf %498, %502 : vector<8x16xf32>
    %c2_364 = arith.constant 2 : index
    %c0_365 = arith.constant 0 : index
    %c0_366 = arith.constant 0 : index
    %504 = vector.load %arg15[%c2_364, %c0_365, %c0_366] : memref<9x8x8xf32, #tpu.memory_space<vmem>>, vector<1x8x8xf32>
    %505 = vector.shape_cast %504 : vector<1x8x8xf32> to vector<8x8xf32>
    %506 = vector.extract_strided_slice %492 {offsets = [0, 2], sizes = [8, 16], strides = [1, 1]} : vector<8x26xf32> to vector<8x16xf32>
    %cst_367 = arith.constant dense<0.000000e+00> : vector<8x16xf32>
    %507 = tpu.matmul %505, %506, %cst_367 {dimension_numbers = #tpu.dot_dimension_numbers<[1], [0], [0], [1], [0, 0, 1, 1], [], []>} : vector<8x8xf32>, vector<8x16xf32>, vector<8x16xf32> -> vector<8x16xf32>
    %508 = arith.addf %503, %507 : vector<8x16xf32>
    %c3_368 = arith.constant 3 : index
    %c0_369 = arith.constant 0 : index
    %c0_370 = arith.constant 0 : index
    %509 = vector.load %arg15[%c3_368, %c0_369, %c0_370] : memref<9x8x8xf32, #tpu.memory_space<vmem>>, vector<1x8x8xf32>
    %510 = vector.shape_cast %509 : vector<1x8x8xf32> to vector<8x8xf32>
    %511 = vector.extract_strided_slice %492 {offsets = [0, 4], sizes = [8, 16], strides = [1, 1]} : vector<8x26xf32> to vector<8x16xf32>
    %cst_371 = arith.constant dense<0.000000e+00> : vector<8x16xf32>
    %512 = tpu.matmul %510, %511, %cst_371 {dimension_numbers = #tpu.dot_dimension_numbers<[1], [0], [0], [1], [0, 0, 1, 1], [], []>} : vector<8x8xf32>, vector<8x16xf32>, vector<8x16xf32> -> vector<8x16xf32>
    %513 = arith.addf %508, %512 : vector<8x16xf32>
    %c4_372 = arith.constant 4 : index
    %c0_373 = arith.constant 0 : index
    %c0_374 = arith.constant 0 : index
    %514 = vector.load %arg15[%c4_372, %c0_373, %c0_374] : memref<9x8x8xf32, #tpu.memory_space<vmem>>, vector<1x8x8xf32>
    %515 = vector.shape_cast %514 : vector<1x8x8xf32> to vector<8x8xf32>
    %516 = vector.extract_strided_slice %492 {offsets = [0, 5], sizes = [8, 16], strides = [1, 1]} : vector<8x26xf32> to vector<8x16xf32>
    %cst_375 = arith.constant dense<0.000000e+00> : vector<8x16xf32>
    %517 = tpu.matmul %515, %516, %cst_375 {dimension_numbers = #tpu.dot_dimension_numbers<[1], [0], [0], [1], [0, 0, 1, 1], [], []>} : vector<8x8xf32>, vector<8x16xf32>, vector<8x16xf32> -> vector<8x16xf32>
    %518 = arith.addf %513, %517 : vector<8x16xf32>
    %c5_376 = arith.constant 5 : index
    %c0_377 = arith.constant 0 : index
    %c0_378 = arith.constant 0 : index
    %519 = vector.load %arg15[%c5_376, %c0_377, %c0_378] : memref<9x8x8xf32, #tpu.memory_space<vmem>>, vector<1x8x8xf32>
    %520 = vector.shape_cast %519 : vector<1x8x8xf32> to vector<8x8xf32>
    %521 = vector.extract_strided_slice %492 {offsets = [0, 6], sizes = [8, 16], strides = [1, 1]} : vector<8x26xf32> to vector<8x16xf32>
    %cst_379 = arith.constant dense<0.000000e+00> : vector<8x16xf32>
    %522 = tpu.matmul %520, %521, %cst_379 {dimension_numbers = #tpu.dot_dimension_numbers<[1], [0], [0], [1], [0, 0, 1, 1], [], []>} : vector<8x8xf32>, vector<8x16xf32>, vector<8x16xf32> -> vector<8x16xf32>
    %523 = arith.addf %518, %522 : vector<8x16xf32>
    %c6_380 = arith.constant 6 : index
    %c0_381 = arith.constant 0 : index
    %c0_382 = arith.constant 0 : index
    %524 = vector.load %arg15[%c6_380, %c0_381, %c0_382] : memref<9x8x8xf32, #tpu.memory_space<vmem>>, vector<1x8x8xf32>
    %525 = vector.shape_cast %524 : vector<1x8x8xf32> to vector<8x8xf32>
    %526 = vector.extract_strided_slice %492 {offsets = [0, 8], sizes = [8, 16], strides = [1, 1]} : vector<8x26xf32> to vector<8x16xf32>
    %cst_383 = arith.constant dense<0.000000e+00> : vector<8x16xf32>
    %527 = tpu.matmul %525, %526, %cst_383 {dimension_numbers = #tpu.dot_dimension_numbers<[1], [0], [0], [1], [0, 0, 1, 1], [], []>} : vector<8x8xf32>, vector<8x16xf32>, vector<8x16xf32> -> vector<8x16xf32>
    %528 = arith.addf %523, %527 : vector<8x16xf32>
    %c7_384 = arith.constant 7 : index
    %c0_385 = arith.constant 0 : index
    %c0_386 = arith.constant 0 : index
    %529 = vector.load %arg15[%c7_384, %c0_385, %c0_386] : memref<9x8x8xf32, #tpu.memory_space<vmem>>, vector<1x8x8xf32>
    %530 = vector.shape_cast %529 : vector<1x8x8xf32> to vector<8x8xf32>
    %531 = vector.extract_strided_slice %492 {offsets = [0, 9], sizes = [8, 16], strides = [1, 1]} : vector<8x26xf32> to vector<8x16xf32>
    %cst_387 = arith.constant dense<0.000000e+00> : vector<8x16xf32>
    %532 = tpu.matmul %530, %531, %cst_387 {dimension_numbers = #tpu.dot_dimension_numbers<[1], [0], [0], [1], [0, 0, 1, 1], [], []>} : vector<8x8xf32>, vector<8x16xf32>, vector<8x16xf32> -> vector<8x16xf32>
    %533 = arith.addf %528, %532 : vector<8x16xf32>
    %c8_388 = arith.constant 8 : index
    %c0_389 = arith.constant 0 : index
    %c0_390 = arith.constant 0 : index
    %534 = vector.load %arg15[%c8_388, %c0_389, %c0_390] : memref<9x8x8xf32, #tpu.memory_space<vmem>>, vector<1x8x8xf32>
    %535 = vector.shape_cast %534 : vector<1x8x8xf32> to vector<8x8xf32>
    %536 = vector.extract_strided_slice %492 {offsets = [0, 10], sizes = [8, 16], strides = [1, 1]} : vector<8x26xf32> to vector<8x16xf32>
    %cst_391 = arith.constant dense<0.000000e+00> : vector<8x16xf32>
    %537 = tpu.matmul %535, %536, %cst_391 {dimension_numbers = #tpu.dot_dimension_numbers<[1], [0], [0], [1], [0, 0, 1, 1], [], []>} : vector<8x8xf32>, vector<8x16xf32>, vector<8x16xf32> -> vector<8x16xf32>
    %538 = arith.addf %533, %537 : vector<8x16xf32>
    %c0_392 = arith.constant 0 : index
    %c0_393 = arith.constant 0 : index
    %539 = vector.load %arg17[%c0_392, %c0_393] : memref<1x16xf32, #tpu.memory_space<vmem>>, vector<1x16xf32>
    %c0_394 = arith.constant 0 : index
    %c0_395 = arith.constant 0 : index
    %540 = vector.load %arg16[%c0_394, %c0_395] : memref<8x1xf32, #tpu.memory_space<vmem>>, vector<8x1xf32>
    %541 = vector.broadcast %540 : vector<8x1xf32> to vector<8x16xf32>
    %542 = arith.addf %538, %541 : vector<8x16xf32>
    %cst_396 = arith.constant 0.000000e+00 : f32
    %543 = vector.broadcast %cst_396 : f32 to vector<8x16xf32>
    %544 = arith.maximumf %542, %543 : vector<8x16xf32>
    %545 = vector.broadcast %539 : vector<1x16xf32> to vector<8x16xf32>
    %546 = arith.mulf %545, %544 : vector<8x16xf32>
    %cst_397 = arith.constant 0.000000e+00 : f32
    %547 = vector.broadcast %cst_397 : f32 to vector<3x6xf32>
    %c0_398 = arith.constant 0 : index
    %c0_399 = arith.constant 0 : index
    %c0_400 = arith.constant 0 : index
    %548 = vector.load %arg18[%c0_398, %c0_399, %c0_400] : memref<9x3x8xf32, #tpu.memory_space<vmem>>, vector<1x3x8xf32>
    %549 = vector.shape_cast %548 : vector<1x3x8xf32> to vector<3x8xf32>
    %550 = vector.extract_strided_slice %546 {offsets = [0, 0], sizes = [8, 6], strides = [1, 1]} : vector<8x16xf32> to vector<8x6xf32>
    %cst_401 = arith.constant dense<0.000000e+00> : vector<3x6xf32>
    %551 = tpu.matmul %549, %550, %cst_401 {dimension_numbers = #tpu.dot_dimension_numbers<[1], [0], [0], [1], [0, 0, 1, 1], [], []>} : vector<3x8xf32>, vector<8x6xf32>, vector<3x6xf32> -> vector<3x6xf32>
    %552 = arith.addf %547, %551 : vector<3x6xf32>
    %c1_402 = arith.constant 1 : index
    %c0_403 = arith.constant 0 : index
    %c0_404 = arith.constant 0 : index
    %553 = vector.load %arg18[%c1_402, %c0_403, %c0_404] : memref<9x3x8xf32, #tpu.memory_space<vmem>>, vector<1x3x8xf32>
    %554 = vector.shape_cast %553 : vector<1x3x8xf32> to vector<3x8xf32>
    %555 = vector.extract_strided_slice %546 {offsets = [0, 1], sizes = [8, 6], strides = [1, 1]} : vector<8x16xf32> to vector<8x6xf32>
    %cst_405 = arith.constant dense<0.000000e+00> : vector<3x6xf32>
    %556 = tpu.matmul %554, %555, %cst_405 {dimension_numbers = #tpu.dot_dimension_numbers<[1], [0], [0], [1], [0, 0, 1, 1], [], []>} : vector<3x8xf32>, vector<8x6xf32>, vector<3x6xf32> -> vector<3x6xf32>
    %557 = arith.addf %552, %556 : vector<3x6xf32>
    %c2_406 = arith.constant 2 : index
    %c0_407 = arith.constant 0 : index
    %c0_408 = arith.constant 0 : index
    %558 = vector.load %arg18[%c2_406, %c0_407, %c0_408] : memref<9x3x8xf32, #tpu.memory_space<vmem>>, vector<1x3x8xf32>
    %559 = vector.shape_cast %558 : vector<1x3x8xf32> to vector<3x8xf32>
    %560 = vector.extract_strided_slice %546 {offsets = [0, 2], sizes = [8, 6], strides = [1, 1]} : vector<8x16xf32> to vector<8x6xf32>
    %cst_409 = arith.constant dense<0.000000e+00> : vector<3x6xf32>
    %561 = tpu.matmul %559, %560, %cst_409 {dimension_numbers = #tpu.dot_dimension_numbers<[1], [0], [0], [1], [0, 0, 1, 1], [], []>} : vector<3x8xf32>, vector<8x6xf32>, vector<3x6xf32> -> vector<3x6xf32>
    %562 = arith.addf %557, %561 : vector<3x6xf32>
    %c3_410 = arith.constant 3 : index
    %c0_411 = arith.constant 0 : index
    %c0_412 = arith.constant 0 : index
    %563 = vector.load %arg18[%c3_410, %c0_411, %c0_412] : memref<9x3x8xf32, #tpu.memory_space<vmem>>, vector<1x3x8xf32>
    %564 = vector.shape_cast %563 : vector<1x3x8xf32> to vector<3x8xf32>
    %565 = vector.extract_strided_slice %546 {offsets = [0, 4], sizes = [8, 6], strides = [1, 1]} : vector<8x16xf32> to vector<8x6xf32>
    %cst_413 = arith.constant dense<0.000000e+00> : vector<3x6xf32>
    %566 = tpu.matmul %564, %565, %cst_413 {dimension_numbers = #tpu.dot_dimension_numbers<[1], [0], [0], [1], [0, 0, 1, 1], [], []>} : vector<3x8xf32>, vector<8x6xf32>, vector<3x6xf32> -> vector<3x6xf32>
    %567 = arith.addf %562, %566 : vector<3x6xf32>
    %c4_414 = arith.constant 4 : index
    %c0_415 = arith.constant 0 : index
    %c0_416 = arith.constant 0 : index
    %568 = vector.load %arg18[%c4_414, %c0_415, %c0_416] : memref<9x3x8xf32, #tpu.memory_space<vmem>>, vector<1x3x8xf32>
    %569 = vector.shape_cast %568 : vector<1x3x8xf32> to vector<3x8xf32>
    %570 = vector.extract_strided_slice %546 {offsets = [0, 5], sizes = [8, 6], strides = [1, 1]} : vector<8x16xf32> to vector<8x6xf32>
    %cst_417 = arith.constant dense<0.000000e+00> : vector<3x6xf32>
    %571 = tpu.matmul %569, %570, %cst_417 {dimension_numbers = #tpu.dot_dimension_numbers<[1], [0], [0], [1], [0, 0, 1, 1], [], []>} : vector<3x8xf32>, vector<8x6xf32>, vector<3x6xf32> -> vector<3x6xf32>
    %572 = arith.addf %567, %571 : vector<3x6xf32>
    %c5_418 = arith.constant 5 : index
    %c0_419 = arith.constant 0 : index
    %c0_420 = arith.constant 0 : index
    %573 = vector.load %arg18[%c5_418, %c0_419, %c0_420] : memref<9x3x8xf32, #tpu.memory_space<vmem>>, vector<1x3x8xf32>
    %574 = vector.shape_cast %573 : vector<1x3x8xf32> to vector<3x8xf32>
    %575 = vector.extract_strided_slice %546 {offsets = [0, 6], sizes = [8, 6], strides = [1, 1]} : vector<8x16xf32> to vector<8x6xf32>
    %cst_421 = arith.constant dense<0.000000e+00> : vector<3x6xf32>
    %576 = tpu.matmul %574, %575, %cst_421 {dimension_numbers = #tpu.dot_dimension_numbers<[1], [0], [0], [1], [0, 0, 1, 1], [], []>} : vector<3x8xf32>, vector<8x6xf32>, vector<3x6xf32> -> vector<3x6xf32>
    %577 = arith.addf %572, %576 : vector<3x6xf32>
    %c6_422 = arith.constant 6 : index
    %c0_423 = arith.constant 0 : index
    %c0_424 = arith.constant 0 : index
    %578 = vector.load %arg18[%c6_422, %c0_423, %c0_424] : memref<9x3x8xf32, #tpu.memory_space<vmem>>, vector<1x3x8xf32>
    %579 = vector.shape_cast %578 : vector<1x3x8xf32> to vector<3x8xf32>
    %580 = vector.extract_strided_slice %546 {offsets = [0, 8], sizes = [8, 6], strides = [1, 1]} : vector<8x16xf32> to vector<8x6xf32>
    %cst_425 = arith.constant dense<0.000000e+00> : vector<3x6xf32>
    %581 = tpu.matmul %579, %580, %cst_425 {dimension_numbers = #tpu.dot_dimension_numbers<[1], [0], [0], [1], [0, 0, 1, 1], [], []>} : vector<3x8xf32>, vector<8x6xf32>, vector<3x6xf32> -> vector<3x6xf32>
    %582 = arith.addf %577, %581 : vector<3x6xf32>
    %c7_426 = arith.constant 7 : index
    %c0_427 = arith.constant 0 : index
    %c0_428 = arith.constant 0 : index
    %583 = vector.load %arg18[%c7_426, %c0_427, %c0_428] : memref<9x3x8xf32, #tpu.memory_space<vmem>>, vector<1x3x8xf32>
    %584 = vector.shape_cast %583 : vector<1x3x8xf32> to vector<3x8xf32>
    %585 = vector.extract_strided_slice %546 {offsets = [0, 9], sizes = [8, 6], strides = [1, 1]} : vector<8x16xf32> to vector<8x6xf32>
    %cst_429 = arith.constant dense<0.000000e+00> : vector<3x6xf32>
    %586 = tpu.matmul %584, %585, %cst_429 {dimension_numbers = #tpu.dot_dimension_numbers<[1], [0], [0], [1], [0, 0, 1, 1], [], []>} : vector<3x8xf32>, vector<8x6xf32>, vector<3x6xf32> -> vector<3x6xf32>
    %587 = arith.addf %582, %586 : vector<3x6xf32>
    %c8_430 = arith.constant 8 : index
    %c0_431 = arith.constant 0 : index
    %c0_432 = arith.constant 0 : index
    %588 = vector.load %arg18[%c8_430, %c0_431, %c0_432] : memref<9x3x8xf32, #tpu.memory_space<vmem>>, vector<1x3x8xf32>
    %589 = vector.shape_cast %588 : vector<1x3x8xf32> to vector<3x8xf32>
    %590 = vector.extract_strided_slice %546 {offsets = [0, 10], sizes = [8, 6], strides = [1, 1]} : vector<8x16xf32> to vector<8x6xf32>
    %cst_433 = arith.constant dense<0.000000e+00> : vector<3x6xf32>
    %591 = tpu.matmul %589, %590, %cst_433 {dimension_numbers = #tpu.dot_dimension_numbers<[1], [0], [0], [1], [0, 0, 1, 1], [], []>} : vector<3x8xf32>, vector<8x6xf32>, vector<3x6xf32> -> vector<3x6xf32>
    %592 = arith.addf %587, %591 : vector<3x6xf32>
    %c0_434 = arith.constant 0 : index
    %c0_435 = arith.constant 0 : index
    %593 = vector.load %arg19[%c0_434, %c0_435] : memref<3x1xf32, #tpu.memory_space<vmem>>, vector<3x1xf32>
    %594 = vector.broadcast %593 : vector<3x1xf32> to vector<3x6xf32>
    %595 = arith.addf %592, %594 : vector<3x6xf32>
    %cst_436 = arith.constant 0.000000e+00 : f32
    %596 = vector.broadcast %cst_436 : f32 to vector<3x6xf32>
    %597 = arith.maximumf %595, %596 : vector<3x6xf32>
    %c0_437 = arith.constant 0 : index
    %c0_438 = arith.constant 0 : index
    %598 = vector.load %arg20[%c0_437, %c0_438] : memref<6x4xf32, #tpu.memory_space<vmem>>, vector<6x4xf32>
    %cst_439 = arith.constant dense<0.000000e+00> : vector<3x4xf32>
    %599 = tpu.matmul %597, %598, %cst_439 {dimension_numbers = #tpu.dot_dimension_numbers<[1], [0], [0], [1], [0, 0, 1, 1], [], []>} : vector<3x6xf32>, vector<6x4xf32>, vector<3x4xf32> -> vector<3x4xf32>
    %c0_440 = arith.constant 0 : index
    %c0_441 = arith.constant 0 : index
    %c0_442 = arith.constant 0 : index
    %600 = vector.load %arg32[%c0_440, %c0_441, %c0_442] : memref<1x3x4xf32, #tpu.memory_space<vmem>>, vector<1x3x4xf32>
    %601 = vector.shape_cast %600 : vector<1x3x4xf32> to vector<3x4xf32>
    %602 = vector.shape_cast %599 : vector<3x4xf32> to vector<1x3x4xf32>
    tpu.vector_store %arg32[%c0_440, %c0_441, %c0_442], %602 {strides = array<i32>} : memref<1x3x4xf32, #tpu.memory_space<vmem>>, vector<1x3x4xf32>,
    %c0_443 = arith.constant 0 : index
    %c0_444 = arith.constant 0 : index
    %603 = vector.load %arg21[%c0_443, %c0_444] : memref<16x49xf32, #tpu.memory_space<vmem>>, vector<16x49xf32>
    %cst_445 = arith.constant dense<0.000000e+00> : vector<8x49xf32>
    %604 = tpu.matmul %546, %603, %cst_445 {dimension_numbers = #tpu.dot_dimension_numbers<[1], [0], [0], [1], [0, 0, 1, 1], [], []>} : vector<8x16xf32>, vector<16x49xf32>, vector<8x49xf32> -> vector<8x49xf32>
    %cst_446 = arith.constant 0.000000e+00 : f32
    %605 = vector.broadcast %cst_446 : f32 to vector<4x25xf32>
    %c0_447 = arith.constant 0 : index
    %c0_448 = arith.constant 0 : index
    %c0_449 = arith.constant 0 : index
    %606 = vector.load %arg22[%c0_447, %c0_448, %c0_449] : memref<16x4x8xf32, #tpu.memory_space<vmem>>, vector<1x4x8xf32>
    %607 = vector.shape_cast %606 : vector<1x4x8xf32> to vector<4x8xf32>
    %608 = vector.extract_strided_slice %604 {offsets = [0, 0], sizes = [8, 25], strides = [1, 1]} : vector<8x49xf32> to vector<8x25xf32>
    %cst_450 = arith.constant dense<0.000000e+00> : vector<4x25xf32>
    %609 = tpu.matmul %607, %608, %cst_450 {dimension_numbers = #tpu.dot_dimension_numbers<[1], [0], [0], [1], [0, 0, 1, 1], [], []>} : vector<4x8xf32>, vector<8x25xf32>, vector<4x25xf32> -> vector<4x25xf32>
    %610 = arith.addf %605, %609 : vector<4x25xf32>
    %c1_451 = arith.constant 1 : index
    %c0_452 = arith.constant 0 : index
    %c0_453 = arith.constant 0 : index
    %611 = vector.load %arg22[%c1_451, %c0_452, %c0_453] : memref<16x4x8xf32, #tpu.memory_space<vmem>>, vector<1x4x8xf32>
    %612 = vector.shape_cast %611 : vector<1x4x8xf32> to vector<4x8xf32>
    %613 = vector.extract_strided_slice %604 {offsets = [0, 1], sizes = [8, 25], strides = [1, 1]} : vector<8x49xf32> to vector<8x25xf32>
    %cst_454 = arith.constant dense<0.000000e+00> : vector<4x25xf32>
    %614 = tpu.matmul %612, %613, %cst_454 {dimension_numbers = #tpu.dot_dimension_numbers<[1], [0], [0], [1], [0, 0, 1, 1], [], []>} : vector<4x8xf32>, vector<8x25xf32>, vector<4x25xf32> -> vector<4x25xf32>
    %615 = arith.addf %610, %614 : vector<4x25xf32>
    %c2_455 = arith.constant 2 : index
    %c0_456 = arith.constant 0 : index
    %c0_457 = arith.constant 0 : index
    %616 = vector.load %arg22[%c2_455, %c0_456, %c0_457] : memref<16x4x8xf32, #tpu.memory_space<vmem>>, vector<1x4x8xf32>
    %617 = vector.shape_cast %616 : vector<1x4x8xf32> to vector<4x8xf32>
    %618 = vector.extract_strided_slice %604 {offsets = [0, 2], sizes = [8, 25], strides = [1, 1]} : vector<8x49xf32> to vector<8x25xf32>
    %cst_458 = arith.constant dense<0.000000e+00> : vector<4x25xf32>
    %619 = tpu.matmul %617, %618, %cst_458 {dimension_numbers = #tpu.dot_dimension_numbers<[1], [0], [0], [1], [0, 0, 1, 1], [], []>} : vector<4x8xf32>, vector<8x25xf32>, vector<4x25xf32> -> vector<4x25xf32>
    %620 = arith.addf %615, %619 : vector<4x25xf32>
    %c3_459 = arith.constant 3 : index
    %c0_460 = arith.constant 0 : index
    %c0_461 = arith.constant 0 : index
    %621 = vector.load %arg22[%c3_459, %c0_460, %c0_461] : memref<16x4x8xf32, #tpu.memory_space<vmem>>, vector<1x4x8xf32>
    %622 = vector.shape_cast %621 : vector<1x4x8xf32> to vector<4x8xf32>
    %623 = vector.extract_strided_slice %604 {offsets = [0, 3], sizes = [8, 25], strides = [1, 1]} : vector<8x49xf32> to vector<8x25xf32>
    %cst_462 = arith.constant dense<0.000000e+00> : vector<4x25xf32>
    %624 = tpu.matmul %622, %623, %cst_462 {dimension_numbers = #tpu.dot_dimension_numbers<[1], [0], [0], [1], [0, 0, 1, 1], [], []>} : vector<4x8xf32>, vector<8x25xf32>, vector<4x25xf32> -> vector<4x25xf32>
    %625 = arith.addf %620, %624 : vector<4x25xf32>
    %c4_463 = arith.constant 4 : index
    %c0_464 = arith.constant 0 : index
    %c0_465 = arith.constant 0 : index
    %626 = vector.load %arg22[%c4_463, %c0_464, %c0_465] : memref<16x4x8xf32, #tpu.memory_space<vmem>>, vector<1x4x8xf32>
    %627 = vector.shape_cast %626 : vector<1x4x8xf32> to vector<4x8xf32>
    %628 = vector.extract_strided_slice %604 {offsets = [0, 7], sizes = [8, 25], strides = [1, 1]} : vector<8x49xf32> to vector<8x25xf32>
    %cst_466 = arith.constant dense<0.000000e+00> : vector<4x25xf32>
    %629 = tpu.matmul %627, %628, %cst_466 {dimension_numbers = #tpu.dot_dimension_numbers<[1], [0], [0], [1], [0, 0, 1, 1], [], []>} : vector<4x8xf32>, vector<8x25xf32>, vector<4x25xf32> -> vector<4x25xf32>
    %630 = arith.addf %625, %629 : vector<4x25xf32>
    %c5_467 = arith.constant 5 : index
    %c0_468 = arith.constant 0 : index
    %c0_469 = arith.constant 0 : index
    %631 = vector.load %arg22[%c5_467, %c0_468, %c0_469] : memref<16x4x8xf32, #tpu.memory_space<vmem>>, vector<1x4x8xf32>
    %632 = vector.shape_cast %631 : vector<1x4x8xf32> to vector<4x8xf32>
    %633 = vector.extract_strided_slice %604 {offsets = [0, 8], sizes = [8, 25], strides = [1, 1]} : vector<8x49xf32> to vector<8x25xf32>
    %cst_470 = arith.constant dense<0.000000e+00> : vector<4x25xf32>
    %634 = tpu.matmul %632, %633, %cst_470 {dimension_numbers = #tpu.dot_dimension_numbers<[1], [0], [0], [1], [0, 0, 1, 1], [], []>} : vector<4x8xf32>, vector<8x25xf32>, vector<4x25xf32> -> vector<4x25xf32>
    %635 = arith.addf %630, %634 : vector<4x25xf32>
    %c6_471 = arith.constant 6 : index
    %c0_472 = arith.constant 0 : index
    %c0_473 = arith.constant 0 : index
    %636 = vector.load %arg22[%c6_471, %c0_472, %c0_473] : memref<16x4x8xf32, #tpu.memory_space<vmem>>, vector<1x4x8xf32>
    %637 = vector.shape_cast %636 : vector<1x4x8xf32> to vector<4x8xf32>
    %638 = vector.extract_strided_slice %604 {offsets = [0, 9], sizes = [8, 25], strides = [1, 1]} : vector<8x49xf32> to vector<8x25xf32>
    %cst_474 = arith.constant dense<0.000000e+00> : vector<4x25xf32>
    %639 = tpu.matmul %637, %638, %cst_474 {dimension_numbers = #tpu.dot_dimension_numbers<[1], [0], [0], [1], [0, 0, 1, 1], [], []>} : vector<4x8xf32>, vector<8x25xf32>, vector<4x25xf32> -> vector<4x25xf32>
    %640 = arith.addf %635, %639 : vector<4x25xf32>
    %c7_475 = arith.constant 7 : index
    %c0_476 = arith.constant 0 : index
    %c0_477 = arith.constant 0 : index
    %641 = vector.load %arg22[%c7_475, %c0_476, %c0_477] : memref<16x4x8xf32, #tpu.memory_space<vmem>>, vector<1x4x8xf32>
    %642 = vector.shape_cast %641 : vector<1x4x8xf32> to vector<4x8xf32>
    %643 = vector.extract_strided_slice %604 {offsets = [0, 10], sizes = [8, 25], strides = [1, 1]} : vector<8x49xf32> to vector<8x25xf32>
    %cst_478 = arith.constant dense<0.000000e+00> : vector<4x25xf32>
    %644 = tpu.matmul %642, %643, %cst_478 {dimension_numbers = #tpu.dot_dimension_numbers<[1], [0], [0], [1], [0, 0, 1, 1], [], []>} : vector<4x8xf32>, vector<8x25xf32>, vector<4x25xf32> -> vector<4x25xf32>
    %645 = arith.addf %640, %644 : vector<4x25xf32>
    %c8_479 = arith.constant 8 : index
    %c0_480 = arith.constant 0 : index
    %c0_481 = arith.constant 0 : index
    %646 = vector.load %arg22[%c8_479, %c0_480, %c0_481] : memref<16x4x8xf32, #tpu.memory_space<vmem>>, vector<1x4x8xf32>
    %647 = vector.shape_cast %646 : vector<1x4x8xf32> to vector<4x8xf32>
    %648 = vector.extract_strided_slice %604 {offsets = [0, 14], sizes = [8, 25], strides = [1, 1]} : vector<8x49xf32> to vector<8x25xf32>
    %cst_482 = arith.constant dense<0.000000e+00> : vector<4x25xf32>
    %649 = tpu.matmul %647, %648, %cst_482 {dimension_numbers = #tpu.dot_dimension_numbers<[1], [0], [0], [1], [0, 0, 1, 1], [], []>} : vector<4x8xf32>, vector<8x25xf32>, vector<4x25xf32> -> vector<4x25xf32>
    %650 = arith.addf %645, %649 : vector<4x25xf32>
    %c9_483 = arith.constant 9 : index
    %c0_484 = arith.constant 0 : index
    %c0_485 = arith.constant 0 : index
    %651 = vector.load %arg22[%c9_483, %c0_484, %c0_485] : memref<16x4x8xf32, #tpu.memory_space<vmem>>, vector<1x4x8xf32>
    %652 = vector.shape_cast %651 : vector<1x4x8xf32> to vector<4x8xf32>
    %653 = vector.extract_strided_slice %604 {offsets = [0, 15], sizes = [8, 25], strides = [1, 1]} : vector<8x49xf32> to vector<8x25xf32>
    %cst_486 = arith.constant dense<0.000000e+00> : vector<4x25xf32>
    %654 = tpu.matmul %652, %653, %cst_486 {dimension_numbers = #tpu.dot_dimension_numbers<[1], [0], [0], [1], [0, 0, 1, 1], [], []>} : vector<4x8xf32>, vector<8x25xf32>, vector<4x25xf32> -> vector<4x25xf32>
    %655 = arith.addf %650, %654 : vector<4x25xf32>
    %c10_487 = arith.constant 10 : index
    %c0_488 = arith.constant 0 : index
    %c0_489 = arith.constant 0 : index
    %656 = vector.load %arg22[%c10_487, %c0_488, %c0_489] : memref<16x4x8xf32, #tpu.memory_space<vmem>>, vector<1x4x8xf32>
    %657 = vector.shape_cast %656 : vector<1x4x8xf32> to vector<4x8xf32>
    %658 = vector.extract_strided_slice %604 {offsets = [0, 16], sizes = [8, 25], strides = [1, 1]} : vector<8x49xf32> to vector<8x25xf32>
    %cst_490 = arith.constant dense<0.000000e+00> : vector<4x25xf32>
    %659 = tpu.matmul %657, %658, %cst_490 {dimension_numbers = #tpu.dot_dimension_numbers<[1], [0], [0], [1], [0, 0, 1, 1], [], []>} : vector<4x8xf32>, vector<8x25xf32>, vector<4x25xf32> -> vector<4x25xf32>
    %660 = arith.addf %655, %659 : vector<4x25xf32>
    %c11_491 = arith.constant 11 : index
    %c0_492 = arith.constant 0 : index
    %c0_493 = arith.constant 0 : index
    %661 = vector.load %arg22[%c11_491, %c0_492, %c0_493] : memref<16x4x8xf32, #tpu.memory_space<vmem>>, vector<1x4x8xf32>
    %662 = vector.shape_cast %661 : vector<1x4x8xf32> to vector<4x8xf32>
    %663 = vector.extract_strided_slice %604 {offsets = [0, 17], sizes = [8, 25], strides = [1, 1]} : vector<8x49xf32> to vector<8x25xf32>
    %cst_494 = arith.constant dense<0.000000e+00> : vector<4x25xf32>
    %664 = tpu.matmul %662, %663, %cst_494 {dimension_numbers = #tpu.dot_dimension_numbers<[1], [0], [0], [1], [0, 0, 1, 1], [], []>} : vector<4x8xf32>, vector<8x25xf32>, vector<4x25xf32> -> vector<4x25xf32>
    %665 = arith.addf %660, %664 : vector<4x25xf32>
    %c12_495 = arith.constant 12 : index
    %c0_496 = arith.constant 0 : index
    %c0_497 = arith.constant 0 : index
    %666 = vector.load %arg22[%c12_495, %c0_496, %c0_497] : memref<16x4x8xf32, #tpu.memory_space<vmem>>, vector<1x4x8xf32>
    %667 = vector.shape_cast %666 : vector<1x4x8xf32> to vector<4x8xf32>
    %668 = vector.extract_strided_slice %604 {offsets = [0, 21], sizes = [8, 25], strides = [1, 1]} : vector<8x49xf32> to vector<8x25xf32>
    %cst_498 = arith.constant dense<0.000000e+00> : vector<4x25xf32>
    %669 = tpu.matmul %667, %668, %cst_498 {dimension_numbers = #tpu.dot_dimension_numbers<[1], [0], [0], [1], [0, 0, 1, 1], [], []>} : vector<4x8xf32>, vector<8x25xf32>, vector<4x25xf32> -> vector<4x25xf32>
    %670 = arith.addf %665, %669 : vector<4x25xf32>
    %c13_499 = arith.constant 13 : index
    %c0_500 = arith.constant 0 : index
    %c0_501 = arith.constant 0 : index
    %671 = vector.load %arg22[%c13_499, %c0_500, %c0_501] : memref<16x4x8xf32, #tpu.memory_space<vmem>>, vector<1x4x8xf32>
    %672 = vector.shape_cast %671 : vector<1x4x8xf32> to vector<4x8xf32>
    %673 = vector.extract_strided_slice %604 {offsets = [0, 22], sizes = [8, 25], strides = [1, 1]} : vector<8x49xf32> to vector<8x25xf32>
    %cst_502 = arith.constant dense<0.000000e+00> : vector<4x25xf32>
    %674 = tpu.matmul %672, %673, %cst_502 {dimension_numbers = #tpu.dot_dimension_numbers<[1], [0], [0], [1], [0, 0, 1, 1], [], []>} : vector<4x8xf32>, vector<8x25xf32>, vector<4x25xf32> -> vector<4x25xf32>
    %675 = arith.addf %670, %674 : vector<4x25xf32>
    %c14_503 = arith.constant 14 : index
    %c0_504 = arith.constant 0 : index
    %c0_505 = arith.constant 0 : index
    %676 = vector.load %arg22[%c14_503, %c0_504, %c0_505] : memref<16x4x8xf32, #tpu.memory_space<vmem>>, vector<1x4x8xf32>
    %677 = vector.shape_cast %676 : vector<1x4x8xf32> to vector<4x8xf32>
    %678 = vector.extract_strided_slice %604 {offsets = [0, 23], sizes = [8, 25], strides = [1, 1]} : vector<8x49xf32> to vector<8x25xf32>
    %cst_506 = arith.constant dense<0.000000e+00> : vector<4x25xf32>
    %679 = tpu.matmul %677, %678, %cst_506 {dimension_numbers = #tpu.dot_dimension_numbers<[1], [0], [0], [1], [0, 0, 1, 1], [], []>} : vector<4x8xf32>, vector<8x25xf32>, vector<4x25xf32> -> vector<4x25xf32>
    %680 = arith.addf %675, %679 : vector<4x25xf32>
    %c15_507 = arith.constant 15 : index
    %c0_508 = arith.constant 0 : index
    %c0_509 = arith.constant 0 : index
    %681 = vector.load %arg22[%c15_507, %c0_508, %c0_509] : memref<16x4x8xf32, #tpu.memory_space<vmem>>, vector<1x4x8xf32>
    %682 = vector.shape_cast %681 : vector<1x4x8xf32> to vector<4x8xf32>
    %683 = vector.extract_strided_slice %604 {offsets = [0, 24], sizes = [8, 25], strides = [1, 1]} : vector<8x49xf32> to vector<8x25xf32>
    %cst_510 = arith.constant dense<0.000000e+00> : vector<4x25xf32>
    %684 = tpu.matmul %682, %683, %cst_510 {dimension_numbers = #tpu.dot_dimension_numbers<[1], [0], [0], [1], [0, 0, 1, 1], [], []>} : vector<4x8xf32>, vector<8x25xf32>, vector<4x25xf32> -> vector<4x25xf32>
    %685 = arith.addf %680, %684 : vector<4x25xf32>
    %c0_511 = arith.constant 0 : index
    %c0_512 = arith.constant 0 : index
    %686 = vector.load %arg23[%c0_511, %c0_512] : memref<25x50xf32, #tpu.memory_space<vmem>>, vector<25x50xf32>
    %cst_513 = arith.constant dense<0.000000e+00> : vector<4x50xf32>
    %687 = tpu.matmul %685, %686, %cst_513 {dimension_numbers = #tpu.dot_dimension_numbers<[1], [0], [0], [1], [0, 0, 1, 1], [], []>} : vector<4x25xf32>, vector<25x50xf32>, vector<4x50xf32> -> vector<4x50xf32>
    %c0_514 = arith.constant 0 : index
    %c0_515 = arith.constant 0 : index
    %688 = vector.load %arg24[%c0_514, %c0_515] : memref<4x50xf32, #tpu.memory_space<vmem>>, vector<4x50xf32>
    %689 = arith.addf %687, %688 : vector<4x50xf32>
    %cst_516 = arith.constant 0.000000e+00 : f32
    %690 = vector.broadcast %cst_516 : f32 to vector<4x36xf32>
    %c0_517 = arith.constant 0 : index
    %c0_518 = arith.constant 0 : index
    %c0_519 = arith.constant 0 : index
    %691 = vector.load %arg25[%c0_517, %c0_518, %c0_519] : memref<9x4x4xf32, #tpu.memory_space<vmem>>, vector<1x4x4xf32>
    %692 = vector.shape_cast %691 : vector<1x4x4xf32> to vector<4x4xf32>
    %693 = vector.extract_strided_slice %689 {offsets = [0, 0], sizes = [4, 36], strides = [1, 1]} : vector<4x50xf32> to vector<4x36xf32>
    %cst_520 = arith.constant dense<0.000000e+00> : vector<4x36xf32>
    %694 = tpu.matmul %692, %693, %cst_520 {dimension_numbers = #tpu.dot_dimension_numbers<[1], [0], [0], [1], [0, 0, 1, 1], [], []>} : vector<4x4xf32>, vector<4x36xf32>, vector<4x36xf32> -> vector<4x36xf32>
    %695 = arith.addf %690, %694 : vector<4x36xf32>
    %c1_521 = arith.constant 1 : index
    %c0_522 = arith.constant 0 : index
    %c0_523 = arith.constant 0 : index
    %696 = vector.load %arg25[%c1_521, %c0_522, %c0_523] : memref<9x4x4xf32, #tpu.memory_space<vmem>>, vector<1x4x4xf32>
    %697 = vector.shape_cast %696 : vector<1x4x4xf32> to vector<4x4xf32>
    %698 = vector.extract_strided_slice %689 {offsets = [0, 1], sizes = [4, 36], strides = [1, 1]} : vector<4x50xf32> to vector<4x36xf32>
    %cst_524 = arith.constant dense<0.000000e+00> : vector<4x36xf32>
    %699 = tpu.matmul %697, %698, %cst_524 {dimension_numbers = #tpu.dot_dimension_numbers<[1], [0], [0], [1], [0, 0, 1, 1], [], []>} : vector<4x4xf32>, vector<4x36xf32>, vector<4x36xf32> -> vector<4x36xf32>
    %700 = arith.addf %695, %699 : vector<4x36xf32>
    %c2_525 = arith.constant 2 : index
    %c0_526 = arith.constant 0 : index
    %c0_527 = arith.constant 0 : index
    %701 = vector.load %arg25[%c2_525, %c0_526, %c0_527] : memref<9x4x4xf32, #tpu.memory_space<vmem>>, vector<1x4x4xf32>
    %702 = vector.shape_cast %701 : vector<1x4x4xf32> to vector<4x4xf32>
    %703 = vector.extract_strided_slice %689 {offsets = [0, 2], sizes = [4, 36], strides = [1, 1]} : vector<4x50xf32> to vector<4x36xf32>
    %cst_528 = arith.constant dense<0.000000e+00> : vector<4x36xf32>
    %704 = tpu.matmul %702, %703, %cst_528 {dimension_numbers = #tpu.dot_dimension_numbers<[1], [0], [0], [1], [0, 0, 1, 1], [], []>} : vector<4x4xf32>, vector<4x36xf32>, vector<4x36xf32> -> vector<4x36xf32>
    %705 = arith.addf %700, %704 : vector<4x36xf32>
    %c3_529 = arith.constant 3 : index
    %c0_530 = arith.constant 0 : index
    %c0_531 = arith.constant 0 : index
    %706 = vector.load %arg25[%c3_529, %c0_530, %c0_531] : memref<9x4x4xf32, #tpu.memory_space<vmem>>, vector<1x4x4xf32>
    %707 = vector.shape_cast %706 : vector<1x4x4xf32> to vector<4x4xf32>
    %708 = vector.extract_strided_slice %689 {offsets = [0, 6], sizes = [4, 36], strides = [1, 1]} : vector<4x50xf32> to vector<4x36xf32>
    %cst_532 = arith.constant dense<0.000000e+00> : vector<4x36xf32>
    %709 = tpu.matmul %707, %708, %cst_532 {dimension_numbers = #tpu.dot_dimension_numbers<[1], [0], [0], [1], [0, 0, 1, 1], [], []>} : vector<4x4xf32>, vector<4x36xf32>, vector<4x36xf32> -> vector<4x36xf32>
    %710 = arith.addf %705, %709 : vector<4x36xf32>
    %c4_533 = arith.constant 4 : index
    %c0_534 = arith.constant 0 : index
    %c0_535 = arith.constant 0 : index
    %711 = vector.load %arg25[%c4_533, %c0_534, %c0_535] : memref<9x4x4xf32, #tpu.memory_space<vmem>>, vector<1x4x4xf32>
    %712 = vector.shape_cast %711 : vector<1x4x4xf32> to vector<4x4xf32>
    %713 = vector.extract_strided_slice %689 {offsets = [0, 7], sizes = [4, 36], strides = [1, 1]} : vector<4x50xf32> to vector<4x36xf32>
    %cst_536 = arith.constant dense<0.000000e+00> : vector<4x36xf32>
    %714 = tpu.matmul %712, %713, %cst_536 {dimension_numbers = #tpu.dot_dimension_numbers<[1], [0], [0], [1], [0, 0, 1, 1], [], []>} : vector<4x4xf32>, vector<4x36xf32>, vector<4x36xf32> -> vector<4x36xf32>
    %715 = arith.addf %710, %714 : vector<4x36xf32>
    %c5_537 = arith.constant 5 : index
    %c0_538 = arith.constant 0 : index
    %c0_539 = arith.constant 0 : index
    %716 = vector.load %arg25[%c5_537, %c0_538, %c0_539] : memref<9x4x4xf32, #tpu.memory_space<vmem>>, vector<1x4x4xf32>
    %717 = vector.shape_cast %716 : vector<1x4x4xf32> to vector<4x4xf32>
    %718 = vector.extract_strided_slice %689 {offsets = [0, 8], sizes = [4, 36], strides = [1, 1]} : vector<4x50xf32> to vector<4x36xf32>
    %cst_540 = arith.constant dense<0.000000e+00> : vector<4x36xf32>
    %719 = tpu.matmul %717, %718, %cst_540 {dimension_numbers = #tpu.dot_dimension_numbers<[1], [0], [0], [1], [0, 0, 1, 1], [], []>} : vector<4x4xf32>, vector<4x36xf32>, vector<4x36xf32> -> vector<4x36xf32>
    %720 = arith.addf %715, %719 : vector<4x36xf32>
    %c6_541 = arith.constant 6 : index
    %c0_542 = arith.constant 0 : index
    %c0_543 = arith.constant 0 : index
    %721 = vector.load %arg25[%c6_541, %c0_542, %c0_543] : memref<9x4x4xf32, #tpu.memory_space<vmem>>, vector<1x4x4xf32>
    %722 = vector.shape_cast %721 : vector<1x4x4xf32> to vector<4x4xf32>
    %723 = vector.extract_strided_slice %689 {offsets = [0, 12], sizes = [4, 36], strides = [1, 1]} : vector<4x50xf32> to vector<4x36xf32>
    %cst_544 = arith.constant dense<0.000000e+00> : vector<4x36xf32>
    %724 = tpu.matmul %722, %723, %cst_544 {dimension_numbers = #tpu.dot_dimension_numbers<[1], [0], [0], [1], [0, 0, 1, 1], [], []>} : vector<4x4xf32>, vector<4x36xf32>, vector<4x36xf32> -> vector<4x36xf32>
    %725 = arith.addf %720, %724 : vector<4x36xf32>
    %c7_545 = arith.constant 7 : index
    %c0_546 = arith.constant 0 : index
    %c0_547 = arith.constant 0 : index
    %726 = vector.load %arg25[%c7_545, %c0_546, %c0_547] : memref<9x4x4xf32, #tpu.memory_space<vmem>>, vector<1x4x4xf32>
    %727 = vector.shape_cast %726 : vector<1x4x4xf32> to vector<4x4xf32>
    %728 = vector.extract_strided_slice %689 {offsets = [0, 13], sizes = [4, 36], strides = [1, 1]} : vector<4x50xf32> to vector<4x36xf32>
    %cst_548 = arith.constant dense<0.000000e+00> : vector<4x36xf32>
    %729 = tpu.matmul %727, %728, %cst_548 {dimension_numbers = #tpu.dot_dimension_numbers<[1], [0], [0], [1], [0, 0, 1, 1], [], []>} : vector<4x4xf32>, vector<4x36xf32>, vector<4x36xf32> -> vector<4x36xf32>
    %730 = arith.addf %725, %729 : vector<4x36xf32>
    %c8_549 = arith.constant 8 : index
    %c0_550 = arith.constant 0 : index
    %c0_551 = arith.constant 0 : index
    %731 = vector.load %arg25[%c8_549, %c0_550, %c0_551] : memref<9x4x4xf32, #tpu.memory_space<vmem>>, vector<1x4x4xf32>
    %732 = vector.shape_cast %731 : vector<1x4x4xf32> to vector<4x4xf32>
    %733 = vector.extract_strided_slice %689 {offsets = [0, 14], sizes = [4, 36], strides = [1, 1]} : vector<4x50xf32> to vector<4x36xf32>
    %cst_552 = arith.constant dense<0.000000e+00> : vector<4x36xf32>
    %734 = tpu.matmul %732, %733, %cst_552 {dimension_numbers = #tpu.dot_dimension_numbers<[1], [0], [0], [1], [0, 0, 1, 1], [], []>} : vector<4x4xf32>, vector<4x36xf32>, vector<4x36xf32> -> vector<4x36xf32>
    %735 = arith.addf %730, %734 : vector<4x36xf32>
    %c0_553 = arith.constant 0 : index
    %c0_554 = arith.constant 0 : index
    %736 = vector.load %arg27[%c0_553, %c0_554] : memref<1x36xf32, #tpu.memory_space<vmem>>, vector<1x36xf32>
    %c0_555 = arith.constant 0 : index
    %c0_556 = arith.constant 0 : index
    %737 = vector.load %arg26[%c0_555, %c0_556] : memref<4x1xf32, #tpu.memory_space<vmem>>, vector<4x1xf32>
    %738 = vector.broadcast %737 : vector<4x1xf32> to vector<4x36xf32>
    %739 = arith.addf %735, %738 : vector<4x36xf32>
    %cst_557 = arith.constant 0.000000e+00 : f32
    %740 = vector.broadcast %cst_557 : f32 to vector<4x36xf32>
    %741 = arith.maximumf %739, %740 : vector<4x36xf32>
    %742 = vector.broadcast %736 : vector<1x36xf32> to vector<4x36xf32>
    %743 = arith.mulf %742, %741 : vector<4x36xf32>
    %cst_558 = arith.constant 0.000000e+00 : f32
    %744 = vector.broadcast %cst_558 : f32 to vector<1x22xf32>
    %c0_559 = arith.constant 0 : index
    %c0_560 = arith.constant 0 : index
    %c0_561 = arith.constant 0 : index
    %745 = vector.load %arg28[%c0_559, %c0_560, %c0_561] : memref<9x1x4xf32, #tpu.memory_space<vmem>>, vector<1x1x4xf32>
    %746 = vector.shape_cast %745 : vector<1x1x4xf32> to vector<1x4xf32>
    %747 = vector.extract_strided_slice %743 {offsets = [0, 0], sizes = [4, 22], strides = [1, 1]} : vector<4x36xf32> to vector<4x22xf32>
    %cst_562 = arith.constant dense<0.000000e+00> : vector<1x22xf32>
    %748 = tpu.matmul %746, %747, %cst_562 {dimension_numbers = #tpu.dot_dimension_numbers<[1], [0], [0], [1], [0, 0, 1, 1], [], []>} : vector<1x4xf32>, vector<4x22xf32>, vector<1x22xf32> -> vector<1x22xf32>
    %749 = arith.addf %744, %748 : vector<1x22xf32>
    %c1_563 = arith.constant 1 : index
    %c0_564 = arith.constant 0 : index
    %c0_565 = arith.constant 0 : index
    %750 = vector.load %arg28[%c1_563, %c0_564, %c0_565] : memref<9x1x4xf32, #tpu.memory_space<vmem>>, vector<1x1x4xf32>
    %751 = vector.shape_cast %750 : vector<1x1x4xf32> to vector<1x4xf32>
    %752 = vector.extract_strided_slice %743 {offsets = [0, 1], sizes = [4, 22], strides = [1, 1]} : vector<4x36xf32> to vector<4x22xf32>
    %cst_566 = arith.constant dense<0.000000e+00> : vector<1x22xf32>
    %753 = tpu.matmul %751, %752, %cst_566 {dimension_numbers = #tpu.dot_dimension_numbers<[1], [0], [0], [1], [0, 0, 1, 1], [], []>} : vector<1x4xf32>, vector<4x22xf32>, vector<1x22xf32> -> vector<1x22xf32>
    %754 = arith.addf %749, %753 : vector<1x22xf32>
    %c2_567 = arith.constant 2 : index
    %c0_568 = arith.constant 0 : index
    %c0_569 = arith.constant 0 : index
    %755 = vector.load %arg28[%c2_567, %c0_568, %c0_569] : memref<9x1x4xf32, #tpu.memory_space<vmem>>, vector<1x1x4xf32>
    %756 = vector.shape_cast %755 : vector<1x1x4xf32> to vector<1x4xf32>
    %757 = vector.extract_strided_slice %743 {offsets = [0, 2], sizes = [4, 22], strides = [1, 1]} : vector<4x36xf32> to vector<4x22xf32>
    %cst_570 = arith.constant dense<0.000000e+00> : vector<1x22xf32>
    %758 = tpu.matmul %756, %757, %cst_570 {dimension_numbers = #tpu.dot_dimension_numbers<[1], [0], [0], [1], [0, 0, 1, 1], [], []>} : vector<1x4xf32>, vector<4x22xf32>, vector<1x22xf32> -> vector<1x22xf32>
    %759 = arith.addf %754, %758 : vector<1x22xf32>
    %c3_571 = arith.constant 3 : index
    %c0_572 = arith.constant 0 : index
    %c0_573 = arith.constant 0 : index
    %760 = vector.load %arg28[%c3_571, %c0_572, %c0_573] : memref<9x1x4xf32, #tpu.memory_space<vmem>>, vector<1x1x4xf32>
    %761 = vector.shape_cast %760 : vector<1x1x4xf32> to vector<1x4xf32>
    %762 = vector.extract_strided_slice %743 {offsets = [0, 6], sizes = [4, 22], strides = [1, 1]} : vector<4x36xf32> to vector<4x22xf32>
    %cst_574 = arith.constant dense<0.000000e+00> : vector<1x22xf32>
    %763 = tpu.matmul %761, %762, %cst_574 {dimension_numbers = #tpu.dot_dimension_numbers<[1], [0], [0], [1], [0, 0, 1, 1], [], []>} : vector<1x4xf32>, vector<4x22xf32>, vector<1x22xf32> -> vector<1x22xf32>
    %764 = arith.addf %759, %763 : vector<1x22xf32>
    %c4_575 = arith.constant 4 : index
    %c0_576 = arith.constant 0 : index
    %c0_577 = arith.constant 0 : index
    %765 = vector.load %arg28[%c4_575, %c0_576, %c0_577] : memref<9x1x4xf32, #tpu.memory_space<vmem>>, vector<1x1x4xf32>
    %766 = vector.shape_cast %765 : vector<1x1x4xf32> to vector<1x4xf32>
    %767 = vector.extract_strided_slice %743 {offsets = [0, 7], sizes = [4, 22], strides = [1, 1]} : vector<4x36xf32> to vector<4x22xf32>
    %cst_578 = arith.constant dense<0.000000e+00> : vector<1x22xf32>
    %768 = tpu.matmul %766, %767, %cst_578 {dimension_numbers = #tpu.dot_dimension_numbers<[1], [0], [0], [1], [0, 0, 1, 1], [], []>} : vector<1x4xf32>, vector<4x22xf32>, vector<1x22xf32> -> vector<1x22xf32>
    %769 = arith.addf %764, %768 : vector<1x22xf32>
    %c5_579 = arith.constant 5 : index
    %c0_580 = arith.constant 0 : index
    %c0_581 = arith.constant 0 : index
    %770 = vector.load %arg28[%c5_579, %c0_580, %c0_581] : memref<9x1x4xf32, #tpu.memory_space<vmem>>, vector<1x1x4xf32>
    %771 = vector.shape_cast %770 : vector<1x1x4xf32> to vector<1x4xf32>
    %772 = vector.extract_strided_slice %743 {offsets = [0, 8], sizes = [4, 22], strides = [1, 1]} : vector<4x36xf32> to vector<4x22xf32>
    %cst_582 = arith.constant dense<0.000000e+00> : vector<1x22xf32>
    %773 = tpu.matmul %771, %772, %cst_582 {dimension_numbers = #tpu.dot_dimension_numbers<[1], [0], [0], [1], [0, 0, 1, 1], [], []>} : vector<1x4xf32>, vector<4x22xf32>, vector<1x22xf32> -> vector<1x22xf32>
    %774 = arith.addf %769, %773 : vector<1x22xf32>
    %c6_583 = arith.constant 6 : index
    %c0_584 = arith.constant 0 : index
    %c0_585 = arith.constant 0 : index
    %775 = vector.load %arg28[%c6_583, %c0_584, %c0_585] : memref<9x1x4xf32, #tpu.memory_space<vmem>>, vector<1x1x4xf32>
    %776 = vector.shape_cast %775 : vector<1x1x4xf32> to vector<1x4xf32>
    %777 = vector.extract_strided_slice %743 {offsets = [0, 12], sizes = [4, 22], strides = [1, 1]} : vector<4x36xf32> to vector<4x22xf32>
    %cst_586 = arith.constant dense<0.000000e+00> : vector<1x22xf32>
    %778 = tpu.matmul %776, %777, %cst_586 {dimension_numbers = #tpu.dot_dimension_numbers<[1], [0], [0], [1], [0, 0, 1, 1], [], []>} : vector<1x4xf32>, vector<4x22xf32>, vector<1x22xf32> -> vector<1x22xf32>
    %779 = arith.addf %774, %778 : vector<1x22xf32>
    %c7_587 = arith.constant 7 : index
    %c0_588 = arith.constant 0 : index
    %c0_589 = arith.constant 0 : index
    %780 = vector.load %arg28[%c7_587, %c0_588, %c0_589] : memref<9x1x4xf32, #tpu.memory_space<vmem>>, vector<1x1x4xf32>
    %781 = vector.shape_cast %780 : vector<1x1x4xf32> to vector<1x4xf32>
    %782 = vector.extract_strided_slice %743 {offsets = [0, 13], sizes = [4, 22], strides = [1, 1]} : vector<4x36xf32> to vector<4x22xf32>
    %cst_590 = arith.constant dense<0.000000e+00> : vector<1x22xf32>
    %783 = tpu.matmul %781, %782, %cst_590 {dimension_numbers = #tpu.dot_dimension_numbers<[1], [0], [0], [1], [0, 0, 1, 1], [], []>} : vector<1x4xf32>, vector<4x22xf32>, vector<1x22xf32> -> vector<1x22xf32>
    %784 = arith.addf %779, %783 : vector<1x22xf32>
    %c8_591 = arith.constant 8 : index
    %c0_592 = arith.constant 0 : index
    %c0_593 = arith.constant 0 : index
    %785 = vector.load %arg28[%c8_591, %c0_592, %c0_593] : memref<9x1x4xf32, #tpu.memory_space<vmem>>, vector<1x1x4xf32>
    %786 = vector.shape_cast %785 : vector<1x1x4xf32> to vector<1x4xf32>
    %787 = vector.extract_strided_slice %743 {offsets = [0, 14], sizes = [4, 22], strides = [1, 1]} : vector<4x36xf32> to vector<4x22xf32>
    %cst_594 = arith.constant dense<0.000000e+00> : vector<1x22xf32>
    %788 = tpu.matmul %786, %787, %cst_594 {dimension_numbers = #tpu.dot_dimension_numbers<[1], [0], [0], [1], [0, 0, 1, 1], [], []>} : vector<1x4xf32>, vector<4x22xf32>, vector<1x22xf32> -> vector<1x22xf32>
    %789 = arith.addf %784, %788 : vector<1x22xf32>
    %c0_595 = arith.constant 0 : index
    %c0_596 = arith.constant 0 : index
    %790 = vector.load %arg29[%c0_595, %c0_596] : memref<1x1xf32, #tpu.memory_space<vmem>>, vector<1x1xf32>
    %791 = vector.broadcast %790 : vector<1x1xf32> to vector<1x22xf32>
    %792 = arith.addf %789, %791 : vector<1x22xf32>
    %cst_597 = arith.constant 0.000000e+00 : f32
    %793 = vector.broadcast %cst_597 : f32 to vector<1x22xf32>
    %794 = arith.maximumf %792, %793 : vector<1x22xf32>
    %c0_598 = arith.constant 0 : index
    %c0_599 = arith.constant 0 : index
    %795 = vector.load %arg30[%c0_598, %c0_599] : memref<22x16xf32, #tpu.memory_space<vmem>>, vector<22x16xf32>
    %cst_600 = arith.constant dense<0.000000e+00> : vector<1x16xf32>
    %796 = tpu.matmul %794, %795, %cst_600 {dimension_numbers = #tpu.dot_dimension_numbers<[1], [0], [0], [1], [0, 0, 1, 1], [], []>} : vector<1x22xf32>, vector<22x16xf32>, vector<1x16xf32> -> vector<1x16xf32>
    %c0_601 = arith.constant 0 : index
    %c0_602 = arith.constant 0 : index
    %c0_603 = arith.constant 0 : index
    %797 = vector.load %arg33[%c0_601, %c0_602, %c0_603] : memref<1x1x16xf32, #tpu.memory_space<vmem>>, vector<1x1x16xf32>
    %798 = vector.shape_cast %797 : vector<1x1x16xf32> to vector<1x16xf32>
    %799 = vector.shape_cast %796 : vector<1x16xf32> to vector<1x1x16xf32>
    tpu.vector_store %arg33[%c0_601, %c0_602, %c0_603], %799 {strides = array<i32>} : memref<1x1x16xf32, #tpu.memory_space<vmem>>, vector<1x1x16xf32>,
    return
  }
  func.func @transform_0(%arg0: i32) -> (i32, i32, i32) {
    %c0_i32 = arith.constant 0 : i32
    %c0_i32_0 = arith.constant 0 : i32
    %c0_i32_1 = arith.constant 0 : i32
    return %arg0, %c0_i32, %c0_i32_0 : i32, i32, i32
  }
  func.func @transform_1(%arg0: i32) -> (i32, i32, i32) {
    %c0_i32 = arith.constant 0 : i32
    %c0_i32_0 = arith.constant 0 : i32
    %c0_i32_1 = arith.constant 0 : i32
    %c0_i32_2 = arith.constant 0 : i32
    return %c0_i32, %c0_i32_0, %c0_i32_1 : i32, i32, i32
  }
  func.func @transform_2(%arg0: i32) -> (i32, i32) {
    %c0_i32 = arith.constant 0 : i32
    %c0_i32_0 = arith.constant 0 : i32
    %c0_i32_1 = arith.constant 0 : i32
    return %c0_i32, %c0_i32_0 : i32, i32
  }
  func.func @transform_3(%arg0: i32) -> (i32, i32) {
    %c0_i32 = arith.constant 0 : i32
    %c0_i32_0 = arith.constant 0 : i32
    %c0_i32_1 = arith.constant 0 : i32
    return %c0_i32, %c0_i32_0 : i32, i32
  }
  func.func @transform_4(%arg0: i32) -> (i32, i32, i32) {
    %c0_i32 = arith.constant 0 : i32
    %c0_i32_0 = arith.constant 0 : i32
    %c0_i32_1 = arith.constant 0 : i32
    %c0_i32_2 = arith.constant 0 : i32
    return %c0_i32, %c0_i32_0, %c0_i32_1 : i32, i32, i32
  }
  func.func @transform_5(%arg0: i32) -> (i32, i32) {
    %c0_i32 = arith.constant 0 : i32
    %c0_i32_0 = arith.constant 0 : i32
    %c0_i32_1 = arith.constant 0 : i32
    return %c0_i32, %c0_i32_0 : i32, i32
  }
  func.func @transform_6(%arg0: i32) -> (i32, i32) {
    %c0_i32 = arith.constant 0 : i32
    %c0_i32_0 = arith.constant 0 : i32
    %c0_i32_1 = arith.constant 0 : i32
    return %c0_i32, %c0_i32_0 : i32, i32
  }
  func.func @transform_7(%arg0: i32) -> (i32, i32, i32) {
    %c0_i32 = arith.constant 0 : i32
    %c0_i32_0 = arith.constant 0 : i32
    %c0_i32_1 = arith.constant 0 : i32
    %c0_i32_2 = arith.constant 0 : i32
    return %c0_i32, %c0_i32_0, %c0_i32_1 : i32, i32, i32
  }
  func.func @transform_8(%arg0: i32) -> (i32, i32) {
    %c0_i32 = arith.constant 0 : i32
    %c0_i32_0 = arith.constant 0 : i32
    %c0_i32_1 = arith.constant 0 : i32
    return %c0_i32, %c0_i32_0 : i32, i32
  }
  func.func @transform_9(%arg0: i32) -> (i32, i32) {
    %c0_i32 = arith.constant 0 : i32
    %c0_i32_0 = arith.constant 0 : i32
    %c0_i32_1 = arith.constant 0 : i32
    return %c0_i32, %c0_i32_0 : i32, i32
  }
  func.func @transform_10(%arg0: i32) -> (i32, i32) {
    %c0_i32 = arith.constant 0 : i32
    %c0_i32_0 = arith.constant 0 : i32
    %c0_i32_1 = arith.constant 0 : i32
    return %c0_i32, %c0_i32_0 : i32, i32
  }
  func.func @transform_11(%arg0: i32) -> (i32, i32) {
    %c0_i32 = arith.constant 0 : i32
    %c0_i32_0 = arith.constant 0 : i32
    %c0_i32_1 = arith.constant 0 : i32
    return %c0_i32, %c0_i32_0 : i32, i32
  }
  func.func @transform_12(%arg0: i32) -> (i32, i32, i32) {
    %c0_i32 = arith.constant 0 : i32
    %c0_i32_0 = arith.constant 0 : i32
    %c0_i32_1 = arith.constant 0 : i32
    %c0_i32_2 = arith.constant 0 : i32
    return %c0_i32, %c0_i32_0, %c0_i32_1 : i32, i32, i32
  }
  func.func @transform_13(%arg0: i32) -> (i32, i32) {
    %c0_i32 = arith.constant 0 : i32
    %c0_i32_0 = arith.constant 0 : i32
    %c0_i32_1 = arith.constant 0 : i32
    return %c0_i32, %c0_i32_0 : i32, i32
  }
  func.func @transform_14(%arg0: i32) -> (i32, i32, i32) {
    %c0_i32 = arith.constant 0 : i32
    %c0_i32_0 = arith.constant 0 : i32
    %c0_i32_1 = arith.constant 0 : i32
    %c0_i32_2 = arith.constant 0 : i32
    return %c0_i32, %c0_i32_0, %c0_i32_1 : i32, i32, i32
  }
  func.func @transform_15(%arg0: i32) -> (i32, i32) {
    %c0_i32 = arith.constant 0 : i32
    %c0_i32_0 = arith.constant 0 : i32
    %c0_i32_1 = arith.constant 0 : i32
    return %c0_i32, %c0_i32_0 : i32, i32
  }
  func.func @transform_16(%arg0: i32) -> (i32, i32) {
    %c0_i32 = arith.constant 0 : i32
    %c0_i32_0 = arith.constant 0 : i32
    %c0_i32_1 = arith.constant 0 : i32
    return %c0_i32, %c0_i32_0 : i32, i32
  }
  func.func @transform_17(%arg0: i32) -> (i32, i32, i32) {
    %c0_i32 = arith.constant 0 : i32
    %c0_i32_0 = arith.constant 0 : i32
    %c0_i32_1 = arith.constant 0 : i32
    %c0_i32_2 = arith.constant 0 : i32
    return %c0_i32, %c0_i32_0, %c0_i32_1 : i32, i32, i32
  }
  func.func @transform_18(%arg0: i32) -> (i32, i32) {
    %c0_i32 = arith.constant 0 : i32
    %c0_i32_0 = arith.constant 0 : i32
    %c0_i32_1 = arith.constant 0 : i32
    return %c0_i32, %c0_i32_0 : i32, i32
  }
  func.func @transform_19(%arg0: i32) -> (i32, i32) {
    %c0_i32 = arith.constant 0 : i32
    %c0_i32_0 = arith.constant 0 : i32
    %c0_i32_1 = arith.constant 0 : i32
    return %c0_i32, %c0_i32_0 : i32, i32
  }
  func.func @transform_20(%arg0: i32) -> (i32, i32) {
    %c0_i32 = arith.constant 0 : i32
    %c0_i32_0 = arith.constant 0 : i32
    %c0_i32_1 = arith.constant 0 : i32
    return %c0_i32, %c0_i32_0 : i32, i32
  }
  func.func @transform_21(%arg0: i32) -> (i32, i32, i32) {
    %c0_i32 = arith.constant 0 : i32
    %c0_i32_0 = arith.constant 0 : i32
    %c0_i32_1 = arith.constant 0 : i32
    %c0_i32_2 = arith.constant 0 : i32
    return %c0_i32, %c0_i32_0, %c0_i32_1 : i32, i32, i32
  }
  func.func @transform_22(%arg0: i32) -> (i32, i32) {
    %c0_i32 = arith.constant 0 : i32
    %c0_i32_0 = arith.constant 0 : i32
    %c0_i32_1 = arith.constant 0 : i32
    return %c0_i32, %c0_i32_0 : i32, i32
  }
  func.func @transform_23(%arg0: i32) -> (i32, i32) {
    %c0_i32 = arith.constant 0 : i32
    %c0_i32_0 = arith.constant 0 : i32
    %c0_i32_1 = arith.constant 0 : i32
    return %c0_i32, %c0_i32_0 : i32, i32
  }
  func.func @transform_24(%arg0: i32) -> (i32, i32, i32) {
    %c0_i32 = arith.constant 0 : i32
    %c0_i32_0 = arith.constant 0 : i32
    %c0_i32_1 = arith.constant 0 : i32
    %c0_i32_2 = arith.constant 0 : i32
    return %c0_i32, %c0_i32_0, %c0_i32_1 : i32, i32, i32
  }
  func.func @transform_25(%arg0: i32) -> (i32, i32) {
    %c0_i32 = arith.constant 0 : i32
    %c0_i32_0 = arith.constant 0 : i32
    %c0_i32_1 = arith.constant 0 : i32
    return %c0_i32, %c0_i32_0 : i32, i32
  }
  func.func @transform_26(%arg0: i32) -> (i32, i32) {
    %c0_i32 = arith.constant 0 : i32
    %c0_i32_0 = arith.constant 0 : i32
    %c0_i32_1 = arith.constant 0 : i32
    return %c0_i32, %c0_i32_0 : i32, i32
  }
  func.func @transform_27(%arg0: i32) -> (i32, i32, i32) {
    %c0_i32 = arith.constant 0 : i32
    %c0_i32_0 = arith.constant 0 : i32
    %c0_i32_1 = arith.constant 0 : i32
    %c0_i32_2 = arith.constant 0 : i32
    return %c0_i32, %c0_i32_0, %c0_i32_1 : i32, i32, i32
  }
  func.func @transform_28(%arg0: i32) -> (i32, i32) {
    %c0_i32 = arith.constant 0 : i32
    %c0_i32_0 = arith.constant 0 : i32
    %c0_i32_1 = arith.constant 0 : i32
    return %c0_i32, %c0_i32_0 : i32, i32
  }
  func.func @transform_29(%arg0: i32) -> (i32, i32) {
    %c0_i32 = arith.constant 0 : i32
    %c0_i32_0 = arith.constant 0 : i32
    %c0_i32_1 = arith.constant 0 : i32
    return %c0_i32, %c0_i32_0 : i32, i32
  }
  func.func @transform_30(%arg0: i32) -> (i32, i32, i32) {
    %c0_i32 = arith.constant 0 : i32
    %c0_i32_0 = arith.constant 0 : i32
    %c0_i32_1 = arith.constant 0 : i32
    return %arg0, %c0_i32, %c0_i32_0 : i32, i32, i32
  }
  func.func @transform_31(%arg0: i32) -> (i32, i32, i32) {
    %c0_i32 = arith.constant 0 : i32
    %c0_i32_0 = arith.constant 0 : i32
    %c0_i32_1 = arith.constant 0 : i32
    return %arg0, %c0_i32, %c0_i32_0 : i32, i32, i32
  }
  func.func @transform_32(%arg0: i32) -> (i32, i32, i32) {
    %c0_i32 = arith.constant 0 : i32
    %c0_i32_0 = arith.constant 0 : i32
    %c0_i32_1 = arith.constant 0 : i32
    return %arg0, %c0_i32, %c0_i32_0 : i32, i32, i32
  }
}

</mosaic_0001>

<bundles_post_ra>
// kernel: convolutional_decoder_forward.1
= control target key start
LH: loop header
LB: loop body
LE: loop exit
PB: predicated region body
PF: predicated region fallthrough
CT: control target
= control target key end

     0   :  { %s29035_s6 = smov 1   ;;  %s29036_s10 = smov 2   ;;  %s32947_s0 = inlined_call_operand.smem [shape: u32[33], index: -1, kind: input, shape index: {}] }
   0x1   :  { %s29150_s5 = sld [smem:[%s32947_s0]]   ;;  %s29037_s14 = smov 3  }
   0x2   :  { %s29155_s9 = sld [smem:[%s32947_s0 + %s29035_s6]]   ;;  %s29038_s18 = smov 4  }
   0x3   :  { %s29160_s13 = sld [smem:[%s32947_s0 + %s29036_s10]]   ;;  %s29039_s22 = smov 5  }
   0x4   :  { %s29165_s17 = sld [smem:[%s32947_s0 + %s29037_s14]]   ;;  %s29040_s26 = smov 6  }
   0x5   :  { %s29170_s21 = sld [smem:[%s32947_s0 + %s29038_s18]]   ;;  %s29041_s30 = smov 7  }
   0x6   :  { %s29175_s25 = sld [smem:[%s32947_s0 + %s29039_s22]]   ;;  %s29042_s4 = smov 8  }
   0x7   :  { %32993 = sst [smem:[#allocation3_spill]] %s29150_s5  ;;  %s29043_s10 = smov 9  }
   0x8   :  { %32994 = sst [smem:[#allocation4_spill]] %s29155_s9  ;;  %s29044_s15 = smov 10  }
   0x9   :  { %s29180_s29 = sld [smem:[%s32947_s0 + %s29040_s26]]   ;;  %s29045_s20 = smov 11  }
   0xa   :  { %s29185_s3 = sld [smem:[%s32947_s0 + %s29041_s30]]   ;;  %s29046_s26 = smov 12  }
   0xb   :  { %s29190_s8 = sld [smem:[%s32947_s0 + %s29042_s4]]   ;;  %s29047_s1 = smov 13  }
   0xc   :  { %s29195_s14 = sld [smem:[%s32947_s0 + %s29043_s10]]   ;;  %s29048_s7 = smov 14  }
   0xd   :  { %s29200_s19 = sld [smem:[%s32947_s0 + %s29044_s15]]   ;;  %s29049_s15 = smov 15  }
   0xe   :  { %s29205_s24 = sld [smem:[%s32947_s0 + %s29045_s20]]   ;;  %s29050_s22 = smov 16  }
   0xf   :  { %s29210_s30 = sld [smem:[%s32947_s0 + %s29046_s26]]   ;;  %s29051_s28 = smov 17  }
  0x10   :  { %32995 = sst [smem:[#allocation5_spill]] %s29185_s3  ;;  %s29064_s10 = smov 30  }
  0x11   :  { %32996 = sst [smem:[#allocation6_spill]] %s29190_s8  ;;  %s29065_s16 = smov 31  }
  0x12   :  { %s29215_s6 = sld [smem:[%s32947_s0 + %s29047_s1]]   ;;  %s29063_s1 = smov 29  }
  0x13   :  { %s29220_s12 = sld [smem:[%s32947_s0 + %s29048_s7]]   ;;  %s29052_s7 = smov 18  }
  0x14   :  { %32997 = sst [smem:[#allocation7_spill]] %s29205_s24  ;;  %s29066_s23 = smov 32  }
  0x15   :  { %s29225_s20 = sld [smem:[%s32947_s0 + %s29049_s15]]   ;;  %s29053_s15 = smov 19  }
  0x16   :  { %s29230_s27 = sld [smem:[%s32947_s0 + %s29050_s22]]   ;;  %s29054_s22 = smov 20  }
  0x17   :  { %s29235_s4 = sld [smem:[%s32947_s0 + %s29051_s28]]   ;;  %s29055_s28 = smov 21  }
  0x18   :  { %32998 = sst [smem:[#allocation8_spill]] %s29215_s6 }
  0x19   :  { %32999 = sst [smem:[#allocation9_spill]] %s29220_s12 }
  0x1a   :  { %s29240_s24 = sld [smem:[%s32947_s0 + %s29052_s7]]   ;;  %s29056_s7 = smov 22  }
  0x1b   :  { %33000 = sst [smem:[#allocation10_spill]] %s29225_s20 }
  0x1c   :  { %33001 = sst [smem:[#allocation11_spill]] %s29230_s27 }
  0x1d   :  { %33002 = sst [smem:[#allocation12_spill]] %s29235_s4 }
  0x1e   :  { %s29245_s12 = sld [smem:[%s32947_s0 + %s29053_s15]]   ;;  %s29057_s15 = smov 23  }
  0x1f   :  { %s29250_s27 = sld [smem:[%s32947_s0 + %s29054_s22]]   ;;  %s29058_s22 = smov 24  }
  0x20   :  { %33003 = sst [smem:[#allocation13_spill]] %s29240_s24 }
  0x21   :  { %s29255_s4 = sld [smem:[%s32947_s0 + %s29055_s28]]   ;;  %s29059_s28 = smov 25  }
  0x22   :  { %s29260_s24 = sld [smem:[%s32947_s0 + %s29056_s7]]   ;;  %s29060_s7 = smov 26  }
  0x23   :  { %s29308_s20 = sld [smem:[%s32947_s0 + %s29066_s23]]  }
  0x24   :  { %33004 = sst [smem:[#allocation14_spill]] %s29245_s12 }
  0x25   :  { %33005 = sst [smem:[#allocation15_spill]] %s29250_s27 }
  0x26   :  { %s29265_s12 = sld [smem:[%s32947_s0 + %s29057_s15]]   ;;  %s29061_s15 = smov 27  }
  0x27   :  { %33006 = sst [smem:[#allocation16_spill]] %s29255_s4 }
  0x28   :  { %33007 = sst [smem:[#allocation17_spill]] %s29260_s24 }
  0x29   :  { %s29270_s27 = sld [smem:[%s32947_s0 + %s29058_s22]]   ;;  %s29062_s22 = smov 28  }
  0x2a   :  { %s29275_s4 = sld [smem:[%s32947_s0 + %s29059_s28]]  }
  0x2b   :  { %s29280_s24 = sld [smem:[%s32947_s0 + %s29060_s7]]  }
  0x2c   :  { %33008 = sst [smem:[#allocation18_spill]] %s29265_s12 }
  0x2d   :  { %s29285_s12 = sld [smem:[%s32947_s0 + %s29061_s15]]  }
  0x2f   :  { %33009 = sst [smem:[#allocation19_spill]] %s29270_s27 }
  0x30   :  { %33010 = sst [smem:[#allocation20_spill]] %s29275_s4 }
  0x31   :  { %33011 = sst [smem:[#allocation21_spill]] %s29280_s24 }
  0x32   :  { %s26711_s27 = sld [smem:[%s32947_s0 + %s29062_s22]]  }
  0x33   :  { %33012 = sst [smem:[#allocation22_spill]] %s29285_s12 }
  0x34   :  { %s29293_s4 = sld [smem:[%s32947_s0 + %s29063_s1]]   ;;  %s29310_s1 = smov 0  }
  0x35   :  { %s29298_s24 = sld [smem:[%s32947_s0 + %s29064_s10]]  }
  0x36   :  { %s29303_s12 = sld [smem:[%s32947_s0 + %s29065_s16]]  }
  0x38   :  { %v71_v0 = vstv %s26711_s27 }
  0x39   :  { %72 = vst [vmem:[#allocation2] sm:$0x1] %v71_v0 }
  0x3a LB: > { %s33013_s9 = sld [smem:[#allocation4_spill]]  ;;  %s33014_s3 = sld [smem:[#allocation5_spill]]  ;;  %s29033_s1 = sphi %s29310_s1, %s78_s1  }
  0x3b   : > { %s26716_s28 = sadd.s32 4294967295, %s29033_s1   ;;  %p26720_p0 = scmp.ge.s32.totalorder %s29033_s1, 1 }
  0x3c   : > { %p902_p1 = scmp.lt.s32.totalorder %s29033_s1, 3 }
  0x3e   : > { %p903_p2 = pnand %p26720_p0, %p902_p1 }
  0x3f   : > { %p990_p3 = scmp.lt.s32.totalorder (!%p903_p2), %s26716_s28, 1  ;;  %s33015_s5 = sld [smem:[#allocation3_spill]] (!%p903_p2)  ;;  %v1018_v1 = vlaneseq (!%p903_p2)  ;;  %v29067_v2 = vmov (!%p903_p2), 1983009808   ;;  %v29069_v16 = vmov (!%p903_p2), 0.0   ;;  %vm1076_vm0 = vcmask (!%p903_p2), 1041408  }
  0x40   : > { %906 = sbr.rel (%p903_p2) target bundleno = 5147 (0x141b), region = 140  ;;  %v1016_v3 = vunpack.c.l.s4 (!%p903_p2), %v29067_v2  ;;  %s29068_s2 = smov (!%p903_p2), 110   ;;  %1228 = vmatprep.mubr.f32.mxu1 (!%p903_p2), %v29069_v16  ;;  %1157 = vmatprep.mubr.f32.mxu0 (!%p903_p2), %v29069_v16  ;;  %vm1064_vm1 = vcmask (!%p903_p2), 900096   ;;  %v26724_v30 = vld [vmem:[%s33013_s9 + $0x4] sm:$0xf] (!%p903_p2)  ;;  %vm32968_vm2 = vcmask (!%p903_p2), 15360  }
  0x41   : > { %v29320_v4 = vshrl.u32 (!%p903_p2), %v1018_v1, 7  ;;  %s32955_s10 = smov (!%p903_p2), 111   ;;  %s29071_s7 = smov (!%p903_p2), 109   ;;  %vm1393_vm3 = vcmask (!%p903_p2), 908288   ;;  %v1009_v43 = vld [vmem:[%s33013_s9] sm:$0xf] (!%p903_p2) }
  0x42   : > { %v1017_v5 = vunpack.c.0.s8 (!%p903_p2), %v1016_v3  ;;  %s29072_s11 = smov (!%p903_p2), 101   ;;  %s29073_s16 = smov (!%p903_p2), 100   ;;  %vm1722_vm4 = vcmask (!%p903_p2), 891904   ;;  %v26749_v58 = vld [vmem:[%s33013_s9 + $0x8] sm:$0xf] (!%p903_p2)  ;;  %vm2069_vm5 = vcmask (!%p903_p2), 826368  }
  0x43   : > { %s29074_s15 = smov (!%p903_p2), 99   ;;  %s32960_s18 = smov (!%p903_p2), 91   ;;  %vm2409_vm6 = vcmask (!%p903_p2), 818176   ;;  %vm2749_vm7 = vcmask (!%p903_p2), 809984   ;;  %vm32970_vm8 = vcmask (!%p903_p2), 744448   ;;  %vm32969_vm9 = vcmask (!%p903_p2), 736256  }
  0x44   : > { %v1020_v6 = vsub.s32 (!%p903_p2), %v1017_v5, %v29320_v4  ;;  %s32958_s23 = smov (!%p903_p2), 90   ;;  %s29077_s22 = smov (!%p903_p2), 89   ;;  %vm3769_vm10 = vcmask (!%p903_p2), 728064   ;;  %vm4109_vm11 = vcmask (!%p903_p2), 89088   ;;  %vm4449_vm12 = vcmask (!%p903_p2), 80896  }
  0x45   : > { %s29078_s26 = smov (!%p903_p2), 11   ;;  %vm4789_vm13 = vcmask (!%p903_p2), 72704   ;;  %vm5129_vm14 = vcmask (!%p903_p2), 7168   ;;  %vm5780_vm15 = vcmask (!%p903_p2), 1039360   ;;  %s33019_s8 = sld [smem:[#allocation6_spill]] (!%p903_p2) }
  0x46   : > { %s33024_s6 = sld [smem:[#allocation8_spill]] (!%p903_p2) }
  0x47   : > { %s33058_s28 = smov (!%p990_p3, %s26716_s28), 1 }
  0x48   : > { %s28906_s0 = smul.u32 20, %s33058_s28 }
  0x4a   : > { %s29325_s27 = scalar_lea.vmem %s33015_s5, %s28906_s0  ;;  %s29079_s0 = smov 10  }
  0x4b   : > { %v1007_v7 = vld [vmem:[%s29325_s27 + $0x8] sm:$0xff]  ;;  %v1006_v8 = vld [vmem:[%s29325_s27] sm:$0xff]  ;;  %v29396_v20 = vld.sshfl [vmem:[%s29325_s27 + $0x10] sm:$0x33 pattern:$0x76325410] }
  0x4c   : > { %v29329_v9 = vrot.slane %v1007_v7, %v1020_v6  ;;  %v29331_v10 = vrot.slane %v1006_v8, %v1020_v6  ;;  %v1014_v11 = vcombine.high %v1006_v8, %v1006_v8  ;;  %v1031_v12 = vcombine.high %v1007_v7, %v1007_v7  ;;  %s29139_s5 = smov 112  }
  0x4e   : > { %1056 = vrot.lane.b32.xlu0 %v29329_v9, %s29068_s2  ;;  %1048 = vrot.lane.b32.xlu1 %v29331_v10, %s29068_s2  ;;  %v29335_v13 = vrot.slane %v1014_v11, %v1020_v6  ;;  %v29339_v14 = vcombine.high %v29331_v10, %v29331_v10  ;;  %v29343_v15 = vcombine.high %v29329_v9, %v29329_v9 }
  0x4f   : > { %v29353_v18 = vrot.slane %v1031_v12, %v1020_v6 }
  0x50   : > { %v29351_v17 = vcombine.high %v29335_v13, %v29335_v13 }
  0x51   : > { %v29359_v19 = vcombine.high %v29353_v18, %v29353_v18 }
  0x52   : > { %1058 = vrot.lane.b32.xlu1 %v29343_v15, %s29068_s2  ;;  %1050 = vrot.lane.b32.xlu0 %v29339_v14, %s29068_s2 }
  0x56   : > { %1052 = vrot.lane.b32.xlu0 %v29335_v13, %s29068_s2  ;;  %1054 = vrot.lane.b32.xlu1 %v29351_v17, %s29068_s2 }
  0x5a   : > { %1060 = vrot.lane.b32.xlu0 %v29353_v18, %s29068_s2  ;;  %1062 = vrot.lane.b32.xlu1 %v29359_v19, %s29068_s2  ;;  %s29080_s2 = smov 9  }
  0x5e   : > { %1379 = vrot.lane.b32.xlu0 %v29339_v14, %s32955_s10  ;;  %1381 = vrot.lane.b32.xlu1 %v29335_v13, %s32955_s10 }
  0x62   : > { %1377 = vrot.lane.b32.xlu0 %v29331_v10, %s32955_s10  ;;  %1383 = vrot.lane.b32.xlu1 %v29351_v17, %s32955_s10 }
  0x66   : > { %1385 = vrot.lane.b32.xlu0 %v29329_v9, %s32955_s10  ;;  %1387 = vrot.lane.b32.xlu1 %v29343_v15, %s32955_s10 }
  0x6a   : > { %1389 = vrot.lane.b32.xlu0 %v29353_v18, %s32955_s10  ;;  %1391 = vrot.lane.b32.xlu1 %v29359_v19, %s32955_s10  ;;  %s32962_s10 = smov 126  }
  0x6e   : > { %1708 = vrot.lane.b32.xlu0 %v29339_v14, %s29071_s7  ;;  %1710 = vrot.lane.b32.xlu1 %v29335_v13, %s29071_s7 }
  0x72   : > { %1706 = vrot.lane.b32.xlu0 %v29331_v10, %s29071_s7  ;;  %1712 = vrot.lane.b32.xlu1 %v29351_v17, %s29071_s7 }
  0x76   : > { %1714 = vrot.lane.b32.xlu0 %v29329_v9, %s29071_s7  ;;  %1716 = vrot.lane.b32.xlu1 %v29343_v15, %s29071_s7 }
  0x7a   : > { %1718 = vrot.lane.b32.xlu0 %v29353_v18, %s29071_s7  ;;  %1720 = vrot.lane.b32.xlu1 %v29359_v19, %s29071_s7  ;;  %s29081_s7 = smov 1  }
  0x7e   : > { %2053 = vrot.lane.b32.xlu0 %v29339_v14, %s29072_s11  ;;  %2055 = vrot.lane.b32.xlu1 %v29335_v13, %s29072_s11 }
  0x82   : > { %2051 = vrot.lane.b32.xlu0 %v29331_v10, %s29072_s11  ;;  %2057 = vrot.lane.b32.xlu1 %v29351_v17, %s29072_s11 }
  0x86   : > { %2059 = vrot.lane.b32.xlu0 %v29329_v9, %s29072_s11  ;;  %2061 = vrot.lane.b32.xlu1 %v29343_v15, %s29072_s11 }
  0x8a   : > { %2063 = vrot.lane.b32.xlu0 %v29353_v18, %s29072_s11  ;;  %2065 = vrot.lane.b32.xlu1 %v29359_v19, %s29072_s11 }
  0x8e   : > { %2067 = vrot.lane.b32.xlu0 %v29396_v20, %s29072_s11  ;;  %2393 = vrot.lane.b32.xlu1 %v29339_v14, %s29073_s16  ;;  %s32990_s11 = smov 127  }
  0x92   : > { %2395 = vrot.lane.b32.xlu0 %v29335_v13, %s29073_s16  ;;  %2391 = vrot.lane.b32.xlu1 %v29331_v10, %s29073_s16 }
  0x96   : > { %2397 = vrot.lane.b32.xlu0 %v29351_v17, %s29073_s16  ;;  %2399 = vrot.lane.b32.xlu1 %v29329_v9, %s29073_s16 }
  0x9a   : > { %2401 = vrot.lane.b32.xlu0 %v29343_v15, %s29073_s16  ;;  %2403 = vrot.lane.b32.xlu1 %v29353_v18, %s29073_s16 }
  0x9e   : > { %2405 = vrot.lane.b32.xlu0 %v29359_v19, %s29073_s16  ;;  %2407 = vrot.lane.b32.xlu1 %v29396_v20, %s29073_s16  ;;  %s32956_s16 = smov 119  }
  0xa2   : > { %2733 = vrot.lane.b32.xlu0 %v29339_v14, %s29074_s15  ;;  %2735 = vrot.lane.b32.xlu1 %v29335_v13, %s29074_s15 }
  0xa6   : > { %2731 = vrot.lane.b32.xlu0 %v29331_v10, %s29074_s15  ;;  %2737 = vrot.lane.b32.xlu1 %v29351_v17, %s29074_s15 }
  0xaa   : > { %2739 = vrot.lane.b32.xlu0 %v29329_v9, %s29074_s15  ;;  %2741 = vrot.lane.b32.xlu1 %v29343_v15, %s29074_s15 }
  0xae   : > { %2743 = vrot.lane.b32.xlu0 %v29353_v18, %s29074_s15  ;;  %2745 = vrot.lane.b32.xlu1 %v29359_v19, %s29074_s15 }
  0xb2   : > { %2747 = vrot.lane.b32.xlu0 %v29396_v20, %s29074_s15  ;;  %3073 = vrot.lane.b32.xlu1 %v29339_v14, %s32960_s18  ;;  %s32972_s15 = smov 118  }
  0xb6   : > { %3075 = vrot.lane.b32.xlu0 %v29335_v13, %s32960_s18  ;;  %3071 = vrot.lane.b32.xlu1 %v29331_v10, %s32960_s18 }
  0xba   : > { %3077 = vrot.lane.b32.xlu0 %v29351_v17, %s32960_s18  ;;  %3079 = vrot.lane.b32.xlu1 %v29329_v9, %s32960_s18 }
  0xbe   : > { %3081 = vrot.lane.b32.xlu0 %v29343_v15, %s32960_s18  ;;  %3083 = vrot.lane.b32.xlu1 %v29353_v18, %s32960_s18 }
  0xc0   : > { %v1057_v21 = vpop.permute.xlu0 %1056  ;;  %v1049_v22 = vpop.permute.xlu1 %1048 }
  0xc2   : > { %3085 = vrot.lane.b32.xlu0 %v29359_v19, %s32960_s18  ;;  %3087 = vrot.lane.b32.xlu1 %v29396_v20, %s32960_s18  ;;  %s32964_s18 = smov 107  }
  0xc4   : > { %v1059_v23 = vpop.permute.xlu1 %1058  ;;  %v1051_v24 = vpop.permute.xlu0 %1050 }
  0xc5   : > { %v1065_v31 = vsel %vm1064_vm1, %v1049_v22, %v1051_v24  ;;  %v1069_v36 = vsel %vm1064_vm1, %v1057_v21, %v1059_v23 }
  0xc6   : > { %3413 = vrot.lane.b32.xlu0 %v29339_v14, %s32958_s23  ;;  %3415 = vrot.lane.b32.xlu1 %v29335_v13, %s32958_s23 }
  0xc8   : > { %v1053_v25 = vpop.permute.xlu0 %1052  ;;  %v1055_v26 = vpop.permute.xlu1 %1054 }
  0xc9   : > { %v1066_v27 = vsel %vm1064_vm1, %v1051_v24, %v1053_v25  ;;  %v1068_v28 = vsel %vm1064_vm1, %v1055_v26, %v1057_v21  ;;  %v1067_v29 = vsel %vm1064_vm1, %v1053_v25, %v1055_v26  ;;  %v26762_v21 = vld [vmem:[%s33013_s9 + $0xc] sm:$0xf] }
  0xca   : > { %26725 = vmatprep.subr.msk.mxu0 %vm1076_vm0, %v1066_v27  ;;  %3411 = vrot.lane.b32.xlu0 %v29331_v10, %s32958_s23 }
  0xcb   : > { %3417 = vrot.lane.b32.xlu1 %v29351_v17, %s32958_s23  ;;  %26728 = vmatprep.subr.msk.mxu1 %vm1076_vm0, %v1068_v28 }
  0xcc   : > { %26726 = vmatpush1.msk.msra.mxu0 %vm1076_vm0, %v1065_v31  ;;  %26729 = vmatpush1.msk.msra.mxu1 %vm1076_vm0, %v1067_v29  ;;  %v1061_v32 = vpop.permute.xlu0 %1060  ;;  %v1063_v33 = vpop.permute.xlu1 %1062 }
  0xcd   : > { %v1071_v34 = vsel %vm1064_vm1, %v1061_v32, %v1063_v33  ;;  %26734 = vmatprep.subr.msk.mxu1 %vm1076_vm0, %v1063_v33  ;;  %v1070_v35 = vsel %vm1064_vm1, %v1059_v23, %v1061_v32  ;;  %26730 = vmatmul.mubr.msk.f32.vlgmr.msra.gmra.mrb[0].mxu1 %vm32968_vm2, %v26724_v30  ;;  %vm6117_vm1 = vcmask 973824  }
  0xce   : > { %26731 = vmatprep.subr.msk.mxu0 %vm1076_vm0, %v1070_v35  ;;  %3419 = vrot.lane.b32.xlu0 %v29329_v9, %s32958_s23 }
  0xcf   : > { %3421 = vrot.lane.b32.xlu1 %v29343_v15, %s32958_s23  ;;  %26735 = vmatpush1.msk.msra.mxu1 %vm1076_vm0, %v1071_v34 }
  0xd0   : > { %26727 = vmatmul.mubr.msk.f32.vlgmr.msra.gmra.mrb[0].mxu0 %vm32968_vm2, %v26724_v30  ;;  %v1380_v37 = vpop.permute.xlu0 %1379  ;;  %v1382_v38 = vpop.permute.xlu1 %1381  ;;  %1370 = vmatprep.mubr.f32.mxu1 %v29069_v16 }
  0xd1   : > { %26732 = vmatpush1.msk.msra.mxu0 %vm1076_vm0, %v1069_v36  ;;  %v1395_v39 = vsel %vm1393_vm3, %v1380_v37, %v1382_v38  ;;  %1299 = vmatprep.mubr.f32.mxu0 %v29069_v16 }
  0xd2   : > { %3423 = vrot.lane.b32.xlu0 %v29353_v18, %s32958_s23  ;;  %26737 = vmatprep.subr.msk.mxu0 %vm1076_vm0, %v1395_v39  ;;  %v26776_v39 = vld [vmem:[%s33013_s9 + $0x10] sm:$0xf] }
  0xd3   : > { %3425 = vrot.lane.b32.xlu1 %v29359_v19, %s32958_s23  ;;  %26736 = vmatmul.mubr.msk.f32.vlgmr.msra.gmra.mrb[2].mxu1 %vm32968_vm2, %v26724_v30 }
  0xd4   : > { %v1378_v40 = vpop.permute.xlu0 %1377  ;;  %v1384_v41 = vpop.permute.xlu1 %1383  ;;  %26733 = vmatmul.mubr.msk.f32.vlgmr.msra.gmra.mrb[2].mxu0 %vm32968_vm2, %v26724_v30  ;;  %1555 = vmatprep.mubr.f32.mxu1 %v29069_v16 }
  0xd5   : > { %v1394_v42 = vsel %vm1393_vm3, %v1378_v40, %v1380_v37  ;;  %1484 = vmatprep.mubr.f32.mxu0 %v29069_v16  ;;  %v1396_v47 = vsel %vm1393_vm3, %v1382_v38, %v1384_v41 }
  0xd6   : > { %3427 = vrot.lane.b32.xlu0 %v29396_v20, %s32958_s23  ;;  %26738 = vmatpush1.msk.msra.mxu0 %vm1076_vm0, %v1394_v42  ;;  %s29099_s23 = smov 108  }
  0xd7   : > { %3753 = vrot.lane.b32.xlu1 %v29339_v14, %s29077_s22 }
  0xd8   : > { %v1386_v44 = vpop.permute.xlu0 %1385  ;;  %v1388_v45 = vpop.permute.xlu1 %1387  ;;  %26739 = vmatmul.mubr.msk.f32.vlgmr.msra.gmra.mrb[0].mxu0 %vm32968_vm2, %v1009_v43 }
  0xd9   : > { %v1397_v46 = vsel %vm1393_vm3, %v1384_v41, %v1386_v44  ;;  %1626 = vmatprep.mubr.f32.mxu0 %v29069_v16  ;;  %v1398_v52 = vsel %vm1393_vm3, %v1386_v44, %v1388_v45 }
  0xda   : > { %3755 = vrot.lane.b32.xlu0 %v29335_v13, %s29077_s22  ;;  %26740 = vmatprep.subr.msk.mxu1 %vm1076_vm0, %v1397_v46 }
  0xdb   : > { %3751 = vrot.lane.b32.xlu1 %v29331_v10, %s29077_s22  ;;  %26741 = vmatpush1.msk.msra.mxu1 %vm1076_vm0, %v1396_v47 }
  0xdc   : > { %v1390_v48 = vpop.permute.xlu0 %1389  ;;  %v1392_v49 = vpop.permute.xlu1 %1391  ;;  %26742 = vmatmul.mubr.msk.f32.vlgmr.msra.gmra.mrb[0].mxu1 %vm32968_vm2, %v1009_v43 }
  0xdd   : > { %v1400_v50 = vsel %vm1393_vm3, %v1390_v48, %v1392_v49  ;;  %26746 = vmatprep.subr.msk.mxu1 %vm1076_vm0, %v1392_v49  ;;  %v1399_v51 = vsel %vm1393_vm3, %v1388_v45, %v1390_v48  ;;  %1697 = vmatprep.mubr.f32.mxu1 %v29069_v16  ;;  %vm6454_vm3 = vcmask 965632  }
  0xde   : > { %3757 = vrot.lane.b32.xlu0 %v29351_v17, %s29077_s22  ;;  %26743 = vmatprep.subr.msk.mxu0 %vm1076_vm0, %v1399_v51 }
  0xdf   : > { %3759 = vrot.lane.b32.xlu1 %v29329_v9, %s29077_s22  ;;  %26747 = vmatpush1.msk.msra.mxu1 %vm1076_vm0, %v1400_v50 }
  0xe0   : > { %26744 = vmatpush1.msk.msra.mxu0 %vm1076_vm0, %v1398_v52  ;;  %v1709_v53 = vpop.permute.xlu0 %1708  ;;  %v1711_v54 = vpop.permute.xlu1 %1710  ;;  %26748 = vmatmul.mubr.msk.f32.vlgmr.msra.gmra.mrb[2].mxu1 %vm32968_vm2, %v1009_v43 }
  0xe1   : > { %v1724_v55 = vsel %vm1722_vm4, %v1709_v53, %v1711_v54  ;;  %26745 = vmatmul.mubr.msk.f32.vlgmr.msra.gmra.mrb[2].mxu0 %vm32968_vm2, %v1009_v43  ;;  %1884 = vmatprep.mubr.f32.mxu1 %v29069_v16 }
  0xe2   : > { %3761 = vrot.lane.b32.xlu0 %v29343_v15, %s29077_s22  ;;  %26750 = vmatprep.subr.msk.mxu0 %vm1076_vm0, %v1724_v55 }
  0xe3   : > { %3763 = vrot.lane.b32.xlu1 %v29353_v18, %s29077_s22  ;;  %1813 = vmatprep.mubr.f32.mxu0 %v29069_v16 }
  0xe4   : > { %v1707_v56 = vpop.permute.xlu0 %1706  ;;  %v1713_v57 = vpop.permute.xlu1 %1712 }
  0xe5   : > { %v1723_v59 = vsel %vm1722_vm4, %v1707_v56, %v1709_v53  ;;  %v1725_v63 = vsel %vm1722_vm4, %v1711_v54, %v1713_v57 }
  0xe6   : > { %3765 = vrot.lane.b32.xlu0 %v29359_v19, %s29077_s22  ;;  %26751 = vmatpush1.msk.msra.mxu0 %vm1076_vm0, %v1723_v59 }
  0xe7   : > { %3767 = vrot.lane.b32.xlu1 %v29396_v20, %s29077_s22  ;;  %26752 = vmatmul.mubr.msk.f32.vlgmr.msra.gmra.mrb[0].mxu0 %vm32968_vm2, %v26749_v58  ;;  %s29085_s22 = smov 117  }
  0xe8   : > { %v1715_v60 = vpop.permute.xlu0 %1714  ;;  %v1717_v61 = vpop.permute.xlu1 %1716  ;;  %1955 = vmatprep.mubr.f32.mxu0 %v29069_v16 }
  0xe9   : > { %v1726_v62 = vsel %vm1722_vm4, %v1713_v57, %v1715_v60  ;;  %v1727_v5 = vsel %vm1722_vm4, %v1715_v60, %v1717_v61  ;;  %v26789_v57 = vld [vmem:[%s33013_s9 + $0x14] sm:$0xf] }
  0xea   : > { %4093 = vrot.lane.b32.xlu0 %v29339_v14, %s29078_s26  ;;  %26753 = vmatprep.subr.msk.mxu1 %vm1076_vm0, %v1726_v62 }
  0xeb   : > { %4095 = vrot.lane.b32.xlu1 %v29335_v13, %s29078_s26  ;;  %26754 = vmatpush1.msk.msra.mxu1 %vm1076_vm0, %v1725_v63 }
  0xec   : > { %v1719_v0 = vpop.permute.xlu0 %1718  ;;  %v1721_v1 = vpop.permute.xlu1 %1720  ;;  %26755 = vmatmul.mubr.msk.f32.vlgmr.msra.gmra.mrb[0].mxu1 %vm32968_vm2, %v26749_v58 }
  0xed   : > { %v1729_v2 = vsel %vm1722_vm4, %v1719_v0, %v1721_v1  ;;  %26759 = vmatprep.subr.msk.mxu1 %vm1076_vm0, %v1721_v1  ;;  %v1728_v3 = vsel %vm1722_vm4, %v1717_v61, %v1719_v0  ;;  %2026 = vmatprep.mubr.f32.mxu1 %v29069_v16  ;;  %vm6791_vm4 = vcmask 957440  }
  0xee   : > { %4091 = vrot.lane.b32.xlu0 %v29331_v10, %s29078_s26  ;;  %26756 = vmatprep.subr.msk.mxu0 %vm1076_vm0, %v1728_v3 }
  0xef   : > { %4097 = vrot.lane.b32.xlu1 %v29351_v17, %s29078_s26  ;;  %26760 = vmatpush1.msk.msra.mxu1 %vm1076_vm0, %v1729_v2 }
  0xf0   : > { %26757 = vmatpush1.msk.msra.mxu0 %vm1076_vm0, %v1727_v5  ;;  %v2054_v6 = vpop.permute.xlu0 %2053  ;;  %v2056_v7 = vpop.permute.xlu1 %2055  ;;  %26761 = vmatmul.mubr.msk.f32.vlgmr.msra.gmra.mrb[2].mxu1 %vm32968_vm2, %v26749_v58 }
  0xf1   : > { %v2071_v8 = vsel %vm2069_vm5, %v2054_v6, %v2056_v7  ;;  %26758 = vmatmul.mubr.msk.f32.vlgmr.msra.gmra.mrb[2].mxu0 %vm32968_vm2, %v26749_v58  ;;  %2232 = vmatprep.mubr.f32.mxu1 %v29069_v16 }
  0xf2   : > { %4099 = vrot.lane.b32.xlu0 %v29329_v9, %s29078_s26  ;;  %26764 = vmatprep.subr.msk.mxu0 %vm1076_vm0, %v2071_v8 }
  0xf3   : > { %4101 = vrot.lane.b32.xlu1 %v29343_v15, %s29078_s26  ;;  %2161 = vmatprep.mubr.f32.mxu0 %v29069_v16 }
  0xf4   : > { %v2052_v11 = vpop.permute.xlu0 %2051  ;;  %v2058_v12 = vpop.permute.xlu1 %2057 }
  0xf5   : > { %v2070_v22 = vsel %vm2069_vm5, %v2052_v11, %v2054_v6  ;;  %v2072_v26 = vsel %vm2069_vm5, %v2056_v7, %v2058_v12 }
  0xf6   : > { %4103 = vrot.lane.b32.xlu0 %v29353_v18, %s29078_s26  ;;  %26765 = vmatpush1.msk.msra.mxu0 %vm1076_vm0, %v2070_v22 }
  0xf7   : > { %4105 = vrot.lane.b32.xlu1 %v29359_v19, %s29078_s26  ;;  %26766 = vmatmul.mubr.msk.f32.vlgmr.msra.gmra.mrb[0].mxu0 %vm32968_vm2, %v26762_v21 }
  0xf8   : > { %v2060_v23 = vpop.permute.xlu0 %2059  ;;  %v2062_v24 = vpop.permute.xlu1 %2061  ;;  %2303 = vmatprep.mubr.f32.mxu0 %v29069_v16 }
  0xf9   : > { %v2073_v25 = vsel %vm2069_vm5, %v2058_v12, %v2060_v23  ;;  %v2074_v30 = vsel %vm2069_vm5, %v2060_v23, %v2062_v24 }
  0xfa   : > { %4107 = vrot.lane.b32.xlu0 %v29396_v20, %s29078_s26  ;;  %26767 = vmatprep.subr.msk.mxu1 %vm1076_vm0, %v2073_v25  ;;  %s29086_s26 = smov 39  }
  0xfb   : > { %4433 = vrot.lane.b32.xlu1 %v29339_v14, %s29079_s0  ;;  %26768 = vmatpush1.msk.msra.mxu1 %vm1076_vm0, %v2072_v26 }
  0xfc   : > { %v2064_v27 = vpop.permute.xlu0 %2063  ;;  %v2066_v28 = vpop.permute.xlu1 %2065  ;;  %26769 = vmatmul.mubr.msk.f32.vlgmr.msra.gmra.mrb[0].mxu1 %vm32968_vm2, %v26762_v21 }
  0xfd   : > { %v2075_v29 = vsel %vm2069_vm5, %v2062_v24, %v2064_v27  ;;  %2374 = vmatprep.mubr.f32.mxu1 %v29069_v16  ;;  %v2076_v34 = vsel %vm2069_vm5, %v2064_v27, %v2066_v28 }
  0xfe   : > { %4435 = vrot.lane.b32.xlu0 %v29335_v13, %s29079_s0  ;;  %26770 = vmatprep.subr.msk.mxu0 %vm1076_vm0, %v2075_v29 }
  0xff   : > { %4431 = vrot.lane.b32.xlu1 %v29331_v10, %s29079_s0  ;;  %26771 = vmatpush1.msk.msra.mxu0 %vm1076_vm0, %v2074_v30 }
 0x100   : > { %v2068_v31 = vpop.permute.xlu0 %2067  ;;  %v2394_v32 = vpop.permute.xlu1 %2393  ;;  %26772 = vmatmul.mubr.msk.f32.vlgmr.msra.gmra.mrb[2].mxu0 %vm32968_vm2, %v26762_v21 }
 0x101   : > { %v2077_v33 = vsel %vm2069_vm5, %v2066_v28, %v2068_v31  ;;  %2501 = vmatprep.mubr.f32.mxu0 %v29069_v16  ;;  %vm7131_vm5 = vcmask 318464  }
 0x102   : > { %4437 = vrot.lane.b32.xlu0 %v29351_v17, %s29079_s0  ;;  %26773 = vmatprep.subr.msk.mxu1 %vm1076_vm0, %v2077_v33 }
 0x103   : > { %4439 = vrot.lane.b32.xlu1 %v29329_v9, %s29079_s0  ;;  %26774 = vmatpush1.msk.msra.mxu1 %vm1076_vm0, %v2076_v34 }
 0x104   : > { %v2396_v35 = vpop.permute.xlu0 %2395  ;;  %v2392_v36 = vpop.permute.xlu1 %2391  ;;  %26775 = vmatmul.mubr.msk.f32.vlgmr.msra.gmra.mrb[2].mxu1 %vm32968_vm2, %v26762_v21  ;;  %v26802_v21 = vld [vmem:[%s33013_s9 + $0x18] sm:$0xf] }
 0x105   : > { %v2410_v37 = vsel %vm2409_vm6, %v2392_v36, %v2394_v32  ;;  %v2411_v38 = vsel %vm2409_vm6, %v2394_v32, %v2396_v35  ;;  %2572 = vmatprep.mubr.f32.mxu1 %v29069_v16 }
 0x106   : > { %4441 = vrot.lane.b32.xlu0 %v29343_v15, %s29079_s0  ;;  %26777 = vmatprep.subr.msk.mxu0 %vm1076_vm0, %v2411_v38  ;;  %v26815_v38 = vld [vmem:[%s33013_s9 + $0x1c] sm:$0xf] }
 0x107   : > { %4443 = vrot.lane.b32.xlu1 %v29353_v18, %s29079_s0  ;;  %26778 = vmatpush1.msk.msra.mxu0 %vm1076_vm0, %v2410_v37 }
 0x108   : > { %v2398_v40 = vpop.permute.xlu0 %2397  ;;  %v2400_v41 = vpop.permute.xlu1 %2399  ;;  %26779 = vmatmul.mubr.msk.f32.vlgmr.msra.gmra.mrb[0].mxu0 %vm32968_vm2, %v26776_v39 }
 0x109   : > { %v2412_v42 = vsel %vm2409_vm6, %v2396_v35, %v2398_v40  ;;  %v2413_v43 = vsel %vm2409_vm6, %v2398_v40, %v2400_v41  ;;  %2643 = vmatprep.mubr.f32.mxu0 %v29069_v16 }
 0x10a   : > { %4445 = vrot.lane.b32.xlu0 %v29359_v19, %s29079_s0  ;;  %26780 = vmatprep.subr.msk.mxu1 %vm1076_vm0, %v2413_v43 }
 0x10b   : > { %4447 = vrot.lane.b32.xlu1 %v29396_v20, %s29079_s0  ;;  %26781 = vmatpush1.msk.msra.mxu1 %vm1076_vm0, %v2412_v42  ;;  %s29088_s0 = smov 37  }
 0x10c   : > { %v2402_v44 = vpop.permute.xlu0 %2401  ;;  %v2404_v45 = vpop.permute.xlu1 %2403  ;;  %26782 = vmatmul.mubr.msk.f32.vlgmr.msra.gmra.mrb[0].mxu1 %vm32968_vm2, %v26776_v39 }
 0x10d   : > { %v2414_v46 = vsel %vm2409_vm6, %v2400_v41, %v2402_v44  ;;  %v2415_v47 = vsel %vm2409_vm6, %v2402_v44, %v2404_v45  ;;  %2714 = vmatprep.mubr.f32.mxu1 %v29069_v16 }
 0x10e   : > { %4773 = vrot.lane.b32.xlu0 %v29339_v14, %s29080_s2  ;;  %26783 = vmatprep.subr.msk.mxu0 %vm1076_vm0, %v2415_v47 }
 0x10f   : > { %4775 = vrot.lane.b32.xlu1 %v29335_v13, %s29080_s2  ;;  %26784 = vmatpush1.msk.msra.mxu0 %vm1076_vm0, %v2414_v46 }
 0x110   : > { %v2406_v48 = vpop.permute.xlu0 %2405  ;;  %v2408_v49 = vpop.permute.xlu1 %2407  ;;  %26785 = vmatmul.mubr.msk.f32.vlgmr.msra.gmra.mrb[2].mxu0 %vm32968_vm2, %v26776_v39 }
 0x111   : > { %v2416_v50 = vsel %vm2409_vm6, %v2404_v45, %v2406_v48  ;;  %v2417_v51 = vsel %vm2409_vm6, %v2406_v48, %v2408_v49  ;;  %2841 = vmatprep.mubr.f32.mxu0 %v29069_v16  ;;  %vm7471_vm6 = vcmask 310272  }
 0x112   : > { %4771 = vrot.lane.b32.xlu0 %v29331_v10, %s29080_s2  ;;  %26786 = vmatprep.subr.msk.mxu1 %vm1076_vm0, %v2417_v51 }
 0x113   : > { %4777 = vrot.lane.b32.xlu1 %v29351_v17, %s29080_s2  ;;  %26787 = vmatpush1.msk.msra.mxu1 %vm1076_vm0, %v2416_v50 }
 0x114   : > { %v2734_v52 = vpop.permute.xlu0 %2733  ;;  %v2736_v53 = vpop.permute.xlu1 %2735  ;;  %26788 = vmatmul.mubr.msk.f32.vlgmr.msra.gmra.mrb[2].mxu1 %vm32968_vm2, %v26776_v39 }
 0x115   : > { %v2751_v54 = vsel %vm2749_vm7, %v2734_v52, %v2736_v53  ;;  %2912 = vmatprep.mubr.f32.mxu1 %v29069_v16 }
 0x116   : > { %4779 = vrot.lane.b32.xlu0 %v29329_v9, %s29080_s2  ;;  %26790 = vmatprep.subr.msk.mxu0 %vm1076_vm0, %v2751_v54 }
 0x117   : > { %4781 = vrot.lane.b32.xlu1 %v29343_v15, %s29080_s2 }
 0x118   : > { %v2732_v55 = vpop.permute.xlu0 %2731  ;;  %v2738_v56 = vpop.permute.xlu1 %2737 }
 0x119   : > { %v2750_v58 = vsel %vm2749_vm7, %v2732_v55, %v2734_v52  ;;  %v2752_v62 = vsel %vm2749_vm7, %v2736_v53, %v2738_v56 }
 0x11a   : > { %4783 = vrot.lane.b32.xlu0 %v29353_v18, %s29080_s2  ;;  %26791 = vmatpush1.msk.msra.mxu0 %vm1076_vm0, %v2750_v58 }
 0x11b   : > { %4785 = vrot.lane.b32.xlu1 %v29359_v19, %s29080_s2  ;;  %26792 = vmatmul.mubr.msk.f32.vlgmr.msra.gmra.mrb[0].mxu0 %vm32968_vm2, %v26789_v57 }
 0x11c   : > { %v2740_v59 = vpop.permute.xlu0 %2739  ;;  %v2742_v60 = vpop.permute.xlu1 %2741  ;;  %2983 = vmatprep.mubr.f32.mxu0 %v29069_v16 }
 0x11d   : > { %v2753_v61 = vsel %vm2749_vm7, %v2738_v56, %v2740_v59  ;;  %v2754_v2 = vsel %vm2749_vm7, %v2740_v59, %v2742_v60  ;;  %v26828_v56 = vld [vmem:[%s33013_s9 + $0x20] sm:$0xf] }
 0x11e   : > { %4787 = vrot.lane.b32.xlu0 %v29396_v20, %s29080_s2  ;;  %26793 = vmatprep.subr.msk.mxu1 %vm1076_vm0, %v2753_v61  ;;  %s29089_s2 = smov 29  }
 0x11f   : > { %5113 = vrot.lane.b32.xlu1 %v29339_v14, %s29081_s7  ;;  %26794 = vmatpush1.msk.msra.mxu1 %vm1076_vm0, %v2752_v62 }
 0x120   : > { %v2744_v63 = vpop.permute.xlu0 %2743  ;;  %v2746_v0 = vpop.permute.xlu1 %2745  ;;  %26795 = vmatmul.mubr.msk.f32.vlgmr.msra.gmra.mrb[0].mxu1 %vm32968_vm2, %v26789_v57 }
 0x121   : > { %v2755_v1 = vsel %vm2749_vm7, %v2742_v60, %v2744_v63  ;;  %3054 = vmatprep.mubr.f32.mxu1 %v29069_v16  ;;  %v2756_v7 = vsel %vm2749_vm7, %v2744_v63, %v2746_v0 }
 0x122   : > { %5115 = vrot.lane.b32.xlu0 %v29335_v13, %s29081_s7  ;;  %26796 = vmatprep.subr.msk.mxu0 %vm1076_vm0, %v2755_v1 }
 0x123   : > { %5111 = vrot.lane.b32.xlu1 %v29331_v10, %s29081_s7  ;;  %26797 = vmatpush1.msk.msra.mxu0 %vm1076_vm0, %v2754_v2 }
 0x124   : > { %v2748_v3 = vpop.permute.xlu0 %2747  ;;  %v3074_v5 = vpop.permute.xlu1 %3073  ;;  %26798 = vmatmul.mubr.msk.f32.vlgmr.msra.gmra.mrb[2].mxu0 %vm32968_vm2, %v26789_v57 }
 0x125   : > { %v2757_v6 = vsel %vm2749_vm7, %v2746_v0, %v2748_v3  ;;  %3181 = vmatprep.mubr.f32.mxu0 %v29069_v16  ;;  %vm7811_vm7 = vcmask 302080  }
 0x126   : > { %5117 = vrot.lane.b32.xlu0 %v29351_v17, %s29081_s7  ;;  %26799 = vmatprep.subr.msk.mxu1 %vm1076_vm0, %v2757_v6 }
 0x127   : > { %5119 = vrot.lane.b32.xlu1 %v29329_v9, %s29081_s7  ;;  %26800 = vmatpush1.msk.msra.mxu1 %vm1076_vm0, %v2756_v7 }
 0x128   : > { %v3076_v10 = vpop.permute.xlu0 %3075  ;;  %v3072_v8 = vpop.permute.xlu1 %3071  ;;  %26801 = vmatmul.mubr.msk.f32.vlgmr.msra.gmra.mrb[2].mxu1 %vm32968_vm2, %v26789_v57 }
 0x129   : > { %v3090_v11 = vsel %vm32970_vm8, %v3072_v8, %v3074_v5  ;;  %v3091_v12 = vsel %vm32970_vm8, %v3074_v5, %v3076_v10  ;;  %3252 = vmatprep.mubr.f32.mxu1 %v29069_v16 }
 0x12a   : > { %5121 = vrot.lane.b32.xlu0 %v29343_v15, %s29081_s7  ;;  %26803 = vmatprep.subr.msk.mxu0 %vm1076_vm0, %v3091_v12  ;;  %v26841_v12 = vld [vmem:[%s33013_s9 + $0x24] sm:$0xf] }
 0x12b   : > { %5123 = vrot.lane.b32.xlu1 %v29353_v18, %s29081_s7  ;;  %26804 = vmatpush1.msk.msra.mxu0 %vm1076_vm0, %v3090_v11 }
 0x12c   : > { %v3078_v22 = vpop.permute.xlu0 %3077  ;;  %v3080_v23 = vpop.permute.xlu1 %3079  ;;  %26805 = vmatmul.mubr.msk.f32.vlgmr.msra.gmra.mrb[0].mxu0 %vm32968_vm2, %v26802_v21 }
 0x12d   : > { %v3092_v24 = vsel %vm32970_vm8, %v3076_v10, %v3078_v22  ;;  %v3093_v25 = vsel %vm32970_vm8, %v3078_v22, %v3080_v23  ;;  %3323 = vmatprep.mubr.f32.mxu0 %v29069_v16 }
 0x12e   : > { %5125 = vrot.lane.b32.xlu0 %v29359_v19, %s29081_s7  ;;  %26806 = vmatprep.subr.msk.mxu1 %vm1076_vm0, %v3093_v25 }
 0x12f   : > { %5127 = vrot.lane.b32.xlu1 %v29396_v20, %s29081_s7  ;;  %26807 = vmatpush1.msk.msra.mxu1 %vm1076_vm0, %v3092_v24  ;;  %s29090_s7 = smov 28  }
 0x130   : > { %v3082_v26 = vpop.permute.xlu0 %3081  ;;  %v3084_v27 = vpop.permute.xlu1 %3083  ;;  %26808 = vmatmul.mubr.msk.f32.vlgmr.msra.gmra.mrb[0].mxu1 %vm32968_vm2, %v26802_v21 }
 0x131   : > { %v3094_v28 = vsel %vm32970_vm8, %v3080_v23, %v3082_v26  ;;  %v3095_v29 = vsel %vm32970_vm8, %v3082_v26, %v3084_v27  ;;  %3394 = vmatprep.mubr.f32.mxu1 %v29069_v16 }
 0x132   : > { %5766 = vrot.lane.b32.xlu0 %v29335_v13, %s32990_s11  ;;  %26809 = vmatprep.subr.msk.mxu0 %vm1076_vm0, %v3095_v29 }
 0x133   : > { %5768 = vrot.lane.b32.xlu1 %v29351_v17, %s32990_s11  ;;  %26810 = vmatpush1.msk.msra.mxu0 %vm1076_vm0, %v3094_v28 }
 0x134   : > { %v3086_v30 = vpop.permute.xlu0 %3085  ;;  %v3088_v31 = vpop.permute.xlu1 %3087  ;;  %26811 = vmatmul.mubr.msk.f32.vlgmr.msra.gmra.mrb[2].mxu0 %vm32968_vm2, %v26802_v21 }
 0x135   : > { %v3096_v32 = vsel %vm32970_vm8, %v3084_v27, %v3086_v30  ;;  %v3097_v33 = vsel %vm32970_vm8, %v3086_v30, %v3088_v31  ;;  %3521 = vmatprep.mubr.f32.mxu0 %v29069_v16  ;;  %vm12869_vm8 = vcmask 867328  }
 0x136   : > { %5764 = vrot.lane.b32.xlu0 %v29339_v14, %s32990_s11  ;;  %26812 = vmatprep.subr.msk.mxu1 %vm1076_vm0, %v3097_v33 }
 0x137   : > { %5770 = vrot.lane.b32.xlu1 %v29329_v9, %s32990_s11  ;;  %26813 = vmatpush1.msk.msra.mxu1 %vm1076_vm0, %v3096_v32 }
 0x138   : > { %v3414_v34 = vpop.permute.xlu0 %3413  ;;  %v3416_v35 = vpop.permute.xlu1 %3415  ;;  %26814 = vmatmul.mubr.msk.f32.vlgmr.msra.gmra.mrb[2].mxu1 %vm32968_vm2, %v26802_v21 }
 0x139   : > { %v3431_v36 = vsel %vm32969_vm9, %v3414_v34, %v3416_v35  ;;  %3592 = vmatprep.mubr.f32.mxu1 %v29069_v16 }
 0x13a   : > { %5772 = vrot.lane.b32.xlu0 %v29343_v15, %s32990_s11  ;;  %26816 = vmatprep.subr.msk.mxu0 %vm1076_vm0, %v3431_v36 }
 0x13b   : > { %5774 = vrot.lane.b32.xlu1 %v29353_v18, %s32990_s11 }
 0x13c   : > { %v3412_v37 = vpop.permute.xlu0 %3411 }
 0x13d   : > { %v3430_v39 = vsel %vm32969_vm9, %v3412_v37, %v3414_v34  ;;  %v3418_v40 = vpop.permute.xlu1 %3417 }
 0x13e   : > { %5776 = vrot.lane.b32.xlu0 %v29359_v19, %s32990_s11  ;;  %26817 = vmatpush1.msk.msra.mxu0 %vm1076_vm0, %v3430_v39  ;;  %v3432_v44 = vsel %vm32969_vm9, %v3416_v35, %v3418_v40 }
 0x13f   : > { %5778 = vrot.lane.b32.xlu1 %v29396_v20, %s32990_s11  ;;  %26818 = vmatmul.mubr.msk.f32.vlgmr.msra.gmra.mrb[0].mxu0 %vm32968_vm2, %v26815_v38 }
 0x140   : > { %v3420_v41 = vpop.permute.xlu0 %3419  ;;  %3663 = vmatprep.mubr.f32.mxu0 %v29069_v16 }
 0x141   : > { %v3422_v42 = vpop.permute.xlu1 %3421  ;;  %v3433_v43 = vsel %vm32969_vm9, %v3418_v40, %v3420_v41 }
 0x142   : > { %6103 = vrot.lane.b32.xlu0 %v29335_v13, %s32956_s16  ;;  %26819 = vmatprep.subr.msk.mxu1 %vm1076_vm0, %v3433_v43  ;;  %v3434_v48 = vsel %vm32969_vm9, %v3420_v41, %v3422_v42 }
 0x143   : > { %6105 = vrot.lane.b32.xlu1 %v29351_v17, %s32956_s16  ;;  %26820 = vmatpush1.msk.msra.mxu1 %vm1076_vm0, %v3432_v44 }
 0x144   : > { %v3424_v45 = vpop.permute.xlu0 %3423  ;;  %26821 = vmatmul.mubr.msk.f32.vlgmr.msra.gmra.mrb[0].mxu1 %vm32968_vm2, %v26815_v38 }
 0x145   : > { %v3426_v46 = vpop.permute.xlu1 %3425  ;;  %v3435_v47 = vsel %vm32969_vm9, %v3422_v42, %v3424_v45  ;;  %3734 = vmatprep.mubr.f32.mxu1 %v29069_v16 }
 0x146   : > { %6101 = vrot.lane.b32.xlu0 %v29339_v14, %s32956_s16  ;;  %26822 = vmatprep.subr.msk.mxu0 %vm1076_vm0, %v3435_v47  ;;  %v3436_v52 = vsel %vm32969_vm9, %v3424_v45, %v3426_v46 }
 0x147   : > { %6107 = vrot.lane.b32.xlu1 %v29329_v9, %s32956_s16  ;;  %26823 = vmatpush1.msk.msra.mxu0 %vm1076_vm0, %v3434_v48 }
 0x148   : > { %v3428_v49 = vpop.permute.xlu0 %3427  ;;  %26824 = vmatmul.mubr.msk.f32.vlgmr.msra.gmra.mrb[2].mxu0 %vm32968_vm2, %v26815_v38 }
 0x149   : > { %v3437_v50 = vsel %vm32969_vm9, %v3426_v46, %v3428_v49  ;;  %v3754_v51 = vpop.permute.xlu1 %3753  ;;  %3861 = vmatprep.mubr.f32.mxu0 %v29069_v16  ;;  %vm12209_vm9 = vcmask 883712  }
 0x14a   : > { %6109 = vrot.lane.b32.xlu0 %v29343_v15, %s32956_s16  ;;  %26825 = vmatprep.subr.msk.mxu1 %vm1076_vm0, %v3437_v50 }
 0x14b   : > { %6111 = vrot.lane.b32.xlu1 %v29353_v18, %s32956_s16  ;;  %26826 = vmatpush1.msk.msra.mxu1 %vm1076_vm0, %v3436_v52 }
 0x14c   : > { %v3756_v53 = vpop.permute.xlu0 %3755  ;;  %26827 = vmatmul.mubr.msk.f32.vlgmr.msra.gmra.mrb[2].mxu1 %vm32968_vm2, %v26815_v38  ;;  %v26854_v38 = vld [vmem:[%s33013_s9 + $0x28] sm:$0xf] }
 0x14d   : > { %v3752_v54 = vpop.permute.xlu1 %3751  ;;  %v3771_v55 = vsel %vm3769_vm10, %v3754_v51, %v3756_v53  ;;  %3932 = vmatprep.mubr.f32.mxu1 %v29069_v16 }
 0x14e   : > { %v3770_v57 = vsel %vm3769_vm10, %v3752_v54, %v3754_v51  ;;  %6113 = vrot.lane.b32.xlu0 %v29359_v19, %s32956_s16  ;;  %26829 = vmatprep.subr.msk.mxu0 %vm1076_vm0, %v3771_v55  ;;  %v29889_v51 = vld.sshfl [vmem:[%s29325_s27 + $0x10] sm:$0x33 pattern:$0x76325410]  ;;  %s29087_s27 = smov 38  }
 0x14f   : > { %6115 = vrot.lane.b32.xlu1 %v29396_v20, %s32956_s16  ;;  %26830 = vmatpush1.msk.msra.mxu0 %vm1076_vm0, %v3770_v57  ;;  %v29893_v52 = vcombine.high %v29889_v51, %v29889_v51  ;;  %v26867_v57 = vld [vmem:[%s33013_s9 + $0x2c] sm:$0xf]  ;;  %s32979_s16 = smov 116  }
 0x150   : > { %v3758_v58 = vpop.permute.xlu0 %3757  ;;  %26831 = vmatmul.mubr.msk.f32.vlgmr.msra.gmra.mrb[0].mxu0 %vm32968_vm2, %v26828_v56 }
 0x151   : > { %v3772_v59 = vsel %vm3769_vm10, %v3756_v53, %v3758_v58  ;;  %v3760_v60 = vpop.permute.xlu1 %3759  ;;  %4003 = vmatprep.mubr.f32.mxu0 %v29069_v16 }
 0x152   : > { %6440 = vrot.lane.b32.xlu0 %v29335_v13, %s32972_s15  ;;  %v3773_v61 = vsel %vm3769_vm10, %v3758_v58, %v3760_v60 }
 0x153   : > { %6442 = vrot.lane.b32.xlu1 %v29351_v17, %s32972_s15  ;;  %26832 = vmatprep.subr.msk.mxu1 %vm1076_vm0, %v3773_v61 }
 0x154   : > { %26833 = vmatpush1.msk.msra.mxu1 %vm1076_vm0, %v3772_v59  ;;  %v3762_v62 = vpop.permute.xlu0 %3761 }
 0x155   : > { %v3774_v63 = vsel %vm3769_vm10, %v3760_v60, %v3762_v62  ;;  %v3764_v0 = vpop.permute.xlu1 %3763  ;;  %26834 = vmatmul.mubr.msk.f32.vlgmr.msra.gmra.mrb[0].mxu1 %vm32968_vm2, %v26828_v56 }
 0x156   : > { %6438 = vrot.lane.b32.xlu0 %v29339_v14, %s32972_s15  ;;  %v3775_v1 = vsel %vm3769_vm10, %v3762_v62, %v3764_v0  ;;  %4074 = vmatprep.mubr.f32.mxu1 %v29069_v16 }
 0x157   : > { %6444 = vrot.lane.b32.xlu1 %v29329_v9, %s32972_s15  ;;  %26835 = vmatprep.subr.msk.mxu0 %vm1076_vm0, %v3775_v1 }
 0x158   : > { %26836 = vmatpush1.msk.msra.mxu0 %vm1076_vm0, %v3774_v63  ;;  %v3766_v2 = vpop.permute.xlu0 %3765 }
 0x159   : > { %v3776_v3 = vsel %vm3769_vm10, %v3764_v0, %v3766_v2  ;;  %v3768_v5 = vpop.permute.xlu1 %3767  ;;  %26837 = vmatmul.mubr.msk.f32.vlgmr.msra.gmra.mrb[2].mxu0 %vm32968_vm2, %v26828_v56 }
 0x15a   : > { %v3777_v6 = vsel %vm3769_vm10, %v3766_v2, %v3768_v5  ;;  %6446 = vrot.lane.b32.xlu0 %v29343_v15, %s32972_s15  ;;  %4201 = vmatprep.mubr.f32.mxu0 %v29069_v16  ;;  %vm8151_vm10 = vcmask 236544  }
 0x15b   : > { %6448 = vrot.lane.b32.xlu1 %v29353_v18, %s32972_s15  ;;  %26838 = vmatprep.subr.msk.mxu1 %vm1076_vm0, %v3777_v6 }
 0x15c   : > { %26839 = vmatpush1.msk.msra.mxu1 %vm1076_vm0, %v3776_v3  ;;  %v4094_v7 = vpop.permute.xlu0 %4093 }
 0x15d   : > { %v4096_v10 = vpop.permute.xlu1 %4095  ;;  %26840 = vmatmul.mubr.msk.f32.vlgmr.msra.gmra.mrb[2].mxu1 %vm32968_vm2, %v26828_v56 }
 0x15e   : > { %6450 = vrot.lane.b32.xlu0 %v29359_v19, %s32972_s15  ;;  %v4111_v8 = vsel %vm4109_vm11, %v4094_v7, %v4096_v10  ;;  %4272 = vmatprep.mubr.f32.mxu1 %v29069_v16 }
 0x15f   : > { %6452 = vrot.lane.b32.xlu1 %v29396_v20, %s32972_s15  ;;  %26842 = vmatprep.subr.msk.mxu0 %vm1076_vm0, %v4111_v8 }
 0x160   : > { %v4092_v11 = vpop.permute.xlu0 %4091 }
 0x161   : > { %v4110_v21 = vsel %vm4109_vm11, %v4092_v11, %v4094_v7  ;;  %v4098_v22 = vpop.permute.xlu1 %4097 }
 0x162   : > { %6777 = vrot.lane.b32.xlu0 %v29335_v13, %s29085_s22  ;;  %26843 = vmatpush1.msk.msra.mxu0 %vm1076_vm0, %v4110_v21  ;;  %v4112_v26 = vsel %vm4109_vm11, %v4096_v10, %v4098_v22  ;;  %v26880_v21 = vld [vmem:[%s33013_s9 + $0x30] sm:$0xf] }
 0x163   : > { %6779 = vrot.lane.b32.xlu1 %v29351_v17, %s29085_s22  ;;  %26844 = vmatmul.mubr.msk.f32.vlgmr.msra.gmra.mrb[0].mxu0 %vm32968_vm2, %v26841_v12 }
 0x164   : > { %v4100_v23 = vpop.permute.xlu0 %4099  ;;  %4343 = vmatprep.mubr.f32.mxu0 %v29069_v16 }
 0x165   : > { %v4102_v24 = vpop.permute.xlu1 %4101  ;;  %v4113_v25 = vsel %vm4109_vm11, %v4098_v22, %v4100_v23 }
 0x166   : > { %6775 = vrot.lane.b32.xlu0 %v29339_v14, %s29085_s22  ;;  %26845 = vmatprep.subr.msk.mxu1 %vm1076_vm0, %v4113_v25  ;;  %v4114_v30 = vsel %vm4109_vm11, %v4100_v23, %v4102_v24 }
 0x167   : > { %6781 = vrot.lane.b32.xlu1 %v29329_v9, %s29085_s22  ;;  %26846 = vmatpush1.msk.msra.mxu1 %vm1076_vm0, %v4112_v26 }
 0x168   : > { %v4104_v27 = vpop.permute.xlu0 %4103  ;;  %26847 = vmatmul.mubr.msk.f32.vlgmr.msra.gmra.mrb[0].mxu1 %vm32968_vm2, %v26841_v12 }
 0x169   : > { %v4106_v28 = vpop.permute.xlu1 %4105  ;;  %v4115_v29 = vsel %vm4109_vm11, %v4102_v24, %v4104_v27  ;;  %4414 = vmatprep.mubr.f32.mxu1 %v29069_v16 }
 0x16a   : > { %6783 = vrot.lane.b32.xlu0 %v29343_v15, %s29085_s22  ;;  %26848 = vmatprep.subr.msk.mxu0 %vm1076_vm0, %v4115_v29  ;;  %v4116_v34 = vsel %vm4109_vm11, %v4104_v27, %v4106_v28 }
 0x16b   : > { %6785 = vrot.lane.b32.xlu1 %v29353_v18, %s29085_s22  ;;  %26849 = vmatpush1.msk.msra.mxu0 %vm1076_vm0, %v4114_v30 }
 0x16c   : > { %v4108_v31 = vpop.permute.xlu0 %4107  ;;  %26850 = vmatmul.mubr.msk.f32.vlgmr.msra.gmra.mrb[2].mxu0 %vm32968_vm2, %v26841_v12 }
 0x16d   : > { %v4117_v32 = vsel %vm4109_vm11, %v4106_v28, %v4108_v31  ;;  %v4434_v33 = vpop.permute.xlu1 %4433  ;;  %4541 = vmatprep.mubr.f32.mxu0 %v29069_v16  ;;  %vm8491_vm11 = vcmask 228352  }
 0x16e   : > { %6787 = vrot.lane.b32.xlu0 %v29359_v19, %s29085_s22  ;;  %26851 = vmatprep.subr.msk.mxu1 %vm1076_vm0, %v4117_v32 }
 0x16f   : > { %6789 = vrot.lane.b32.xlu1 %v29396_v20, %s29085_s22  ;;  %26852 = vmatpush1.msk.msra.mxu1 %vm1076_vm0, %v4116_v34 }
 0x170   : > { %v4436_v35 = vpop.permute.xlu0 %4435  ;;  %26853 = vmatmul.mubr.msk.f32.vlgmr.msra.gmra.mrb[2].mxu1 %vm32968_vm2, %v26841_v12 }
 0x171   : > { %v4432_v36 = vpop.permute.xlu1 %4431  ;;  %v4451_v37 = vsel %vm4449_vm12, %v4434_v33, %v4436_v35  ;;  %4612 = vmatprep.mubr.f32.mxu1 %v29069_v16 }
 0x172   : > { %v4450_v39 = vsel %vm4449_vm12, %v4432_v36, %v4434_v33  ;;  %7115 = vrot.lane.b32.xlu0 %v29335_v13, %s29086_s26  ;;  %26855 = vmatprep.subr.msk.mxu0 %vm1076_vm0, %v4451_v37 }
 0x173   : > { %7117 = vrot.lane.b32.xlu1 %v29351_v17, %s29086_s26  ;;  %26856 = vmatpush1.msk.msra.mxu0 %vm1076_vm0, %v4450_v39 }
 0x174   : > { %v4438_v20 = vpop.permute.xlu0 %4437  ;;  %26857 = vmatmul.mubr.msk.f32.vlgmr.msra.gmra.mrb[0].mxu0 %vm32968_vm2, %v26854_v38 }
 0x175   : > { %v4452_v40 = vsel %vm4449_vm12, %v4436_v35, %v4438_v20  ;;  %v4440_v41 = vpop.permute.xlu1 %4439  ;;  %4683 = vmatprep.mubr.f32.mxu0 %v29069_v16  ;;  %v26893_v35 = vld [vmem:[%s33013_s9 + $0x34] sm:$0xf] }
 0x176   : > { %7113 = vrot.lane.b32.xlu0 %v29339_v14, %s29086_s26  ;;  %v4453_v42 = vsel %vm4449_vm12, %v4438_v20, %v4440_v41 }
 0x177   : > { %7119 = vrot.lane.b32.xlu1 %v29329_v9, %s29086_s26  ;;  %26858 = vmatprep.subr.msk.mxu1 %vm1076_vm0, %v4453_v42 }
 0x178   : > { %26859 = vmatpush1.msk.msra.mxu1 %vm1076_vm0, %v4452_v40  ;;  %v4442_v43 = vpop.permute.xlu0 %4441 }
 0x179   : > { %v4454_v44 = vsel %vm4449_vm12, %v4440_v41, %v4442_v43  ;;  %v4444_v45 = vpop.permute.xlu1 %4443  ;;  %26860 = vmatmul.mubr.msk.f32.vlgmr.msra.gmra.mrb[0].mxu1 %vm32968_vm2, %v26854_v38 }
 0x17a   : > { %7121 = vrot.lane.b32.xlu0 %v29343_v15, %s29086_s26  ;;  %v4455_v46 = vsel %vm4449_vm12, %v4442_v43, %v4444_v45  ;;  %4754 = vmatprep.mubr.f32.mxu1 %v29069_v16 }
 0x17b   : > { %7123 = vrot.lane.b32.xlu1 %v29353_v18, %s29086_s26  ;;  %26861 = vmatprep.subr.msk.mxu0 %vm1076_vm0, %v4455_v46  ;;  %v26906_v46 = vld [vmem:[%s33013_s9 + $0x38] sm:$0xf] }
 0x17c   : > { %26862 = vmatpush1.msk.msra.mxu0 %vm1076_vm0, %v4454_v44  ;;  %v4446_v47 = vpop.permute.xlu0 %4445 }
 0x17d   : > { %v4456_v48 = vsel %vm4449_vm12, %v4444_v45, %v4446_v47  ;;  %v4448_v49 = vpop.permute.xlu1 %4447  ;;  %26863 = vmatmul.mubr.msk.f32.vlgmr.msra.gmra.mrb[2].mxu0 %vm32968_vm2, %v26854_v38 }
 0x17e   : > { %v4457_v50 = vsel %vm4449_vm12, %v4446_v47, %v4448_v49  ;;  %7125 = vrot.lane.b32.xlu0 %v29359_v19, %s29086_s26  ;;  %4881 = vmatprep.mubr.f32.mxu0 %v29069_v16 }
 0x17f   : > { %7127 = vrot.lane.b32.xlu1 %v29889_v51, %s29086_s26  ;;  %26864 = vmatprep.subr.msk.mxu1 %vm1076_vm0, %v4457_v50 }
 0x180   : > { %26865 = vmatpush1.msk.msra.mxu1 %vm1076_vm0, %v4456_v48  ;;  %v4774_v53 = vpop.permute.xlu0 %4773 }
 0x181   : > { %v4776_v54 = vpop.permute.xlu1 %4775  ;;  %26866 = vmatmul.mubr.msk.f32.vlgmr.msra.gmra.mrb[2].mxu1 %vm32968_vm2, %v26854_v38 }
 0x182   : > { %7129 = vrot.lane.b32.xlu0 %v29893_v52, %s29086_s26  ;;  %v4791_v55 = vsel %vm4789_vm13, %v4774_v53, %v4776_v54  ;;  %4952 = vmatprep.mubr.f32.mxu1 %v29069_v16  ;;  %s29091_s26 = smov 27  }
 0x183   : > { %7455 = vrot.lane.b32.xlu1 %v29335_v13, %s29087_s27  ;;  %26868 = vmatprep.subr.msk.mxu0 %vm1076_vm0, %v4791_v55 }
 0x184   : > { %v4772_v56 = vpop.permute.xlu0 %4771 }
 0x185   : > { %v4790_v58 = vsel %vm4789_vm13, %v4772_v56, %v4774_v53  ;;  %v4778_v59 = vpop.permute.xlu1 %4777 }
 0x186   : > { %7457 = vrot.lane.b32.xlu0 %v29351_v17, %s29087_s27  ;;  %26869 = vmatpush1.msk.msra.mxu0 %vm1076_vm0, %v4790_v58  ;;  %v4792_v63 = vsel %vm4789_vm13, %v4776_v54, %v4778_v59 }
 0x187   : > { %7453 = vrot.lane.b32.xlu1 %v29339_v14, %s29087_s27  ;;  %26870 = vmatmul.mubr.msk.f32.vlgmr.msra.gmra.mrb[0].mxu0 %vm32968_vm2, %v26867_v57 }
 0x188   : > { %v4780_v60 = vpop.permute.xlu0 %4779  ;;  %5023 = vmatprep.mubr.f32.mxu0 %v29069_v16 }
 0x189   : > { %v4782_v61 = vpop.permute.xlu1 %4781  ;;  %v4793_v62 = vsel %vm4789_vm13, %v4778_v59, %v4780_v60  ;;  %v26919_v59 = vld [vmem:[%s33013_s9 + $0x3c] sm:$0xf] }
 0x18a   : > { %7459 = vrot.lane.b32.xlu0 %v29329_v9, %s29087_s27  ;;  %26871 = vmatprep.subr.msk.mxu1 %vm1076_vm0, %v4793_v62  ;;  %v4794_v3 = vsel %vm4789_vm13, %v4780_v60, %v4782_v61 }
 0x18b   : > { %7461 = vrot.lane.b32.xlu1 %v29343_v15, %s29087_s27  ;;  %26872 = vmatpush1.msk.msra.mxu1 %vm1076_vm0, %v4792_v63 }
 0x18c   : > { %v4784_v0 = vpop.permute.xlu0 %4783  ;;  %26873 = vmatmul.mubr.msk.f32.vlgmr.msra.gmra.mrb[0].mxu1 %vm32968_vm2, %v26867_v57 }
 0x18d   : > { %v4786_v1 = vpop.permute.xlu1 %4785  ;;  %v4795_v2 = vsel %vm4789_vm13, %v4782_v61, %v4784_v0  ;;  %5094 = vmatprep.mubr.f32.mxu1 %v29069_v16 }
 0x18e   : > { %7463 = vrot.lane.b32.xlu0 %v29353_v18, %s29087_s27  ;;  %26874 = vmatprep.subr.msk.mxu0 %vm1076_vm0, %v4795_v2  ;;  %v4796_v10 = vsel %vm4789_vm13, %v4784_v0, %v4786_v1 }
 0x18f   : > { %7465 = vrot.lane.b32.xlu1 %v29359_v19, %s29087_s27  ;;  %26875 = vmatpush1.msk.msra.mxu0 %vm1076_vm0, %v4794_v3 }
 0x190   : > { %v4788_v5 = vpop.permute.xlu0 %4787  ;;  %26876 = vmatmul.mubr.msk.f32.vlgmr.msra.gmra.mrb[2].mxu0 %vm32968_vm2, %v26867_v57 }
 0x191   : > { %v4797_v6 = vsel %vm4789_vm13, %v4786_v1, %v4788_v5  ;;  %v5114_v7 = vpop.permute.xlu1 %5113  ;;  %5221 = vmatprep.mubr.f32.mxu0 %v29069_v16  ;;  %vm8831_vm13 = vcmask 220160  }
 0x192   : > { %7467 = vrot.lane.b32.xlu0 %v29889_v51, %s29087_s27  ;;  %26877 = vmatprep.subr.msk.mxu1 %vm1076_vm0, %v4797_v6 }
 0x193   : > { %7469 = vrot.lane.b32.xlu1 %v29893_v52, %s29087_s27  ;;  %26878 = vmatpush1.msk.msra.mxu1 %vm1076_vm0, %v4796_v10  ;;  %s29092_s27 = smov 19  }
 0x194   : > { %v5116_v8 = vpop.permute.xlu0 %5115  ;;  %26879 = vmatmul.mubr.msk.f32.vlgmr.msra.gmra.mrb[2].mxu1 %vm32968_vm2, %v26867_v57 }
 0x195   : > { %v5112_v11 = vpop.permute.xlu1 %5111  ;;  %v5131_v12 = vsel %vm5129_vm14, %v5114_v7, %v5116_v8  ;;  %5292 = vmatprep.mubr.f32.mxu1 %v29069_v16 }
 0x196   : > { %v5130_v22 = vsel %vm5129_vm14, %v5112_v11, %v5114_v7  ;;  %7795 = vrot.lane.b32.xlu0 %v29335_v13, %s29088_s0  ;;  %26881 = vmatprep.subr.msk.mxu0 %vm1076_vm0, %v5131_v12  ;;  %v26932_v11 = vld [vmem:[%s33013_s9 + $0x40] sm:$0xf] }
 0x197   : > { %7797 = vrot.lane.b32.xlu1 %v29351_v17, %s29088_s0  ;;  %26882 = vmatpush1.msk.msra.mxu0 %vm1076_vm0, %v5130_v22 }
 0x198   : > { %v5118_v23 = vpop.permute.xlu0 %5117  ;;  %26883 = vmatmul.mubr.msk.f32.vlgmr.msra.gmra.mrb[0].mxu0 %vm32968_vm2, %v26880_v21 }
 0x199   : > { %v5132_v24 = vsel %vm5129_vm14, %v5116_v8, %v5118_v23  ;;  %v5120_v25 = vpop.permute.xlu1 %5119  ;;  %5363 = vmatprep.mubr.f32.mxu0 %v29069_v16 }
 0x19a   : > { %7793 = vrot.lane.b32.xlu0 %v29339_v14, %s29088_s0  ;;  %v5133_v26 = vsel %vm5129_vm14, %v5118_v23, %v5120_v25 }
 0x19b   : > { %7799 = vrot.lane.b32.xlu1 %v29329_v9, %s29088_s0  ;;  %26884 = vmatprep.subr.msk.mxu1 %vm1076_vm0, %v5133_v26 }
 0x19c   : > { %26885 = vmatpush1.msk.msra.mxu1 %vm1076_vm0, %v5132_v24  ;;  %v5122_v27 = vpop.permute.xlu0 %5121 }
 0x19d   : > { %v5134_v28 = vsel %vm5129_vm14, %v5120_v25, %v5122_v27  ;;  %v5124_v29 = vpop.permute.xlu1 %5123  ;;  %26886 = vmatmul.mubr.msk.f32.vlgmr.msra.gmra.mrb[0].mxu1 %vm32968_vm2, %v26880_v21 }
 0x19e   : > { %7801 = vrot.lane.b32.xlu0 %v29343_v15, %s29088_s0  ;;  %v5135_v30 = vsel %vm5129_vm14, %v5122_v27, %v5124_v29  ;;  %5434 = vmatprep.mubr.f32.mxu1 %v29069_v16 }
 0x19f   : > { %7803 = vrot.lane.b32.xlu1 %v29353_v18, %s29088_s0  ;;  %26887 = vmatprep.subr.msk.mxu0 %vm1076_vm0, %v5135_v30 }
 0x1a0   : > { %26888 = vmatpush1.msk.msra.mxu0 %vm1076_vm0, %v5134_v28  ;;  %v5126_v31 = vpop.permute.xlu0 %5125 }
 0x1a1   : > { %v5136_v32 = vsel %vm5129_vm14, %v5124_v29, %v5126_v31  ;;  %v5128_v33 = vpop.permute.xlu1 %5127  ;;  %26889 = vmatmul.mubr.msk.f32.vlgmr.msra.gmra.mrb[2].mxu0 %vm32968_vm2, %v26880_v21  ;;  %26894 = vmatprep.subr.msk.mxu0 %vm1076_vm0, %v29335_v13 }
 0x1a2   : > { %v5137_v34 = vsel %vm5129_vm14, %v5126_v31, %v5128_v33  ;;  %7805 = vrot.lane.b32.xlu0 %v29359_v19, %s29088_s0  ;;  %26895 = vmatpush1.msk.msra.mxu0 %vm1076_vm0, %v29339_v14  ;;  %vm9171_vm14 = vcmask 154624  }
 0x1a3   : > { %7807 = vrot.lane.b32.xlu1 %v29889_v51, %s29088_s0  ;;  %26890 = vmatprep.subr.msk.mxu1 %vm1076_vm0, %v5137_v34 }
 0x1a4   : > { %26891 = vmatpush1.msk.msra.mxu1 %vm1076_vm0, %v5136_v32  ;;  %v5767_v36 = vpop.permute.xlu0 %5766  ;;  %5534 = vmatprep.mubr.f32.mxu0 %v29069_v16 }
 0x1a5   : > { %26900 = vmatprep.subr.msk.mxu0 %vm1076_vm0, %v29353_v18  ;;  %v5769_v37 = vpop.permute.xlu1 %5768  ;;  %26896 = vmatmul.mubr.msk.f32.vlgmr.msra.gmra.mrb[0].mxu0 %vm32968_vm2, %v26893_v35 }
 0x1a6   : > { %26901 = vmatpush1.msk.msra.mxu0 %vm1076_vm0, %v29343_v15  ;;  %7809 = vrot.lane.b32.xlu0 %v29893_v52, %s29088_s0  ;;  %v5782_v38 = vsel %vm5780_vm15, %v5767_v36, %v5769_v37  ;;  %s29093_s0 = smov 18  }
 0x1a7   : > { %8135 = vrot.lane.b32.xlu1 %v29335_v13, %s29089_s2  ;;  %26892 = vmatmul.mubr.msk.f32.vlgmr.msra.gmra.mrb[2].mxu1 %vm32968_vm2, %v26880_v21 }
 0x1a8   : > { %26907 = vmatprep.subr.msk.mxu0 %vm1076_vm0, %v5782_v38  ;;  %v5765_v39 = vpop.permute.xlu0 %5764  ;;  %26897 = vmatprep.subr.msk.mxu1 %vm1076_vm0, %v29329_v9 }
 0x1a9   : > { %v5771_v20 = vpop.permute.xlu1 %5770  ;;  %26898 = vmatpush1.msk.msra.mxu1 %vm1076_vm0, %v29351_v17  ;;  %5605 = vmatprep.mubr.f32.mxu1 %v29069_v16  ;;  %v5781_v40 = vsel %vm5780_vm15, %v5765_v39, %v5767_v36 }
 0x1aa   : > { %5676 = vmatprep.mubr.f32.mxu0 %v29069_v16  ;;  %8137 = vrot.lane.b32.xlu0 %v29351_v17, %s29089_s2  ;;  %v5783_v44 = vsel %vm5780_vm15, %v5769_v37, %v5771_v20 }
 0x1ab   : > { %8133 = vrot.lane.b32.xlu1 %v29339_v14, %s29089_s2  ;;  %26899 = vmatmul.mubr.msk.f32.vlgmr.msra.gmra.mrb[0].mxu1 %vm32968_vm2, %v26893_v35 }
 0x1ac   : > { %26902 = vmatmul.mubr.msk.f32.vlgmr.msra.gmra.mrb[2].mxu0 %vm32968_vm2, %v26893_v35  ;;  %v5773_v41 = vpop.permute.xlu0 %5772  ;;  %26903 = vmatprep.subr.msk.mxu1 %vm1076_vm0, %v29889_v51 }
 0x1ad   : > { %26908 = vmatpush1.msk.msra.mxu0 %vm1076_vm0, %v5781_v40  ;;  %v5775_v42 = vpop.permute.xlu1 %5774  ;;  %26904 = vmatpush1.msk.msra.mxu1 %vm1076_vm0, %v29359_v19  ;;  %v5784_v43 = vsel %vm5780_vm15, %v5771_v20, %v5773_v41 }
 0x1ae   : > { %5747 = vmatprep.mubr.f32.mxu1 %v29069_v16  ;;  %8139 = vrot.lane.b32.xlu0 %v29329_v9, %s29089_s2  ;;  %v5785_v53 = vsel %vm5780_vm15, %v5773_v41, %v5775_v42 }
 0x1af   : > { %8141 = vrot.lane.b32.xlu1 %v29343_v15, %s29089_s2  ;;  %26905 = vmatmul.mubr.msk.f32.vlgmr.msra.gmra.mrb[2].mxu1 %vm32968_vm2, %v26893_v35  ;;  %v26945_v35 = vld [vmem:[%s33013_s9 + $0x44] sm:$0xf] }
 0x1b0   : > { %26910 = vmatprep.subr.msk.mxu1 %vm1076_vm0, %v5784_v43  ;;  %v5777_v45 = vpop.permute.xlu0 %5776  ;;  %5942 = vmatprep.mubr.f32.mxu1 %v29069_v16 }
 0x1b1   : > { %26911 = vmatpush1.msk.msra.mxu1 %vm1076_vm0, %v5783_v44  ;;  %v5779_v47 = vpop.permute.xlu1 %5778  ;;  %5871 = vmatprep.mubr.f32.mxu0 %v29069_v16  ;;  %v5786_v48 = vsel %vm5780_vm15, %v5775_v42, %v5777_v45 }
 0x1b2   : > { %v5787_v49 = vsel %vm5780_vm15, %v5777_v45, %v5779_v47  ;;  %26916 = vmatprep.subr.msk.mxu1 %vm1076_vm0, %v5779_v47  ;;  %8143 = vrot.lane.b32.xlu0 %v29353_v18, %s29089_s2 }
 0x1b3   : > { %8145 = vrot.lane.b32.xlu1 %v29359_v19, %s29089_s2  ;;  %26912 = vmatmul.mubr.msk.f32.vlgmr.msra.gmra.mrb[0].mxu1 %vm32968_vm2, %v26906_v46 }
 0x1b4   : > { %26913 = vmatprep.subr.msk.mxu0 %vm1076_vm0, %v5786_v48  ;;  %26917 = vmatpush1.msk.msra.mxu1 %vm1076_vm0, %v5787_v49  ;;  %v6104_v50 = vpop.permute.xlu0 %6103 }
 0x1b5   : > { %26909 = vmatmul.mubr.msk.f32.vlgmr.msra.gmra.mrb[0].mxu0 %vm32968_vm2, %v26906_v46  ;;  %v6106_v54 = vpop.permute.xlu1 %6105  ;;  %6084 = vmatprep.mubr.f32.mxu1 %v29069_v16 }
 0x1b6   : > { %26914 = vmatpush1.msk.msra.mxu0 %vm1076_vm0, %v5785_v53  ;;  %8147 = vrot.lane.b32.xlu0 %v29889_v51, %s29089_s2  ;;  %v6119_v55 = vsel %vm6117_vm1, %v6104_v50, %v6106_v54 }
 0x1b7   : > { %8149 = vrot.lane.b32.xlu1 %v29893_v52, %s29089_s2  ;;  %26920 = vmatprep.subr.msk.mxu0 %vm1076_vm0, %v6119_v55  ;;  %s29094_s2 = smov 17  }
 0x1b8   : > { %v6102_v56 = vpop.permute.xlu0 %6101  ;;  %6013 = vmatprep.mubr.f32.mxu0 %v29069_v16  ;;  %26918 = vmatmul.mubr.msk.f32.vlgmr.msra.gmra.mrb[2].mxu1 %vm32968_vm2, %v26906_v46 }
 0x1b9   : > { %v6118_v57 = vsel %vm6117_vm1, %v6102_v56, %v6104_v50  ;;  %v6108_v58 = vpop.permute.xlu1 %6107  ;;  %26915 = vmatmul.mubr.msk.f32.vlgmr.msra.gmra.mrb[2].mxu0 %vm32968_vm2, %v26906_v46  ;;  %6279 = vmatprep.mubr.f32.mxu1 %v29069_v16  ;;  %v26958_v50 = vld [vmem:[%s33013_s9 + $0x48] sm:$0xf] }
 0x1ba   : > { %8475 = vrot.lane.b32.xlu0 %v29335_v13, %s29090_s7  ;;  %26921 = vmatpush1.msk.msra.mxu0 %vm1076_vm0, %v6118_v57  ;;  %v6120_v63 = vsel %vm6117_vm1, %v6106_v54, %v6108_v58 }
 0x1bb   : > { %8477 = vrot.lane.b32.xlu1 %v29351_v17, %s29090_s7  ;;  %6208 = vmatprep.mubr.f32.mxu0 %v29069_v16 }
 0x1bc   : > { %v6110_v60 = vpop.permute.xlu0 %6109 }
 0x1bd   : > { %v6112_v61 = vpop.permute.xlu1 %6111  ;;  %v6121_v62 = vsel %vm6117_vm1, %v6108_v58, %v6110_v60  ;;  %26922 = vmatmul.mubr.msk.f32.vlgmr.msra.gmra.mrb[0].mxu0 %vm32968_vm2, %v26919_v59 }
 0x1be   : > { %8473 = vrot.lane.b32.xlu0 %v29339_v14, %s29090_s7  ;;  %26923 = vmatprep.subr.msk.mxu1 %vm1076_vm0, %v6121_v62  ;;  %v6122_v5 = vsel %vm6117_vm1, %v6110_v60, %v6112_v61 }
 0x1bf   : > { %8479 = vrot.lane.b32.xlu1 %v29329_v9, %s29090_s7  ;;  %26924 = vmatpush1.msk.msra.mxu1 %vm1076_vm0, %v6120_v63 }
 0x1c0   : > { %v6114_v0 = vpop.permute.xlu0 %6113  ;;  %26925 = vmatmul.mubr.msk.f32.vlgmr.msra.gmra.mrb[0].mxu1 %vm32968_vm2, %v26919_v59  ;;  %6350 = vmatprep.mubr.f32.mxu0 %v29069_v16 }
 0x1c1   : > { %v6116_v1 = vpop.permute.xlu1 %6115  ;;  %v6123_v2 = vsel %vm6117_vm1, %v6112_v61, %v6114_v0  ;;  %6421 = vmatprep.mubr.f32.mxu1 %v29069_v16 }
 0x1c2   : > { %v6124_v3 = vsel %vm6117_vm1, %v6114_v0, %v6116_v1  ;;  %26929 = vmatprep.subr.msk.mxu1 %vm1076_vm0, %v6116_v1  ;;  %8481 = vrot.lane.b32.xlu0 %v29343_v15, %s29090_s7  ;;  %vm9511_vm1 = vcmask 146432  }
 0x1c3   : > { %8483 = vrot.lane.b32.xlu1 %v29353_v18, %s29090_s7  ;;  %26926 = vmatprep.subr.msk.mxu0 %vm1076_vm0, %v6123_v2 }
 0x1c4   : > { %26930 = vmatpush1.msk.msra.mxu1 %vm1076_vm0, %v6124_v3  ;;  %26927 = vmatpush1.msk.msra.mxu0 %vm1076_vm0, %v6122_v5  ;;  %v6441_v6 = vpop.permute.xlu0 %6440 }
 0x1c5   : > { %v6443_v7 = vpop.permute.xlu1 %6442  ;;  %26928 = vmatmul.mubr.msk.f32.vlgmr.msra.gmra.mrb[2].mxu0 %vm32968_vm2, %v26919_v59  ;;  %26931 = vmatmul.mubr.msk.f32.vlgmr.msra.gmra.mrb[2].mxu1 %vm32968_vm2, %v26919_v59 }
 0x1c6   : > { %8485 = vrot.lane.b32.xlu0 %v29359_v19, %s29090_s7  ;;  %v6456_v10 = vsel %vm6454_vm3, %v6441_v6, %v6443_v7  ;;  %6616 = vmatprep.mubr.f32.mxu1 %v29069_v16 }
 0x1c7   : > { %8487 = vrot.lane.b32.xlu1 %v29889_v51, %s29090_s7  ;;  %26933 = vmatprep.subr.msk.mxu0 %vm1076_vm0, %v6456_v10 }
 0x1c8   : > { %v6439_v8 = vpop.permute.xlu0 %6438  ;;  %6545 = vmatprep.mubr.f32.mxu0 %v29069_v16 }
 0x1c9   : > { %v6455_v12 = vsel %vm6454_vm3, %v6439_v8, %v6441_v6  ;;  %v6445_v21 = vpop.permute.xlu1 %6444 }
 0x1ca   : > { %8489 = vrot.lane.b32.xlu0 %v29893_v52, %s29090_s7  ;;  %26934 = vmatpush1.msk.msra.mxu0 %vm1076_vm0, %v6455_v12  ;;  %v6457_v25 = vsel %vm6454_vm3, %v6443_v7, %v6445_v21  ;;  %v26971_v7 = vld [vmem:[%s33013_s9 + $0x4c] sm:$0xf] }
 0x1cb   : > { %8815 = vrot.lane.b32.xlu1 %v29335_v13, %s29091_s26  ;;  %26935 = vmatmul.mubr.msk.f32.vlgmr.msra.gmra.mrb[0].mxu0 %vm32968_vm2, %v26932_v11 }
 0x1cc   : > { %v6447_v22 = vpop.permute.xlu0 %6446  ;;  %6687 = vmatprep.mubr.f32.mxu0 %v29069_v16 }
 0x1cd   : > { %v6449_v23 = vpop.permute.xlu1 %6448  ;;  %v6458_v24 = vsel %vm6454_vm3, %v6445_v21, %v6447_v22 }
 0x1ce   : > { %8817 = vrot.lane.b32.xlu0 %v29351_v17, %s29091_s26  ;;  %26936 = vmatprep.subr.msk.mxu1 %vm1076_vm0, %v6458_v24  ;;  %v6459_v30 = vsel %vm6454_vm3, %v6447_v22, %v6449_v23 }
 0x1cf   : > { %8813 = vrot.lane.b32.xlu1 %v29339_v14, %s29091_s26  ;;  %26937 = vmatpush1.msk.msra.mxu1 %vm1076_vm0, %v6457_v25 }
 0x1d0   : > { %v6451_v26 = vpop.permute.xlu0 %6450  ;;  %26938 = vmatmul.mubr.msk.f32.vlgmr.msra.gmra.mrb[0].mxu1 %vm32968_vm2, %v26932_v11 }
 0x1d1   : > { %v6453_v27 = vpop.permute.xlu1 %6452  ;;  %v6460_v28 = vsel %vm6454_vm3, %v6449_v23, %v6451_v26  ;;  %6758 = vmatprep.mubr.f32.mxu1 %v29069_v16 }
 0x1d2   : > { %v6461_v29 = vsel %vm6454_vm3, %v6451_v26, %v6453_v27  ;;  %26942 = vmatprep.subr.msk.mxu1 %vm1076_vm0, %v6453_v27  ;;  %8819 = vrot.lane.b32.xlu0 %v29329_v9, %s29091_s26 }
 0x1d3   : > { %8821 = vrot.lane.b32.xlu1 %v29343_v15, %s29091_s26  ;;  %26939 = vmatprep.subr.msk.mxu0 %vm1076_vm0, %v6460_v28 }
 0x1d4   : > { %26943 = vmatpush1.msk.msra.mxu1 %vm1076_vm0, %v6461_v29  ;;  %26940 = vmatpush1.msk.msra.mxu0 %vm1076_vm0, %v6459_v30  ;;  %v6778_v31 = vpop.permute.xlu0 %6777  ;;  %v29095_v30 = vmov 0  }
 0x1d5   : > { %v6780_v32 = vpop.permute.xlu1 %6779  ;;  %26941 = vmatmul.mubr.msk.f32.vlgmr.msra.gmra.mrb[2].mxu0 %vm32968_vm2, %v26932_v11  ;;  %26944 = vmatmul.mubr.msk.f32.vlgmr.msra.gmra.mrb[2].mxu1 %vm32968_vm2, %v26932_v11 }
 0x1d6   : > { %8823 = vrot.lane.b32.xlu0 %v29353_v18, %s29091_s26  ;;  %v6793_v33 = vsel %vm6791_vm4, %v6778_v31, %v6780_v32  ;;  %6953 = vmatprep.mubr.f32.mxu1 %v29069_v16 }
 0x1d7   : > { %8825 = vrot.lane.b32.xlu1 %v29359_v19, %s29091_s26  ;;  %26946 = vmatprep.subr.msk.mxu0 %vm1076_vm0, %v6793_v33 }
 0x1d8   : > { %v6776_v34 = vpop.permute.xlu0 %6775  ;;  %6882 = vmatprep.mubr.f32.mxu0 %v29069_v16  ;;  %29022 = vset.pattern.permute.xlu1 %v29095_v30 }
 0x1d9   : > { %v6792_v36 = vsel %vm6791_vm4, %v6776_v34, %v6778_v31  ;;  %v6782_v37 = vpop.permute.xlu1 %6781  ;;  %v26984_v31 = vld [vmem:[%s33013_s9 + $0x50] sm:$0xf]  ;;  %29023 = vset.pattern.permute.xlu0 %v29095_v30 }
 0x1da   : > { %8827 = vrot.lane.b32.xlu0 %v29889_v51, %s29091_s26  ;;  %26947 = vmatpush1.msk.msra.mxu0 %vm1076_vm0, %v6792_v36  ;;  %v6794_v40 = vsel %vm6791_vm4, %v6780_v32, %v6782_v37 }
 0x1db   : > { %8829 = vrot.lane.b32.xlu1 %v29893_v52, %s29091_s26  ;;  %26948 = vmatmul.mubr.msk.f32.vlgmr.msra.gmra.mrb[0].mxu0 %vm32968_vm2, %v26945_v35 }
 0x1dc   : > { %v6784_v38 = vpop.permute.xlu0 %6783  ;;  %7024 = vmatprep.mubr.f32.mxu0 %v29069_v16 }
 0x1dd   : > { %v6786_v39 = vpop.permute.xlu1 %6785  ;;  %v6795_v20 = vsel %vm6791_vm4, %v6782_v37, %v6784_v38 }
 0x1de   : > { %9155 = vrot.lane.b32.xlu0 %v29335_v13, %s29092_s27  ;;  %26949 = vmatprep.subr.msk.mxu1 %vm1076_vm0, %v6795_v20  ;;  %v6796_v45 = vsel %vm6791_vm4, %v6784_v38, %v6786_v39 }
 0x1df   : > { %9157 = vrot.lane.b32.xlu1 %v29351_v17, %s29092_s27  ;;  %26950 = vmatpush1.msk.msra.mxu1 %vm1076_vm0, %v6794_v40 }
 0x1e0   : > { %v6788_v41 = vpop.permute.xlu0 %6787  ;;  %26951 = vmatmul.mubr.msk.f32.vlgmr.msra.gmra.mrb[0].mxu1 %vm32968_vm2, %v26945_v35 }
 0x1e1   : > { %v6790_v42 = vpop.permute.xlu1 %6789  ;;  %v6797_v43 = vsel %vm6791_vm4, %v6786_v39, %v6788_v41  ;;  %7095 = vmatprep.mubr.f32.mxu1 %v29069_v16 }
 0x1e2   : > { %v6798_v44 = vsel %vm6791_vm4, %v6788_v41, %v6790_v42  ;;  %26955 = vmatprep.subr.msk.mxu1 %vm1076_vm0, %v6790_v42  ;;  %9153 = vrot.lane.b32.xlu0 %v29339_v14, %s29092_s27 }
 0x1e3   : > { %9159 = vrot.lane.b32.xlu1 %v29329_v9, %s29092_s27  ;;  %26952 = vmatprep.subr.msk.mxu0 %vm1076_vm0, %v6797_v43 }
 0x1e4   : > { %26956 = vmatpush1.msk.msra.mxu1 %vm1076_vm0, %v6798_v44  ;;  %26953 = vmatpush1.msk.msra.mxu0 %vm1076_vm0, %v6796_v45  ;;  %v7116_v46 = vpop.permute.xlu0 %7115  ;;  %v26997_v44 = vld [vmem:[%s33013_s9 + $0x54] sm:$0xf] }
 0x1e5   : > { %v7118_v47 = vpop.permute.xlu1 %7117  ;;  %26954 = vmatmul.mubr.msk.f32.vlgmr.msra.gmra.mrb[2].mxu0 %vm32968_vm2, %v26945_v35  ;;  %26957 = vmatmul.mubr.msk.f32.vlgmr.msra.gmra.mrb[2].mxu1 %vm32968_vm2, %v26945_v35 }
 0x1e6   : > { %9161 = vrot.lane.b32.xlu0 %v29343_v15, %s29092_s27  ;;  %v7133_v48 = vsel %vm7131_vm5, %v7116_v46, %v7118_v47  ;;  %7223 = vmatprep.mubr.f32.mxu0 %v29069_v16 }
 0x1e7   : > { %9163 = vrot.lane.b32.xlu1 %v29353_v18, %s29092_s27  ;;  %26959 = vmatprep.subr.msk.mxu0 %vm1076_vm0, %v7133_v48 }
 0x1e8   : > { %v7114_v49 = vpop.permute.xlu0 %7113  ;;  %7294 = vmatprep.mubr.f32.mxu1 %v29069_v16 }
 0x1e9   : > { %v7132_v53 = vsel %vm7131_vm5, %v7114_v49, %v7116_v46  ;;  %v7120_v54 = vpop.permute.xlu1 %7119 }
 0x1ea   : > { %9165 = vrot.lane.b32.xlu0 %v29359_v19, %s29092_s27  ;;  %26960 = vmatpush1.msk.msra.mxu0 %vm1076_vm0, %v7132_v53  ;;  %v7134_v58 = vsel %vm7131_vm5, %v7118_v47, %v7120_v54 }
 0x1eb   : > { %9167 = vrot.lane.b32.xlu1 %v29889_v51, %s29092_s27  ;;  %26961 = vmatmul.mubr.msk.f32.vlgmr.msra.gmra.mrb[0].mxu0 %vm32968_vm2, %v26958_v50 }
 0x1ec   : > { %v7122_v55 = vpop.permute.xlu0 %7121  ;;  %7365 = vmatprep.mubr.f32.mxu0 %v29069_v16 }
 0x1ed   : > { %v7124_v56 = vpop.permute.xlu1 %7123  ;;  %v7135_v57 = vsel %vm7131_vm5, %v7120_v54, %v7122_v55 }
 0x1ee   : > { %9169 = vrot.lane.b32.xlu0 %v29893_v52, %s29092_s27  ;;  %26962 = vmatprep.subr.msk.mxu1 %vm1076_vm0, %v7135_v57  ;;  %v7136_v62 = vsel %vm7131_vm5, %v7122_v55, %v7124_v56  ;;  %s32965_s27 = smov 106  }
 0x1ef   : > { %9495 = vrot.lane.b32.xlu1 %v29335_v13, %s29093_s0  ;;  %26963 = vmatpush1.msk.msra.mxu1 %vm1076_vm0, %v7134_v58 }
 0x1f0   : > { %v7126_v59 = vpop.permute.xlu0 %7125  ;;  %26964 = vmatmul.mubr.msk.f32.vlgmr.msra.gmra.mrb[0].mxu1 %vm32968_vm2, %v26958_v50 }
 0x1f1   : > { %v7128_v60 = vpop.permute.xlu1 %7127  ;;  %v7137_v61 = vsel %vm7131_vm5, %v7124_v56, %v7126_v59  ;;  %7436 = vmatprep.mubr.f32.mxu1 %v29069_v16 }
 0x1f2   : > { %9497 = vrot.lane.b32.xlu0 %v29351_v17, %s29093_s0  ;;  %26965 = vmatprep.subr.msk.mxu0 %vm1076_vm0, %v7137_v61  ;;  %v7138_v2 = vsel %vm7131_vm5, %v7126_v59, %v7128_v60 }
 0x1f3   : > { %9493 = vrot.lane.b32.xlu1 %v29339_v14, %s29093_s0  ;;  %26966 = vmatpush1.msk.msra.mxu0 %vm1076_vm0, %v7136_v62 }
 0x1f4   : > { %v7130_v63 = vpop.permute.xlu0 %7129  ;;  %26967 = vmatmul.mubr.msk.f32.vlgmr.msra.gmra.mrb[2].mxu0 %vm32968_vm2, %v26958_v50 }
 0x1f5   : > { %v7139_v0 = vsel %vm7131_vm5, %v7128_v60, %v7130_v63  ;;  %v7456_v1 = vpop.permute.xlu1 %7455  ;;  %7563 = vmatprep.mubr.f32.mxu0 %v29069_v16  ;;  %vm9851_vm5 = vcmask 138240  }
 0x1f6   : > { %9499 = vrot.lane.b32.xlu0 %v29329_v9, %s29093_s0  ;;  %26968 = vmatprep.subr.msk.mxu1 %vm1076_vm0, %v7139_v0  ;;  %v27010_v0 = vld [vmem:[%s33013_s9 + $0x58] sm:$0xf] }
 0x1f7   : > { %9501 = vrot.lane.b32.xlu1 %v29343_v15, %s29093_s0  ;;  %26969 = vmatpush1.msk.msra.mxu1 %vm1076_vm0, %v7138_v2 }
 0x1f8   : > { %v7458_v3 = vpop.permute.xlu0 %7457  ;;  %26970 = vmatmul.mubr.msk.f32.vlgmr.msra.gmra.mrb[2].mxu1 %vm32968_vm2, %v26958_v50 }
 0x1f9   : > { %v7454_v5 = vpop.permute.xlu1 %7453  ;;  %v7473_v6 = vsel %vm7471_vm6, %v7456_v1, %v7458_v3  ;;  %7634 = vmatprep.mubr.f32.mxu1 %v29069_v16 }
 0x1fa   : > { %v7472_v10 = vsel %vm7471_vm6, %v7454_v5, %v7456_v1  ;;  %9503 = vrot.lane.b32.xlu0 %v29353_v18, %s29093_s0  ;;  %26972 = vmatprep.subr.msk.mxu0 %vm1076_vm0, %v7473_v6 }
 0x1fb   : > { %9505 = vrot.lane.b32.xlu1 %v29359_v19, %s29093_s0  ;;  %26973 = vmatpush1.msk.msra.mxu0 %vm1076_vm0, %v7472_v10 }
 0x1fc   : > { %v7460_v8 = vpop.permute.xlu0 %7459  ;;  %26974 = vmatmul.mubr.msk.f32.vlgmr.msra.gmra.mrb[0].mxu0 %vm32968_vm2, %v26971_v7 }
 0x1fd   : > { %v7474_v11 = vsel %vm7471_vm6, %v7458_v3, %v7460_v8  ;;  %v7462_v12 = vpop.permute.xlu1 %7461  ;;  %7705 = vmatprep.mubr.f32.mxu0 %v29069_v16 }
 0x1fe   : > { %9507 = vrot.lane.b32.xlu0 %v29889_v51, %s29093_s0  ;;  %v7475_v21 = vsel %vm7471_vm6, %v7460_v8, %v7462_v12 }
 0x1ff   : > { %9509 = vrot.lane.b32.xlu1 %v29893_v52, %s29093_s0  ;;  %26975 = vmatprep.subr.msk.mxu1 %vm1076_vm0, %v7475_v21 }
 0x200   : > { %26976 = vmatpush1.msk.msra.mxu1 %vm1076_vm0, %v7474_v11  ;;  %v7464_v22 = vpop.permute.xlu0 %7463 }
 0x201   : > { %v7476_v23 = vsel %vm7471_vm6, %v7462_v12, %v7464_v22  ;;  %v7466_v24 = vpop.permute.xlu1 %7465  ;;  %26977 = vmatmul.mubr.msk.f32.vlgmr.msra.gmra.mrb[0].mxu1 %vm32968_vm2, %v26971_v7 }
 0x202   : > { %9835 = vrot.lane.b32.xlu0 %v29335_v13, %s29094_s2  ;;  %v7477_v25 = vsel %vm7471_vm6, %v7464_v22, %v7466_v24  ;;  %7776 = vmatprep.mubr.f32.mxu1 %v29069_v16 }
 0x203   : > { %9837 = vrot.lane.b32.xlu1 %v29351_v17, %s29094_s2  ;;  %26978 = vmatprep.subr.msk.mxu0 %vm1076_vm0, %v7477_v25 }
 0x204   : > { %26979 = vmatpush1.msk.msra.mxu0 %vm1076_vm0, %v7476_v23  ;;  %v7468_v26 = vpop.permute.xlu0 %7467 }
 0x205   : > { %v7478_v27 = vsel %vm7471_vm6, %v7466_v24, %v7468_v26  ;;  %v7470_v28 = vpop.permute.xlu1 %7469  ;;  %26980 = vmatmul.mubr.msk.f32.vlgmr.msra.gmra.mrb[2].mxu0 %vm32968_vm2, %v26971_v7 }
 0x206   : > { %v7479_v29 = vsel %vm7471_vm6, %v7468_v26, %v7470_v28  ;;  %9833 = vrot.lane.b32.xlu0 %v29339_v14, %s29094_s2  ;;  %7903 = vmatprep.mubr.f32.mxu0 %v29069_v16  ;;  %v27023_v28 = vld [vmem:[%s33013_s9 + $0x5c] sm:$0xf]  ;;  %vm10277_vm6 = vcmask 1043456  }
 0x207   : > { %9839 = vrot.lane.b32.xlu1 %v29329_v9, %s29094_s2  ;;  %26981 = vmatprep.subr.msk.mxu1 %vm1076_vm0, %v7479_v29 }
 0x208   : > { %26982 = vmatpush1.msk.msra.mxu1 %vm1076_vm0, %v7478_v27  ;;  %v7796_v13 = vpop.permute.xlu0 %7795 }
 0x209   : > { %v7798_v17 = vpop.permute.xlu1 %7797  ;;  %26983 = vmatmul.mubr.msk.f32.vlgmr.msra.gmra.mrb[2].mxu1 %vm32968_vm2, %v26971_v7 }
 0x20a   : > { %9841 = vrot.lane.b32.xlu0 %v29343_v15, %s29094_s2  ;;  %v7813_v14 = vsel %vm7811_vm7, %v7796_v13, %v7798_v17  ;;  %7974 = vmatprep.mubr.f32.mxu1 %v29069_v16 }
 0x20b   : > { %26985 = vmatprep.subr.msk.mxu0 %vm1076_vm0, %v7813_v14  ;;  %9843 = vrot.lane.b32.xlu1 %v29353_v18, %s29094_s2  ;;  %v10172_v18 = vld [vmem:[%s29160_s13] sm:$0xf] }
 0x20c   : > { %v7794_v9 = vpop.permute.xlu0 %7793 }
 0x20d   : > { %v7812_v32 = vsel %vm7811_vm7, %v7794_v9, %v7796_v13  ;;  %v7800_v33 = vpop.permute.xlu1 %7799 }
 0x20e   : > { %9845 = vrot.lane.b32.xlu0 %v29359_v19, %s29094_s2  ;;  %26986 = vmatpush1.msk.msra.mxu0 %vm1076_vm0, %v7812_v32  ;;  %v7814_v36 = vsel %vm7811_vm7, %v7798_v17, %v7800_v33 }
 0x20f   : > { %9847 = vrot.lane.b32.xlu1 %v29889_v51, %s29094_s2  ;;  %26987 = vmatmul.mubr.msk.f32.vlgmr.msra.gmra.mrb[0].mxu0 %vm32968_vm2, %v26984_v31 }
 0x210   : > { %v7802_v15 = vpop.permute.xlu0 %7801  ;;  %8045 = vmatprep.mubr.f32.mxu0 %v29069_v16 }
 0x211   : > { %v7804_v34 = vpop.permute.xlu1 %7803  ;;  %v7815_v35 = vsel %vm7811_vm7, %v7800_v33, %v7802_v15 }
 0x212   : > { %9849 = vrot.lane.b32.xlu0 %v29893_v52, %s29094_s2  ;;  %26988 = vmatprep.subr.msk.mxu1 %vm1076_vm0, %v7815_v35  ;;  %v7816_v38 = vsel %vm7811_vm7, %v7802_v15, %v7804_v34 }
 0x213   : > { %26989 = vmatpush1.msk.msra.mxu1 %vm1076_vm0, %v7814_v36  ;;  %10175 = vperm.xlu1 %29022, %v10172_v18  }
 0x214   : > { %v7806_v19 = vpop.permute.xlu0 %7805  ;;  %26990 = vmatmul.mubr.msk.f32.vlgmr.msra.gmra.mrb[0].mxu1 %vm32968_vm2, %v26984_v31 }
 0x215   : > { %v7808_v51 = vpop.permute.xlu1 %7807  ;;  %v7817_v37 = vsel %vm7811_vm7, %v7804_v34, %v7806_v19  ;;  %8116 = vmatprep.mubr.f32.mxu1 %v29069_v16 }
 0x216   : > { %26991 = vmatprep.subr.msk.mxu0 %vm1076_vm0, %v7817_v37  ;;  %v7818_v40 = vsel %vm7811_vm7, %v7806_v19, %v7808_v51 }
 0x217   : > { %26992 = vmatpush1.msk.msra.mxu0 %vm1076_vm0, %v7816_v38  ;;  %v27036_v38 = vld [vmem:[%s33013_s9 + $0x60] sm:$0xf] }
 0x218   : > { %v7810_v52 = vpop.permute.xlu0 %7809  ;;  %26993 = vmatmul.mubr.msk.f32.vlgmr.msra.gmra.mrb[2].mxu0 %vm32968_vm2, %v26984_v31 }
 0x219   : > { %v7819_v39 = vsel %vm7811_vm7, %v7808_v51, %v7810_v52  ;;  %v8136_v20 = vpop.permute.xlu1 %8135  ;;  %8243 = vmatprep.mubr.f32.mxu0 %v29069_v16  ;;  %vm10273_vm7 = vcmask 31744  }
 0x21a   : > { %26994 = vmatprep.subr.msk.mxu1 %vm1076_vm0, %v7819_v39 }
 0x21b   : > { %26995 = vmatpush1.msk.msra.mxu1 %vm1076_vm0, %v7818_v40 }
 0x21c   : > { %v8138_v41 = vpop.permute.xlu0 %8137  ;;  %26996 = vmatmul.mubr.msk.f32.vlgmr.msra.gmra.mrb[2].mxu1 %vm32968_vm2, %v26984_v31 }
 0x21d   : > { %v8134_v42 = vpop.permute.xlu1 %8133  ;;  %v8153_v43 = vsel %vm8151_vm10, %v8136_v20, %v8138_v41  ;;  %8314 = vmatprep.mubr.f32.mxu1 %v29069_v16 }
 0x21e   : > { %v8152_v45 = vsel %vm8151_vm10, %v8134_v42, %v8136_v20  ;;  %26998 = vmatprep.subr.msk.mxu0 %vm1076_vm0, %v8153_v43 }
 0x21f   : > { %26999 = vmatpush1.msk.msra.mxu0 %vm1076_vm0, %v8152_v45 }
 0x220   : > { %v8140_v46 = vpop.permute.xlu0 %8139  ;;  %27000 = vmatmul.mubr.msk.f32.vlgmr.msra.gmra.mrb[0].mxu0 %vm32968_vm2, %v26997_v44 }
 0x221   : > { %v8154_v47 = vsel %vm8151_vm10, %v8138_v41, %v8140_v46  ;;  %v8142_v48 = vpop.permute.xlu1 %8141  ;;  %8385 = vmatprep.mubr.f32.mxu0 %v29069_v16 }
 0x222   : > { %v8155_v49 = vsel %vm8151_vm10, %v8140_v46, %v8142_v48 }
 0x223   : > { %27001 = vmatprep.subr.msk.mxu1 %vm1076_vm0, %v8155_v49 }
 0x224   : > { %27002 = vmatpush1.msk.msra.mxu1 %vm1076_vm0, %v8154_v47  ;;  %v8144_v50 = vpop.permute.xlu0 %8143 }
 0x225   : > { %v8156_v53 = vsel %vm8151_vm10, %v8142_v48, %v8144_v50  ;;  %v8146_v54 = vpop.permute.xlu1 %8145  ;;  %27003 = vmatmul.mubr.msk.f32.vlgmr.msra.gmra.mrb[0].mxu1 %vm32968_vm2, %v26997_v44 }
 0x226   : > { %v8157_v55 = vsel %vm8151_vm10, %v8144_v50, %v8146_v54  ;;  %8456 = vmatprep.mubr.f32.mxu1 %v29069_v16 }
 0x227   : > { %27004 = vmatprep.subr.msk.mxu0 %vm1076_vm0, %v8157_v55 }
 0x228   : > { %27005 = vmatpush1.msk.msra.mxu0 %vm1076_vm0, %v8156_v53  ;;  %v8148_v56 = vpop.permute.xlu0 %8147 }
 0x229   : > { %v8158_v57 = vsel %vm8151_vm10, %v8146_v54, %v8148_v56  ;;  %v8150_v58 = vpop.permute.xlu1 %8149  ;;  %27006 = vmatmul.mubr.msk.f32.vlgmr.msra.gmra.mrb[2].mxu0 %vm32968_vm2, %v26997_v44 }
 0x22a   : > { %v8159_v59 = vsel %vm8151_vm10, %v8148_v56, %v8150_v58  ;;  %8583 = vmatprep.mubr.f32.mxu0 %v29069_v16  ;;  %v27049_v56 = vld [vmem:[%s33013_s9 + $0x64] sm:$0xf]  ;;  %vm29104_vm10 = vmmov 0  }
 0x22b   : > { %27007 = vmatprep.subr.msk.mxu1 %vm1076_vm0, %v8159_v59 }
 0x22c   : > { %27008 = vmatpush1.msk.msra.mxu1 %vm1076_vm0, %v8158_v57  ;;  %v8476_v60 = vpop.permute.xlu0 %8475 }
 0x22d   : > { %v8478_v61 = vpop.permute.xlu1 %8477  ;;  %27009 = vmatmul.mubr.msk.f32.vlgmr.msra.gmra.mrb[2].mxu1 %vm32968_vm2, %v26997_v44 }
 0x22e   : > { %v8493_v62 = vsel %vm8491_vm11, %v8476_v60, %v8478_v61  ;;  %8654 = vmatprep.mubr.f32.mxu1 %v29069_v16 }
 0x22f   : > { %27011 = vmatprep.subr.msk.mxu0 %vm1076_vm0, %v8493_v62 }
 0x230   : > { %v8474_v63 = vpop.permute.xlu0 %8473 }
 0x231   : > { %v8492_v1 = vsel %vm8491_vm11, %v8474_v63, %v8476_v60  ;;  %v8480_v2 = vpop.permute.xlu1 %8479 }
 0x232   : > { %27012 = vmatpush1.msk.msra.mxu0 %vm1076_vm0, %v8492_v1  ;;  %v8494_v7 = vsel %vm8491_vm11, %v8478_v61, %v8480_v2 }
 0x233   : > { %27013 = vmatmul.mubr.msk.f32.vlgmr.msra.gmra.mrb[0].mxu0 %vm32968_vm2, %v27010_v0 }
 0x234   : > { %v8482_v3 = vpop.permute.xlu0 %8481  ;;  %8725 = vmatprep.mubr.f32.mxu0 %v29069_v16 }
 0x235   : > { %v8484_v5 = vpop.permute.xlu1 %8483  ;;  %v8495_v6 = vsel %vm8491_vm11, %v8480_v2, %v8482_v3 }
 0x236   : > { %27014 = vmatprep.subr.msk.mxu1 %vm1076_vm0, %v8495_v6  ;;  %v8496_v12 = vsel %vm8491_vm11, %v8482_v3, %v8484_v5 }
 0x237   : > { %27015 = vmatpush1.msk.msra.mxu1 %vm1076_vm0, %v8494_v7 }
 0x238   : > { %v8486_v10 = vpop.permute.xlu0 %8485  ;;  %27016 = vmatmul.mubr.msk.f32.vlgmr.msra.gmra.mrb[0].mxu1 %vm32968_vm2, %v27010_v0 }
 0x239   : > { %v8488_v8 = vpop.permute.xlu1 %8487  ;;  %v8497_v11 = vsel %vm8491_vm11, %v8484_v5, %v8486_v10  ;;  %8796 = vmatprep.mubr.f32.mxu1 %v29069_v16 }
 0x23a   : > { %27017 = vmatprep.subr.msk.mxu0 %vm1076_vm0, %v8497_v11  ;;  %v8498_v24 = vsel %vm8491_vm11, %v8486_v10, %v8488_v8 }
 0x23b   : > { %27018 = vmatpush1.msk.msra.mxu0 %vm1076_vm0, %v8496_v12  ;;  %v27062_v12 = vld [vmem:[%s33013_s9 + $0x68] sm:$0xf]  ;;  %s29141_s9 = smov 105  }
 0x23c   : > { %v8490_v21 = vpop.permute.xlu0 %8489  ;;  %27019 = vmatmul.mubr.msk.f32.vlgmr.msra.gmra.mrb[2].mxu0 %vm32968_vm2, %v27010_v0 }
 0x23d   : > { %v8499_v22 = vsel %vm8491_vm11, %v8488_v8, %v8490_v21  ;;  %v8816_v23 = vpop.permute.xlu1 %8815  ;;  %8923 = vmatprep.mubr.f32.mxu0 %v29069_v16 }
 0x23e   : > { %27020 = vmatprep.subr.msk.mxu1 %vm1076_vm0, %v8499_v22 }
 0x23f   : > { %27021 = vmatpush1.msk.msra.mxu1 %vm1076_vm0, %v8498_v24 }
 0x240   : > { %v8818_v25 = vpop.permute.xlu0 %8817  ;;  %27022 = vmatmul.mubr.msk.f32.vlgmr.msra.gmra.mrb[2].mxu1 %vm32968_vm2, %v27010_v0 }
 0x241   : > { %v8814_v26 = vpop.permute.xlu1 %8813  ;;  %v8833_v27 = vsel %vm8831_vm13, %v8816_v23, %v8818_v25  ;;  %8994 = vmatprep.mubr.f32.mxu1 %v29069_v16 }
 0x242   : > { %v8832_v29 = vsel %vm8831_vm13, %v8814_v26, %v8816_v23  ;;  %27024 = vmatprep.subr.msk.mxu0 %vm1076_vm0, %v8833_v27 }
 0x243   : > { %27025 = vmatpush1.msk.msra.mxu0 %vm1076_vm0, %v8832_v29 }
 0x244   : > { %v8820_v13 = vpop.permute.xlu0 %8819  ;;  %27026 = vmatmul.mubr.msk.f32.vlgmr.msra.gmra.mrb[0].mxu0 %vm32968_vm2, %v27023_v28 }
 0x245   : > { %v8834_v17 = vsel %vm8831_vm13, %v8818_v25, %v8820_v13  ;;  %v8822_v30 = vpop.permute.xlu1 %8821  ;;  %9065 = vmatprep.mubr.f32.mxu0 %v29069_v16 }
 0x246   : > { %v8835_v14 = vsel %vm8831_vm13, %v8820_v13, %v8822_v30 }
 0x247   : > { %27027 = vmatprep.subr.msk.mxu1 %vm1076_vm0, %v8835_v14 }
 0x248   : > { %27028 = vmatpush1.msk.msra.mxu1 %vm1076_vm0, %v8834_v17  ;;  %v8824_v9 = vpop.permute.xlu0 %8823 }
 0x249   : > { %v8836_v31 = vsel %vm8831_vm13, %v8822_v30, %v8824_v9  ;;  %v8826_v32 = vpop.permute.xlu1 %8825  ;;  %27029 = vmatmul.mubr.msk.f32.vlgmr.msra.gmra.mrb[0].mxu1 %vm32968_vm2, %v27023_v28 }
 0x24a   : > { %v8837_v33 = vsel %vm8831_vm13, %v8824_v9, %v8826_v32  ;;  %9136 = vmatprep.mubr.f32.mxu1 %v29069_v16  ;;  %v30446_v9 = vsub.s32 0, %v29320_v4 }
 0x24b   : > { %27030 = vmatprep.subr.msk.mxu0 %vm1076_vm0, %v8837_v33 }
 0x24c   : > { %27031 = vmatpush1.msk.msra.mxu0 %vm1076_vm0, %v8836_v31  ;;  %v8828_v15 = vpop.permute.xlu0 %8827 }
 0x24d   : > { %v8838_v18 = vsel %vm8831_vm13, %v8826_v32, %v8828_v15  ;;  %v8830_v34 = vpop.permute.xlu1 %8829  ;;  %27032 = vmatmul.mubr.msk.f32.vlgmr.msra.gmra.mrb[2].mxu0 %vm32968_vm2, %v27023_v28  ;;  %v30451_v32 = vld [vmem:[%s29165_s17] sm:$0xff] }
 0x24e   : > { %v8839_v35 = vsel %vm8831_vm13, %v8828_v15, %v8830_v34  ;;  %9263 = vmatprep.mubr.f32.mxu0 %v29069_v16  ;;  %v10198_v34 = vrot.slane %v30451_v32, %v30446_v9 }
 0x24f   : > { %27033 = vmatprep.subr.msk.mxu1 %vm1076_vm0, %v8839_v35 }
 0x250   : > { %27034 = vmatpush1.msk.msra.mxu1 %vm1076_vm0, %v8838_v18  ;;  %v9156_v36 = vpop.permute.xlu0 %9155 }
 0x251   : > { %v9158_v19 = vpop.permute.xlu1 %9157  ;;  %27035 = vmatmul.mubr.msk.f32.vlgmr.msra.gmra.mrb[2].mxu1 %vm32968_vm2, %v27023_v28 }
 0x252   : > { %v9173_v51 = vsel %vm9171_vm14, %v9156_v36, %v9158_v19  ;;  %9334 = vmatprep.mubr.f32.mxu1 %v29069_v16 }
 0x253   : > { %27037 = vmatprep.subr.msk.mxu0 %vm1076_vm0, %v9173_v51  ;;  %v30459_v51 = vsub.s32 1, %v29320_v4 }
 0x254   : > { %v9154_v37 = vpop.permute.xlu0 %9153 }
 0x255   : > { %v9172_v52 = vsel %vm9171_vm14, %v9154_v37, %v9156_v36  ;;  %v9160_v39 = vpop.permute.xlu1 %9159  ;;  %v10209_v36 = vsub.s32 3, %v29320_v4 }
 0x256   : > { %27038 = vmatpush1.msk.msra.mxu0 %vm1076_vm0, %v9172_v52  ;;  %v9174_v42 = vsel %vm9171_vm14, %v9158_v19, %v9160_v39 }
 0x257   : > { %27039 = vmatmul.mubr.msk.f32.vlgmr.msra.gmra.mrb[0].mxu0 %vm32968_vm2, %v27036_v38 }
 0x258   : > { %v9162_v20 = vpop.permute.xlu0 %9161  ;;  %9405 = vmatprep.mubr.f32.mxu0 %v29069_v16 }
 0x259   : > { %v9164_v40 = vpop.permute.xlu1 %9163  ;;  %v9175_v41 = vsel %vm9171_vm14, %v9160_v39, %v9162_v20 }
 0x25a   : > { %27040 = vmatprep.subr.msk.mxu1 %vm1076_vm0, %v9175_v41  ;;  %v9176_v46 = vsel %vm9171_vm14, %v9162_v20, %v9164_v40  ;;  %v10210_v20 = vrot.slane %v30451_v32, %v10209_v36 }
 0x25b   : > { %27041 = vmatpush1.msk.msra.mxu1 %vm1076_vm0, %v9174_v42  ;;  %v10202_v42 = vrot.slane %v30451_v32, %v30459_v51 }
 0x25c   : > { %v9166_v43 = vpop.permute.xlu0 %9165  ;;  %27042 = vmatmul.mubr.msk.f32.vlgmr.msra.gmra.mrb[0].mxu1 %vm32968_vm2, %v27036_v38 }
 0x25d   : > { %v9168_v44 = vpop.permute.xlu1 %9167  ;;  %v9177_v45 = vsel %vm9171_vm14, %v9164_v40, %v9166_v43  ;;  %9476 = vmatprep.mubr.f32.mxu1 %v29069_v16  ;;  %v10217_v40 = vsub.s32 5, %v29320_v4 }
 0x25e   : > { %27043 = vmatprep.subr.msk.mxu0 %vm1076_vm0, %v9177_v45  ;;  %v9178_v50 = vsel %vm9171_vm14, %v9166_v43, %v9168_v44 }
 0x25f   : > { %27044 = vmatpush1.msk.msra.mxu0 %vm1076_vm0, %v9176_v46  ;;  %v32967_v46 = vsub.s32 6, %v29320_v4 }
 0x260   : > { %v9170_v47 = vpop.permute.xlu0 %9169  ;;  %27045 = vmatmul.mubr.msk.f32.vlgmr.msra.gmra.mrb[2].mxu0 %vm32968_vm2, %v27036_v38 }
 0x261   : > { %v9179_v48 = vsel %vm9171_vm14, %v9168_v44, %v9170_v47  ;;  %v9496_v49 = vpop.permute.xlu1 %9495  ;;  %9603 = vmatprep.mubr.f32.mxu0 %v29069_v16  ;;  %vm32975_vm14 = vcmask 1031168  }
 0x262   : > { %27046 = vmatprep.subr.msk.mxu1 %vm1076_vm0, %v9179_v48 }
 0x263   : > { %27047 = vmatpush1.msk.msra.mxu1 %vm1076_vm0, %v9178_v50  ;;  %v32966_v50 = vsub.s32 7, %v29320_v4 }
 0x264   : > { %v9498_v53 = vpop.permute.xlu0 %9497  ;;  %27048 = vmatmul.mubr.msk.f32.vlgmr.msra.gmra.mrb[2].mxu1 %vm32968_vm2, %v27036_v38 }
 0x265   : > { %v9494_v54 = vpop.permute.xlu1 %9493  ;;  %v9513_v55 = vsel %vm9511_vm1, %v9496_v49, %v9498_v53  ;;  %9674 = vmatprep.mubr.f32.mxu1 %v29069_v16 }
 0x266   : > { %v9512_v57 = vsel %vm9511_vm1, %v9494_v54, %v9496_v49  ;;  %27050 = vmatprep.subr.msk.mxu0 %vm1076_vm0, %v9513_v55  ;;  %v10218_v49 = vrot.slane %v30451_v32, %v10217_v40  ;;  %v10205_v55 = vsub.s32 2, %v29320_v4 }
 0x267   : > { %27051 = vmatpush1.msk.msra.mxu0 %vm1076_vm0, %v9512_v57 }
 0x268   : > { %v9500_v58 = vpop.permute.xlu0 %9499  ;;  %27052 = vmatmul.mubr.msk.f32.vlgmr.msra.gmra.mrb[0].mxu0 %vm32968_vm2, %v27049_v56 }
 0x269   : > { %v9514_v59 = vsel %vm9511_vm1, %v9498_v53, %v9500_v58  ;;  %v9502_v60 = vpop.permute.xlu1 %9501  ;;  %9745 = vmatprep.mubr.f32.mxu0 %v29069_v16 }
 0x26a   : > { %v9515_v61 = vsel %vm9511_vm1, %v9500_v58, %v9502_v60 }
 0x26b   : > { %27053 = vmatprep.subr.msk.mxu1 %vm1076_vm0, %v9515_v61 }
 0x26c   : > { %27054 = vmatpush1.msk.msra.mxu1 %vm1076_vm0, %v9514_v59  ;;  %v9504_v62 = vpop.permute.xlu0 %9503  ;;  %v10222_v59 = vrot.slane %v30451_v32, %v32967_v46 }
 0x26d   : > { %v9516_v63 = vsel %vm9511_vm1, %v9502_v60, %v9504_v62  ;;  %v9506_v0 = vpop.permute.xlu1 %9505  ;;  %27055 = vmatmul.mubr.msk.f32.vlgmr.msra.gmra.mrb[0].mxu1 %vm32968_vm2, %v27049_v56 }
 0x26e   : > { %v9517_v1 = vsel %vm9511_vm1, %v9504_v62, %v9506_v0  ;;  %9816 = vmatprep.mubr.f32.mxu1 %v29069_v16 }
 0x26f   : > { %27056 = vmatprep.subr.msk.mxu0 %vm1076_vm0, %v9517_v1 }
 0x270   : > { %27057 = vmatpush1.msk.msra.mxu0 %vm1076_vm0, %v9516_v63  ;;  %v9508_v2 = vpop.permute.xlu0 %9507  ;;  %v10226_v63 = vrot.slane %v30451_v32, %v32966_v50 }
 0x271   : > { %v9518_v3 = vsel %vm9511_vm1, %v9506_v0, %v9508_v2  ;;  %v9510_v5 = vpop.permute.xlu1 %9509  ;;  %27058 = vmatmul.mubr.msk.f32.vlgmr.msra.gmra.mrb[2].mxu0 %vm32968_vm2, %v27049_v56 }
 0x272   : > { %v9519_v6 = vsel %vm9511_vm1, %v9508_v2, %v9510_v5  ;;  %9943 = vmatprep.mubr.f32.mxu0 %v29069_v16  ;;  %v10206_v2 = vrot.slane %v30451_v32, %v10205_v55 }
 0x273   : > { %27059 = vmatprep.subr.msk.mxu1 %vm1076_vm0, %v9519_v6 }
 0x274   : > { %27060 = vmatpush1.msk.msra.mxu1 %vm1076_vm0, %v9518_v3  ;;  %v9836_v7 = vpop.permute.xlu0 %9835 }
 0x275   : > { %v9838_v10 = vpop.permute.xlu1 %9837  ;;  %27061 = vmatmul.mubr.msk.f32.vlgmr.msra.gmra.mrb[2].mxu1 %vm32968_vm2, %v27049_v56 }
 0x276   : > { %v9853_v8 = vsel %vm9851_vm5, %v9836_v7, %v9838_v10  ;;  %10014 = vmatprep.mubr.f32.mxu1 %v29069_v16 }
 0x277   : > { %27063 = vmatprep.subr.msk.mxu0 %vm1076_vm0, %v9853_v8  ;;  %v10213_v8 = vsub.s32 4, %v29320_v4 }
 0x278   : > { %v9834_v11 = vpop.permute.xlu0 %9833 }
 0x279   : > { %v9852_v21 = vsel %vm9851_vm5, %v9834_v11, %v9836_v7  ;;  %v9840_v22 = vpop.permute.xlu1 %9839 }
 0x27a   : > { %27064 = vmatpush1.msk.msra.mxu0 %vm1076_vm0, %v9852_v21  ;;  %v9854_v26 = vsel %vm9851_vm5, %v9838_v10, %v9840_v22 }
 0x27b   : > { %27065 = vmatmul.mubr.msk.f32.vlgmr.msra.gmra.mrb[0].mxu0 %vm32968_vm2, %v27062_v12 }
 0x27c   : > { %v9842_v23 = vpop.permute.xlu0 %9841  ;;  %10085 = vmatprep.mubr.f32.mxu0 %v29069_v16 }
 0x27d   : > { %v9855_v24 = vsel %vm9851_vm5, %v9840_v22, %v9842_v23  ;;  %v9844_v25 = vpop.permute.xlu1 %9843 }
 0x27e   : > { %27066 = vmatprep.subr.msk.mxu1 %vm1076_vm0, %v9855_v24  ;;  %v9856_v28 = vsel %vm9851_vm5, %v9842_v23, %v9844_v25 }
 0x27f   : > { %27067 = vmatpush1.msk.msra.mxu1 %vm1076_vm0, %v9854_v26 }
 0x280   : > { %v9846_v27 = vpop.permute.xlu0 %9845  ;;  %27068 = vmatmul.mubr.msk.f32.vlgmr.msra.gmra.mrb[0].mxu1 %vm32968_vm2, %v27062_v12 }
 0x281   : > { %v9857_v29 = vsel %vm9851_vm5, %v9844_v25, %v9846_v27  ;;  %v9848_v13 = vpop.permute.xlu1 %9847  ;;  %10156 = vmatprep.mubr.f32.mxu1 %v29069_v16 }
 0x282   : > { %27069 = vmatprep.subr.msk.mxu0 %vm1076_vm0, %v9857_v29  ;;  %v9858_v30 = vsel %vm9851_vm5, %v9846_v27, %v9848_v13 }
 0x283   : > { %27070 = vmatpush1.msk.msra.mxu0 %vm1076_vm0, %v9856_v28 }
 0x284   : > { %v9850_v17 = vpop.permute.xlu0 %9849  ;;  %27071 = vmatmul.mubr.msk.f32.vlgmr.msra.gmra.mrb[2].mxu0 %vm32968_vm2, %v27062_v12 }
 0x285   : > { %v9859_v14 = vsel %vm9851_vm5, %v9848_v13, %v9850_v17  ;;  %10356 = vmatprep.mubr.f32.mxu0 %v29069_v16 }
 0x286   : > { %27072 = vmatprep.subr.msk.mxu1 %vm1076_vm0, %v9859_v14 }
 0x287   : > { %27073 = vmatpush1.msk.msra.mxu1 %vm1076_vm0, %v9858_v30 }
 0x288   : > { %27074 = vmatmul.mubr.msk.f32.vlgmr.msra.gmra.mrb[2].mxu1 %vm32968_vm2, %v27062_v12  ;;  %v10214_v12 = vrot.slane %v30451_v32, %v10213_v8  ;;  %vm32971_vm2 = vcmask 949248  }
 0x289   : > { %10427 = vmatprep.mubr.f32.mxu1 %v29069_v16 }
 0x292   : > { %v30448_v31 = vpop.permute.xlu1 %10175 }
 0x34e   : > { %v9945_v33 = vpop.f32.mrb[0].mxu0 }
 0x34f   : > { %v10178_v15 = vadd.f32 %v30448_v31, %v9945_v33  ;;  %v9947_v18 = vpop.f32.mrb[1].mxu0 }
 0x350   : > { %v10179_v19 = vadd.f32 %v30448_v31, %v9947_v18 }
 0x351   : > { %v10186_v35 = vmax.f32 %v10178_v15, 0.0 }
 0x352   : > { %v10187_v41 = vmax.f32 %v10179_v19, 0.0 }
 0x353   : > { %v30461_v37 = vmul.f32 %v10198_v34, %v10186_v35  ;;  %v10016_v38 = vpop.f32.mrb[0].mxu1 }
 0x354   : > { %v10018_v52 = vpop.f32.mrb[1].mxu1  ;;  %v30486_v53 = vmul.f32 %v10202_v42, %v10187_v41  ;;  %v10180_v54 = vadd.f32 %v30448_v31, %v10016_v38  ;;  %v30691_v38 = vld [vmem:[%s29170_s21 + $0x8] sm:$0xff] }
 0x355   : > { %v10181_v39 = vadd.f32 %v30448_v31, %v10018_v52  ;;  %12855 = vrot.lane.b32.xlu1 %v30461_v37, %s32965_s27  ;;  %10253 = vrot.lane.b32.xlu0 %v30461_v37, %s32990_s11 }
 0x356   : > { %v10188_v1 = vmax.f32 %v10180_v54, 0.0 }
 0x357   : > { %v10189_v43 = vmax.f32 %v10181_v39, 0.0  ;;  %v10087_v44 = vpop.f32.mrb[2].mxu0 }
 0x358   : > { %v10089_v45 = vpop.f32.mrb[3].mxu0  ;;  %v30515_v7 = vmul.f32 %v10206_v2, %v10188_v1  ;;  %v10182_v10 = vadd.f32 %v30448_v31, %v10087_v44 }
 0x359   : > { %v30475_v47 = vmul.f32 %v10210_v20, %v10189_v43  ;;  %v10183_v48 = vadd.f32 %v30448_v31, %v10089_v45  ;;  %13185 = vrot.lane.b32.xlu1 %v30461_v37, %s29090_s7  ;;  %10877 = vrot.lane.b32.xlu0 %v30461_v37, %s32962_s10 }
 0x35a   : > { %v10190_v11 = vmax.f32 %v10182_v10, 0.0 }
 0x35b   : > { %v10191_v56 = vmax.f32 %v10183_v48, 0.0  ;;  %v10158_v57 = vpop.f32.mrb[2].mxu1 }
 0x35c   : > { %v10184_v58 = vadd.f32 %v30448_v31, %v10158_v57  ;;  %v10160_v60 = vpop.f32.mrb[3].mxu1  ;;  %v30550_v21 = vmul.f32 %v10214_v12, %v10190_v11 }
 0x35d   : > { %v30494_v61 = vmul.f32 %v10218_v49, %v10191_v56  ;;  %v10185_v62 = vadd.f32 %v30448_v31, %v10160_v60  ;;  %12857 = vrot.lane.b32.xlu1 %v30486_v53, %s32965_s27  ;;  %11207 = vrot.lane.b32.xlu0 %v30461_v37, %s32972_s15 }
 0x35e   : > { %v10192_v0 = vmax.f32 %v10184_v58, 0.0 }
 0x35f   : > { %v10193_v3 = vmax.f32 %v10185_v62, 0.0 }
 0x360   : > { %v30507_v5 = vmul.f32 %v10222_v59, %v10192_v0 }
 0x361   : > { %v30509_v6 = vmul.f32 %v10226_v63, %v10193_v3  ;;  %13187 = vrot.lane.b32.xlu1 %v30486_v53, %s29090_s7  ;;  %11536 = vrot.lane.b32.xlu0 %v30461_v37, %s29085_s22 }
 0x365   : > { %10257 = vrot.lane.b32.xlu1 %v30515_v7, %s32990_s11  ;;  %11865 = vrot.lane.b32.xlu0 %v30461_v37, %s32979_s16 }
 0x369   : > { %10881 = vrot.lane.b32.xlu1 %v30515_v7, %s32962_s10  ;;  %12195 = vrot.lane.b32.xlu0 %v30461_v37, %s29099_s23 }
 0x36d   : > { %11211 = vrot.lane.b32.xlu1 %v30515_v7, %s32972_s15  ;;  %12525 = vrot.lane.b32.xlu0 %v30461_v37, %s32964_s18 }
 0x371   : > { %11540 = vrot.lane.b32.xlu1 %v30515_v7, %s29085_s22  ;;  %10255 = vrot.lane.b32.xlu0 %v30486_v53, %s32990_s11 }
 0x375   : > { %11869 = vrot.lane.b32.xlu1 %v30515_v7, %s32979_s16  ;;  %10879 = vrot.lane.b32.xlu0 %v30486_v53, %s32962_s10 }
 0x379   : > { %12199 = vrot.lane.b32.xlu1 %v30515_v7, %s29099_s23  ;;  %11209 = vrot.lane.b32.xlu0 %v30486_v53, %s32972_s15 }
 0x37d   : > { %12529 = vrot.lane.b32.xlu1 %v30515_v7, %s32964_s18  ;;  %11538 = vrot.lane.b32.xlu0 %v30486_v53, %s29085_s22 }
 0x381   : > { %10261 = vrot.lane.b32.xlu1 %v30550_v21, %s32990_s11  ;;  %11867 = vrot.lane.b32.xlu0 %v30486_v53, %s32979_s16 }
 0x385   : > { %10885 = vrot.lane.b32.xlu1 %v30550_v21, %s32962_s10  ;;  %12197 = vrot.lane.b32.xlu0 %v30486_v53, %s29099_s23 }
 0x389   : > { %11215 = vrot.lane.b32.xlu1 %v30550_v21, %s32972_s15  ;;  %12527 = vrot.lane.b32.xlu0 %v30486_v53, %s32964_s18 }
 0x38d   : > { %11544 = vrot.lane.b32.xlu1 %v30550_v21, %s29085_s22  ;;  %12859 = vrot.lane.b32.xlu0 %v30515_v7, %s32965_s27 }
 0x391   : > { %11873 = vrot.lane.b32.xlu1 %v30550_v21, %s32979_s16  ;;  %13189 = vrot.lane.b32.xlu0 %v30515_v7, %s29090_s7 }
 0x395   : > { %12203 = vrot.lane.b32.xlu1 %v30550_v21, %s29099_s23  ;;  %10259 = vrot.lane.b32.xlu0 %v30475_v47, %s32990_s11 }
 0x399   : > { %12533 = vrot.lane.b32.xlu1 %v30550_v21, %s32964_s18  ;;  %12863 = vrot.lane.b32.xlu0 %v30550_v21, %s32965_s27 }
 0x39d   : > { %10263 = vrot.lane.b32.xlu1 %v30494_v61, %s32990_s11  ;;  %12865 = vrot.lane.b32.xlu0 %v30494_v61, %s32965_s27 }
 0x3a1   : > { %10887 = vrot.lane.b32.xlu1 %v30494_v61, %s32962_s10  ;;  %13195 = vrot.lane.b32.xlu0 %v30494_v61, %s29090_s7 }
 0x3a5   : > { %11217 = vrot.lane.b32.xlu1 %v30494_v61, %s32972_s15  ;;  %10265 = vrot.lane.b32.xlu0 %v30507_v5, %s32990_s11 }
 0x3a9   : > { %11546 = vrot.lane.b32.xlu1 %v30494_v61, %s29085_s22  ;;  %10889 = vrot.lane.b32.xlu0 %v30507_v5, %s32962_s10 }
 0x3ad   : > { %11875 = vrot.lane.b32.xlu1 %v30494_v61, %s32979_s16  ;;  %11219 = vrot.lane.b32.xlu0 %v30507_v5, %s32972_s15 }
 0x3b1   : > { %12205 = vrot.lane.b32.xlu1 %v30494_v61, %s29099_s23  ;;  %11548 = vrot.lane.b32.xlu0 %v30507_v5, %s29085_s22 }
 0x3b5   : > { %12535 = vrot.lane.b32.xlu1 %v30494_v61, %s32964_s18  ;;  %11877 = vrot.lane.b32.xlu0 %v30507_v5, %s32979_s16 }
 0x3b9   : > { %12867 = vrot.lane.b32.xlu1 %v30507_v5, %s32965_s27  ;;  %12207 = vrot.lane.b32.xlu0 %v30507_v5, %s29099_s23 }
 0x3bd   : > { %13197 = vrot.lane.b32.xlu1 %v30507_v5, %s29090_s7  ;;  %12537 = vrot.lane.b32.xlu0 %v30507_v5, %s32964_s18 }
 0x3c1   : > { %10883 = vrot.lane.b32.xlu1 %v30475_v47, %s32962_s10  ;;  %13193 = vrot.lane.b32.xlu0 %v30550_v21, %s29090_s7  ;;  %s29101_s10 = smov 26  }
 0x3c5   : > { %13518 = vrot.lane.b32.xlu1 %v30515_v7, %s29091_s26  ;;  %13516 = vrot.lane.b32.xlu0 %v30486_v53, %s29091_s26 }
 0x3c7   : > { %v30624_v22 = vpop.permute.xlu1 %12855  ;;  %v10254_v23 = vpop.permute.xlu0 %10253 }
 0x3c9   : > { %13524 = vrot.lane.b32.xlu1 %v30494_v61, %s29091_s26  ;;  %13514 = vrot.lane.b32.xlu0 %v30461_v37, %s29091_s26 }
 0x3cb   : > { %v30630_v24 = vpop.permute.xlu1 %13185  ;;  %v30632_v25 = vpop.permute.xlu0 %10877 }
 0x3cd   : > { %13522 = vrot.lane.b32.xlu1 %v30550_v21, %s29091_s26  ;;  %13526 = vrot.lane.b32.xlu0 %v30507_v5, %s29091_s26 }
 0x3cf   : > { %v30638_v26 = vpop.permute.xlu1 %12857  ;;  %v30640_v27 = vpop.permute.xlu0 %11207 }
 0x3d1   : > { %13845 = vrot.lane.b32.xlu1 %v30486_v53, %s29101_s10  ;;  %11213 = vrot.lane.b32.xlu0 %v30475_v47, %s32972_s15  ;;  %s29114_s15 = smov 35  }
 0x3d3   : > { %v30646_v28 = vpop.permute.xlu1 %13187  ;;  %v30648_v29 = vpop.permute.xlu0 %11536 }
 0x3d5   : > { %13843 = vrot.lane.b32.xlu1 %v30461_v37, %s29101_s10  ;;  %13847 = vrot.lane.b32.xlu0 %v30515_v7, %s29101_s10 }
 0x3d7   : > { %v10258_v13 = vpop.permute.xlu1 %10257  ;;  %v30654_v17 = vpop.permute.xlu0 %11865 }
 0x3d9   : > { %13855 = vrot.lane.b32.xlu1 %v30507_v5, %s29101_s10  ;;  %13853 = vrot.lane.b32.xlu0 %v30494_v61, %s29101_s10 }
 0x3db   : > { %v30660_v30 = vpop.permute.xlu1 %10881  ;;  %v30662_v14 = vpop.permute.xlu0 %12195 }
 0x3dd   : > { %11542 = vrot.lane.b32.xlu1 %v30475_v47, %s29085_s22  ;;  %13851 = vrot.lane.b32.xlu0 %v30550_v21, %s29101_s10  ;;  %s29102_s22 = smov 16  }
 0x3df   : > { %v30668_v31 = vpop.permute.xlu1 %11211  ;;  %v30670_v32 = vpop.permute.xlu0 %12525 }
 0x3e1   : > { %14177 = vrot.lane.b32.xlu1 %v30515_v7, %s29093_s0  ;;  %14175 = vrot.lane.b32.xlu0 %v30486_v53, %s29093_s0 }
 0x3e3   : > { %v30676_v33 = vpop.permute.xlu1 %11540  ;;  %v10256_v15 = vpop.permute.xlu0 %10255 }
 0x3e4   : > { %v10267_v18 = vsel %vm5780_vm15, %v10254_v23, %v10256_v15  ;;  %v10268_v34 = vsel %vm5780_vm15, %v10256_v15, %v10258_v13 }
 0x3e5   : > { %14183 = vrot.lane.b32.xlu1 %v30494_v61, %s29093_s0  ;;  %14173 = vrot.lane.b32.xlu0 %v30461_v37, %s29093_s0 }
 0x3e6   : > { %27076 = vmatprep.subr.msk.mxu0 %vm10277_vm6, %v10268_v34 }
 0x3e7   : > { %27077 = vmatpush1.msk.msra.mxu0 %vm10277_vm6, %v10267_v18  ;;  %v30686_v35 = vpop.permute.xlu1 %11869  ;;  %v30688_v19 = vpop.permute.xlu0 %10879 }
 0x3e8   : > { %27078 = vmatmul.mubr.msk.f32.vlgmr.msra.gmra.mrb[4].mxu0 %vm10273_vm7, %v30691_v38 }
 0x3e9   : > { %14181 = vrot.lane.b32.xlu1 %v30550_v21, %s29093_s0  ;;  %14185 = vrot.lane.b32.xlu0 %v30507_v5, %s29093_s0 }
 0x3ea   : > { %10498 = vmatprep.mubr.f32.mxu0 %v29069_v16 }
 0x3eb   : > { %v30700_v52 = vpop.permute.xlu1 %12199  ;;  %v30702_v39 = vpop.permute.xlu0 %11209 }
 0x3ed   : > { %14504 = vrot.lane.b32.xlu1 %v30486_v53, %s29094_s2  ;;  %11871 = vrot.lane.b32.xlu0 %v30475_v47, %s32979_s16 }
 0x3ef   : > { %v30708_v20 = vpop.permute.xlu1 %12529  ;;  %v30710_v41 = vpop.permute.xlu0 %11538 }
 0x3f0   : > { %v11550_v46 = vsel %vm6791_vm4, %v30648_v29, %v30710_v41 }
 0x3f1   : > { %14502 = vrot.lane.b32.xlu1 %v30461_v37, %s29094_s2  ;;  %14506 = vrot.lane.b32.xlu0 %v30515_v7, %s29094_s2 }
 0x3f3   : > { %v10262_v42 = vpop.permute.xlu1 %10261  ;;  %v30716_v43 = vpop.permute.xlu0 %11867 }
 0x3f5   : > { %14514 = vrot.lane.b32.xlu1 %v30507_v5, %s29094_s2  ;;  %14512 = vrot.lane.b32.xlu0 %v30494_v61, %s29094_s2 }
 0x3f7   : > { %v30722_v44 = vpop.permute.xlu1 %10885  ;;  %v30724_v45 = vpop.permute.xlu0 %12197 }
 0x3f9   : > { %12201 = vrot.lane.b32.xlu1 %v30475_v47, %s29099_s23  ;;  %14510 = vrot.lane.b32.xlu0 %v30550_v21, %s29094_s2  ;;  %s29103_s23 = smov 8  }
 0x3fb   : > { %v30730_v48 = vpop.permute.xlu1 %11215  ;;  %v30732_v49 = vpop.permute.xlu0 %12527 }
 0x3fd   : > { %14835 = vrot.lane.b32.xlu1 %v30515_v7, %s29102_s22  ;;  %14833 = vrot.lane.b32.xlu0 %v30486_v53, %s29102_s22 }
 0x3ff   : > { %v30738_v54 = vpop.permute.xlu1 %11544  ;;  %v30740_v56 = vpop.permute.xlu0 %12859 }
 0x401   : > { %14841 = vrot.lane.b32.xlu1 %v30494_v61, %s29102_s22  ;;  %14831 = vrot.lane.b32.xlu0 %v30461_v37, %s29102_s22 }
 0x403   : > { %v30746_v57 = vpop.permute.xlu1 %11873  ;;  %v30748_v58 = vpop.permute.xlu0 %13189 }
 0x405   : > { %14839 = vrot.lane.b32.xlu1 %v30550_v21, %s29102_s22  ;;  %14843 = vrot.lane.b32.xlu0 %v30507_v5, %s29102_s22 }
 0x407   : > { %v30754_v59 = vpop.permute.xlu1 %12203  ;;  %v10260_v60 = vpop.permute.xlu0 %10259 }
 0x408   : > { %v10269_v62 = vsel %vm5780_vm15, %v10258_v13, %v10260_v60  ;;  %v10270_v63 = vsel %vm5780_vm15, %v10260_v60, %v10262_v42 }
 0x409   : > { %15164 = vrot.lane.b32.xlu1 %v30486_v53, %s29103_s23  ;;  %12531 = vrot.lane.b32.xlu0 %v30475_v47, %s32964_s18  ;;  %s29105_s18 = smov 7  }
 0x40a   : > { %27079 = vmatprep.subr.msk.mxu1 %vm10277_vm6, %v10270_v63 }
 0x40b   : > { %27080 = vmatpush1.msk.msra.mxu1 %vm10277_vm6, %v10269_v62  ;;  %v30764_v0 = vpop.permute.xlu1 %12533  ;;  %v30766_v1 = vpop.permute.xlu0 %12863  ;;  %v10893_v62 = vsel %vm32975_vm14, %v30688_v19, %v30660_v30 }
 0x40c   : > { %27081 = vmatmul.mubr.msk.f32.vlgmr.msra.gmra.mrb[4].mxu1 %vm10273_vm7, %v30691_v38  ;;  %27762 = vmatprep.subr.mxu1 %v29069_v16 }
 0x40d   : > { %15162 = vrot.lane.b32.xlu1 %v30461_v37, %s29103_s23  ;;  %15166 = vrot.lane.b32.xlu0 %v30515_v7, %s29103_s23 }
 0x40e   : > { %27764 = vmatprep.mubr.msk.f32.mxu1 %vm29104_vm10, %v29069_v16 }
 0x40f   : > { %v10264_v2 = vpop.permute.xlu1 %10263  ;;  %v30777_v3 = vpop.permute.xlu0 %12865 }
 0x410   : > { %v10271_v15 = vsel %vm5780_vm15, %v10262_v42, %v10264_v2  ;;  %v10243_v42 = vld [vmem:[%s29170_s21] sm:$0xff] }
 0x411   : > { %15174 = vrot.lane.b32.xlu1 %v30507_v5, %s29103_s23  ;;  %15172 = vrot.lane.b32.xlu0 %v30494_v61, %s29103_s23 }
 0x413   : > { %v10888_v10 = vpop.permute.xlu1 %10887  ;;  %v30783_v11 = vpop.permute.xlu0 %13195 }
 0x415   : > { %12861 = vrot.lane.b32.xlu1 %v30475_v47, %s32965_s27  ;;  %15170 = vrot.lane.b32.xlu0 %v30550_v21, %s29103_s23  ;;  %s29106_s27 = smov 6  }
 0x417   : > { %v30789_v12 = vpop.permute.xlu1 %11217  ;;  %v10266_v23 = vpop.permute.xlu0 %10265 }
 0x418   : > { %27763 = vmatpush3.msk.msra.mxu1 %vm10277_vm6, %v10266_v23  ;;  %v10272_v13 = vsel %vm5780_vm15, %v10264_v2, %v10266_v23  ;;  %v10892_v23 = vsel %vm32975_vm14, %v30632_v25, %v30688_v19  ;;  %v10896_v25 = vsel %vm32975_vm14, %v30722_v44, %v10888_v10  ;;  %v11222_v19 = vsel %vm6454_vm3, %v30702_v39, %v30668_v31 }
 0x419   : > { %15499 = vrot.lane.b32.xlu1 %v30515_v7, %s29105_s18  ;;  %15497 = vrot.lane.b32.xlu0 %v30486_v53, %s29105_s18 }
 0x41a   : > { %27082 = vmatprep.subr.msk.mxu0 %vm10277_vm6, %v10272_v13  ;;  %27765 = vmatmul.mubr.msk.f32.vlgmr.msra.gmra.mrb[6].mxu1 %vm10273_vm7, %v30691_v38 }
 0x41b   : > { %27090 = vmatprep.subr.msk.mxu1 %vm10277_vm6, %v30475_v47  ;;  %27083 = vmatpush1.msk.msra.mxu0 %vm10277_vm6, %v10271_v15  ;;  %v30804_v18 = vpop.permute.xlu1 %11546  ;;  %v30806_v34 = vpop.permute.xlu0 %10889 }
 0x41c   : > { %27091 = vmatpush1.msk.msra.mxu1 %vm10277_vm6, %v30515_v7  ;;  %27084 = vmatmul.mubr.msk.f32.vlgmr.msra.gmra.mrb[6].mxu0 %vm10273_vm7, %v30691_v38  ;;  %v10897_v13 = vsel %vm32975_vm14, %v10888_v10, %v30806_v34  ;;  %v11221_v10 = vsel %vm6454_vm3, %v30640_v27, %v30702_v39  ;;  %v11225_v27 = vsel %vm6454_vm3, %v30730_v48, %v30789_v12 }
 0x41d   : > { %27087 = vmatprep.subr.msk.mxu0 %vm10277_vm6, %v30486_v53  ;;  %10727 = vmatprep.mubr.f32.mxu1 %v29069_v16  ;;  %v11551_v39 = vsel %vm6791_vm4, %v30710_v41, %v30676_v33  ;;  %v11881_v41 = vsel %vm32971_vm2, %v30716_v43, %v30686_v35 }
 0x41e   : > { %27088 = vmatpush1.msk.msra.mxu0 %vm10277_vm6, %v30461_v37  ;;  %27767 = vmatprep.subr.mxu1 %v29069_v16 }
 0x41f   : > { %15505 = vrot.lane.b32.xlu1 %v30494_v61, %s29105_s18  ;;  %15495 = vrot.lane.b32.xlu0 %v30461_v37, %s29105_s18  ;;  %v30823_v60 = vpop.permute.xlu1 %11875  ;;  %v30825_v38 = vpop.permute.xlu0 %11219 }
 0x420   : > { %27092 = vmatmul.mubr.msk.f32.vlgmr.msra.gmra.mrb[4].mxu1 %vm10273_vm7, %v10243_v42  ;;  %27093 = vmatprep.subr.msk.mxu0 %vm10277_vm6, %v30494_v61 }
 0x421   : > { %27768 = vmatpush3.msk.msra.mxu1 %vm10277_vm6, %v30507_v5  ;;  %10656 = vmatprep.mubr.f32.mxu0 %v29069_v16 }
 0x422   : > { %27089 = vmatmul.mubr.msk.f32.vlgmr.msra.gmra.mrb[4].mxu0 %vm10273_vm7, %v10243_v42  ;;  %27769 = vmatprep.mubr.msk.f32.mxu1 %vm29104_vm10, %v29069_v16 }
 0x423   : > { %27094 = vmatpush1.msk.msra.mxu0 %vm10277_vm6, %v30550_v21  ;;  %15503 = vrot.lane.b32.xlu1 %v30550_v21, %s29105_s18  ;;  %v30843_v63 = vpop.permute.xlu1 %12205  ;;  %v30845_v2 = vpop.permute.xlu0 %11548 }
 0x424   : > { %27099 = vmatprep.subr.msk.mxu0 %vm10277_vm6, %v10893_v62  ;;  %15507 = vrot.lane.b32.xlu0 %v30507_v5, %s29105_s18  ;;  %v30865_v62 = vld [vmem:[%s29170_s21 + $0x10] sm:$0xff] }
 0x425   : > { %10798 = vmatprep.mubr.f32.mxu0 %v29069_v16  ;;  %27770 = vmatmul.mubr.msk.f32.vlgmr.msra.gmra.mrb[6].mxu1 %vm10273_vm7, %v10243_v42 }
 0x426   : > { %27095 = vmatmul.mubr.msk.f32.vlgmr.msra.gmra.mrb[6].mxu0 %vm10273_vm7, %v10243_v42  ;;  %11050 = vmatprep.mubr.f32.mxu1 %v29069_v16 }
 0x427   : > { %27100 = vmatpush1.msk.msra.mxu0 %vm10277_vm6, %v10892_v23  ;;  %15830 = vrot.lane.b32.xlu1 %v30486_v53, %s29106_s27  ;;  %v30862_v15 = vpop.permute.xlu1 %12535  ;;  %v30867_v50 = vpop.permute.xlu0 %11877 }
 0x428   : > { %27105 = vmatprep.subr.msk.mxu0 %vm10277_vm6, %v10897_v13  ;;  %13191 = vrot.lane.b32.xlu0 %v30475_v47, %s29090_s7  ;;  %s29107_s7 = smov 56  }
 0x429   : > { %10979 = vmatprep.mubr.f32.mxu0 %v29069_v16 }
 0x42a   : > { %27101 = vmatmul.mubr.msk.f32.vlgmr.msra.gmra.mrb[4].mxu0 %vm10273_vm7, %v30865_v62 }
 0x42b   : > { %27106 = vmatpush1.msk.msra.mxu0 %vm10277_vm6, %v10896_v25  ;;  %15828 = vrot.lane.b32.xlu1 %v30461_v37, %s29106_s27  ;;  %v30883_v42 = vpop.permute.xlu1 %12867  ;;  %v30885_v23 = vpop.permute.xlu0 %12207  ;;  %v11226_v37 = vsel %vm6454_vm3, %v30789_v12, %v30825_v38  ;;  %v30905_v25 = vld [vmem:[%s29170_s21 + $0x18] sm:$0xff] }
 0x42c   : > { %27111 = vmatprep.subr.msk.mxu0 %vm10277_vm6, %v11222_v19  ;;  %15832 = vrot.lane.b32.xlu0 %v30515_v7, %s29106_s27 }
 0x42d   : > { %11121 = vmatprep.mubr.f32.mxu0 %v29069_v16 }
 0x42e   : > { %27107 = vmatmul.mubr.msk.f32.vlgmr.msra.gmra.mrb[6].mxu0 %vm10273_vm7, %v30865_v62 }
 0x42f   : > { %27112 = vmatpush1.msk.msra.mxu0 %vm10277_vm6, %v11221_v10  ;;  %15840 = vrot.lane.b32.xlu1 %v30507_v5, %s29106_s27  ;;  %v30902_v13 = vpop.permute.xlu1 %13197  ;;  %v30907_v19 = vpop.permute.xlu0 %12537 }
 0x430   : > { %27117 = vmatprep.subr.msk.mxu0 %vm10277_vm6, %v11226_v37  ;;  %15838 = vrot.lane.b32.xlu0 %v30494_v61, %s29106_s27 }
 0x431   : > { %11308 = vmatprep.mubr.f32.mxu0 %v29069_v16 }
 0x432   : > { %27113 = vmatmul.mubr.msk.f32.vlgmr.msra.gmra.mrb[4].mxu0 %vm10273_vm7, %v30905_v25 }
 0x433   : > { %27118 = vmatpush1.msk.msra.mxu0 %vm10277_vm6, %v11225_v27  ;;  %13520 = vrot.lane.b32.xlu1 %v30475_v47, %s29091_s26  ;;  %v10884_v10 = vpop.permute.xlu1 %10883  ;;  %v30924_v37 = vpop.permute.xlu0 %13193  ;;  %s29108_s26 = smov 55  }
 0x434   : > { %27123 = vmatprep.subr.msk.mxu0 %vm10277_vm6, %v11551_v39  ;;  %15836 = vrot.lane.b32.xlu0 %v30550_v21, %s29106_s27  ;;  %v10894_v12 = vsel %vm32975_vm14, %v30660_v30, %v10884_v10  ;;  %v10895_v27 = vsel %vm32975_vm14, %v10884_v10, %v30722_v44  ;;  %v11555_v30 = vsel %vm6791_vm4, %v30804_v18, %v30845_v2  ;;  %v30950_v39 = vld [vmem:[%s29170_s21 + $0x20] sm:$0xff]  ;;  %vm18155_vm14 = vcmask 293888  }
 0x435   : > { %11450 = vmatprep.mubr.f32.mxu0 %v29069_v16  ;;  %27102 = vmatprep.subr.msk.mxu1 %vm10277_vm6, %v10895_v27 }
 0x436   : > { %27119 = vmatmul.mubr.msk.f32.vlgmr.msra.gmra.mrb[6].mxu0 %vm10273_vm7, %v30905_v25  ;;  %27103 = vmatpush1.msk.msra.mxu1 %vm10277_vm6, %v10894_v12 }
 0x437   : > { %27124 = vmatpush1.msk.msra.mxu0 %vm10277_vm6, %v11550_v46  ;;  %16165 = vrot.lane.b32.xlu1 %v30475_v47, %s29107_s7  ;;  %v30947_v44 = vpop.permute.xlu1 %13518  ;;  %v30952_v29 = vpop.permute.xlu0 %13516  ;;  %v11554_v46 = vsel %vm6791_vm4, %v30738_v54, %v30804_v18  ;;  %v11880_v18 = vsel %vm32971_vm2, %v30654_v17, %v30716_v43  ;;  %v11884_v17 = vsel %vm32971_vm2, %v30746_v57, %v30823_v60 }
 0x438   : > { %27129 = vmatprep.subr.msk.mxu0 %vm10277_vm6, %v11555_v30  ;;  %16163 = vrot.lane.b32.xlu0 %v30515_v7, %s29107_s7  ;;  %v30997_v30 = vld [vmem:[%s29170_s21 + $0x28] sm:$0xff]  ;;  %v12211_v43 = vsel %vm12209_vm9, %v30724_v45, %v30700_v52 }
 0x439   : > { %11637 = vmatprep.mubr.f32.mxu0 %v29069_v16  ;;  %27772 = vmatprep.subr.mxu1 %v29069_v16 }
 0x43a   : > { %27125 = vmatmul.mubr.msk.f32.vlgmr.msra.gmra.mrb[4].mxu0 %vm10273_vm7, %v30950_v39  ;;  %27104 = vmatmul.mubr.msk.f32.vlgmr.msra.gmra.mrb[4].mxu1 %vm10273_vm7, %v30865_v62 }
 0x43b   : > { %27130 = vmatpush1.msk.msra.mxu0 %vm10277_vm6, %v11554_v46  ;;  %27773 = vmatpush3.msk.msra.mxu1 %vm10277_vm6, %v30806_v34  ;;  %v30972_v10 = vpop.permute.xlu1 %13524  ;;  %v30974_v12 = vpop.permute.xlu0 %13514  ;;  %v11885_v34 = vsel %vm32971_vm2, %v30823_v60, %v30867_v50 }
 0x43c   : > { %27135 = vmatprep.subr.msk.mxu0 %vm10277_vm6, %v11881_v41  ;;  %16171 = vrot.lane.b32.xlu1 %v30507_v5, %s29107_s7 }
 0x43d   : > { %16161 = vrot.lane.b32.xlu0 %v30486_v53, %s29107_s7  ;;  %11779 = vmatprep.mubr.f32.mxu0 %v29069_v16 }
 0x43e   : > { %27131 = vmatmul.mubr.msk.f32.vlgmr.msra.gmra.mrb[6].mxu0 %vm10273_vm7, %v30950_v39  ;;  %27774 = vmatprep.mubr.msk.f32.mxu1 %vm29104_vm10, %v29069_v16 }
 0x43f   : > { %27136 = vmatpush1.msk.msra.mxu0 %vm10277_vm6, %v11880_v18  ;;  %11967 = vmatprep.mubr.f32.mxu0 %v29069_v16  ;;  %v30994_v27 = vpop.permute.xlu1 %13522  ;;  %v30999_v46 = vpop.permute.xlu0 %13526 }
 0x440   : > { %27141 = vmatprep.subr.msk.mxu0 %vm10277_vm6, %v11885_v34  ;;  %16169 = vrot.lane.b32.xlu1 %v30494_v61, %s29107_s7  ;;  %v12210_v34 = vsel %vm12209_vm9, %v30662_v14, %v30724_v45  ;;  %v12214_v14 = vsel %vm12209_vm9, %v30754_v59, %v30843_v63 }
 0x441   : > { %16173 = vrot.lane.b32.xlu0 %v30509_v6, %s29107_s7  ;;  %27775 = vmatmul.mubr.msk.f32.vlgmr.msra.gmra.mrb[6].mxu1 %vm10273_vm7, %v30865_v62 }
 0x442   : > { %27137 = vmatmul.mubr.msk.f32.vlgmr.msra.gmra.mrb[4].mxu0 %vm10273_vm7, %v30997_v30  ;;  %11379 = vmatprep.mubr.f32.mxu1 %v29069_v16 }
 0x443   : > { %27142 = vmatpush1.msk.msra.mxu0 %vm10277_vm6, %v11884_v17  ;;  %12109 = vmatprep.mubr.f32.mxu0 %v29069_v16  ;;  %v31019_v41 = vpop.permute.xlu1 %13845  ;;  %v11214_v62 = vpop.permute.xlu0 %11213  ;;  %v31045_v17 = vld [vmem:[%s29170_s21 + $0x30] sm:$0xff] }
 0x444   : > { %27147 = vmatprep.subr.msk.mxu0 %vm10277_vm6, %v12211_v43  ;;  %16493 = vrot.lane.b32.xlu1 %v30515_v7, %s29108_s26  ;;  %v11223_v60 = vsel %vm6454_vm3, %v30668_v31, %v11214_v62  ;;  %v11224_v18 = vsel %vm6454_vm3, %v11214_v62, %v30730_v48  ;;  %v12215_v31 = vsel %vm12209_vm9, %v30843_v63, %v30885_v23  ;;  %vm12539_vm3 = vcmask 875520  }
 0x445   : > { %13849 = vrot.lane.b32.xlu0 %v30475_v47, %s29101_s10  ;;  %27114 = vmatprep.subr.msk.mxu1 %vm10277_vm6, %v11224_v18  ;;  %v12541_v45 = vsel %vm12539_vm3, %v30732_v49, %v30708_v20  ;;  %v12545_v63 = vsel %vm12539_vm3, %v30862_v15, %v30907_v19  ;;  %s29109_s10 = smov 54  }
 0x446   : > { %27143 = vmatmul.mubr.msk.f32.vlgmr.msra.gmra.mrb[6].mxu0 %vm10273_vm7, %v30997_v30  ;;  %27115 = vmatpush1.msk.msra.mxu1 %vm10277_vm6, %v11223_v60 }
 0x447   : > { %27148 = vmatpush1.msk.msra.mxu0 %vm10277_vm6, %v12210_v34  ;;  %12297 = vmatprep.mubr.f32.mxu0 %v29069_v16  ;;  %v31042_v48 = vpop.permute.xlu1 %13843  ;;  %v31047_v43 = vpop.permute.xlu0 %13847  ;;  %v31091_v34 = vld [vmem:[%s29170_s21 + $0x38] sm:$0xff] }
 0x448   : > { %27153 = vmatprep.subr.msk.mxu0 %vm10277_vm6, %v12215_v31  ;;  %16491 = vrot.lane.b32.xlu1 %v30486_v53, %s29108_s26 }
 0x449   : > { %16495 = vrot.lane.b32.xlu0 %v30475_v47, %s29108_s26  ;;  %27777 = vmatprep.subr.mxu1 %v29069_v16 }
 0x44a   : > { %27149 = vmatmul.mubr.msk.f32.vlgmr.msra.gmra.mrb[4].mxu0 %vm10273_vm7, %v31045_v17  ;;  %27116 = vmatmul.mubr.msk.f32.vlgmr.msra.gmra.mrb[4].mxu1 %vm10273_vm7, %v30905_v25 }
 0x44b   : > { %27154 = vmatpush1.msk.msra.mxu0 %vm10277_vm6, %v12214_v14  ;;  %27778 = vmatpush3.msk.msra.mxu1 %vm10277_vm6, %v30825_v38  ;;  %v31068_v62 = vpop.permute.xlu1 %13855  ;;  %v31070_v60 = vpop.permute.xlu0 %13853  ;;  %v12540_v38 = vsel %vm12539_vm3, %v30670_v32, %v30732_v49  ;;  %v12544_v14 = vsel %vm12539_vm3, %v30764_v0, %v30862_v15  ;;  %v12870_v15 = vsel %vm12869_vm8, %v30624_v22, %v30638_v26  ;;  %v31147_v22 = vld [vmem:[%s29170_s21 + $0x40] sm:$0xff] }
 0x44c   : > { %27159 = vmatprep.subr.msk.mxu0 %vm10277_vm6, %v12541_v45  ;;  %16503 = vrot.lane.b32.xlu1 %v30509_v6, %s29108_s26 }
 0x44d   : > { %16501 = vrot.lane.b32.xlu0 %v30507_v5, %s29108_s26  ;;  %12439 = vmatprep.mubr.f32.mxu0 %v29069_v16 }
 0x44e   : > { %27155 = vmatmul.mubr.msk.f32.vlgmr.msra.gmra.mrb[6].mxu0 %vm10273_vm7, %v31045_v17  ;;  %27779 = vmatprep.mubr.msk.f32.mxu1 %vm29104_vm10, %v29069_v16 }
 0x44f   : > { %27160 = vmatpush1.msk.msra.mxu0 %vm10277_vm6, %v12540_v38  ;;  %12627 = vmatprep.mubr.f32.mxu0 %v29069_v16  ;;  %v11543_v18 = vpop.permute.xlu1 %11542  ;;  %v31093_v31 = vpop.permute.xlu0 %13851 }
 0x450   : > { %27165 = vmatprep.subr.msk.mxu0 %vm10277_vm6, %v12545_v63  ;;  %14179 = vrot.lane.b32.xlu1 %v30475_v47, %s29093_s0  ;;  %v11552_v32 = vsel %vm6791_vm4, %v30676_v33, %v11543_v18  ;;  %v11553_v49 = vsel %vm6791_vm4, %v11543_v18, %v30738_v54  ;;  %v12871_v33 = vsel %vm12869_vm8, %v30638_v26, %v30740_v56  ;;  %s29110_s0 = smov 46   ;;  %vm13857_vm4 = vcmask 211968  }
 0x451   : > { %16499 = vrot.lane.b32.xlu0 %v30494_v61, %s29108_s26  ;;  %27780 = vmatmul.mubr.msk.f32.vlgmr.msra.gmra.mrb[6].mxu1 %vm10273_vm7, %v30905_v25  ;;  %v12875_v63 = vsel %vm12869_vm8, %v30777_v3, %v30883_v42  ;;  %v12874_v26 = vsel %vm12869_vm8, %v30766_v1, %v30777_v3  ;;  %v13199_v3 = vsel %vm8491_vm11, %v30630_v24, %v30646_v28 }
 0x452   : > { %27161 = vmatmul.mubr.msk.f32.vlgmr.msra.gmra.mrb[4].mxu0 %vm10273_vm7, %v31091_v34  ;;  %27126 = vmatprep.subr.msk.mxu1 %vm10277_vm6, %v11553_v49 }
 0x453   : > { %27166 = vmatpush1.msk.msra.mxu0 %vm10277_vm6, %v12544_v14  ;;  %27127 = vmatpush1.msk.msra.mxu1 %vm10277_vm6, %v11552_v32  ;;  %v31117_v54 = vpop.permute.xlu1 %14177  ;;  %v31119_v25 = vpop.permute.xlu0 %14175  ;;  %v13200_v32 = vsel %vm8491_vm11, %v30646_v28, %v30748_v58 }
 0x454   : > { %27171 = vmatprep.subr.msk.mxu0 %vm10277_vm6, %v12871_v33  ;;  %16825 = vrot.lane.b32.xlu1 %v30475_v47, %s29109_s10  ;;  %v13204_v33 = vsel %vm8491_vm11, %v30783_v11, %v30902_v13 }
 0x455   : > { %16823 = vrot.lane.b32.xlu0 %v30515_v7, %s29109_s10  ;;  %12769 = vmatprep.mubr.f32.mxu0 %v29069_v16 }
 0x456   : > { %11708 = vmatprep.mubr.f32.mxu1 %v29069_v16  ;;  %27782 = vmatprep.subr.mxu1 %v29069_v16 }
 0x457   : > { %27167 = vmatmul.mubr.msk.f32.vlgmr.msra.gmra.mrb[6].mxu0 %vm10273_vm7, %v31091_v34  ;;  %27128 = vmatmul.mubr.msk.f32.vlgmr.msra.gmra.mrb[4].mxu1 %vm10273_vm7, %v30950_v39  ;;  %v31136_v45 = vpop.permute.xlu1 %14183  ;;  %v31138_v38 = vpop.permute.xlu0 %14173 }
 0x458   : > { %27172 = vmatpush1.msk.msra.mxu0 %vm10277_vm6, %v12870_v15  ;;  %27783 = vmatpush3.msk.msra.mxu1 %vm10277_vm6, %v30845_v2  ;;  %v13203_v15 = vsel %vm8491_vm11, %v30924_v37, %v30783_v11  ;;  %v13528_v11 = vsel %vm8831_vm13, %v30974_v12, %v30952_v29 }
 0x459   : > { %27177 = vmatprep.subr.msk.mxu0 %vm10277_vm6, %v12875_v63  ;;  %16831 = vrot.lane.b32.xlu1 %v30507_v5, %s29109_s10  ;;  %v13529_v63 = vsel %vm8831_vm13, %v30952_v29, %v30947_v44  ;;  %v31243_v29 = vld [vmem:[%s29170_s21 + $0x50] sm:$0xff] }
 0x45a   : > { %16821 = vrot.lane.b32.xlu0 %v30486_v53, %s29109_s10  ;;  %12957 = vmatprep.mubr.f32.mxu0 %v29069_v16 }
 0x45b   : > { %27173 = vmatmul.mubr.msk.f32.vlgmr.msra.gmra.mrb[4].mxu0 %vm10273_vm7, %v31147_v22  ;;  %v31160_v2 = vpop.permute.xlu1 %14181  ;;  %v31162_v18 = vpop.permute.xlu0 %14185  ;;  %27784 = vmatprep.mubr.msk.f32.mxu1 %vm29104_vm10, %v29069_v16 }
 0x45c   : > { %27178 = vmatpush1.msk.msra.mxu0 %vm10277_vm6, %v12874_v26  ;;  %13099 = vmatprep.mubr.f32.mxu0 %v29069_v16 }
 0x45d   : > { %27183 = vmatprep.subr.msk.mxu0 %vm10277_vm6, %v13200_v32  ;;  %16829 = vrot.lane.b32.xlu1 %v30494_v61, %s29109_s10 }
 0x45e   : > { %16833 = vrot.lane.b32.xlu0 %v30509_v6, %s29109_s10  ;;  %27785 = vmatmul.mubr.msk.f32.vlgmr.msra.gmra.mrb[6].mxu1 %vm10273_vm7, %v30950_v39  ;;  %v31192_v39 = vld [vmem:[%s29170_s21 + $0x48] sm:$0xff] }
 0x45f   : > { %27179 = vmatmul.mubr.msk.f32.vlgmr.msra.gmra.mrb[6].mxu0 %vm10273_vm7, %v31147_v22  ;;  %v31183_v49 = vpop.permute.xlu1 %14504  ;;  %v11872_v14 = vpop.permute.xlu0 %11871  ;;  %12038 = vmatprep.mubr.f32.mxu1 %v29069_v16 }
 0x460   : > { %27184 = vmatpush1.msk.msra.mxu0 %vm10277_vm6, %v13199_v3  ;;  %13286 = vmatprep.mubr.f32.mxu0 %v29069_v16  ;;  %v11882_v24 = vsel %vm32971_vm2, %v30686_v35, %v11872_v14  ;;  %v11883_v28 = vsel %vm32971_vm2, %v11872_v14, %v30746_v57  ;;  %v13533_v3 = vsel %vm8831_vm13, %v30972_v10, %v30999_v46  ;;  %vm32976_vm2 = vcmask 48128  }
 0x461   : > { %27189 = vmatprep.subr.msk.mxu0 %vm10277_vm6, %v13204_v33  ;;  %17153 = vrot.lane.b32.xlu1 %v30515_v7, %s29110_s0  ;;  %v13859_v33 = vsel %vm13857_vm4, %v31019_v41, %v31047_v43 }
 0x462   : > { %14508 = vrot.lane.b32.xlu0 %v30475_v47, %s29094_s2  ;;  %27138 = vmatprep.subr.msk.mxu1 %vm10277_vm6, %v11883_v28  ;;  %v13858_v28 = vsel %vm13857_vm4, %v31042_v48, %v31019_v41  ;;  %s29111_s2 = smov 45  }
 0x463   : > { %27185 = vmatmul.mubr.msk.f32.vlgmr.msra.gmra.mrb[4].mxu0 %vm10273_vm7, %v31192_v39  ;;  %27139 = vmatpush1.msk.msra.mxu1 %vm10277_vm6, %v11882_v24  ;;  %v31210_v35 = vpop.permute.xlu1 %14502  ;;  %v31212_v57 = vpop.permute.xlu0 %14506 }
 0x464   : > { %27190 = vmatpush1.msk.msra.mxu0 %vm10277_vm6, %v13203_v15  ;;  %13428 = vmatprep.mubr.f32.mxu0 %v29069_v16 }
 0x465   : > { %27195 = vmatprep.subr.msk.mxu0 %vm10277_vm6, %v13529_v63  ;;  %17151 = vrot.lane.b32.xlu1 %v30486_v53, %s29110_s0  ;;  %v13862_v63 = vsel %vm13857_vm4, %v31093_v31, %v31070_v60 }
 0x466   : > { %17155 = vrot.lane.b32.xlu0 %v30475_v47, %s29110_s0  ;;  %27787 = vmatprep.subr.mxu1 %v29069_v16 }
 0x467   : > { %27191 = vmatmul.mubr.msk.f32.vlgmr.msra.gmra.mrb[6].mxu0 %vm10273_vm7, %v31192_v39  ;;  %27140 = vmatmul.mubr.msk.f32.vlgmr.msra.gmra.mrb[4].mxu1 %vm10273_vm7, %v30997_v30  ;;  %v31232_v26 = vpop.permute.xlu1 %14514  ;;  %v31234_v32 = vpop.permute.xlu0 %14512 }
 0x468   : > { %27196 = vmatpush1.msk.msra.mxu0 %vm10277_vm6, %v13528_v11  ;;  %27788 = vmatpush3.msk.msra.mxu1 %vm10277_vm6, %v30867_v50  ;;  %v13532_v50 = vsel %vm8831_vm13, %v30994_v27, %v30972_v10  ;;  %v14188_v11 = vsel %vm9511_vm1, %v31119_v25, %v31117_v54 }
 0x469   : > { %27201 = vmatprep.subr.msk.mxu0 %vm10277_vm6, %v13533_v3  ;;  %17163 = vrot.lane.b32.xlu1 %v30509_v6, %s29110_s0 }
 0x46a   : > { %17161 = vrot.lane.b32.xlu0 %v30507_v5, %s29110_s0  ;;  %13615 = vmatprep.mubr.f32.mxu0 %v29069_v16 }
 0x46b   : > { %27197 = vmatmul.mubr.msk.f32.vlgmr.msra.gmra.mrb[4].mxu0 %vm10273_vm7, %v31243_v29  ;;  %v12202_v12 = vpop.permute.xlu1 %12201  ;;  %27789 = vmatprep.mubr.msk.f32.mxu1 %vm29104_vm10, %v29069_v16  ;;  %v31258_v14 = vpop.permute.xlu0 %14510 }
 0x46c   : > { %27202 = vmatpush1.msk.msra.mxu0 %vm10277_vm6, %v13532_v50  ;;  %13757 = vmatprep.mubr.f32.mxu0 %v29069_v16  ;;  %v12213_v10 = vsel %vm12209_vm9, %v12202_v12, %v30754_v59  ;;  %v12212_v24 = vsel %vm12209_vm9, %v30700_v52, %v12202_v12  ;;  %v13863_v52 = vsel %vm13857_vm4, %v31070_v60, %v31068_v62  ;;  %v31342_v12 = vld [vmem:[%s29170_s21 + $0x60] sm:$0xff]  ;;  %vm32974_vm9 = vcmask 130048  }
 0x46d   : > { %27207 = vmatprep.subr.msk.mxu0 %vm10277_vm6, %v13859_v33  ;;  %14837 = vrot.lane.b32.xlu1 %v30475_v47, %s29102_s22  ;;  %v14192_v50 = vsel %vm9511_vm1, %v31136_v45, %v31162_v18  ;;  %v14191_v33 = vsel %vm9511_vm1, %v31160_v2, %v31136_v45  ;;  %s29112_s22 = smov 44  }
 0x46e   : > { %17159 = vrot.lane.b32.xlu0 %v30494_v61, %s29110_s0  ;;  %27790 = vmatmul.mubr.msk.f32.vlgmr.msra.gmra.mrb[6].mxu1 %vm10273_vm7, %v30997_v30  ;;  %v31295_v30 = vld [vmem:[%s29170_s21 + $0x58] sm:$0xff] }
 0x46f   : > { %27203 = vmatmul.mubr.msk.f32.vlgmr.msra.gmra.mrb[6].mxu0 %vm10273_vm7, %v31243_v29  ;;  %27150 = vmatprep.subr.msk.mxu1 %vm10277_vm6, %v12213_v10  ;;  %v31282_v59 = vpop.permute.xlu1 %14835  ;;  %v31284_v15 = vpop.permute.xlu0 %14833 }
 0x470   : > { %27208 = vmatpush1.msk.msra.mxu0 %vm10277_vm6, %v13858_v28  ;;  %27151 = vmatpush1.msk.msra.mxu1 %vm10277_vm6, %v12212_v24  ;;  %v14517_v24 = vsel %vm9851_vm5, %v31183_v49, %v31212_v57  ;;  %v14516_v28 = vsel %vm9851_vm5, %v31210_v35, %v31183_v49 }
 0x471   : > { %27213 = vmatprep.subr.msk.mxu0 %vm10277_vm6, %v13863_v52  ;;  %17485 = vrot.lane.b32.xlu1 %v30475_v47, %s29111_s2  ;;  %v31388_v52 = vld [vmem:[%s29170_s21 + $0x68] sm:$0xff] }
 0x472   : > { %17483 = vrot.lane.b32.xlu0 %v30515_v7, %s29111_s2  ;;  %13945 = vmatprep.mubr.f32.mxu0 %v29069_v16 }
 0x473   : > { %12368 = vmatprep.mubr.f32.mxu1 %v29069_v16  ;;  %27792 = vmatprep.subr.mxu1 %v29069_v16  ;;  %v31302_v41 = vpop.permute.xlu1 %14841  ;;  %v31304_v48 = vpop.permute.xlu0 %14831 }
 0x474   : > { %27209 = vmatmul.mubr.msk.f32.vlgmr.msra.gmra.mrb[4].mxu0 %vm10273_vm7, %v31295_v30  ;;  %27152 = vmatmul.mubr.msk.f32.vlgmr.msra.gmra.mrb[4].mxu1 %vm10273_vm7, %v31045_v17 }
 0x475   : > { %27214 = vmatpush1.msk.msra.mxu0 %vm10277_vm6, %v13862_v63  ;;  %27793 = vmatpush3.msk.msra.mxu1 %vm10277_vm6, %v30885_v23  ;;  %v14187_v23 = vsel %vm9511_vm1, %v31138_v38, %v31119_v25  ;;  %v14520_v63 = vsel %vm9851_vm5, %v31258_v14, %v31234_v32 }
 0x476   : > { %27219 = vmatprep.subr.msk.mxu0 %vm10277_vm6, %v14188_v11  ;;  %17491 = vrot.lane.b32.xlu1 %v30507_v5, %s29111_s2  ;;  %v14847_v11 = vsel %vm32974_vm9, %v31284_v15, %v31282_v59 }
 0x477   : > { %17481 = vrot.lane.b32.xlu0 %v30486_v53, %s29111_s2  ;;  %14087 = vmatprep.mubr.f32.mxu0 %v29069_v16  ;;  %v31325_v60 = vpop.permute.xlu1 %14839  ;;  %v31327_v3 = vpop.permute.xlu0 %14843 }
 0x478   : > { %27215 = vmatmul.mubr.msk.f32.vlgmr.msra.gmra.mrb[6].mxu0 %vm10273_vm7, %v31295_v30  ;;  %27794 = vmatprep.mubr.msk.f32.mxu1 %vm29104_vm10, %v29069_v16 }
 0x479   : > { %27220 = vmatpush1.msk.msra.mxu0 %vm10277_vm6, %v14187_v23  ;;  %14274 = vmatprep.mubr.f32.mxu0 %v29069_v16 }
 0x47a   : > { %27225 = vmatprep.subr.msk.mxu0 %vm10277_vm6, %v14192_v50  ;;  %17489 = vrot.lane.b32.xlu1 %v30494_v61, %s29111_s2  ;;  %v14851_v50 = vsel %vm32974_vm9, %v31302_v41, %v31327_v3 }
 0x47b   : > { %17493 = vrot.lane.b32.xlu0 %v30509_v6, %s29111_s2  ;;  %v31349_v25 = vpop.permute.xlu1 %15164  ;;  %v12532_v38 = vpop.permute.xlu0 %12531  ;;  %27795 = vmatmul.mubr.msk.f32.vlgmr.msra.gmra.mrb[6].mxu1 %vm10273_vm7, %v31045_v17 }
 0x47c   : > { %27221 = vmatmul.mubr.msk.f32.vlgmr.msra.gmra.mrb[4].mxu0 %vm10273_vm7, %v31342_v12  ;;  %v12543_v10 = vsel %vm12539_vm3, %v12532_v38, %v30764_v0  ;;  %12698 = vmatprep.mubr.f32.mxu1 %v29069_v16  ;;  %v12542_v17 = vsel %vm12539_vm3, %v30708_v20, %v12532_v38  ;;  %v14521_v20 = vsel %vm9851_vm5, %v31234_v32, %v31232_v26  ;;  %v31432_v38 = vld [vmem:[%s29170_s21 + $0x70] sm:$0xff]  ;;  %vm15178_vm3 = vcmask 64512  }
 0x47d   : > { %27226 = vmatpush1.msk.msra.mxu0 %vm10277_vm6, %v14191_v33  ;;  %14416 = vmatprep.mubr.f32.mxu0 %v29069_v16 }
 0x47e   : > { %27231 = vmatprep.subr.msk.mxu0 %vm10277_vm6, %v14517_v24  ;;  %17813 = vrot.lane.b32.xlu1 %v30515_v7, %s29112_s22 }
 0x47f   : > { %15168 = vrot.lane.b32.xlu0 %v30475_v47, %s29103_s23  ;;  %27162 = vmatprep.subr.msk.mxu1 %vm10277_vm6, %v12543_v10  ;;  %v15163_v0 = vpop.permute.xlu1 %15162  ;;  %v31374_v45 = vpop.permute.xlu0 %15166 }
 0x480   : > { %27227 = vmatmul.mubr.msk.f32.vlgmr.msra.gmra.mrb[6].mxu0 %vm10273_vm7, %v31342_v12  ;;  %27163 = vmatpush1.msk.msra.mxu1 %vm10277_vm6, %v12542_v17 }
 0x481   : > { %27232 = vmatpush1.msk.msra.mxu0 %vm10277_vm6, %v14516_v28  ;;  %14603 = vmatprep.mubr.f32.mxu0 %v29069_v16  ;;  %v31478_v28 = vld [vmem:[%s29170_s21 + $0x78] sm:$0xff] }
 0x482   : > { %27237 = vmatprep.subr.msk.mxu0 %vm10277_vm6, %v14521_v20  ;;  %17811 = vrot.lane.b32.xlu1 %v30486_v53, %s29112_s22 }
 0x483   : > { %17815 = vrot.lane.b32.xlu0 %v30475_v47, %s29112_s22  ;;  %27797 = vmatprep.subr.mxu1 %v29069_v16  ;;  %v31396_v49 = vpop.permute.xlu1 %15174  ;;  %v15173_v35 = vpop.permute.xlu0 %15172 }
 0x484   : > { %27233 = vmatmul.mubr.msk.f32.vlgmr.msra.gmra.mrb[4].mxu0 %vm10273_vm7, %v31388_v52  ;;  %27164 = vmatmul.mubr.msk.f32.vlgmr.msra.gmra.mrb[4].mxu1 %vm10273_vm7, %v31091_v34  ;;  %v15184_v17 = vsel %vm15178_vm3, %v15173_v35, %v31396_v49 }
 0x485   : > { %27238 = vmatpush1.msk.msra.mxu0 %vm10277_vm6, %v14520_v63  ;;  %27798 = vmatpush3.msk.msra.mxu1 %vm10277_vm6, %v30907_v19  ;;  %v14846_v19 = vsel %vm32974_vm9, %v31304_v48, %v31284_v15 }
 0x486   : > { %27243 = vmatprep.subr.msk.mxu0 %vm10277_vm6, %v14847_v11  ;;  %17823 = vrot.lane.b32.xlu1 %v30509_v6, %s29112_s22 }
 0x487   : > { %17821 = vrot.lane.b32.xlu0 %v30507_v5, %s29112_s22  ;;  %14745 = vmatprep.mubr.f32.mxu0 %v29069_v16  ;;  %v12862_v32 = vpop.permute.xlu1 %12861  ;;  %v31417_v23 = vpop.permute.xlu0 %15170 }
 0x488   : > { %27239 = vmatmul.mubr.msk.f32.vlgmr.msra.gmra.mrb[6].mxu0 %vm10273_vm7, %v31388_v52  ;;  %27799 = vmatprep.mubr.msk.f32.mxu1 %vm29104_vm10, %v29069_v16  ;;  %v12873_v33 = vsel %vm12869_vm8, %v12862_v32, %v30766_v1  ;;  %v12872_v15 = vsel %vm12869_vm8, %v30740_v56, %v12862_v32  ;;  %v14850_v1 = vsel %vm32974_vm9, %v31325_v60, %v31302_v41  ;;  %vm15511_vm8 = vcmask 56320   ;;  %v31516_v32 = vld [vmem:[%s29170_s21 + $0x80] sm:$0xff] }
 0x489   : > { %27244 = vmatpush1.msk.msra.mxu0 %vm10277_vm6, %v14846_v19  ;;  %14933 = vmatprep.mubr.f32.mxu0 %v29069_v16  ;;  %v15180_v56 = vsel %vm15178_vm3, %v31349_v25, %v31374_v45 }
 0x48a   : > { %27249 = vmatprep.subr.msk.mxu0 %vm10277_vm6, %v14851_v50  ;;  %17819 = vrot.lane.b32.xlu1 %v30494_v61, %s29112_s22 }
 0x48b   : > { %15176 = vrot.lane.b32.xlu0 %v30509_v6, %s29103_s23  ;;  %27800 = vmatmul.mubr.msk.f32.vlgmr.msra.gmra.mrb[6].mxu1 %vm10273_vm7, %v31091_v34  ;;  %v31445_v48 = vpop.permute.xlu1 %15499  ;;  %v15498_v10 = vpop.permute.xlu0 %15497  ;;  %s29113_s23 = smov 36   ;;  %v15179_v34 = vsel %vm15178_vm3, %v15163_v0, %v31349_v25  ;;  %v15183_v25 = vsel %vm15178_vm3, %v31417_v23, %v15173_v35 }
 0x48c   : > { %27245 = vmatmul.mubr.msk.f32.vlgmr.msra.gmra.mrb[4].mxu0 %vm10273_vm7, %v31432_v38  ;;  %27174 = vmatprep.subr.msk.mxu1 %vm10277_vm6, %v12873_v33  ;;  %v15513_v0 = vsel %vm15511_vm8, %v15498_v10, %v31445_v48 }
 0x48d   : > { %27250 = vmatpush1.msk.msra.mxu0 %vm10277_vm6, %v14850_v1  ;;  %27175 = vmatpush1.msk.msra.mxu1 %vm10277_vm6, %v12872_v15 }
 0x48e   : > { %27255 = vmatprep.subr.msk.mxu0 %vm10277_vm6, %v15180_v56  ;;  %18143 = vrot.lane.b32.xlu1 %v30515_v7, %s29113_s23 }
 0x48f   : > { %15501 = vrot.lane.b32.xlu0 %v30475_v47, %s29105_s18  ;;  %15075 = vmatprep.mubr.f32.mxu0 %v29069_v16 }
 0x490   : > { %13028 = vmatprep.mubr.f32.mxu1 %v29069_v16  ;;  %27802 = vmatprep.subr.mxu1 %v29069_v16 }
 0x491   : > { %27251 = vmatmul.mubr.msk.f32.vlgmr.msra.gmra.mrb[6].mxu0 %vm10273_vm7, %v31432_v38  ;;  %27176 = vmatmul.mubr.msk.f32.vlgmr.msra.gmra.mrb[4].mxu1 %vm10273_vm7, %v31147_v22  ;;  %v15506_v41 = vpop.permute.xlu1 %15505  ;;  %v15496_v24 = vpop.permute.xlu0 %15495 }
 0x492   : > { %27256 = vmatpush1.msk.msra.mxu0 %vm10277_vm6, %v15179_v34  ;;  %27803 = vmatpush3.msk.msra.mxu1 %vm10277_vm6, %v30883_v42  ;;  %v15512_v63 = vsel %vm15511_vm8, %v15496_v24, %v15498_v10  ;;  %v31562_v34 = vld [vmem:[%s29170_s21 + $0x88] sm:$0xff] }
 0x493   : > { %27261 = vmatprep.subr.msk.mxu0 %vm10277_vm6, %v15184_v17  ;;  %18141 = vrot.lane.b32.xlu1 %v30486_v53, %s29113_s23 }
 0x494   : > { %18145 = vrot.lane.b32.xlu0 %v30475_v47, %s29113_s23  ;;  %15267 = vmatprep.mubr.f32.mxu0 %v29069_v16 }
 0x495   : > { %27257 = vmatmul.mubr.msk.f32.vlgmr.msra.gmra.mrb[4].mxu0 %vm10273_vm7, %v31478_v28  ;;  %v31490_v42 = vpop.permute.xlu1 %15503  ;;  %27804 = vmatprep.mubr.msk.f32.mxu1 %vm29104_vm10, %v29069_v16 }
 0x496   : > { %27262 = vmatpush1.msk.msra.mxu0 %vm10277_vm6, %v15183_v25  ;;  %15409 = vmatprep.mubr.f32.mxu0 %v29069_v16  ;;  %v31498_v20 = vpop.permute.xlu0 %15507  ;;  %v15516_v33 = vsel %vm15511_vm8, %v31490_v42, %v15506_v41 }
 0x497   : > { %27267 = vmatprep.subr.msk.mxu0 %vm10277_vm6, %v15513_v0  ;;  %18153 = vrot.lane.b32.xlu1 %v30509_v6, %s29113_s23  ;;  %v15517_v35 = vsel %vm15511_vm8, %v15506_v41, %v31498_v20 }
 0x498   : > { %18151 = vrot.lane.b32.xlu0 %v30507_v5, %s29113_s23  ;;  %27805 = vmatmul.mubr.msk.f32.vlgmr.msra.gmra.mrb[6].mxu1 %vm10273_vm7, %v31147_v22 }
 0x499   : > { %27263 = vmatmul.mubr.msk.f32.vlgmr.msra.gmra.mrb[6].mxu0 %vm10273_vm7, %v31478_v28  ;;  %v15831_v11 = vpop.permute.xlu1 %15830  ;;  %13357 = vmatprep.mubr.f32.mxu1 %v29069_v16 }
 0x49a   : > { %27268 = vmatpush1.msk.msra.mxu0 %vm10277_vm6, %v15512_v63  ;;  %15600 = vmatprep.mubr.f32.mxu0 %v29069_v16  ;;  %v13192_v19 = vpop.permute.xlu0 %13191  ;;  %v31613_v63 = vld [vmem:[%s29170_s21 + $0x90] sm:$0xff] }
 0x49b   : > { %18149 = vrot.lane.b32.xlu1 %v30494_v61, %s29113_s23  ;;  %27273 = vmatprep.subr.msk.mxu0 %vm10277_vm6, %v15517_v35  ;;  %v13201_v22 = vsel %vm8491_vm11, %v30748_v58, %v13192_v19  ;;  %v13202_v50 = vsel %vm8491_vm11, %v13192_v19, %v30924_v37  ;;  %vm16175_vm11 = vcmask 457728  }
 0x49c   : > { %15509 = vrot.lane.b32.xlu0 %v30509_v6, %s29105_s18  ;;  %27186 = vmatprep.subr.msk.mxu1 %vm10277_vm6, %v13202_v50  ;;  %s29115_s18 = smov 34  }
 0x49d   : > { %27269 = vmatmul.mubr.msk.f32.vlgmr.msra.gmra.mrb[4].mxu0 %vm10273_vm7, %v31516_v32  ;;  %27187 = vmatpush1.msk.msra.mxu1 %vm10277_vm6, %v13201_v22  ;;  %v15829_v15 = vpop.permute.xlu1 %15828 }
 0x49e   : > { %27274 = vmatpush1.msk.msra.mxu0 %vm10277_vm6, %v15516_v33  ;;  %27807 = vmatprep.subr.mxu1 %v29069_v16  ;;  %v31535_v58 = vpop.permute.xlu0 %15832  ;;  %v15845_v10 = vsel %vm32976_vm2, %v15829_v15, %v15831_v11 }
 0x49f   : > { %18473 = vrot.lane.b32.xlu1 %v30515_v7, %s29114_s15  ;;  %27188 = vmatmul.mubr.msk.f32.vlgmr.msra.gmra.mrb[4].mxu1 %vm10273_vm7, %v31192_v39  ;;  %v15846_v37 = vsel %vm32976_vm2, %v15831_v11, %v31535_v58 }
 0x4a0   : > { %15834 = vrot.lane.b32.xlu0 %v30475_v47, %s29106_s27  ;;  %27808 = vmatpush3.msk.msra.mxu1 %vm10277_vm6, %v30902_v13 }
 0x4a1   : > { %15742 = vmatprep.mubr.f32.mxu0 %v29069_v16  ;;  %27279 = vmatprep.subr.msk.mxu0 %vm10277_vm6, %v15846_v37  ;;  %v31550_v1 = vpop.permute.xlu1 %15840 }
 0x4a2   : > { %27275 = vmatmul.mubr.msk.f32.vlgmr.msra.gmra.mrb[6].mxu0 %vm10273_vm7, %v31516_v32  ;;  %v15839_v56 = vpop.permute.xlu0 %15838  ;;  %27809 = vmatprep.mubr.msk.f32.mxu1 %vm29104_vm10, %v29069_v16 }
 0x4a3   : > { %18471 = vrot.lane.b32.xlu1 %v30486_v53, %s29114_s15  ;;  %27280 = vmatpush1.msk.msra.mxu0 %vm10277_vm6, %v15845_v10  ;;  %v15850_v13 = vsel %vm32976_vm2, %v15839_v56, %v31550_v1 }
 0x4a4   : > { %18475 = vrot.lane.b32.xlu0 %v30475_v47, %s29114_s15  ;;  %27285 = vmatprep.subr.msk.mxu0 %vm10277_vm6, %v15850_v13 }
 0x4a5   : > { %v13521_v41 = vpop.permute.xlu1 %13520  ;;  %27810 = vmatmul.mubr.msk.f32.vlgmr.msra.gmra.mrb[6].mxu1 %vm10273_vm7, %v31192_v39  ;;  %15933 = vmatprep.mubr.f32.mxu0 %v29069_v16 }
 0x4a6   : > { %v13530_v24 = vsel %vm8831_vm13, %v30947_v44, %v13521_v41  ;;  %v31572_v17 = vpop.permute.xlu0 %15836  ;;  %v13531_v25 = vsel %vm8831_vm13, %v13521_v41, %v30994_v27  ;;  %27281 = vmatmul.mubr.msk.f32.vlgmr.msra.gmra.mrb[4].mxu0 %vm10273_vm7, %v31562_v34  ;;  %13686 = vmatprep.mubr.f32.mxu1 %v29069_v16  ;;  %vm16505_vm13 = vcmask 449536  }
 0x4a7   : > { %18483 = vrot.lane.b32.xlu1 %v30509_v6, %s29114_s15  ;;  %v15849_v39 = vsel %vm32976_vm2, %v31572_v17, %v15839_v56  ;;  %27198 = vmatprep.subr.msk.mxu1 %vm10277_vm6, %v13531_v25 }
 0x4a8   : > { %18481 = vrot.lane.b32.xlu0 %v30507_v5, %s29114_s15  ;;  %27286 = vmatpush1.msk.msra.mxu0 %vm10277_vm6, %v15849_v39 }
 0x4a9   : > { %27199 = vmatpush1.msk.msra.mxu1 %vm10277_vm6, %v13530_v24  ;;  %v31588_v44 = vpop.permute.xlu1 %16165  ;;  %16075 = vmatprep.mubr.f32.mxu0 %v29069_v16 }
 0x4aa   : > { %27812 = vmatprep.subr.mxu1 %v29069_v16  ;;  %v16164_v27 = vpop.permute.xlu0 %16163  ;;  %27200 = vmatmul.mubr.msk.f32.vlgmr.msra.gmra.mrb[4].mxu1 %vm10273_vm7, %v31243_v29 }
 0x4ab   : > { %18479 = vrot.lane.b32.xlu1 %v30494_v61, %s29114_s15  ;;  %27813 = vmatpush3.msk.msra.mxu1 %vm10277_vm6, %v30999_v46  ;;  %v16177_v0 = vsel %vm16175_vm11, %v16164_v27, %v31588_v44 }
 0x4ac   : > { %15842 = vrot.lane.b32.xlu0 %v30509_v6, %s29106_s27  ;;  %27291 = vmatprep.subr.msk.mxu0 %vm10277_vm6, %v16177_v0  ;;  %s32987_s27 = smov 122  }
 0x4ad   : > { %27287 = vmatmul.mubr.msk.f32.vlgmr.msra.gmra.mrb[6].mxu0 %vm10273_vm7, %v31562_v34  ;;  %27814 = vmatprep.mubr.msk.f32.mxu1 %vm29104_vm10, %v29069_v16 }
 0x4ae   : > { %v16172_v35 = vpop.permute.xlu1 %16171  ;;  %16263 = vmatprep.mubr.f32.mxu0 %v29069_v16  ;;  %27815 = vmatmul.mubr.msk.f32.vlgmr.msra.gmra.mrb[6].mxu1 %vm10273_vm7, %v31243_v29 }
 0x4af   : > { %18803 = vrot.lane.b32.xlu1 %v30515_v7, %s29115_s18  ;;  %v16162_v46 = vpop.permute.xlu0 %16161  ;;  %14016 = vmatprep.mubr.f32.mxu1 %v29069_v16 }
 0x4b0   : > { %16167 = vrot.lane.b32.xlu0 %v30550_v21, %s29107_s7  ;;  %v16176_v11 = vsel %vm16175_vm11, %v16162_v46, %v16164_v27 }
 0x4b1   : > { %27292 = vmatpush1.msk.msra.mxu0 %vm10277_vm6, %v16176_v11 }
 0x4b2   : > { %v31620_v19 = vpop.permute.xlu1 %16169  ;;  %27293 = vmatmul.mubr.msk.f32.vlgmr.msra.gmra.mrb[4].mxu0 %vm10273_vm7, %v31613_v63 }
 0x4b3   : > { %18801 = vrot.lane.b32.xlu1 %v30486_v53, %s29115_s18  ;;  %v16180_v7 = vsel %vm16175_vm11, %v31620_v19, %v16172_v35  ;;  %v31628_v29 = vpop.permute.xlu0 %16173  ;;  %16405 = vmatprep.mubr.f32.mxu0 %v29069_v16 }
 0x4b4   : > { %18805 = vrot.lane.b32.xlu0 %v30475_v47, %s29115_s18  ;;  %v16181_v22 = vsel %vm16175_vm11, %v16172_v35, %v31628_v29 }
 0x4b5   : > { %27297 = vmatprep.subr.msk.mxu0 %vm10277_vm6, %v16181_v22 }
 0x4b6   : > { %27298 = vmatpush1.msk.msra.mxu0 %vm10277_vm6, %v16180_v7  ;;  %v16494_v50 = vpop.permute.xlu1 %16493 }
 0x4b7   : > { %16827 = vrot.lane.b32.xlu1 %v30550_v21, %s29109_s10  ;;  %v13850_v53 = vpop.permute.xlu0 %13849  ;;  %27299 = vmatmul.mubr.msk.f32.vlgmr.msra.gmra.mrb[6].mxu0 %vm10273_vm7, %v31613_v63 }
 0x4b8   : > { %16497 = vrot.lane.b32.xlu0 %v30550_v21, %s29108_s26  ;;  %v13860_v47 = vsel %vm13857_vm4, %v31047_v43, %v13850_v53  ;;  %v13861_v33 = vsel %vm13857_vm4, %v13850_v53, %v31093_v31  ;;  %16593 = vmatprep.mubr.f32.mxu0 %v29069_v16  ;;  %v31663_v31 = vld [vmem:[%s29170_s21 + $0x98] sm:$0xff]  ;;  %vm16835_vm4 = vcmask 441344  }
 0x4b9   : > { %27210 = vmatprep.subr.msk.mxu1 %vm10277_vm6, %v13861_v33 }
 0x4ba   : > { %27211 = vmatpush1.msk.msra.mxu1 %vm10277_vm6, %v13860_v47  ;;  %v16492_v15 = vpop.permute.xlu1 %16491 }
 0x4bb   : > { %17487 = vrot.lane.b32.xlu1 %v30550_v21, %s29111_s2  ;;  %v16506_v37 = vsel %vm16505_vm13, %v16492_v15, %v16494_v50  ;;  %27817 = vmatprep.subr.mxu1 %v29069_v16  ;;  %v31654_v10 = vpop.permute.xlu0 %16495  ;;  %s32981_s2 = smov 120  }
 0x4bc   : > { %17157 = vrot.lane.b32.xlu0 %v30550_v21, %s29110_s0  ;;  %27212 = vmatmul.mubr.msk.f32.vlgmr.msra.gmra.mrb[4].mxu1 %vm10273_vm7, %v31295_v30  ;;  %v16507_v43 = vsel %vm16505_vm13, %v16494_v50, %v31654_v10  ;;  %s32977_s0 = smov 121  }
 0x4bd   : > { %27818 = vmatpush3.msk.msra.mxu1 %vm10277_vm6, %v31068_v62  ;;  %27303 = vmatprep.subr.msk.mxu0 %vm10277_vm6, %v16507_v43 }
 0x4be   : > { %27304 = vmatpush1.msk.msra.mxu0 %vm10277_vm6, %v16506_v37  ;;  %v31669_v56 = vpop.permute.xlu1 %16503  ;;  %27819 = vmatprep.mubr.msk.f32.mxu1 %vm29104_vm10, %v29069_v16 }
 0x4bf   : > { %18147 = vrot.lane.b32.xlu1 %v30550_v21, %s29113_s23  ;;  %v16502_v13 = vpop.permute.xlu0 %16501  ;;  %27305 = vmatmul.mubr.msk.f32.vlgmr.msra.gmra.mrb[4].mxu0 %vm10273_vm7, %v31663_v31  ;;  %s32983_s23 = smov 115  }
 0x4c0   : > { %17817 = vrot.lane.b32.xlu0 %v30550_v21, %s29112_s22  ;;  %v16511_v62 = vsel %vm16505_vm13, %v16502_v13, %v31669_v56  ;;  %27820 = vmatmul.mubr.msk.f32.vlgmr.msra.gmra.mrb[6].mxu1 %vm10273_vm7, %v31295_v30 }
 0x4c1   : > { %27309 = vmatprep.subr.msk.mxu0 %vm10277_vm6, %v16511_v62  ;;  %14345 = vmatprep.mubr.f32.mxu1 %v29069_v16 }
 0x4c2   : > { %v14180_v41 = vpop.permute.xlu1 %14179  ;;  %16735 = vmatprep.mubr.f32.mxu0 %v29069_v16 }
 0x4c3   : > { %18807 = vrot.lane.b32.xlu1 %v30550_v21, %s29115_s18  ;;  %v14189_v24 = vsel %vm9511_vm1, %v31117_v54, %v14180_v41  ;;  %v31690_v25 = vpop.permute.xlu0 %16499  ;;  %v14190_v39 = vsel %vm9511_vm1, %v14180_v41, %v31160_v2  ;;  %v31725_v2 = vld [vmem:[%s29170_s21 + $0xa0] sm:$0xff]  ;;  %vm17165_vm1 = vcmask 375808  }
 0x4c4   : > { %18477 = vrot.lane.b32.xlu0 %v30550_v21, %s29114_s15  ;;  %v16510_v30 = vsel %vm16505_vm13, %v31690_v25, %v16502_v13  ;;  %27222 = vmatprep.subr.msk.mxu1 %vm10277_vm6, %v14190_v39  ;;  %v31810_v39 = vld [vmem:[%s29170_s21 + $0xb0] sm:$0xff]  ;;  %s33016_s15 = smov 126  }
 0x4c5   : > { %27310 = vmatpush1.msk.msra.mxu0 %vm10277_vm6, %v16510_v30  ;;  %27223 = vmatpush1.msk.msra.mxu1 %vm10277_vm6, %v14189_v24 }
 0x4c6   : > { %v31701_v27 = vpop.permute.xlu1 %16825  ;;  %27822 = vmatprep.subr.mxu1 %v29069_v16  ;;  %27224 = vmatmul.mubr.msk.f32.vlgmr.msra.gmra.mrb[4].mxu1 %vm10273_vm7, %v31342_v12 }
 0x4c7   : > { %18811 = vrot.lane.b32.xlu1 %v30507_v5, %s29115_s18  ;;  %v16824_v21 = vpop.permute.xlu0 %16823  ;;  %27823 = vmatpush3.msk.msra.mxu1 %vm10277_vm6, %v31162_v18 }
 0x4c8   : > { %18809 = vrot.lane.b32.xlu0 %v30494_v61, %s29115_s18  ;;  %v16837_v54 = vsel %vm16835_vm4, %v16824_v21, %v31701_v27  ;;  %27311 = vmatmul.mubr.msk.f32.vlgmr.msra.gmra.mrb[6].mxu0 %vm10273_vm7, %v31663_v31 }
 0x4c9   : > { %27315 = vmatprep.subr.msk.mxu0 %vm10277_vm6, %v16837_v54  ;;  %16923 = vmatprep.mubr.f32.mxu0 %v29069_v16 }
 0x4ca   : > { %27824 = vmatprep.mubr.msk.f32.mxu1 %vm29104_vm10, %v29069_v16 }
 0x4cb   : > { %v16832_v5 = vpop.permute.xlu1 %16831  ;;  %27825 = vmatmul.mubr.msk.f32.vlgmr.msra.gmra.mrb[6].mxu1 %vm10273_vm7, %v31342_v12 }
 0x4cc   : > { %18813 = vrot.lane.b32.xlu0 %v30509_v6, %s29115_s18  ;;  %v16822_v61 = vpop.permute.xlu0 %16821  ;;  %14674 = vmatprep.mubr.f32.mxu1 %v29069_v16  ;;  %s32985_s18 = smov 114  }
 0x4cd   : > { %v16836_v18 = vsel %vm16835_vm4, %v16822_v61, %v16824_v21 }
 0x4ce   : > { %27316 = vmatpush1.msk.msra.mxu0 %vm10277_vm6, %v16836_v18 }
 0x4cf   : > { %v31730_v0 = vpop.permute.xlu1 %16829  ;;  %27317 = vmatmul.mubr.msk.f32.vlgmr.msra.gmra.mrb[4].mxu0 %vm10273_vm7, %v31725_v2 }
 0x4d0   : > { %v16840_v12 = vsel %vm16835_vm4, %v31730_v0, %v16832_v5  ;;  %v31736_v35 = vpop.permute.xlu0 %16833  ;;  %17065 = vmatprep.mubr.f32.mxu0 %v29069_v16 }
 0x4d1   : > { %v16841_v6 = vsel %vm16835_vm4, %v16832_v5, %v31736_v35 }
 0x4d2   : > { %27321 = vmatprep.subr.msk.mxu0 %vm10277_vm6, %v16841_v6 }
 0x4d3   : > { %27322 = vmatpush1.msk.msra.mxu0 %vm10277_vm6, %v16840_v12  ;;  %v17154_v46 = vpop.permute.xlu1 %17153 }
 0x4d4   : > { %v14509_v11 = vpop.permute.xlu0 %14508  ;;  %27323 = vmatmul.mubr.msk.f32.vlgmr.msra.gmra.mrb[6].mxu0 %vm10273_vm7, %v31725_v2 }
 0x4d5   : > { %v14518_v7 = vsel %vm9851_vm5, %v31212_v57, %v14509_v11  ;;  %v14519_v22 = vsel %vm9851_vm5, %v14509_v11, %v31258_v14  ;;  %17253 = vmatprep.mubr.f32.mxu0 %v29069_v16  ;;  %v31765_v14 = vld [vmem:[%s29170_s21 + $0xa8] sm:$0xff]  ;;  %vm17495_vm5 = vcmask 367616  }
 0x4d6   : > { %27234 = vmatprep.subr.msk.mxu1 %vm10277_vm6, %v14519_v22 }
 0x4d7   : > { %27235 = vmatpush1.msk.msra.mxu1 %vm10277_vm6, %v14518_v7  ;;  %v17152_v50 = vpop.permute.xlu1 %17151 }
 0x4d8   : > { %v17166_v53 = vsel %vm17165_vm1, %v17152_v50, %v17154_v46  ;;  %27827 = vmatprep.subr.mxu1 %v29069_v16  ;;  %v31754_v47 = vpop.permute.xlu0 %17155  ;;  %27236 = vmatmul.mubr.msk.f32.vlgmr.msra.gmra.mrb[4].mxu1 %vm10273_vm7, %v31388_v52 }
 0x4d9   : > { %27828 = vmatpush3.msk.msra.mxu1 %vm10277_vm6, %v31232_v26  ;;  %v17167_v57 = vsel %vm17165_vm1, %v17154_v46, %v31754_v47  ;;  %27829 = vmatprep.mubr.msk.f32.mxu1 %vm29104_vm10, %v29069_v16 }
 0x4da   : > { %27327 = vmatprep.subr.msk.mxu0 %vm10277_vm6, %v17167_v57 }
 0x4db   : > { %27328 = vmatpush1.msk.msra.mxu0 %vm10277_vm6, %v17166_v53  ;;  %v31769_v33 = vpop.permute.xlu1 %17163 }
 0x4dc   : > { %v17162_v15 = vpop.permute.xlu0 %17161  ;;  %27830 = vmatmul.mubr.msk.f32.vlgmr.msra.gmra.mrb[6].mxu1 %vm10273_vm7, %v31388_v52  ;;  %27329 = vmatmul.mubr.msk.f32.vlgmr.msra.gmra.mrb[4].mxu0 %vm10273_vm7, %v31765_v14 }
 0x4dd   : > { %v17171_v26 = vsel %vm17165_vm1, %v17162_v15, %v31769_v33  ;;  %15004 = vmatprep.mubr.f32.mxu1 %v29069_v16  ;;  %17395 = vmatprep.mubr.f32.mxu0 %v29069_v16 }
 0x4de   : > { %27333 = vmatprep.subr.msk.mxu0 %vm10277_vm6, %v17171_v26 }
 0x4df   : > { %v14838_v37 = vpop.permute.xlu1 %14837 }
 0x4e0   : > { %v14848_v43 = vsel %vm32974_vm9, %v31282_v59, %v14838_v37  ;;  %v31782_v13 = vpop.permute.xlu0 %17159  ;;  %v14849_v52 = vsel %vm32974_vm9, %v14838_v37, %v31325_v60  ;;  %vm17825_vm9 = vcmask 359424  }
 0x4e1   : > { %v17170_v62 = vsel %vm17165_vm1, %v31782_v13, %v17162_v15  ;;  %27246 = vmatprep.subr.msk.mxu1 %vm10277_vm6, %v14849_v52 }
 0x4e2   : > { %27334 = vmatpush1.msk.msra.mxu0 %vm10277_vm6, %v17170_v62  ;;  %27247 = vmatpush1.msk.msra.mxu1 %vm10277_vm6, %v14848_v43 }
 0x4e3   : > { %v31791_v41 = vpop.permute.xlu1 %17485  ;;  %27832 = vmatprep.subr.mxu1 %v29069_v16  ;;  %27248 = vmatmul.mubr.msk.f32.vlgmr.msra.gmra.mrb[4].mxu1 %vm10273_vm7, %v31432_v38 }
 0x4e4   : > { %v17484_v59 = vpop.permute.xlu0 %17483  ;;  %27833 = vmatpush3.msk.msra.mxu1 %vm10277_vm6, %v31327_v3  ;;  %27335 = vmatmul.mubr.msk.f32.vlgmr.msra.gmra.mrb[6].mxu0 %vm10273_vm7, %v31765_v14 }
 0x4e5   : > { %v17497_v60 = vsel %vm17495_vm5, %v17484_v59, %v31791_v41  ;;  %17583 = vmatprep.mubr.f32.mxu0 %v29069_v16  ;;  %27834 = vmatprep.mubr.msk.f32.mxu1 %vm29104_vm10, %v29069_v16 }
 0x4e6   : > { %27339 = vmatprep.subr.msk.mxu0 %vm10277_vm6, %v17497_v60 }
 0x4e7   : > { %27835 = vmatmul.mubr.msk.f32.vlgmr.msra.gmra.mrb[6].mxu1 %vm10273_vm7, %v31432_v38 }
 0x4e8   : > { %v17492_v24 = vpop.permute.xlu1 %17491  ;;  %15338 = vmatprep.mubr.f32.mxu1 %v29069_v16 }
 0x4e9   : > { %v17482_v3 = vpop.permute.xlu0 %17481 }
 0x4ea   : > { %v17496_v30 = vsel %vm17495_vm5, %v17482_v3, %v17484_v59 }
 0x4eb   : > { %27340 = vmatpush1.msk.msra.mxu0 %vm10277_vm6, %v17496_v30 }
 0x4ec   : > { %v31814_v21 = vpop.permute.xlu1 %17489  ;;  %27341 = vmatmul.mubr.msk.f32.vlgmr.msra.gmra.mrb[4].mxu0 %vm10273_vm7, %v31810_v39 }
 0x4ed   : > { %v17500_v54 = vsel %vm17495_vm5, %v31814_v21, %v17492_v24  ;;  %v31820_v5 = vpop.permute.xlu0 %17493  ;;  %17725 = vmatprep.mubr.f32.mxu0 %v29069_v16 }
 0x4ee   : > { %v17501_v38 = vsel %vm17495_vm5, %v17492_v24, %v31820_v5 }
 0x4ef   : > { %27345 = vmatprep.subr.msk.mxu0 %vm10277_vm6, %v17501_v38 }
 0x4f0   : > { %27346 = vmatpush1.msk.msra.mxu0 %vm10277_vm6, %v17500_v54  ;;  %v17814_v61 = vpop.permute.xlu1 %17813 }
 0x4f1   : > { %v15169_v18 = vpop.permute.xlu0 %15168  ;;  %27347 = vmatmul.mubr.msk.f32.vlgmr.msra.gmra.mrb[6].mxu0 %vm10273_vm7, %v31810_v39 }
 0x4f2   : > { %v15181_v12 = vsel %vm15178_vm3, %v31374_v45, %v15169_v18  ;;  %v15182_v6 = vsel %vm15178_vm3, %v15169_v18, %v31417_v23  ;;  %17913 = vmatprep.mubr.f32.mxu0 %v29069_v16  ;;  %v31845_v23 = vld [vmem:[%s29170_s21 + $0xb8] sm:$0xff] }
 0x4f3   : > { %27258 = vmatprep.subr.msk.mxu1 %vm10277_vm6, %v15182_v6 }
 0x4f4   : > { %27259 = vmatpush1.msk.msra.mxu1 %vm10277_vm6, %v15181_v12  ;;  %v17812_v46 = vpop.permute.xlu1 %17811 }
 0x4f5   : > { %v17826_v11 = vsel %vm17825_vm9, %v17812_v46, %v17814_v61  ;;  %v31837_v7 = vpop.permute.xlu0 %17815  ;;  %27837 = vmatprep.subr.mxu1 %v29069_v16  ;;  %27260 = vmatmul.mubr.msk.f32.vlgmr.msra.gmra.mrb[4].mxu1 %vm10273_vm7, %v31478_v28 }
 0x4f6   : > { %v17827_v45 = vsel %vm17825_vm9, %v17814_v61, %v31837_v7  ;;  %27839 = vmatprep.mubr.msk.f32.mxu1 %vm29104_vm10, %v29069_v16 }
 0x4f7   : > { %27351 = vmatprep.subr.msk.mxu0 %vm10277_vm6, %v17827_v45 }
 0x4f8   : > { %27352 = vmatpush1.msk.msra.mxu0 %vm10277_vm6, %v17826_v11  ;;  %v31851_v22 = vpop.permute.xlu1 %17823 }
 0x4f9   : > { %v17822_v50 = vpop.permute.xlu0 %17821  ;;  %27353 = vmatmul.mubr.msk.f32.vlgmr.msra.gmra.mrb[4].mxu0 %vm10273_vm7, %v31845_v23 }
 0x4fa   : > { %v17831_v53 = vsel %vm17825_vm9, %v17822_v50, %v31851_v22  ;;  %18055 = vmatprep.mubr.f32.mxu0 %v29069_v16 }
 0x4fb   : > { %27357 = vmatprep.subr.msk.mxu0 %vm10277_vm6, %v17831_v53 }
 0x4fc   : > { %v31859_v57 = vpop.permute.xlu1 %17819 }
 0x4fd   : > { %v17830_v15 = vsel %vm17825_vm9, %v31859_v57, %v17822_v50  ;;  %v15177_v26 = vpop.permute.xlu0 %15176  ;;  %v31931_v50 = vld [vmem:[%s29170_s21 + $0xc8] sm:$0xff] }
 0x4fe   : > { %v15185_v37 = vsel %vm15178_vm3, %v31396_v49, %v15177_v26  ;;  %27358 = vmatpush1.msk.msra.mxu0 %vm10277_vm6, %v17830_v15 }
 0x4ff   : > { %27838 = vmatpush3.msk.msra.mxu1 %vm10277_vm6, %v15185_v37  ;;  %27359 = vmatmul.mubr.msk.f32.vlgmr.msra.gmra.mrb[6].mxu0 %vm10273_vm7, %v31845_v23 }
 0x500   : > { %v18144_v43 = vpop.permute.xlu1 %18143  ;;  %27840 = vmatmul.mubr.msk.f32.vlgmr.msra.gmra.mrb[6].mxu1 %vm10273_vm7, %v31478_v28  ;;  %18243 = vmatprep.mubr.f32.mxu0 %v29069_v16 }
 0x501   : > { %v15502_v52 = vpop.permute.xlu0 %15501  ;;  %15671 = vmatprep.mubr.f32.mxu1 %v29069_v16 }
 0x502   : > { %v15514_v49 = vsel %vm15511_vm8, %v31445_v48, %v15502_v52  ;;  %v15515_v62 = vsel %vm15511_vm8, %v15502_v52, %v31490_v42  ;;  %v31890_v42 = vld [vmem:[%s29170_s21 + $0xc0] sm:$0xff] }
 0x503   : > { %27270 = vmatprep.subr.msk.mxu1 %vm10277_vm6, %v15515_v62 }
 0x504   : > { %27271 = vmatpush1.msk.msra.mxu1 %vm10277_vm6, %v15514_v49 }
 0x505   : > { %v18142_v59 = vpop.permute.xlu1 %18141  ;;  %27842 = vmatprep.subr.mxu1 %v29069_v16  ;;  %27272 = vmatmul.mubr.msk.f32.vlgmr.msra.gmra.mrb[4].mxu1 %vm10273_vm7, %v31516_v32 }
 0x506   : > { %v18156_v28 = vsel %vm18155_vm14, %v18142_v59, %v18144_v43  ;;  %v31883_v60 = vpop.permute.xlu0 %18145  ;;  %27844 = vmatprep.mubr.msk.f32.mxu1 %vm29104_vm10, %v29069_v16 }
 0x507   : > { %v18157_v48 = vsel %vm18155_vm14, %v18144_v43, %v31883_v60 }
 0x508   : > { %27363 = vmatprep.subr.msk.mxu0 %vm10277_vm6, %v18157_v48 }
 0x509   : > { %27364 = vmatpush1.msk.msra.mxu0 %vm10277_vm6, %v18156_v28  ;;  %v31894_v24 = vpop.permute.xlu1 %18153 }
 0x50a   : > { %v18152_v3 = vpop.permute.xlu0 %18151  ;;  %27365 = vmatmul.mubr.msk.f32.vlgmr.msra.gmra.mrb[4].mxu0 %vm10273_vm7, %v31890_v42 }
 0x50b   : > { %v18161_v30 = vsel %vm18155_vm14, %v18152_v3, %v31894_v24  ;;  %18385 = vmatprep.mubr.f32.mxu0 %v29069_v16 }
 0x50c   : > { %27369 = vmatprep.subr.msk.mxu0 %vm10277_vm6, %v18161_v30 }
 0x50d   : > { %v31902_v54 = vpop.permute.xlu1 %18149 }
 0x50e   : > { %v18160_v38 = vsel %vm18155_vm14, %v31902_v54, %v18152_v3  ;;  %v15510_v61 = vpop.permute.xlu0 %15509 }
 0x50f   : > { %v15518_v18 = vsel %vm15511_vm8, %v31498_v20, %v15510_v61  ;;  %27370 = vmatpush1.msk.msra.mxu0 %vm10277_vm6, %v18160_v38  ;;  %vm18485_vm8 = vcmask 285696  }
 0x510   : > { %27843 = vmatpush3.msk.msra.mxu1 %vm10277_vm6, %v15518_v18  ;;  %27371 = vmatmul.mubr.msk.f32.vlgmr.msra.gmra.mrb[6].mxu0 %vm10273_vm7, %v31890_v42 }
 0x511   : > { %v18474_v12 = vpop.permute.xlu1 %18473  ;;  %27845 = vmatmul.mubr.msk.f32.vlgmr.msra.gmra.mrb[6].mxu1 %vm10273_vm7, %v31516_v32  ;;  %18573 = vmatprep.mubr.f32.mxu0 %v29069_v16 }
 0x512   : > { %v15835_v6 = vpop.permute.xlu0 %15834  ;;  %16004 = vmatprep.mubr.f32.mxu1 %v29069_v16 }
 0x513   : > { %v15847_v20 = vsel %vm32976_vm2, %v31535_v58, %v15835_v6  ;;  %v15848_v46 = vsel %vm32976_vm2, %v15835_v6, %v31572_v17  ;;  %v19130_v6 = vld [vmem:[%s29180_s29 + $0x8] sm:$0xff] }
 0x514   : > { %27282 = vmatprep.subr.msk.mxu1 %vm10277_vm6, %v15848_v46  ;;  %v19129_v46 = vld [vmem:[%s29180_s29] sm:$0xff] }
 0x515   : > { %27283 = vmatpush1.msk.msra.mxu1 %vm10277_vm6, %v15847_v20  ;;  %v18472_v11 = vpop.permute.xlu1 %18471  ;;  %v19132_v20 = vld [vmem:[%s29180_s29 + $0x18] sm:$0xff] }
 0x516   : > { %v18486_v45 = vsel %vm18485_vm8, %v18472_v11, %v18474_v12  ;;  %v31923_v32 = vpop.permute.xlu0 %18475  ;;  %27284 = vmatmul.mubr.msk.f32.vlgmr.msra.gmra.mrb[4].mxu1 %vm10273_vm7, %v31562_v34  ;;  %27847 = vmatprep.subr.mxu1 %v29069_v16 }
 0x517   : > { %v18487_v58 = vsel %vm18485_vm8, %v18474_v12, %v31923_v32  ;;  %27849 = vmatprep.mubr.msk.f32.mxu1 %vm29104_vm10, %v29069_v16 }
 0x518   : > { %27375 = vmatprep.subr.msk.mxu0 %vm10277_vm6, %v18487_v58  ;;  %v19134_v58 = vld [vmem:[%s29180_s29 + $0x28] sm:$0xff] }
 0x519   : > { %27376 = vmatpush1.msk.msra.mxu0 %vm10277_vm6, %v18486_v45  ;;  %v31937_v17 = vpop.permute.xlu1 %18483 }
 0x51a   : > { %v18482_v53 = vpop.permute.xlu0 %18481  ;;  %27377 = vmatmul.mubr.msk.f32.vlgmr.msra.gmra.mrb[4].mxu0 %vm10273_vm7, %v31931_v50 }
 0x51b   : > { %v18491_v15 = vsel %vm18485_vm8, %v18482_v53, %v31937_v17  ;;  %18715 = vmatprep.mubr.f32.mxu0 %v29069_v16 }
 0x51c   : > { %27381 = vmatprep.subr.msk.mxu0 %vm10277_vm6, %v18491_v15 }
 0x51d   : > { %v31945_v26 = vpop.permute.xlu1 %18479 }
 0x51e   : > { %v18490_v37 = vsel %vm18485_vm8, %v31945_v26, %v18482_v53  ;;  %v15843_v43 = vpop.permute.xlu0 %15842  ;;  %v19136_v53 = vld [vmem:[%s29180_s29 + $0x38] sm:$0xff] }
 0x51f   : > { %v15851_v52 = vsel %vm32976_vm2, %v31550_v1, %v15843_v43  ;;  %27382 = vmatpush1.msk.msra.mxu0 %vm10277_vm6, %v18490_v37  ;;  %vm18815_vm2 = vcmask 277504   ;;  %v28193_v43 = vpack.c.bf16 %v19136_v53, %v19134_v58  ;;  %v19158_v58 = vld [vmem:[%s29180_s29 + $0xe8] sm:$0xff]  ;;  %v19160_v53 = vld [vmem:[%s29180_s29 + $0xf8] sm:$0xff] }
 0x520   : > { %27848 = vmatpush3.msk.msra.mxu1 %vm10277_vm6, %v15851_v52  ;;  %27383 = vmatmul.mubr.msk.f32.vlgmr.msra.gmra.mrb[6].mxu0 %vm10273_vm7, %v31931_v50  ;;  %v19133_v52 = vld [vmem:[%s29180_s29 + $0x20] sm:$0xff] }
 0x521   : > { %v18804_v49 = vpop.permute.xlu1 %18803  ;;  %27850 = vmatmul.mubr.msk.f32.vlgmr.msra.gmra.mrb[6].mxu1 %vm10273_vm7, %v31562_v34  ;;  %18903 = vmatprep.mubr.f32.mxu0 %v29069_v16 }
 0x522   : > { %v16168_v62 = vpop.permute.xlu0 %16167  ;;  %16334 = vmatprep.mubr.f32.mxu1 %v29069_v16 }
 0x523   : > { %v16178_v1 = vsel %vm16175_vm11, %v31588_v44, %v16168_v62  ;;  %v16179_v59 = vsel %vm16175_vm11, %v16168_v62, %v31620_v19  ;;  %v31978_v19 = vld [vmem:[%s29170_s21 + $0xd0] sm:$0xff]  ;;  %v19138_v62 = vld [vmem:[%s29180_s29 + $0x48] sm:$0xff] }
 0x524   : > { %27294 = vmatprep.subr.msk.mxu1 %vm10277_vm6, %v16179_v59  ;;  %v19137_v59 = vld [vmem:[%s29180_s29 + $0x40] sm:$0xff] }
 0x525   : > { %27295 = vmatpush1.msk.msra.mxu1 %vm10277_vm6, %v16178_v1  ;;  %v18802_v28 = vpop.permute.xlu1 %18801  ;;  %v19140_v1 = vld [vmem:[%s29180_s29 + $0x58] sm:$0xff] }
 0x526   : > { %v18816_v34 = vsel %vm18815_vm2, %v18802_v28, %v18804_v49  ;;  %27296 = vmatmul.mubr.msk.f32.vlgmr.msra.gmra.mrb[4].mxu1 %vm10273_vm7, %v31613_v63  ;;  %27852 = vmatprep.subr.mxu1 %v29069_v16  ;;  %v31969_v48 = vpop.permute.xlu0 %18805  ;;  %v19139_v28 = vld [vmem:[%s29180_s29 + $0x50] sm:$0xff] }
 0x527   : > { %27853 = vmatpush3.msk.msra.mxu1 %vm10277_vm6, %v31628_v29  ;;  %v18817_v44 = vsel %vm18815_vm2, %v18804_v49, %v31969_v48  ;;  %27854 = vmatprep.mubr.msk.f32.mxu1 %vm29104_vm10, %v29069_v16  ;;  %v19135_v49 = vld [vmem:[%s29180_s29 + $0x30] sm:$0xff] }
 0x528   : > { %27387 = vmatprep.subr.msk.mxu0 %vm10277_vm6, %v18817_v44  ;;  %v19142_v44 = vld [vmem:[%s29180_s29 + $0x68] sm:$0xff] }
 0x529   : > { %27388 = vmatpush1.msk.msra.mxu0 %vm10277_vm6, %v18816_v34  ;;  %v16828_v3 = vpop.permute.xlu1 %16827 }
 0x52a   : > { %27855 = vmatmul.mubr.msk.f32.vlgmr.msra.gmra.mrb[6].mxu1 %vm10273_vm7, %v31613_v63  ;;  %27389 = vmatmul.mubr.msk.f32.vlgmr.msra.gmra.mrb[4].mxu0 %vm10273_vm7, %v31978_v19  ;;  %v16498_v29 = vpop.permute.xlu0 %16497  ;;  %v16838_v18 = vsel %vm16835_vm4, %v31701_v27, %v16828_v3 }
 0x52b   : > { %v16508_v30 = vsel %vm16505_vm13, %v31654_v10, %v16498_v29  ;;  %v16509_v38 = vsel %vm16505_vm13, %v16498_v29, %v31690_v25  ;;  %16664 = vmatprep.mubr.f32.mxu1 %v29069_v16  ;;  %19045 = vmatprep.mubr.f32.mxu0 %v29069_v16  ;;  %v16839_v10 = vsel %vm16835_vm4, %v16828_v3, %v31730_v0  ;;  %v19144_v3 = vld [vmem:[%s29180_s29 + $0x78] sm:$0xff] }
 0x52c   : > { %27306 = vmatprep.subr.msk.mxu1 %vm10277_vm6, %v16509_v38  ;;  %v28199_v29 = vpack.c.bf16 %v19139_v28, %v19137_v59  ;;  %v19143_v38 = vld [vmem:[%s29180_s29 + $0x70] sm:$0xff]  ;;  %v19170_v28 = vld [vmem:[%s29180_s29 + $0x148] sm:$0xff] }
 0x52d   : > { %27307 = vmatpush1.msk.msra.mxu1 %vm10277_vm6, %v16508_v30  ;;  %v17488_v61 = vpop.permute.xlu1 %17487  ;;  %v19167_v59 = vld [vmem:[%s29180_s29 + $0x130] sm:$0xff] }
 0x52e   : > { %27308 = vmatmul.mubr.msk.f32.vlgmr.msra.gmra.mrb[4].mxu1 %vm10273_vm7, %v31663_v31  ;;  %27857 = vmatprep.subr.mxu1 %v29069_v16  ;;  %v17158_v63 = vpop.permute.xlu0 %17157  ;;  %v17499_v45 = vsel %vm17495_vm5, %v17488_v61, %v31814_v21  ;;  %v17498_v21 = vsel %vm17495_vm5, %v31791_v41, %v17488_v61  ;;  %v28197_v41 = vpack.c.bf16 %v19140_v1, %v19138_v62  ;;  %v19146_v61 = vld [vmem:[%s29180_s29 + $0x88] sm:$0xff]  ;;  %v19168_v1 = vld [vmem:[%s29180_s29 + $0x138] sm:$0xff]  ;;  %vm33021_vm5 = vcmask 949248  }
 0x52f   : > { %27858 = vmatpush3.msk.msra.mxu1 %vm10277_vm6, %v31669_v56  ;;  %27859 = vmatprep.mubr.msk.f32.mxu1 %vm29104_vm10, %v29069_v16  ;;  %v17169_v27 = vsel %vm17165_vm1, %v17158_v63, %v31782_v13  ;;  %v17168_v0 = vsel %vm17165_vm1, %v31754_v47, %v17158_v63  ;;  %v19148_v63 = vld [vmem:[%s29180_s29 + $0x98] sm:$0xff]  ;;  %v19166_v62 = vld [vmem:[%s29180_s29 + $0x128] sm:$0xff]  ;;  %vm20043_vm1 = vcmask 982016  }
 0x530   : > { %27318 = vmatprep.subr.msk.mxu1 %vm10277_vm6, %v16839_v10  ;;  %v19145_v10 = vld [vmem:[%s29180_s29 + $0x80] sm:$0xff] }
 0x531   : > { %v32004_v25 = vpop.permute.xlu1 %18147 }
 0x532   : > { %27860 = vmatmul.mubr.msk.f32.vlgmr.msra.gmra.mrb[6].mxu1 %vm10273_vm7, %v31663_v31  ;;  %v32010_v12 = vpop.permute.xlu0 %17817 }
 0x533   : > { %27319 = vmatpush1.msk.msra.mxu1 %vm10277_vm6, %v16838_v18  ;;  %16994 = vmatprep.mubr.f32.mxu1 %v29069_v16  ;;  %v17829_v34 = vsel %vm17825_vm9, %v32010_v12, %v31859_v57  ;;  %v17828_v30 = vsel %vm17825_vm9, %v31837_v7, %v32010_v12  ;;  %v19141_v57 = vld [vmem:[%s29180_s29 + $0x60] sm:$0xff]  ;;  %v19147_v18 = vld [vmem:[%s29180_s29 + $0x90] sm:$0xff]  ;;  %v18159_v12 = vsel %vm18155_vm14, %v32004_v25, %v31902_v54 }
 0x534   : > { %27862 = vmatprep.subr.mxu1 %v29069_v16  ;;  %v28203_v7 = vpack.c.bf16 %v19143_v38, %v19141_v57  ;;  %v19149_v54 = vld [vmem:[%s29180_s29 + $0xa0] sm:$0xff]  ;;  %v19175_v38 = vld [vmem:[%s29180_s29 + $0x170] sm:$0xff] }
 0x535   : > { %v32021_v31 = vpop.permute.xlu1 %18807  ;;  %v19173_v57 = vld [vmem:[%s29180_s29 + $0x160] sm:$0xff] }
 0x536   : > { %27320 = vmatmul.mubr.msk.f32.vlgmr.msra.gmra.mrb[4].mxu1 %vm10273_vm7, %v31725_v2  ;;  %v32017_v56 = vpop.permute.xlu0 %18477 }
 0x537   : > { %27863 = vmatpush3.msk.msra.mxu1 %vm10277_vm6, %v31736_v35  ;;  %27864 = vmatprep.mubr.msk.f32.mxu1 %vm29104_vm10, %v29069_v16 }
 0x538   : > { %27330 = vmatprep.subr.msk.mxu1 %vm10277_vm6, %v17169_v27  ;;  %v19150_v27 = vld [vmem:[%s29180_s29 + $0xa8] sm:$0xff] }
 0x539   : > { %v18812_v35 = vpop.permute.xlu1 %18811 }
 0x53a   : > { %27865 = vmatmul.mubr.msk.f32.vlgmr.msra.gmra.mrb[6].mxu1 %vm10273_vm7, %v31725_v2  ;;  %v32032_v13 = vpop.permute.xlu0 %18809  ;;  %v19131_v2 = vld [vmem:[%s29180_s29 + $0x10] sm:$0xff] }
 0x53b   : > { %27331 = vmatpush1.msk.msra.mxu1 %vm10277_vm6, %v17168_v0  ;;  %17324 = vmatprep.mubr.f32.mxu1 %v29069_v16  ;;  %v18820_v15 = vsel %vm18815_vm2, %v32032_v13, %v18812_v35  ;;  %v28191_v37 = vpack.c.bf16 %v19131_v2, %v19129_v46  ;;  %v19152_v0 = vld [vmem:[%s29180_s29 + $0xb8] sm:$0xff]  ;;  %v19154_v46 = vld [vmem:[%s29180_s29 + $0xc8] sm:$0xff] }
 0x53c   : > { %27867 = vmatprep.subr.mxu1 %v29069_v16  ;;  %v19156_v2 = vld [vmem:[%s29180_s29 + $0xd8] sm:$0xff] }
 0x53e   : > { %27332 = vmatmul.mubr.msk.f32.vlgmr.msra.gmra.mrb[4].mxu1 %vm10273_vm7, %v31765_v14  ;;  %v32041_v47 = vpop.permute.xlu0 %18813 }
 0x53f   : > { %27868 = vmatpush3.msk.msra.mxu1 %vm10277_vm6, %v31769_v33  ;;  %v18821_v11 = vsel %vm18815_vm2, %v18812_v35, %v32041_v47  ;;  %27869 = vmatprep.mubr.msk.f32.mxu1 %vm29104_vm10, %v29069_v16  ;;  %v28189_v33 = vpack.c.bf16 %v19132_v20, %v19130_v6  ;;  %v28207_v35 = vpack.c.bf16 %v19147_v18, %v19145_v10  ;;  %v19151_v20 = vld [vmem:[%s29180_s29 + $0xb0] sm:$0xff]  ;;  %v19184_v18 = vld [vmem:[%s29180_s29 + $0x1b8] sm:$0xff] }
 0x540   : > { %27342 = vmatprep.subr.msk.mxu1 %vm10277_vm6, %v17499_v45  ;;  %27393 = vmatprep.subr.msk.mxu0 %vm10277_vm6, %v18821_v11  ;;  %v18158_v6 = vsel %vm18155_vm14, %v31883_v60, %v32004_v25  ;;  %v28211_v60 = vpack.c.bf16 %v19151_v20, %v19149_v54  ;;  %v19153_v25 = vld [vmem:[%s29180_s29 + $0xc0] sm:$0xff]  ;;  %v19155_v11 = vld [vmem:[%s29180_s29 + $0xd0] sm:$0xff]  ;;  %v18489_v45 = vsel %vm18485_vm8, %v32017_v56, %v31945_v26 }
 0x541   : > { %27394 = vmatpush1.msk.msra.mxu0 %vm10277_vm6, %v18820_v15  ;;  %v28215_v15 = vpack.c.bf16 %v19155_v11, %v19153_v25  ;;  %v19157_v26 = vld [vmem:[%s29180_s29 + $0xe0] sm:$0xff]  ;;  %v19179_v10 = vld [vmem:[%s29180_s29 + $0x190] sm:$0xff] }
 0x542   : > { %27870 = vmatmul.mubr.msk.f32.vlgmr.msra.gmra.mrb[6].mxu1 %vm10273_vm7, %v31765_v14  ;;  %27395 = vmatmul.mubr.msk.f32.vlgmr.msra.gmra.mrb[6].mxu0 %vm10273_vm7, %v31978_v19  ;;  %v28195_v14 = vpack.c.bf16 %v19135_v49, %v19133_v52  ;;  %v19163_v52 = vld [vmem:[%s29180_s29 + $0x110] sm:$0xff]  ;;  %v18819_v49 = vsel %vm18815_vm2, %v32021_v31, %v32032_v13  ;;  %v19165_v13 = vld [vmem:[%s29180_s29 + $0x120] sm:$0xff] }
 0x543   : > { %27343 = vmatpush1.msk.msra.mxu1 %vm10277_vm6, %v17498_v21  ;;  %17654 = vmatprep.mubr.f32.mxu1 %v29069_v16  ;;  %v19162_v21 = vld [vmem:[%s29180_s29 + $0x108] sm:$0xff] }
 0x544   : > { %27872 = vmatprep.subr.mxu1 %v29069_v16  ;;  %28190 = vmatprep.subr.bf16.mxu0 %v28189_v33  ;;  %v18488_v33 = vsel %vm18485_vm8, %v31923_v32, %v32017_v56  ;;  %v19161_v56 = vld [vmem:[%s29180_s29 + $0x100] sm:$0xff]  ;;  %vm20214_vm8 = vcmask 941056  }
 0x545   : > { %28192 = vmatpush1.bf16.msra.mxu0 %v28191_v37  ;;  %v19159_v37 = vld [vmem:[%s29180_s29 + $0xf0] sm:$0xff] }
 0x546   : > { %27344 = vmatmul.mubr.msk.f32.vlgmr.msra.gmra.mrb[4].mxu1 %vm10273_vm7, %v31810_v39  ;;  %28194 = vmatprep.subr.bf16.mxu0 %v28193_v43  ;;  %v19164_v43 = vld [vmem:[%s29180_s29 + $0x118] sm:$0xff]  ;;  %v28219_v32 = vpack.c.bf16 %v19159_v37, %v19157_v26  ;;  %v19193_v26 = vld [vmem:[%s29180_s29 + $0x200] sm:$0xff]  ;;  %v19195_v37 = vld [vmem:[%s29180_s29 + $0x210] sm:$0xff] }
 0x547   : > { %27873 = vmatpush3.msk.msra.mxu1 %vm10277_vm6, %v31820_v5  ;;  %27874 = vmatprep.mubr.msk.f32.mxu1 %vm29104_vm10, %v29069_v16  ;;  %v28201_v5 = vpack.c.bf16 %v19144_v3, %v19142_v44  ;;  %v19171_v44 = vld [vmem:[%s29180_s29 + $0x150] sm:$0xff]  ;;  %v19174_v3 = vld [vmem:[%s29180_s29 + $0x168] sm:$0xff] }
 0x548   : > { %27354 = vmatprep.subr.msk.mxu1 %vm10277_vm6, %v17829_v34  ;;  %v19172_v34 = vld [vmem:[%s29180_s29 + $0x158] sm:$0xff] }
 0x549   : > { %28196 = vmatpush1.bf16.msra.mxu0 %v28195_v14  ;;  %v28223_v14 = vpack.c.bf16 %v19163_v52, %v19161_v56 }
 0x54a   : > { %27875 = vmatmul.mubr.msk.f32.vlgmr.msra.gmra.mrb[6].mxu1 %vm10273_vm7, %v31810_v39  ;;  %28198 = vmatprep.subr.bf16.mxu0 %v28197_v41  ;;  %v28205_v39 = vpack.c.bf16 %v19148_v63, %v19146_v61  ;;  %v18818_v41 = vsel %vm18815_vm2, %v31969_v48, %v32021_v31  ;;  %v28227_v48 = vpack.c.bf16 %v19167_v59, %v19165_v13  ;;  %v19169_v31 = vld [vmem:[%s29180_s29 + $0x140] sm:$0xff]  ;;  %v19180_v61 = vld [vmem:[%s29180_s29 + $0x198] sm:$0xff]  ;;  %v19203_v59 = vld [vmem:[%s29180_s29 + $0x250] sm:$0xff]  ;;  %vm29116_vm2 = vmmov 1  }
 0x54b   : > { %27355 = vmatpush1.msk.msra.mxu1 %vm10277_vm6, %v17828_v30  ;;  %17984 = vmatprep.mubr.f32.mxu1 %v29069_v16  ;;  %v28231_v30 = vpack.c.bf16 %v19171_v44, %v19169_v31  ;;  %v28235_v63 = vpack.c.bf16 %v19175_v38, %v19173_v57  ;;  %v19201_v13 = vld [vmem:[%s29180_s29 + $0x240] sm:$0xff]  ;;  %v19207_v44 = vld [vmem:[%s29180_s29 + $0x270] sm:$0xff]  ;;  %vm28382_vm14 = vmpackc.low %vm1076_vm0, %vm29116_vm2  ;;  %vm33020_vm0 = vcmask 1031168  }
 0x54c   : > { %27877 = vmatprep.subr.mxu1 %v29069_v16  ;;  %v19205_v31 = vld [vmem:[%s29180_s29 + $0x260] sm:$0xff]  ;;  %v19211_v38 = vld [vmem:[%s29180_s29 + $0x290] sm:$0xff] }
 0x54d   : > { %28200 = vmatpush1.bf16.msra.mxu0 %v28199_v29  ;;  %v19176_v29 = vld [vmem:[%s29180_s29 + $0x178] sm:$0xff]  ;;  %v19209_v57 = vld [vmem:[%s29180_s29 + $0x280] sm:$0xff] }
 0x54e   : > { %27356 = vmatmul.mubr.msk.f32.vlgmr.msra.gmra.mrb[4].mxu1 %vm10273_vm7, %v31845_v23  ;;  %28202 = vmatprep.subr.bf16.mxu0 %v28201_v5  ;;  %v28233_v5 = vpack.c.bf16 %v19176_v29, %v19174_v3  ;;  %v19210_v3 = vld [vmem:[%s29180_s29 + $0x288] sm:$0xff]  ;;  %v19212_v29 = vld [vmem:[%s29180_s29 + $0x298] sm:$0xff] }
 0x54f   : > { %27878 = vmatpush3.msk.msra.mxu1 %vm10277_vm6, %v31851_v22  ;;  %27879 = vmatprep.mubr.msk.f32.mxu1 %vm29104_vm10, %v29069_v16  ;;  %v28209_v22 = vpack.c.bf16 %v19152_v0, %v19150_v27  ;;  %v19181_v0 = vld [vmem:[%s29180_s29 + $0x1a0] sm:$0xff] }
 0x550   : > { %27366 = vmatprep.subr.msk.mxu1 %vm10277_vm6, %v18159_v12 }
 0x551   : > { %28204 = vmatpush1.bf16.msra.mxu0 %v28203_v7 }
 0x552   : > { %27880 = vmatmul.mubr.msk.f32.vlgmr.msra.gmra.mrb[6].mxu1 %vm10273_vm7, %v31845_v23  ;;  %28206 = vmatprep.subr.bf16.mxu0 %v28205_v39  ;;  %v28213_v23 = vpack.c.bf16 %v19156_v2, %v19154_v46  ;;  %v19177_v39 = vld [vmem:[%s29180_s29 + $0x180] sm:$0xff]  ;;  %v19187_v2 = vld [vmem:[%s29180_s29 + $0x1d0] sm:$0xff] }
 0x553   : > { %27367 = vmatpush1.msk.msra.mxu1 %vm10277_vm6, %v18158_v6  ;;  %18314 = vmatprep.mubr.f32.mxu1 %v29069_v16  ;;  %v28239_v12 = vpack.c.bf16 %v19179_v10, %v19177_v39  ;;  %v19186_v6 = vld [vmem:[%s29180_s29 + $0x1c8] sm:$0xff]  ;;  %v19185_v46 = vld [vmem:[%s29180_s29 + $0x1c0] sm:$0xff]  ;;  %v19215_v10 = vld [vmem:[%s29180_s29 + $0x2b0] sm:$0xff] }
 0x554   : > { %27882 = vmatprep.subr.mxu1 %v29069_v16  ;;  %v28247_v25 = vpack.c.bf16 %v19187_v2, %v19185_v46  ;;  %v19213_v39 = vld [vmem:[%s29180_s29 + $0x2a0] sm:$0xff] }
 0x555   : > { %28208 = vmatpush1.bf16.msra.mxu0 %v28207_v35  ;;  %v19183_v35 = vld [vmem:[%s29180_s29 + $0x1b0] sm:$0xff] }
 0x556   : > { %27368 = vmatmul.mubr.msk.f32.vlgmr.msra.gmra.mrb[4].mxu1 %vm10273_vm7, %v31890_v42  ;;  %28210 = vmatprep.subr.bf16.mxu0 %v28209_v22  ;;  %v19188_v22 = vld [vmem:[%s29180_s29 + $0x1d8] sm:$0xff]  ;;  %v28243_v54 = vpack.c.bf16 %v19183_v35, %v19181_v0  ;;  %v19217_v0 = vld [vmem:[%s29180_s29 + $0x2c0] sm:$0xff]  ;;  %v19219_v35 = vld [vmem:[%s29180_s29 + $0x2d0] sm:$0xff] }
 0x557   : > { %27883 = vmatpush3.msk.msra.mxu1 %vm10277_vm6, %v31894_v24  ;;  %27884 = vmatprep.mubr.msk.f32.mxu1 %vm29104_vm10, %v29069_v16  ;;  %v28217_v24 = vpack.c.bf16 %v19160_v53, %v19158_v58  ;;  %v28245_v20 = vpack.c.bf16 %v19188_v22, %v19186_v6  ;;  %v19191_v58 = vld [vmem:[%s29180_s29 + $0x1f0] sm:$0xff]  ;;  %v19222_v6 = vld [vmem:[%s29180_s29 + $0x2e8] sm:$0xff]  ;;  %v19224_v22 = vld [vmem:[%s29180_s29 + $0x2f8] sm:$0xff] }
 0x558   : > { %27378 = vmatprep.subr.msk.mxu1 %vm10277_vm6, %v18489_v45  ;;  %v19189_v45 = vld [vmem:[%s29180_s29 + $0x1e0] sm:$0xff]  ;;  %v28281_v2 = vpack.c.bf16 %v19224_v22, %v19222_v6  ;;  %v19258_v6 = vld [vmem:[%s29180_s29 + $0x408] sm:$0xff]  ;;  %v19260_v22 = vld [vmem:[%s29180_s29 + $0x418] sm:$0xff] }
 0x559   : > { %28212 = vmatpush1.bf16.msra.mxu0 %v28211_v60  ;;  %v19190_v60 = vld [vmem:[%s29180_s29 + $0x1e8] sm:$0xff]  ;;  %v28251_v53 = vpack.c.bf16 %v19191_v58, %v19189_v45 }
 0x55a   : > { %27885 = vmatmul.mubr.msk.f32.vlgmr.msra.gmra.mrb[6].mxu1 %vm10273_vm7, %v31890_v42  ;;  %28214 = vmatprep.subr.bf16.mxu0 %v28213_v23  ;;  %v28221_v42 = vpack.c.bf16 %v19164_v43, %v19162_v21  ;;  %v19192_v23 = vld [vmem:[%s29180_s29 + $0x1f8] sm:$0xff]  ;;  %v19198_v21 = vld [vmem:[%s29180_s29 + $0x228] sm:$0xff] }
 0x55b   : > { %27379 = vmatpush1.msk.msra.mxu1 %vm10277_vm6, %v18488_v33  ;;  %18644 = vmatprep.mubr.f32.mxu1 %v29069_v16  ;;  %v28249_v11 = vpack.c.bf16 %v19192_v23, %v19190_v60  ;;  %v19196_v33 = vld [vmem:[%s29180_s29 + $0x218] sm:$0xff]  ;;  %v19221_v60 = vld [vmem:[%s29180_s29 + $0x2e0] sm:$0xff]  ;;  %v19223_v23 = vld [vmem:[%s29180_s29 + $0x2f0] sm:$0xff] }
 0x55c   : > { %27887 = vmatprep.subr.mxu1 %v29069_v16  ;;  %v19200_v43 = vld [vmem:[%s29180_s29 + $0x238] sm:$0xff]  ;;  %v28283_v45 = vpack.c.bf16 %v19223_v23, %v19221_v60  ;;  %v28317_v23 = vpack.c.bf16 %v19260_v22, %v19258_v6  ;;  %v19289_v22 = vld [vmem:[%s29180_s29 + $0x500] sm:$0xff] }
 0x55d   : > { %28216 = vmatpush1.bf16.msra.mxu0 %v28215_v15  ;;  %v19194_v15 = vld [vmem:[%s29180_s29 + $0x208] sm:$0xff]  ;;  %v28257_v52 = vpack.c.bf16 %v19200_v43, %v19198_v21  ;;  %v19229_v21 = vld [vmem:[%s29180_s29 + $0x320] sm:$0xff]  ;;  %v19231_v43 = vld [vmem:[%s29180_s29 + $0x330] sm:$0xff] }
 0x55e   : > { %27380 = vmatmul.mubr.msk.f32.vlgmr.msra.gmra.mrb[4].mxu1 %vm10273_vm7, %v31931_v50  ;;  %28218 = vmatprep.subr.bf16.mxu0 %v28217_v24  ;;  %v28253_v24 = vpack.c.bf16 %v19196_v33, %v19194_v15  ;;  %v19227_v15 = vld [vmem:[%s29180_s29 + $0x310] sm:$0xff]  ;;  %v19230_v33 = vld [vmem:[%s29180_s29 + $0x328] sm:$0xff] }
 0x55f   : > { %27888 = vmatpush3.msk.msra.mxu1 %vm10277_vm6, %v31937_v17  ;;  %27889 = vmatprep.mubr.msk.f32.mxu1 %vm29104_vm10, %v29069_v16  ;;  %v28225_v17 = vpack.c.bf16 %v19168_v1, %v19166_v62  ;;  %v19199_v62 = vld [vmem:[%s29180_s29 + $0x230] sm:$0xff]  ;;  %v19202_v1 = vld [vmem:[%s29180_s29 + $0x248] sm:$0xff] }
 0x560   : > { %27390 = vmatprep.subr.msk.mxu1 %vm10277_vm6, %v18819_v49  ;;  %v19197_v49 = vld [vmem:[%s29180_s29 + $0x220] sm:$0xff] }
 0x561   : > { %28220 = vmatpush1.bf16.msra.mxu0 %v28219_v32 }
 0x562   : > { %27890 = vmatmul.mubr.msk.f32.vlgmr.msra.gmra.mrb[6].mxu1 %vm10273_vm7, %v31931_v50  ;;  %28222 = vmatprep.subr.bf16.mxu0 %v28221_v42  ;;  %v28229_v50 = vpack.c.bf16 %v19172_v34, %v19170_v28  ;;  %v28255_v42 = vpack.c.bf16 %v19195_v37, %v19193_v26  ;;  %v19206_v28 = vld [vmem:[%s29180_s29 + $0x268] sm:$0xff]  ;;  %v19208_v34 = vld [vmem:[%s29180_s29 + $0x278] sm:$0xff] }
 0x563   : > { %27391 = vmatpush1.msk.msra.mxu1 %vm10277_vm6, %v18818_v41  ;;  %18974 = vmatprep.mubr.f32.mxu1 %v29069_v16  ;;  %v28259_v41 = vpack.c.bf16 %v19199_v62, %v19197_v49  ;;  %v19233_v49 = vld [vmem:[%s29180_s29 + $0x340] sm:$0xff]  ;;  %v19235_v62 = vld [vmem:[%s29180_s29 + $0x350] sm:$0xff] }
 0x564   : > { %27892 = vmatprep.subr.mxu1 %v29069_v16 }
 0x565   : > { %28224 = vmatpush1.bf16.msra.mxu0 %v28223_v14  ;;  %v19204_v14 = vld [vmem:[%s29180_s29 + $0x258] sm:$0xff] }
 0x566   : > { %27392 = vmatmul.mubr.msk.f32.vlgmr.msra.gmra.mrb[4].mxu1 %vm10273_vm7, %v31978_v19  ;;  %28226 = vmatprep.subr.bf16.mxu0 %v28225_v17  ;;  %v28261_v17 = vpack.c.bf16 %v19204_v14, %v19202_v1  ;;  %v19238_v1 = vld [vmem:[%s29180_s29 + $0x368] sm:$0xff]  ;;  %v19240_v14 = vld [vmem:[%s29180_s29 + $0x378] sm:$0xff] }
 0x567   : > { %27893 = vmatpush3.msk.msra.mxu1 %vm10277_vm6, %v32041_v47  ;;  %27894 = vmatprep.mubr.msk.f32.mxu1 %vm29104_vm10, %v29069_v16  ;;  %v19178_v47 = vld [vmem:[%s29180_s29 + $0x188] sm:$0xff] }
 0x568   : > { %v28237_v7 = vpack.c.bf16 %v19180_v61, %v19178_v47  ;;  %v19214_v47 = vld [vmem:[%s29180_s29 + $0x2a8] sm:$0xff]  ;;  %v19216_v61 = vld [vmem:[%s29180_s29 + $0x2b8] sm:$0xff] }
 0x569   : > { %28228 = vmatpush1.bf16.msra.mxu0 %v28227_v48  ;;  %v28263_v48 = vpack.c.bf16 %v19203_v59, %v19201_v13  ;;  %v19237_v13 = vld [vmem:[%s29180_s29 + $0x360] sm:$0xff]  ;;  %v19239_v59 = vld [vmem:[%s29180_s29 + $0x370] sm:$0xff] }
 0x56a   : > { %27895 = vmatmul.mubr.msk.f32.vlgmr.msra.gmra.mrb[6].mxu1 %vm10273_vm7, %v31978_v19  ;;  %28230 = vmatprep.subr.bf16.mxu0 %v28229_v50  ;;  %v19182_v19 = vld [vmem:[%s29180_s29 + $0x1a8] sm:$0xff]  ;;  %v28265_v50 = vpack.c.bf16 %v19208_v34, %v19206_v28  ;;  %v19244_v34 = vld [vmem:[%s29180_s29 + $0x398] sm:$0xff] }
 0x56b   : > { %19699 = vmatprep.mubr.f32.mxu1 %v29069_v16  ;;  %v28241_v27 = vpack.c.bf16 %v19184_v18, %v19182_v19  ;;  %v19218_v19 = vld [vmem:[%s29180_s29 + $0x2c8] sm:$0xff]  ;;  %v19220_v18 = vld [vmem:[%s29180_s29 + $0x2d8] sm:$0xff] }
 0x56c   : > { %v19242_v28 = vld [vmem:[%s29180_s29 + $0x388] sm:$0xff] }
 0x56d   : > { %28232 = vmatpush1.bf16.msra.mxu0 %v28231_v30  ;;  %v28267_v30 = vpack.c.bf16 %v19207_v44, %v19205_v31  ;;  %v19241_v31 = vld [vmem:[%s29180_s29 + $0x380] sm:$0xff]  ;;  %v19243_v44 = vld [vmem:[%s29180_s29 + $0x390] sm:$0xff] }
 0x56e   : > { %28234 = vmatprep.subr.bf16.mxu0 %v28233_v5  ;;  %v28269_v5 = vpack.c.bf16 %v19212_v29, %v19210_v3  ;;  %v19246_v3 = vld [vmem:[%s29180_s29 + $0x3a8] sm:$0xff]  ;;  %v19248_v29 = vld [vmem:[%s29180_s29 + $0x3b8] sm:$0xff] }
 0x571   : > { %28236 = vmatpush1.bf16.msra.mxu0 %v28235_v63  ;;  %v28271_v63 = vpack.c.bf16 %v19211_v38, %v19209_v57  ;;  %v19245_v57 = vld [vmem:[%s29180_s29 + $0x3a0] sm:$0xff]  ;;  %v19247_v38 = vld [vmem:[%s29180_s29 + $0x3b0] sm:$0xff] }
 0x572   : > { %28238 = vmatprep.subr.bf16.mxu0 %v28237_v7  ;;  %v28273_v7 = vpack.c.bf16 %v19216_v61, %v19214_v47  ;;  %v19250_v47 = vld [vmem:[%s29180_s29 + $0x3c8] sm:$0xff]  ;;  %v19252_v61 = vld [vmem:[%s29180_s29 + $0x3d8] sm:$0xff] }
 0x575   : > { %28240 = vmatpush1.bf16.msra.mxu0 %v28239_v12  ;;  %v28275_v12 = vpack.c.bf16 %v19215_v10, %v19213_v39  ;;  %v19249_v39 = vld [vmem:[%s29180_s29 + $0x3c0] sm:$0xff]  ;;  %v19251_v10 = vld [vmem:[%s29180_s29 + $0x3d0] sm:$0xff] }
 0x576   : > { %28242 = vmatprep.subr.bf16.mxu0 %v28241_v27  ;;  %v28277_v27 = vpack.c.bf16 %v19220_v18, %v19218_v19  ;;  %v19254_v19 = vld [vmem:[%s29180_s29 + $0x3e8] sm:$0xff]  ;;  %v19256_v18 = vld [vmem:[%s29180_s29 + $0x3f8] sm:$0xff] }
 0x579   : > { %28244 = vmatpush1.bf16.msra.mxu0 %v28243_v54 }
 0x57a   : > { %28246 = vmatprep.subr.bf16.mxu0 %v28245_v20  ;;  %v28279_v20 = vpack.c.bf16 %v19219_v35, %v19217_v0  ;;  %v19253_v0 = vld [vmem:[%s29180_s29 + $0x3e0] sm:$0xff]  ;;  %v19255_v35 = vld [vmem:[%s29180_s29 + $0x3f0] sm:$0xff] }
 0x57d   : > { %28248 = vmatpush1.bf16.msra.mxu0 %v28247_v25  ;;  %v19226_v25 = vld [vmem:[%s29180_s29 + $0x308] sm:$0xff] }
 0x57e   : > { %28250 = vmatprep.subr.bf16.mxu0 %v28249_v11  ;;  %v19228_v11 = vld [vmem:[%s29180_s29 + $0x318] sm:$0xff] }
 0x57f   : > { %v28285_v58 = vpack.c.bf16 %v19228_v11, %v19226_v25  ;;  %v19257_v25 = vld [vmem:[%s29180_s29 + $0x400] sm:$0xff]  ;;  %v19259_v11 = vld [vmem:[%s29180_s29 + $0x410] sm:$0xff] }
 0x581   : > { %28252 = vmatpush1.bf16.msra.mxu0 %v28251_v53  ;;  %v19225_v53 = vld [vmem:[%s29180_s29 + $0x300] sm:$0xff] }
 0x582   : > { %28254 = vmatprep.subr.bf16.mxu0 %v28253_v24  ;;  %v19232_v24 = vld [vmem:[%s29180_s29 + $0x338] sm:$0xff]  ;;  %v28287_v26 = vpack.c.bf16 %v19227_v15, %v19225_v53  ;;  %v28319_v15 = vpack.c.bf16 %v19259_v11, %v19257_v25  ;;  %v19293_v11 = vld [vmem:[%s29180_s29 + $0x520] sm:$0xff] }
 0x583   : > { %v28289_v37 = vpack.c.bf16 %v19232_v24, %v19230_v33 }
 0x5fd   : > { %v18905_v32 = vpop.f32.mrb[4].mxu0 }
 0x5fe   : > { %v18907_v56 = vpop.f32.mrb[5].mxu0 }
 0x5ff   : > { %19400 = vmatprep.mubr.f32.mxu0 %v18907_v56  ;;  %v28291_v56 = vpack.c.bf16 %v19231_v43, %v19229_v21  ;;  %v19266_v21 = vld [vmem:[%s29180_s29 + $0x448] sm:$0xff]  ;;  %v19268_v43 = vld [vmem:[%s29180_s29 + $0x458] sm:$0xff] }
 0x600   : > { %19401 = vmatmul.mubr.f32.vlgmr.msra.gmra.mrb[8].mxu0 %v18905_v32  ;;  %v19234_v32 = vld [vmem:[%s29180_s29 + $0x348] sm:$0xff] }
 0x601   : > { %28256 = vmatpush1.bf16.msra.mxu0 %v28255_v42  ;;  %v19236_v42 = vld [vmem:[%s29180_s29 + $0x358] sm:$0xff] }
 0x602   : > { %28258 = vmatprep.subr.bf16.mxu0 %v28257_v52  ;;  %v28293_v52 = vpack.c.bf16 %v19236_v42, %v19234_v32  ;;  %v28325_v42 = vpack.c.bf16 %v19268_v43, %v19266_v21  ;;  %v19302_v21 = vld [vmem:[%s29180_s29 + $0x568] sm:$0xff]  ;;  %v19304_v43 = vld [vmem:[%s29180_s29 + $0x578] sm:$0xff] }
 0x605   : > { %28260 = vmatpush1.bf16.msra.mxu0 %v28259_v41  ;;  %v28295_v41 = vpack.c.bf16 %v19235_v62, %v19233_v49  ;;  %v19270_v49 = vld [vmem:[%s29180_s29 + $0x468] sm:$0xff]  ;;  %v19272_v62 = vld [vmem:[%s29180_s29 + $0x478] sm:$0xff] }
 0x606   : > { %28262 = vmatprep.subr.bf16.mxu0 %v28261_v17  ;;  %v28297_v17 = vpack.c.bf16 %v19240_v14, %v19238_v1  ;;  %v28329_v14 = vpack.c.bf16 %v19272_v62, %v19270_v49  ;;  %v19306_v49 = vld [vmem:[%s29180_s29 + $0x588] sm:$0xff]  ;;  %v19308_v62 = vld [vmem:[%s29180_s29 + $0x598] sm:$0xff] }
 0x609   : > { %28264 = vmatpush1.bf16.msra.mxu0 %v28263_v48  ;;  %v28299_v48 = vpack.c.bf16 %v19239_v59, %v19237_v13  ;;  %v19276_v13 = vld [vmem:[%s29180_s29 + $0x498] sm:$0xff] }
 0x60a   : > { %28266 = vmatprep.subr.bf16.mxu0 %v28265_v50  ;;  %v28301_v50 = vpack.c.bf16 %v19244_v34, %v19242_v28  ;;  %v19273_v34 = vld [vmem:[%s29180_s29 + $0x480] sm:$0xff] }
 0x60d   : > { %28268 = vmatpush1.bf16.msra.mxu0 %v28267_v30  ;;  %v28303_v30 = vpack.c.bf16 %v19243_v44, %v19241_v31  ;;  %v19280_v31 = vld [vmem:[%s29180_s29 + $0x4b8] sm:$0xff] }
 0x60e   : > { %28270 = vmatprep.subr.bf16.mxu0 %v28269_v5  ;;  %v28305_v5 = vpack.c.bf16 %v19248_v29, %v19246_v3  ;;  %v19277_v29 = vld [vmem:[%s29180_s29 + $0x4a0] sm:$0xff] }
 0x611   : > { %28272 = vmatpush1.bf16.msra.mxu0 %v28271_v63  ;;  %v28307_v63 = vpack.c.bf16 %v19247_v38, %v19245_v57  ;;  %v19284_v57 = vld [vmem:[%s29180_s29 + $0x4d8] sm:$0xff] }
 0x612   : > { %28274 = vmatprep.subr.bf16.mxu0 %v28273_v7  ;;  %v28309_v7 = vpack.c.bf16 %v19252_v61, %v19250_v47  ;;  %v19281_v61 = vld [vmem:[%s29180_s29 + $0x4c0] sm:$0xff] }
 0x615   : > { %28276 = vmatpush1.bf16.msra.mxu0 %v28275_v12  ;;  %v32238_v54 = vpop.f32.mrb[6].mxu0  ;;  %v28311_v12 = vpack.c.bf16 %v19251_v10, %v19249_v39  ;;  %v19288_v39 = vld [vmem:[%s29180_s29 + $0x4f8] sm:$0xff] }
 0x616   : > { %v32240_v46 = vpop.f32.mrb[7].mxu0  ;;  %28278 = vmatprep.subr.bf16.mxu0 %v28277_v27  ;;  %v28313_v27 = vpack.c.bf16 %v19256_v18, %v19254_v19  ;;  %v19285_v18 = vld [vmem:[%s29180_s29 + $0x4e0] sm:$0xff] }
 0x619   : > { %28280 = vmatpush1.bf16.msra.mxu0 %v28279_v20 }
 0x61a   : > { %28282 = vmatprep.subr.bf16.mxu0 %v28281_v2  ;;  %v28315_v2 = vpack.c.bf16 %v19255_v35, %v19253_v0  ;;  %v19292_v0 = vld [vmem:[%s29180_s29 + $0x518] sm:$0xff] }
 0x61d   : > { %28284 = vmatpush1.bf16.msra.mxu0 %v28283_v45  ;;  %v19262_v45 = vld [vmem:[%s29180_s29 + $0x428] sm:$0xff] }
 0x61e   : > { %28286 = vmatprep.subr.bf16.mxu0 %v28285_v58  ;;  %v19264_v58 = vld [vmem:[%s29180_s29 + $0x438] sm:$0xff] }
 0x61f   : > { %v28321_v24 = vpack.c.bf16 %v19264_v58, %v19262_v45  ;;  %v19295_v45 = vld [vmem:[%s29180_s29 + $0x530] sm:$0xff]  ;;  %v19298_v58 = vld [vmem:[%s29180_s29 + $0x548] sm:$0xff] }
 0x621   : > { %28288 = vmatpush1.bf16.msra.mxu0 %v28287_v26  ;;  %v19261_v26 = vld [vmem:[%s29180_s29 + $0x420] sm:$0xff] }
 0x622   : > { %28290 = vmatprep.subr.bf16.mxu0 %v28289_v37  ;;  %v19263_v37 = vld [vmem:[%s29180_s29 + $0x430] sm:$0xff] }
 0x623   : > { %v28323_v32 = vpack.c.bf16 %v19263_v37, %v19261_v26  ;;  %v19297_v26 = vld [vmem:[%s29180_s29 + $0x540] sm:$0xff]  ;;  %v19299_v37 = vld [vmem:[%s29180_s29 + $0x550] sm:$0xff] }
 0x625   : > { %28292 = vmatpush1.bf16.msra.mxu0 %v28291_v56  ;;  %v19265_v56 = vld [vmem:[%s29180_s29 + $0x440] sm:$0xff] }
 0x626   : > { %28294 = vmatprep.subr.bf16.mxu0 %v28293_v52  ;;  %v19267_v52 = vld [vmem:[%s29180_s29 + $0x450] sm:$0xff] }
 0x627   : > { %v28327_v1 = vpack.c.bf16 %v19267_v52, %v19265_v56  ;;  %v19301_v56 = vld [vmem:[%s29180_s29 + $0x560] sm:$0xff]  ;;  %v19303_v52 = vld [vmem:[%s29180_s29 + $0x570] sm:$0xff] }
 0x629   : > { %28296 = vmatpush1.bf16.msra.mxu0 %v28295_v41  ;;  %v19269_v41 = vld [vmem:[%s29180_s29 + $0x460] sm:$0xff] }
 0x62a   : > { %28298 = vmatprep.subr.bf16.mxu0 %v28297_v17  ;;  %v19271_v17 = vld [vmem:[%s29180_s29 + $0x470] sm:$0xff] }
 0x62b   : > { %v28331_v59 = vpack.c.bf16 %v19271_v17, %v19269_v41  ;;  %v19305_v41 = vld [vmem:[%s29180_s29 + $0x580] sm:$0xff]  ;;  %v19307_v17 = vld [vmem:[%s29180_s29 + $0x590] sm:$0xff] }
 0x62d   : > { %28300 = vmatpush1.bf16.msra.mxu0 %v28299_v48  ;;  %v19275_v48 = vld [vmem:[%s29180_s29 + $0x490] sm:$0xff] }
 0x62e   : > { %28302 = vmatprep.subr.bf16.mxu0 %v28301_v50  ;;  %v19278_v50 = vld [vmem:[%s29180_s29 + $0x4a8] sm:$0xff]  ;;  %v28335_v44 = vpack.c.bf16 %v19275_v48, %v19273_v34  ;;  %v19309_v34 = vld [vmem:[%s29180_s29 + $0x5a0] sm:$0xff]  ;;  %v19311_v48 = vld [vmem:[%s29180_s29 + $0x5b0] sm:$0xff] }
 0x62f   : > { %v28337_v3 = vpack.c.bf16 %v19280_v31, %v19278_v50  ;;  %v19314_v50 = vld [vmem:[%s29180_s29 + $0x5c8] sm:$0xff]  ;;  %v19316_v31 = vld [vmem:[%s29180_s29 + $0x5d8] sm:$0xff] }
 0x631   : > { %28304 = vmatpush1.bf16.msra.mxu0 %v28303_v30  ;;  %v19279_v30 = vld [vmem:[%s29180_s29 + $0x4b0] sm:$0xff] }
 0x632   : > { %28306 = vmatprep.subr.bf16.mxu0 %v28305_v5  ;;  %v19282_v5 = vld [vmem:[%s29180_s29 + $0x4c8] sm:$0xff]  ;;  %v28339_v38 = vpack.c.bf16 %v19279_v30, %v19277_v29  ;;  %v19313_v29 = vld [vmem:[%s29180_s29 + $0x5c0] sm:$0xff]  ;;  %v19315_v30 = vld [vmem:[%s29180_s29 + $0x5d0] sm:$0xff] }
 0x633   : > { %v28341_v47 = vpack.c.bf16 %v19284_v57, %v19282_v5  ;;  %v19318_v5 = vld [vmem:[%s29180_s29 + $0x5e8] sm:$0xff]  ;;  %v19320_v57 = vld [vmem:[%s29180_s29 + $0x5f8] sm:$0xff] }
 0x635   : > { %28308 = vmatpush1.bf16.msra.mxu0 %v28307_v63  ;;  %v19283_v63 = vld [vmem:[%s29180_s29 + $0x4d0] sm:$0xff] }
 0x636   : > { %28310 = vmatprep.subr.bf16.mxu0 %v28309_v7  ;;  %v19286_v7 = vld [vmem:[%s29180_s29 + $0x4e8] sm:$0xff]  ;;  %v28343_v10 = vpack.c.bf16 %v19283_v63, %v19281_v61  ;;  %v19317_v61 = vld [vmem:[%s29180_s29 + $0x5e0] sm:$0xff]  ;;  %v19319_v63 = vld [vmem:[%s29180_s29 + $0x5f0] sm:$0xff] }
 0x637   : > { %v28345_v19 = vpack.c.bf16 %v19288_v39, %v19286_v7  ;;  %v19322_v7 = vld [vmem:[%s29180_s29 + $0x608] sm:$0xff]  ;;  %v19324_v39 = vld [vmem:[%s29180_s29 + $0x618] sm:$0x3] }
 0x639   : > { %28312 = vmatpush1.bf16.msra.mxu0 %v28311_v12  ;;  %v18976_v20 = vpop.f32.mrb[4].mxu1  ;;  %v19287_v12 = vld [vmem:[%s29180_s29 + $0x4f0] sm:$0xff] }
 0x63a   : > { %v18978_v60 = vpop.f32.mrb[5].mxu1  ;;  %28314 = vmatprep.subr.bf16.mxu0 %v28313_v27  ;;  %v19290_v27 = vld [vmem:[%s29180_s29 + $0x508] sm:$0xff]  ;;  %v28347_v35 = vpack.c.bf16 %v19287_v12, %v19285_v18  ;;  %v19321_v18 = vld [vmem:[%s29180_s29 + $0x600] sm:$0xff]  ;;  %v19323_v12 = vld [vmem:[%s29180_s29 + $0x610] sm:$0x3] }
 0x63b   : > { %19471 = vmatprep.mubr.f32.mxu0 %v18978_v60  ;;  %v28349_v6 = vpack.c.bf16 %v19292_v0, %v19290_v27  ;;  %v19296_v60 = vld [vmem:[%s29180_s29 + $0x538] sm:$0xff]  ;;  %v28384_v27 = vpack.c.bf16 %v19323_v12, %v19321_v18  ;;  %v19325_v0 = vld [vmem:[%s29175_s25] sm:$0xff] }
 0x63c   : > { %v27422_v18 = vld [vmem:[%s33014_s3 + $0x58] sm:$0xff] }
 0x63d   : > { %28316 = vmatpush1.bf16.msra.mxu0 %v28315_v2  ;;  %v32282_v53 = vpop.f32.mrb[6].mxu1  ;;  %v19294_v2 = vld [vmem:[%s29180_s29 + $0x528] sm:$0xff] }
 0x63e   : > { %v27896_v33 = vpop.f32.mrb[7].mxu1  ;;  %28318 = vmatprep.subr.bf16.mxu0 %v28317_v23  ;;  %v28353_v25 = vpack.c.bf16 %v19296_v60, %v19294_v2 }
 0x63f   : > { %v28355_v33 = vpack.c.bf16 %v19295_v45, %v19293_v11 }
 0x640   : > { %19472 = vmatmul.mubr.f32.vlgmr.msra.gmra.mrb[8].mxu0 %v18976_v20  ;;  %v19291_v20 = vld [vmem:[%s29180_s29 + $0x510] sm:$0xff] }
 0x641   : > { %28320 = vmatpush1.bf16.msra.mxu0 %v28319_v15  ;;  %19542 = vmatprep.mubr.f32.mxu0 %v32240_v46  ;;  %v19274_v46 = vld [vmem:[%s29180_s29 + $0x488] sm:$0xff]  ;;  %v28351_v23 = vpack.c.bf16 %v19291_v20, %v19289_v22  ;;  %v19300_v15 = vld [vmem:[%s29180_s29 + $0x558] sm:$0xff] }
 0x642   : > { %28322 = vmatprep.subr.bf16.mxu0 %v28321_v24  ;;  %v28333_v28 = vpack.c.bf16 %v19276_v13, %v19274_v46  ;;  %v28357_v24 = vpack.c.bf16 %v19300_v15, %v19298_v58  ;;  %v19310_v46 = vld [vmem:[%s29180_s29 + $0x5a8] sm:$0xff]  ;;  %v19312_v13 = vld [vmem:[%s29180_s29 + $0x5b8] sm:$0xff]  ;;  %v19620_v58 = vld [vmem:[%s33014_s3] sm:$0xff] }
 0x645   : > { %28324 = vmatpush1.bf16.msra.mxu0 %v28323_v32  ;;  %v28359_v32 = vpack.c.bf16 %v19299_v37, %v19297_v26  ;;  %v27404_v26 = vld [vmem:[%s33014_s3 + $0x10] sm:$0xff] }
 0x646   : > { %28326 = vmatprep.subr.bf16.mxu0 %v28325_v42  ;;  %v28361_v42 = vpack.c.bf16 %v19304_v43, %v19302_v21 }
 0x649   : > { %28328 = vmatpush1.bf16.msra.mxu0 %v28327_v1  ;;  %v28363_v1 = vpack.c.bf16 %v19303_v52, %v19301_v56 }
 0x64a   : > { %28330 = vmatprep.subr.bf16.mxu0 %v28329_v14  ;;  %v28365_v14 = vpack.c.bf16 %v19308_v62, %v19306_v49  ;;  %v27408_v49 = vld [vmem:[%s33014_s3 + $0x20] sm:$0xff] }
 0x64d   : > { %28332 = vmatpush1.bf16.msra.mxu0 %v28331_v59  ;;  %v28367_v59 = vpack.c.bf16 %v19307_v17, %v19305_v41  ;;  %v27410_v41 = vld [vmem:[%s33014_s3 + $0x28] sm:$0xff] }
 0x64e   : > { %28334 = vmatprep.subr.bf16.mxu0 %v28333_v28  ;;  %v28369_v28 = vpack.c.bf16 %v19312_v13, %v19310_v46 }
 0x651   : > { %28336 = vmatpush1.bf16.msra.mxu0 %v28335_v44  ;;  %v28371_v44 = vpack.c.bf16 %v19311_v48, %v19309_v34 }
 0x652   : > { %28338 = vmatprep.subr.bf16.mxu0 %v28337_v3  ;;  %v28373_v3 = vpack.c.bf16 %v19316_v31, %v19314_v50  ;;  %v27414_v50 = vld [vmem:[%s33014_s3 + $0x38] sm:$0xff] }
 0x655   : > { %28340 = vmatpush1.bf16.msra.mxu0 %v28339_v38  ;;  %v28375_v38 = vpack.c.bf16 %v19315_v30, %v19313_v29  ;;  %v27416_v29 = vld [vmem:[%s33014_s3 + $0x40] sm:$0xff] }
 0x656   : > { %28342 = vmatprep.subr.bf16.mxu0 %v28341_v47  ;;  %v28377_v47 = vpack.c.bf16 %v19320_v57, %v19318_v5 }
 0x659   : > { %28344 = vmatpush1.bf16.msra.mxu0 %v28343_v10  ;;  %v28379_v10 = vpack.c.bf16 %v19319_v63, %v19317_v61 }
 0x65a   : > { %28346 = vmatprep.subr.bf16.mxu0 %v28345_v19  ;;  %v28381_v19 = vpack.c.bf16 %v19324_v39, %v19322_v7  ;;  %v27420_v7 = vld [vmem:[%s33014_s3 + $0x50] sm:$0xff] }
 0x65d   : > { %28348 = vmatpush1.bf16.msra.mxu0 %v28347_v35  ;;  %v19326_v35 = vld [vmem:[%s29175_s25 + $0x8] sm:$0xff] }
 0x65e   : > { %28350 = vmatprep.subr.bf16.mxu0 %v28349_v6 }
 0x661   : > { %28352 = vmatpush1.bf16.msra.mxu0 %v28351_v23  ;;  %v27401_v23 = vld [vmem:[%s33014_s3 + $0x8] sm:$0xff] }
 0x662   : > { %28354 = vmatprep.subr.bf16.mxu0 %v28353_v25 }
 0x665   : > { %28356 = vmatpush1.bf16.msra.mxu0 %v28355_v33 }
 0x666   : > { %28358 = vmatprep.subr.bf16.mxu0 %v28357_v24 }
 0x669   : > { %28360 = vmatpush1.bf16.msra.mxu0 %v28359_v32  ;;  %v27406_v32 = vld [vmem:[%s33014_s3 + $0x18] sm:$0xff] }
 0x66a   : > { %28362 = vmatprep.subr.bf16.mxu0 %v28361_v42 }
 0x66d   : > { %28364 = vmatpush1.bf16.msra.mxu0 %v28363_v1 }
 0x66e   : > { %28366 = vmatprep.subr.bf16.mxu0 %v28365_v14 }
 0x671   : > { %28368 = vmatpush1.bf16.msra.mxu0 %v28367_v59  ;;  %v27412_v59 = vld [vmem:[%s33014_s3 + $0x30] sm:$0xff] }
 0x672   : > { %28370 = vmatprep.subr.bf16.mxu0 %v28369_v28 }
 0x675   : > { %28372 = vmatpush1.bf16.msra.mxu0 %v28371_v44 }
 0x676   : > { %28374 = vmatprep.subr.bf16.mxu0 %v28373_v3 }
 0x679   : > { %28376 = vmatpush1.bf16.msra.mxu0 %v28375_v38  ;;  %v27418_v38 = vld [vmem:[%s33014_s3 + $0x48] sm:$0xff] }
 0x67a   : > { %28378 = vmatprep.subr.bf16.mxu0 %v28377_v47 }
 0x67d   : > { %28380 = vmatpush1.bf16.msra.mxu0 %v28379_v10 }
 0x67e   : > { %28383 = vmatprep.subr.msk.bf16.mxu0 %vm28382_vm14, %v28381_v19 }
 0x680   : > { %19543 = vmatmul.mubr.f32.vlgmr.msra.gmra.mrb[8].mxu0 %v32238_v54  ;;  %v21922_v54 = vld [vmem:[%s33019_s8] sm:$0xff]  ;;  %s29140_s8 = smov 104  }
 0x681   : > { %28386 = vmatpush1.bf16.msk.msra.mxu0 %vm28382_vm14, %v28384_v27  ;;  %19613 = vmatprep.mubr.f32.mxu0 %v29069_v16  ;;  %vm20300_vm14 = vcmask 932864  }
 0x688   : > { %27400 = vmatmul.mubr.msk.f32.vlgmr.msra.gmra.mrb[8].mxu0 %vm4449_vm12, %v32282_v53  ;;  %vm19871_vm12 = vcmask 998400  }
 0x689   : > { %28087 = vmatprep.mubr.msk.f32.mxu0 %vm29104_vm10, %v29069_v16 }
 0x75b   : > { %v19615_v6 = vpop.f32.mrb[8].mxu0 }
 0x75c   : > { %v32357_v22 = vadd.f32 %v19615_v6, %v19325_v0  ;;  %v19617_v20 = vpop.f32.mrb[9].mxu0 }
 0x75d   : > { %v32359_v2 = vadd.f32 %v19617_v20, %v19326_v35  ;;  %v27424_v35 = vld [vmem:[%s33014_s3 + $0x60] sm:$0xff] }
 0x75e   : > { %19625 = vrot.lane.b32.xlu1 %v32357_v22, %s32990_s11 }
 0x75f   : > { %19627 = vrot.lane.b32.xlu0 %v32359_v2, %s32990_s11 }
 0x762   : > { %19782 = vrot.lane.b32.xlu1 %v32357_v22, %s33016_s15 }
 0x763   : > { %19784 = vrot.lane.b32.xlu0 %v32359_v2, %s33016_s15 }
 0x766   : > { %19867 = vrot.lane.b32.xlu1 %v32357_v22, %s32987_s27 }
 0x767   : > { %19869 = vrot.lane.b32.xlu0 %v32359_v2, %s32987_s27 }
 0x76a   : > { %19953 = vrot.lane.b32.xlu1 %v32357_v22, %s32977_s0 }
 0x76b   : > { %19955 = vrot.lane.b32.xlu0 %v32359_v2, %s32977_s0  ;;  %s29122_s0 = smov 92  }
 0x76e   : > { %20039 = vrot.lane.b32.xlu1 %v32357_v22, %s32981_s2 }
 0x76f   : > { %20041 = vrot.lane.b32.xlu0 %v32359_v2, %s32981_s2  ;;  %s33018_s2 = smov 90  }
 0x772   : > { %20125 = vrot.lane.b32.xlu1 %v32357_v22, %s32979_s16 }
 0x773   : > { %20127 = vrot.lane.b32.xlu0 %v32359_v2, %s32979_s16  ;;  %s33017_s16 = smov 91  }
 0x776   : > { %20210 = vrot.lane.b32.xlu1 %v32357_v22, %s32983_s23 }
 0x777   : > { %20212 = vrot.lane.b32.xlu0 %v32359_v2, %s32983_s23  ;;  %s29123_s23 = smov 86  }
 0x77a   : > { %20296 = vrot.lane.b32.xlu1 %v32357_v22, %s32985_s18 }
 0x77b   : > { %20298 = vrot.lane.b32.xlu0 %v32359_v2, %s32985_s18  ;;  %s29124_s18 = smov 85  }
 0x77e   : > { %20382 = vrot.lane.b32.xlu1 %v32357_v22, %s29122_s0 }
 0x77f   : > { %20384 = vrot.lane.b32.xlu0 %v32359_v2, %s29122_s0  ;;  %s29125_s0 = smov 84  }
 0x782   : > { %20468 = vrot.lane.b32.xlu1 %v32357_v22, %s33017_s16 }
 0x783   : > { %20470 = vrot.lane.b32.xlu0 %v32359_v2, %s33017_s16  ;;  %s29126_s16 = smov 80  }
 0x786   : > { %20553 = vrot.lane.b32.xlu1 %v32357_v22, %s33018_s2 }
 0x787   : > { %20555 = vrot.lane.b32.xlu0 %v32359_v2, %s33018_s2  ;;  %s29127_s2 = smov 79  }
 0x78a   : > { %20638 = vrot.lane.b32.xlu1 %v32357_v22, %s29123_s23 }
 0x78b   : > { %20640 = vrot.lane.b32.xlu0 %v32359_v2, %s29123_s23  ;;  %s29128_s23 = smov 78  }
 0x78e   : > { %20724 = vrot.lane.b32.xlu1 %v32357_v22, %s29124_s18 }
 0x78f   : > { %20726 = vrot.lane.b32.xlu0 %v32359_v2, %s29124_s18  ;;  %s29129_s18 = smov 50  }
 0x792   : > { %20810 = vrot.lane.b32.xlu1 %v32357_v22, %s29125_s0 }
 0x793   : > { %20812 = vrot.lane.b32.xlu0 %v32359_v2, %s29125_s0  ;;  %s29130_s0 = smov 49  }
 0x796   : > { %20896 = vrot.lane.b32.xlu1 %v32357_v22, %s29126_s16 }
 0x797   : > { %20898 = vrot.lane.b32.xlu0 %v32359_v2, %s29126_s16  ;;  %s33029_s16 = sld [smem:[#allocation9_spill]] }
 0x79a   : > { %20982 = vrot.lane.b32.xlu1 %v32357_v22, %s29127_s2 }
 0x79b   : > { %20984 = vrot.lane.b32.xlu0 %v32359_v2, %s29127_s2  ;;  %s29134_s2 = smov 124  }
 0x79e   : > { %21068 = vrot.lane.b32.xlu1 %v32357_v22, %s29128_s23 }
 0x79f   : > { %21070 = vrot.lane.b32.xlu0 %v32359_v2, %s29128_s23  ;;  %s29135_s23 = smov 123  }
 0x7a2   : > { %21154 = vrot.lane.b32.xlu1 %v32357_v22, %s29107_s7 }
 0x7a3   : > { %21156 = vrot.lane.b32.xlu0 %v32359_v2, %s29107_s7  ;;  %s29131_s7 = smov 48  }
 0x7a6   : > { %21239 = vrot.lane.b32.xlu1 %v32357_v22, %s29108_s26 }
 0x7a7   : > { %21241 = vrot.lane.b32.xlu0 %v32359_v2, %s29108_s26  ;;  %s29132_s26 = smov 43  }
 0x7aa   : > { %21324 = vrot.lane.b32.xlu1 %v32357_v22, %s29109_s10 }
 0x7ab   : > { %21326 = vrot.lane.b32.xlu0 %v32359_v2, %s29109_s10  ;;  %s29133_s10 = smov 42  }
 0x7ae   : > { %21409 = vrot.lane.b32.xlu1 %v32357_v22, %s29129_s18 }
 0x7af   : > { %21411 = vrot.lane.b32.xlu0 %v32359_v2, %s29129_s18  ;;  %s33030_s18 = smov 120  }
 0x7b2   : > { %21495 = vrot.lane.b32.xlu1 %v32357_v22, %s29130_s0 }
 0x7b3   : > { %21497 = vrot.lane.b32.xlu0 %v32359_v2, %s29130_s0  ;;  %s33031_s0 = smov 119  }
 0x7b6   : > { %21581 = vrot.lane.b32.xlu1 %v32357_v22, %s29131_s7 }
 0x7b7   : > { %21583 = vrot.lane.b32.xlu0 %v32359_v2, %s29131_s7  ;;  %s33032_s7 = smov 118  }
 0x7ba   : > { %21667 = vrot.lane.b32.xlu1 %v32357_v22, %s29112_s22 }
 0x7bb   : > { %21669 = vrot.lane.b32.xlu0 %v32359_v2, %s29112_s22  ;;  %s33028_s22 = sld [smem:[#allocation10_spill]] }
 0x7be   : > { %21752 = vrot.lane.b32.xlu1 %v32357_v22, %s29132_s26 }
 0x7bf   : > { %21754 = vrot.lane.b32.xlu0 %v32359_v2, %s29132_s26  ;;  %s33033_s26 = sld [smem:[#allocation11_spill]] }
 0x7c2   : > { %21838 = vrot.lane.b32.xlu1 %v32357_v22, %s29133_s10 }
 0x7c3   : > { %21840 = vrot.lane.b32.xlu0 %v32359_v2, %s29133_s10  ;;  %s33034_s10 = sld [smem:[#allocation13_spill]] }
 0x7c6   : > { %21925 = vperm.xlu1 %29022, %v21922_v54  }
 0x7d0   : > { %v19626_v53 = vpop.permute.xlu1 %19625 }
 0x7d1   : > { %v19628_v60 = vpop.permute.xlu0 %19627 }
 0x7d2   : > { %v19629_v25 = vsel %vm5780_vm15, %v19626_v53, %v19628_v60  ;;  %19635 = vmatprep.subr.mxu1 %v19628_v60  ;;  %vm19957_vm15 = vcmask 990208  }
 0x7d3   : > { %19636 = vmatpush1.msra.mxu1 %v19629_v25 }
 0x7d4   : > { %27402 = vmatmul.mubr.msk.f32.vlgmr.msra.gmra.mrb[8].mxu1 %vm15178_vm3, %v27401_v23  ;;  %19709 = vmatprep.subr.mxu1 %v32359_v2  ;;  %v19783_v45 = vpop.permute.xlu1 %19782  ;;  %v27426_v2 = vld [vmem:[%s33014_s3 + $0x68] sm:$0xff]  ;;  %v27428_v23 = vld [vmem:[%s33014_s3 + $0x70] sm:$0xff] }
 0x7d5   : > { %v19785_v11 = vpop.permute.xlu0 %19784  ;;  %19710 = vmatpush1.msra.mxu1 %v32357_v22  ;;  %19773 = vmatprep.mubr.f32.mxu1 %v29069_v16 }
 0x7d6   : > { %19792 = vmatprep.subr.mxu1 %v19785_v11  ;;  %v19786_v15 = vsel %vm33020_vm0, %v19783_v45, %v19785_v11  ;;  %vm20386_vm0 = vcmask 752640  }
 0x7d8   : > { %v19868_v24 = vpop.permute.xlu1 %19867 }
 0x7d9   : > { %v19870_v33 = vpop.permute.xlu0 %19869 }
 0x7da   : > { %v19872_v37 = vsel %vm19871_vm12, %v19868_v24, %v19870_v33  ;;  %vm33022_vm12 = vcmask 744448  }
 0x7dc   : > { %27403 = vmatmul.mubr.msk.f32.vlgmr.msra.gmra.mrb[8].mxu1 %vm15178_vm3, %v19620_v58  ;;  %v19954_v43 = vpop.permute.xlu1 %19953  ;;  %v27430_v58 = vld [vmem:[%s33014_s3 + $0x78] sm:$0xff] }
 0x7dd   : > { %19793 = vmatpush1.msra.mxu1 %v19786_v15  ;;  %19856 = vmatprep.mubr.f32.mxu1 %v29069_v16  ;;  %v19956_v21 = vpop.permute.xlu0 %19955 }
 0x7de   : > { %19878 = vmatprep.subr.mxu1 %v19870_v33  ;;  %v19958_v42 = vsel %vm19957_vm15, %v19954_v43, %v19956_v21  ;;  %vm33023_vm15 = vcmask 736256  }
 0x7e0   : > { %v20040_v52 = vpop.permute.xlu1 %20039 }
 0x7e1   : > { %v20042_v56 = vpop.permute.xlu0 %20041 }
 0x7e2   : > { %v20044_v62 = vsel %vm20043_vm1, %v20040_v52, %v20042_v56  ;;  %vm20642_vm1 = vcmask 703488  }
 0x7e4   : > { %27405 = vmatmul.mubr.msk.f32.vlgmr.msra.gmra.mrb[8].mxu1 %vm15178_vm3, %v27404_v26  ;;  %v20126_v14 = vpop.permute.xlu1 %20125  ;;  %v27432_v26 = vld [vmem:[%s33014_s3 + $0x80] sm:$0xff] }
 0x7e5   : > { %19879 = vmatpush1.msra.mxu1 %v19872_v37  ;;  %19942 = vmatprep.mubr.f32.mxu1 %v29069_v16  ;;  %v20128_v1 = vpop.permute.xlu0 %20127 }
 0x7e6   : > { %19964 = vmatprep.subr.mxu1 %v19956_v21  ;;  %v20129_v17 = vsel %vm33021_vm5, %v20126_v14, %v20128_v1  ;;  %vm20728_vm5 = vcmask 695296  }
 0x7e8   : > { %v20211_v13 = vpop.permute.xlu1 %20210 }
 0x7e9   : > { %v20213_v46 = vpop.permute.xlu0 %20212 }
 0x7ea   : > { %v20215_v28 = vsel %vm20214_vm8, %v20211_v13, %v20213_v46  ;;  %vm20814_vm8 = vcmask 687104  }
 0x7ec   : > { %27407 = vmatmul.mubr.msk.f32.vlgmr.msra.gmra.mrb[8].mxu1 %vm15178_vm3, %v27406_v32  ;;  %v20297_v48 = vpop.permute.xlu1 %20296  ;;  %v27434_v32 = vld [vmem:[%s33014_s3 + $0x88] sm:$0xff] }
 0x7ed   : > { %19965 = vmatpush1.msra.mxu1 %v19958_v42  ;;  %20028 = vmatprep.mubr.f32.mxu1 %v29069_v16  ;;  %v20299_v34 = vpop.permute.xlu0 %20298 }
 0x7ee   : > { %20050 = vmatprep.subr.mxu1 %v20042_v56  ;;  %v20301_v31 = vsel %vm20300_vm14, %v20297_v48, %v20299_v34  ;;  %vm20900_vm14 = vcmask 654336  }
 0x7f0   : > { %v20383_v3 = vpop.permute.xlu1 %20382 }
 0x7f1   : > { %v20385_v44 = vpop.permute.xlu0 %20384 }
 0x7f2   : > { %v20387_v30 = vsel %vm20386_vm0, %v20383_v3, %v20385_v44  ;;  %vm20986_vm0 = vcmask 646144  }
 0x7f4   : > { %27409 = vmatmul.mubr.msk.f32.vlgmr.msra.gmra.mrb[8].mxu1 %vm15178_vm3, %v27408_v49  ;;  %v20469_v57 = vpop.permute.xlu1 %20468  ;;  %v27436_v49 = vld [vmem:[%s33014_s3 + $0x90] sm:$0xff] }
 0x7f5   : > { %20051 = vmatpush1.msra.mxu1 %v20044_v62  ;;  %20114 = vmatprep.mubr.f32.mxu1 %v29069_v16  ;;  %v20471_v5 = vpop.permute.xlu0 %20470 }
 0x7f6   : > { %20135 = vmatprep.subr.mxu1 %v20128_v1  ;;  %v20472_v47 = vsel %vm33022_vm12, %v20469_v57, %v20471_v5  ;;  %vm21072_vm12 = vcmask 637952  }
 0x7f8   : > { %v20554_v63 = vpop.permute.xlu1 %20553 }
 0x7f9   : > { %v20556_v61 = vpop.permute.xlu0 %20555 }
 0x7fa   : > { %v20557_v39 = vsel %vm33023_vm15, %v20554_v63, %v20556_v61  ;;  %vm21756_vm15 = vcmask 351232  }
 0x7fc   : > { %27411 = vmatmul.mubr.msk.f32.vlgmr.msra.gmra.mrb[8].mxu1 %vm15178_vm3, %v27410_v41  ;;  %v20639_v19 = vpop.permute.xlu1 %20638  ;;  %v27438_v41 = vld [vmem:[%s33014_s3 + $0x98] sm:$0xff] }
 0x7fd   : > { %20136 = vmatpush1.msra.mxu1 %v20129_v17  ;;  %20199 = vmatprep.mubr.f32.mxu1 %v29069_v16  ;;  %v20641_v10 = vpop.permute.xlu0 %20640 }
 0x7fe   : > { %20221 = vmatprep.subr.mxu1 %v20213_v46  ;;  %v20643_v12 = vsel %vm20642_vm1, %v20639_v19, %v20641_v10  ;;  %vm33025_vm1 = vcmask 15360  }
 0x800   : > { %v20725_v0 = vpop.permute.xlu1 %20724 }
 0x801   : > { %v20727_v27 = vpop.permute.xlu0 %20726 }
 0x802   : > { %v20729_v6 = vsel %vm20728_vm5, %v20725_v0, %v20727_v27  ;;  %v21932_v0 = vld [vmem:[%s29195_s14] sm:$0x3]  ;;  %vm22027_vm5 = vcmask 1045504  }
 0x804   : > { %27413 = vmatmul.mubr.msk.f32.vlgmr.msra.gmra.mrb[8].mxu1 %vm15178_vm3, %v27412_v59  ;;  %v20811_v20 = vpop.permute.xlu1 %20810  ;;  %v27440_v59 = vld [vmem:[%s33014_s3 + $0xa0] sm:$0xff] }
 0x805   : > { %20222 = vmatpush1.msra.mxu1 %v20215_v28  ;;  %20285 = vmatprep.mubr.f32.mxu1 %v29069_v16  ;;  %v20813_v22 = vpop.permute.xlu0 %20812 }
 0x806   : > { %20307 = vmatprep.subr.mxu1 %v20299_v34  ;;  %v20815_v54 = vsel %vm20814_vm8, %v20811_v20, %v20813_v22  ;;  %vm22029_vm8 = vcmask 13312  }
 0x808   : > { %v20897_v60 = vpop.permute.xlu1 %20896 }
 0x809   : > { %v20899_v53 = vpop.permute.xlu0 %20898 }
 0x80a   : > { %v20901_v25 = vsel %vm20900_vm14, %v20897_v60, %v20899_v53  ;;  %v21937_v60 = vrot.slane %v21932_v0, %v30446_v9  ;;  %vm33038_vm14 = vcmask 48128  }
 0x80c   : > { %27415 = vmatmul.mubr.msk.f32.vlgmr.msra.gmra.mrb[8].mxu1 %vm15178_vm3, %v27414_v50  ;;  %v20983_v45 = vpop.permute.xlu1 %20982  ;;  %v27442_v50 = vld [vmem:[%s33014_s3 + $0xa8] sm:$0xff] }
 0x80d   : > { %20308 = vmatpush1.msra.mxu1 %v20301_v31  ;;  %20371 = vmatprep.mubr.f32.mxu1 %v29069_v16  ;;  %v20985_v11 = vpop.permute.xlu0 %20984 }
 0x80e   : > { %20393 = vmatprep.subr.mxu1 %v20385_v44  ;;  %v20987_v15 = vsel %vm20986_vm0, %v20983_v45, %v20985_v11  ;;  %vm33039_vm0 = vcmask 130048  }
 0x810   : > { %v21069_v24 = vpop.permute.xlu1 %21068 }
 0x811   : > { %v21071_v33 = vpop.permute.xlu0 %21070 }
 0x812   : > { %v21073_v37 = vsel %vm21072_vm12, %v21069_v24, %v21071_v33  ;;  %vm23615_vm12 = vcmask 26624  }
 0x814   : > { %27417 = vmatmul.mubr.msk.f32.vlgmr.msra.gmra.mrb[8].mxu1 %vm15178_vm3, %v27416_v29  ;;  %v21155_v43 = vpop.permute.xlu1 %21154  ;;  %v27444_v29 = vld [vmem:[%s33014_s3 + $0xb0] sm:$0xff] }
 0x815   : > { %20394 = vmatpush1.msra.mxu1 %v20387_v30  ;;  %20457 = vmatprep.mubr.f32.mxu1 %v29069_v16  ;;  %v21157_v21 = vpop.permute.xlu0 %21156 }
 0x816   : > { %20478 = vmatprep.subr.mxu1 %v20471_v5  ;;  %v21158_v42 = vsel %vm16175_vm11, %v21155_v43, %v21157_v21  ;;  %vm21413_vm11 = vcmask 408576   ;;  %v27455_v43 = vld [vmem:[%s29210_s30 + $0x8] sm:$0xff] }
 0x818   : > { %v21240_v52 = vpop.permute.xlu1 %21239 }
 0x819   : > { %v21242_v56 = vpop.permute.xlu0 %21241 }
 0x81a   : > { %v21243_v62 = vsel %vm16505_vm13, %v21240_v52, %v21242_v56  ;;  %vm21499_vm13 = vcmask 400384  }
 0x81c   : > { %27419 = vmatmul.mubr.msk.f32.vlgmr.msra.gmra.mrb[8].mxu1 %vm15178_vm3, %v27418_v38  ;;  %v21325_v14 = vpop.permute.xlu1 %21324  ;;  %v27446_v38 = vld [vmem:[%s33014_s3 + $0xb8] sm:$0xff] }
 0x81d   : > { %20479 = vmatpush1.msra.mxu1 %v20472_v47  ;;  %20542 = vmatprep.mubr.f32.mxu1 %v29069_v16  ;;  %v21327_v1 = vpop.permute.xlu0 %21326 }
 0x81e   : > { %20563 = vmatprep.subr.mxu1 %v20556_v61  ;;  %v21328_v17 = vsel %vm16835_vm4, %v21325_v14, %v21327_v1  ;;  %vm21585_vm4 = vcmask 392192  }
 0x820   : > { %v21410_v13 = vpop.permute.xlu1 %21409 }
 0x821   : > { %v21412_v46 = vpop.permute.xlu0 %21411 }
 0x822   : > { %v21414_v28 = vsel %vm21413_vm11, %v21410_v13, %v21412_v46  ;;  %vm24959_vm11 = vcmask 1040384  }
 0x824   : > { %27421 = vmatmul.mubr.msk.f32.vlgmr.msra.gmra.mrb[8].mxu1 %vm15178_vm3, %v27420_v7  ;;  %v21496_v48 = vpop.permute.xlu1 %21495  ;;  %v27448_v7 = vld [vmem:[%s33014_s3 + $0xc0] sm:$0xff] }
 0x825   : > { %20564 = vmatpush1.msra.mxu1 %v20557_v39  ;;  %20627 = vmatprep.mubr.f32.mxu1 %v29069_v16  ;;  %v21498_v34 = vpop.permute.xlu0 %21497 }
 0x826   : > { %20649 = vmatprep.subr.mxu1 %v20641_v10  ;;  %v21500_v31 = vsel %vm21499_vm13, %v21496_v48, %v21498_v34  ;;  %v33026_v48 = vsub.s32 6, %v29320_v4  ;;  %vm28395_vm13 = vmpackc.low %vm24959_vm11, %vm29116_vm2  ;;  %vm24955_vm2 = vcmask 203776  }
 0x828   : > { %v21582_v3 = vpop.permute.xlu1 %21581 }
 0x829   : > { %v21584_v44 = vpop.permute.xlu0 %21583 }
 0x82a   : > { %v21586_v30 = vsel %vm21585_vm4, %v21582_v3, %v21584_v44  ;;  %v33027_v3 = vsub.s32 7, %v29320_v4  ;;  %v22809_v4 = vld [vmem:[%s33028_s22] sm:$0xff]  ;;  %s33035_s22 = sld [smem:[#allocation12_spill]] }
 0x82c   : > { %27423 = vmatmul.mubr.msk.f32.vlgmr.msra.gmra.mrb[8].mxu1 %vm15178_vm3, %v27422_v18  ;;  %v21668_v57 = vpop.permute.xlu1 %21667  ;;  %v27450_v18 = vld [vmem:[%s33014_s3 + $0xc8] sm:$0xff] }
 0x82d   : > { %20650 = vmatpush1.msra.mxu1 %v20643_v12  ;;  %20713 = vmatprep.mubr.f32.mxu1 %v29069_v16  ;;  %v21670_v5 = vpop.permute.xlu0 %21669 }
 0x82e   : > { %20735 = vmatprep.subr.mxu1 %v20727_v27  ;;  %v21671_v47 = vsel %vm17825_vm9, %v21668_v57, %v21670_v5  ;;  %vm21842_vm9 = vcmask 343040   ;;  %v27452_v27 = vld [vmem:[%s33014_s3 + $0xd0] sm:$0xff]  ;;  %s33041_s3 = smov 121  }
 0x830   : > { %v21753_v63 = vpop.permute.xlu1 %21752 }
 0x831   : > { %v21755_v61 = vpop.permute.xlu0 %21754 }
 0x832   : > { %v21757_v39 = vsel %vm21756_vm15, %v21753_v63, %v21755_v61 }
 0x834   : > { %27425 = vmatmul.mubr.msk.f32.vlgmr.msra.gmra.mrb[8].mxu1 %vm15178_vm3, %v27424_v35  ;;  %v21839_v19 = vpop.permute.xlu1 %21838 }
 0x835   : > { %20736 = vmatpush1.msra.mxu1 %v20729_v6  ;;  %20799 = vmatprep.mubr.f32.mxu1 %v29069_v16  ;;  %v21841_v10 = vpop.permute.xlu0 %21840 }
 0x836   : > { %20821 = vmatprep.subr.mxu1 %v20813_v22  ;;  %v21843_v12 = vsel %vm21842_vm9, %v21839_v19, %v21841_v10 }
 0x83c   : > { %27427 = vmatmul.mubr.msk.f32.vlgmr.msra.gmra.mrb[8].mxu1 %vm15178_vm3, %v27426_v2 }
 0x83d   : > { %20822 = vmatpush1.msra.mxu1 %v20815_v54  ;;  %20885 = vmatprep.mubr.f32.mxu1 %v29069_v16  ;;  %v32536_v54 = vrot.slane %v21932_v0, %v30459_v51 }
 0x83e   : > { %20907 = vmatprep.subr.mxu1 %v20899_v53 }
 0x844   : > { %27429 = vmatmul.mubr.msk.f32.vlgmr.msra.gmra.mrb[8].mxu1 %vm15178_vm3, %v27428_v23 }
 0x845   : > { %20908 = vmatpush1.msra.mxu1 %v20901_v25  ;;  %20971 = vmatprep.mubr.f32.mxu1 %v29069_v16  ;;  %v21926_v35 = vpop.permute.xlu1 %21925 }
 0x846   : > { %20993 = vmatprep.subr.mxu1 %v20985_v11 }
 0x84c   : > { %27431 = vmatmul.mubr.msk.f32.vlgmr.msra.gmra.mrb[8].mxu1 %vm15178_vm3, %v27430_v58 }
 0x84d   : > { %20994 = vmatpush1.msra.mxu1 %v20987_v15  ;;  %21057 = vmatprep.mubr.f32.mxu1 %v29069_v16  ;;  %v21950_v15 = vld [vmem:[%s29200_s19] sm:$0x3f] }
 0x84e   : > { %21079 = vmatprep.subr.mxu1 %v21071_v33  ;;  %v22039_v33 = vld [vmem:[%s29210_s30] sm:$0xff] }
 0x854   : > { %27433 = vmatmul.mubr.msk.f32.vlgmr.msra.gmra.mrb[8].mxu1 %vm15178_vm3, %v27432_v26 }
 0x855   : > { %21080 = vmatpush1.msra.mxu1 %v21073_v37  ;;  %21143 = vmatprep.mubr.f32.mxu1 %v29069_v16 }
 0x856   : > { %21164 = vmatprep.subr.mxu1 %v21157_v21  ;;  %v22038_v21 = vld [vmem:[%s33024_s6] sm:$0xff]  ;;  %s33045_s6 = sld [smem:[#allocation16_spill]] }
 0x85c   : > { %27435 = vmatmul.mubr.msk.f32.vlgmr.msra.gmra.mrb[8].mxu1 %vm15178_vm3, %v27434_v32 }
 0x85d   : > { %21165 = vmatpush1.msra.mxu1 %v21158_v42  ;;  %21228 = vmatprep.mubr.f32.mxu1 %v29069_v16 }
 0x85e   : > { %21249 = vmatprep.subr.mxu1 %v21242_v56  ;;  %v27456_v56 = vld [vmem:[%s29210_s30 + $0x10] sm:$0xff] }
 0x864   : > { %27437 = vmatmul.mubr.msk.f32.vlgmr.msra.gmra.mrb[8].mxu1 %vm15178_vm3, %v27436_v49 }
 0x865   : > { %21250 = vmatpush1.msra.mxu1 %v21243_v62  ;;  %21313 = vmatprep.mubr.f32.mxu1 %v29069_v16 }
 0x866   : > { %21334 = vmatprep.subr.mxu1 %v21327_v1  ;;  %v27457_v1 = vld [vmem:[%s29210_s30 + $0x18] sm:$0xff] }
 0x86c   : > { %27439 = vmatmul.mubr.msk.f32.vlgmr.msra.gmra.mrb[8].mxu1 %vm15178_vm3, %v27438_v41 }
 0x86d   : > { %21335 = vmatpush1.msra.mxu1 %v21328_v17  ;;  %21398 = vmatprep.mubr.f32.mxu1 %v29069_v16  ;;  %v27458_v17 = vld [vmem:[%s29210_s30 + $0x20] sm:$0xff] }
 0x86e   : > { %21420 = vmatprep.subr.mxu1 %v21412_v46 }
 0x874   : > { %27441 = vmatmul.mubr.msk.f32.vlgmr.msra.gmra.mrb[8].mxu1 %vm15178_vm3, %v27440_v59  ;;  %v27459_v59 = vld [vmem:[%s29210_s30 + $0x28] sm:$0xff] }
 0x875   : > { %21421 = vmatpush1.msra.mxu1 %v21414_v28  ;;  %21484 = vmatprep.mubr.f32.mxu1 %v29069_v16 }
 0x876   : > { %21506 = vmatprep.subr.mxu1 %v21498_v34 }
 0x87c   : > { %27443 = vmatmul.mubr.msk.f32.vlgmr.msra.gmra.mrb[8].mxu1 %vm15178_vm3, %v27442_v50 }
 0x87d   : > { %21507 = vmatpush1.msra.mxu1 %v21500_v31  ;;  %21570 = vmatprep.mubr.f32.mxu1 %v29069_v16 }
 0x87e   : > { %21592 = vmatprep.subr.mxu1 %v21584_v44 }
 0x884   : > { %27445 = vmatmul.mubr.msk.f32.vlgmr.msra.gmra.mrb[8].mxu1 %vm15178_vm3, %v27444_v29 }
 0x885   : > { %21593 = vmatpush1.msra.mxu1 %v21586_v30  ;;  %21656 = vmatprep.mubr.f32.mxu1 %v29069_v16 }
 0x886   : > { %21677 = vmatprep.subr.mxu1 %v21670_v5 }
 0x88c   : > { %27447 = vmatmul.mubr.msk.f32.vlgmr.msra.gmra.mrb[8].mxu1 %vm15178_vm3, %v27446_v38 }
 0x88d   : > { %21678 = vmatpush1.msra.mxu1 %v21671_v47  ;;  %21741 = vmatprep.mubr.f32.mxu1 %v29069_v16 }
 0x88e   : > { %21763 = vmatprep.subr.mxu1 %v21755_v61  ;;  %v27462_v61 = vld [vmem:[%s33029_s16 + $0x8] sm:$0xff] }
 0x894   : > { %27449 = vmatmul.mubr.msk.f32.vlgmr.msra.gmra.mrb[8].mxu1 %vm15178_vm3, %v27448_v7 }
 0x895   : > { %21764 = vmatpush1.msra.mxu1 %v21757_v39  ;;  %21827 = vmatprep.mubr.f32.mxu1 %v29069_v16 }
 0x896   : > { %21849 = vmatprep.subr.mxu1 %v21841_v10 }
 0x89c   : > { %27451 = vmatmul.mubr.msk.f32.vlgmr.msra.gmra.mrb[8].mxu1 %vm15178_vm3, %v27450_v18 }
 0x89d   : > { %21850 = vmatpush1.msra.mxu1 %v21843_v12  ;;  %21913 = vmatprep.mubr.f32.mxu1 %v29069_v16  ;;  %v22102_v12 = vld [vmem:[%s33029_s16] sm:$0xff] }
 0x8a4   : > { %27453 = vmatmul.mubr.msk.f32.vlgmr.msra.gmra.mrb[8].mxu1 %vm15178_vm3, %v27452_v27 }
 0x8a5   : > { %22018 = vmatprep.mubr.f32.mxu1 %v29069_v16 }
 0x977   : > { %v21915_v6 = vpop.f32.mrb[8].mxu1 }
 0x978   : > { %v21928_v22 = vadd.f32 %v21926_v35, %v21915_v6  ;;  %v21917_v20 = vpop.f32.mrb[9].mxu1 }
 0x979   : > { %v21929_v2 = vadd.f32 %v21926_v35, %v21917_v20  ;;  %v27465_v35 = vld [vmem:[%s33029_s16 + $0x10] sm:$0xff] }
 0x97a   : > { %v21930_v53 = vmax.f32 %v21928_v22, 0.0  ;;  %v27467_v22 = vld [vmem:[%s33029_s16 + $0x18] sm:$0xff] }
 0x97b   : > { %v21931_v23 = vmax.f32 %v21929_v2, 0.0  ;;  %v27469_v2 = vld [vmem:[%s33029_s16 + $0x20] sm:$0xff] }
 0x97c   : > { %v21944_v11 = vmul.f32 %v21937_v60, %v21930_v53 }
 0x97d   : > { %v21945_v25 = vmul.f32 %v32536_v54, %v21931_v23  ;;  %21954 = vmatprep.subr.mxu1 %v21931_v23  ;;  %v27473_v23 = vld [vmem:[%s33029_s16 + $0x30] sm:$0xff] }
 0x97e   : > { %21955 = vmatpush1.msra.mxu1 %v21930_v53  ;;  %v27471_v53 = vld [vmem:[%s33029_s16 + $0x28] sm:$0xff] }
 0x97f   : > { %v21946_v45 = vsel %vm33025_vm1, %v21945_v25, 0.0  ;;  %27897 = vmatprep.subr.mxu1 %v29069_v16  ;;  %27454 = vmatmul.mubr.msk.f32.vlgmr.msra.gmra.mrb[10].mxu1 %vm15178_vm3, %v21950_v15 }
 0x980   : > { %v21947_v58 = vadd.f32 %v21946_v45, %v21944_v11  ;;  %27899 = vmatprep.mubr.msk.f32.mxu1 %vm29104_vm10, %v29069_v16  ;;  %v27475_v11 = vld [vmem:[%s33029_s16 + $0x38] sm:$0xff] }
 0x982   : > { %21948 = vadd.xlane.f32.xlu0 %v21947_v58  ;;  %v27477_v58 = vld [vmem:[%s33029_s16 + $0x40] sm:$0xff] }
 0x998   : > { %22812 = vperm.xlu0 %29023, %v22809_v4  }
 0xa0f   : > { %v21949_v24 = vpop.xlane.xlu0 %21948 }
 0xa10   : > { %v22043_v26 = vrot.slane %v21949_v24, %v30446_v9  ;;  %v22051_v37 = vrot.slane %v21949_v24, %v30459_v51  ;;  %v22059_v42 = vrot.slane %v21949_v24, %v10205_v55  ;;  %v22067_v62 = vrot.slane %v21949_v24, %v10209_v36  ;;  %v27460_v36 = vld [vmem:[%s29210_s30 + $0x30] sm:$0xff] }
 0xa11   : > { %v22075_v51 = vrot.slane %v21949_v24, %v10213_v8  ;;  %v22083_v55 = vrot.slane %v21949_v24, %v10217_v40  ;;  %v22091_v50 = vrot.slane %v21949_v24, %v33026_v48  ;;  %v22099_v29 = vrot.slane %v21949_v24, %v33027_v3  ;;  %v27461_v8 = vld [vmem:[%s29210_s30 + $0x38] sm:$0xff] }
 0xa12   : > { %v22044_v32 = vmul.f32 %v22043_v26, %v22039_v33  ;;  %v22052_v49 = vmul.f32 %v27455_v43, %v22051_v37  ;;  %v22060_v41 = vmul.f32 %v27456_v56, %v22059_v42  ;;  %v22068_v13 = vmul.f32 %v27457_v1, %v22067_v62 }
 0xa13   : > { %v22076_v34 = vmul.f32 %v27458_v17, %v22075_v51  ;;  %v22084_v44 = vmul.f32 %v27459_v59, %v22083_v55  ;;  %v22092_v5 = vmul.f32 %v27460_v36, %v22091_v50  ;;  %v22100_v38 = vmul.f32 %v27461_v8, %v22099_v29  ;;  %v23530_v8 = vld [vmem:[%s33034_s10] sm:$0x7] }
 0xa14   : > { %v22045_v52 = vadd.f32 %v22044_v32, %v22038_v21 }
 0xa16   : > { %v22053_v14 = vadd.f32 %v22052_v49, %v22045_v52 }
 0xa17   : > { %v22813_v48 = vpop.permute.xlu0 %22812 }
 0xa18   : > { %v22061_v46 = vadd.f32 %v22060_v41, %v22053_v14 }
 0xa1a   : > { %v22069_v28 = vadd.f32 %v22068_v13, %v22061_v46 }
 0xa1c   : > { %v22077_v31 = vadd.f32 %v22076_v34, %v22069_v28 }
 0xa1e   : > { %v22085_v30 = vadd.f32 %v22084_v44, %v22077_v31  ;;  %v27479_v44 = vld [vmem:[%s33033_s26] ss:$0 sm:$0xff]  ;;  %s26723_s26 = sshll.u32 %s33058_s28, 2 }
 0xa1f   : > { %s1002_s10 = scalar_lea.vmem %s29303_s12, %s26723_s26  ;;  %s29138_s26 = smov 113  }
 0xa20   : > { %v22093_v57 = vadd.f32 %v22092_v5, %v22085_v30  ;;  %v27480_v30 = vld [vmem:[%s33035_s22 + $0x4] sm:$0x7] }
 0xa22   : > { %v22101_v40 = vadd.f32 %v22100_v38, %v22093_v57  ;;  %v22824_v57 = vld [vmem:[%s33035_s22] sm:$0x7] }
 0xa24   : > { %22106 = vrot.lane.b32.xlu1 %v22101_v40, %s32990_s11 }
 0xa28   : > { %22257 = vrot.lane.b32.xlu1 %v22101_v40, %s33016_s15 }
 0xa2c   : > { %22336 = vrot.lane.b32.xlu1 %v22101_v40, %s29134_s2 }
 0xa30   : > { %22415 = vrot.lane.b32.xlu1 %v22101_v40, %s29135_s23 }
 0xa34   : > { %22494 = vrot.lane.b32.xlu1 %v22101_v40, %s32987_s27 }
 0xa38   : > { %22573 = vrot.lane.b32.xlu1 %v22101_v40, %s33030_s18 }
 0xa3c   : > { %22652 = vrot.lane.b32.xlu1 %v22101_v40, %s33031_s0 }
 0xa40   : > { %22731 = vrot.lane.b32.xlu1 %v22101_v40, %s33032_s7 }
 0xa52   : > { %v22020_v47 = vpop.f32.mrb[10].mxu1 }
 0xa53   : > { %v22025_v63 = vmul.f32 %v22020_v47, %v21937_v60  ;;  %v22022_v7 = vpop.f32.mrb[11].mxu1  ;;  %v27485_v47 = vld [vmem:[%s33035_s22 + $0xc] sm:$0x7] }
 0xa54   : > { %v22026_v10 = vmul.f32 %v22022_v7, %v32536_v54 }
 0xa55   : > { %v22028_v19 = vsel %vm22027_vm5, %v22025_v63, 0.0  ;;  %v27487_v63 = vld [vmem:[%s33035_s22 + $0x10] sm:$0x7] }
 0xa56   : > { %v22030_v18 = vsel %vm22029_vm8, %v22026_v10, 0.0 }
 0xa57   : > { %v32586_v27 = vadd.f32 %v22030_v18, %v22028_v19  ;;  %v27491_v19 = vld [vmem:[%s33035_s22 + $0x18] sm:$0x7] }
 0xa96   : > { %v22107_v39 = vpop.permute.xlu1 %22106 }
 0xa97   : > { %27898 = vmatpush3.msra.mxu1 %v22107_v39  ;;  %v27489_v39 = vld [vmem:[%s33035_s22 + $0x14] sm:$0x7] }
 0xa98   : > { %27900 = vmatmul.mubr.msk.f32.vlgmr.msra.gmra.mrb[12].mxu1 %vm15178_vm3, %v27462_v61  ;;  %27902 = vmatprep.subr.mxu1 %v29069_v16 }
 0xa99   : > { %27903 = vmatpush3.msra.mxu1 %v22101_v40  ;;  %27904 = vmatprep.mubr.msk.f32.mxu1 %vm29104_vm10, %v29069_v16  ;;  %v27483_v40 = vld [vmem:[%s33035_s22 + $0x8] sm:$0x7] }
 0xa9a   : > { %v22258_v0 = vpop.permute.xlu1 %22257  ;;  %27907 = vmatprep.subr.mxu1 %v29069_v16 }
 0xa9c   : > { %27905 = vmatmul.mubr.msk.f32.vlgmr.msra.gmra.mrb[14].mxu1 %vm15178_vm3, %v22102_v12  ;;  %v27493_v12 = vld [vmem:[%s33035_s22 + $0x1c] sm:$0x7] }
 0xa9d   : > { %27908 = vmatpush3.msra.mxu1 %v22258_v0  ;;  %27909 = vmatprep.mubr.msk.f32.mxu1 %vm29104_vm10, %v29069_v16 }
 0xa9e   : > { %v22337_v6 = vpop.permute.xlu1 %22336  ;;  %27912 = vmatprep.subr.mxu1 %v29069_v16 }
 0xaa0   : > { %27910 = vmatmul.mubr.msk.f32.vlgmr.msra.gmra.mrb[16].mxu1 %vm15178_vm3, %v27465_v35  ;;  %v27495_v35 = vld [vmem:[%s33035_s22 + $0x20] sm:$0x7] }
 0xaa1   : > { %27913 = vmatpush3.msra.mxu1 %v22337_v6  ;;  %27914 = vmatprep.mubr.msk.f32.mxu1 %vm29104_vm10, %v29069_v16 }
 0xaa2   : > { %v22416_v20 = vpop.permute.xlu1 %22415  ;;  %27917 = vmatprep.subr.mxu1 %v29069_v16 }
 0xaa4   : > { %27915 = vmatmul.mubr.msk.f32.vlgmr.msra.gmra.mrb[18].mxu1 %vm15178_vm3, %v27467_v22  ;;  %v29136_v22 = vmov 0.0|0.0  }
 0xaa5   : > { %27918 = vmatpush3.msra.mxu1 %v22416_v20  ;;  %27919 = vmatprep.mubr.msk.f32.mxu1 %vm29104_vm10, %v29069_v16 }
 0xaa6   : > { %v22495_v54 = vpop.permute.xlu1 %22494  ;;  %27922 = vmatprep.subr.mxu1 %v29069_v16  ;;  %28390 = vmatprep.subr.bf16.mxu0 %v29136_v22 }
 0xaa8   : > { %27920 = vmatmul.mubr.msk.f32.vlgmr.msra.gmra.mrb[20].mxu1 %vm15178_vm3, %v27469_v2 }
 0xaa9   : > { %27923 = vmatpush3.msra.mxu1 %v22495_v54  ;;  %27924 = vmatprep.mubr.msk.f32.mxu1 %vm29104_vm10, %v29069_v16 }
 0xaaa   : > { %v22574_v60 = vpop.permute.xlu1 %22573  ;;  %27927 = vmatprep.subr.mxu1 %v29069_v16 }
 0xaac   : > { %27925 = vmatmul.mubr.msk.f32.vlgmr.msra.gmra.mrb[22].mxu1 %vm15178_vm3, %v27471_v53 }
 0xaad   : > { %27928 = vmatpush3.msra.mxu1 %v22574_v60  ;;  %27929 = vmatprep.mubr.msk.f32.mxu1 %vm29104_vm10, %v29069_v16 }
 0xaae   : > { %v22653_v25 = vpop.permute.xlu1 %22652  ;;  %27932 = vmatprep.subr.mxu1 %v29069_v16 }
 0xab0   : > { %27930 = vmatmul.mubr.msk.f32.vlgmr.msra.gmra.mrb[24].mxu1 %vm15178_vm3, %v27473_v23 }
 0xab1   : > { %27933 = vmatpush3.msra.mxu1 %v22653_v25  ;;  %27934 = vmatprep.mubr.msk.f32.mxu1 %vm29104_vm10, %v29069_v16 }
 0xab2   : > { %v22732_v45 = vpop.permute.xlu1 %22731  ;;  %27937 = vmatprep.subr.mxu1 %v29069_v16 }
 0xab4   : > { %27935 = vmatmul.mubr.msk.f32.vlgmr.msra.gmra.mrb[26].mxu1 %vm15178_vm3, %v27475_v11 }
 0xab5   : > { %27938 = vmatpush3.msra.mxu1 %v22732_v45  ;;  %27939 = vmatprep.mubr.msk.f32.mxu1 %vm29104_vm10, %v29069_v16 }
 0xab6   : > { %27942 = vmatprep.subr.mxu1 %v29069_v16 }
 0xab8   : > { %27940 = vmatmul.mubr.msk.f32.vlgmr.msra.gmra.mrb[28].mxu1 %vm15178_vm3, %v27477_v58 }
 0xab9   : > { %27944 = vmatprep.mubr.msk.f32.mxu1 %vm29104_vm10, %v29069_v16 }
 0xb6b   : > { %v22178_v15 = vpop.f32.mrb[12].mxu1 }
 0xb6c   : > { %v27901_v33 = vpop.f32.mrb[13].mxu1 }
 0xb6f   : > { %v22251_v24 = vpop.f32.mrb[14].mxu1 }
 0xb70   : > { %v22252_v26 = vadd.f32 %v22251_v24, %v22178_v15  ;;  %v27906_v37 = vpop.f32.mrb[15].mxu1 }
 0xb73   : > { %v22329_v21 = vpop.f32.mrb[16].mxu1 }
 0xb74   : > { %v22333_v43 = vadd.f32 %v22329_v21, %v22252_v26  ;;  %v27911_v32 = vpop.f32.mrb[17].mxu1 }
 0xb77   : > { %v22408_v42 = vpop.f32.mrb[18].mxu1 }
 0xb78   : > { %v22412_v56 = vadd.f32 %v22408_v42, %v22333_v43  ;;  %v27916_v52 = vpop.f32.mrb[19].mxu1 }
 0xb7b   : > { %v22487_v49 = vpop.f32.mrb[20].mxu1 }
 0xb7c   : > { %v22491_v62 = vadd.f32 %v22487_v49, %v22412_v56  ;;  %v27921_v1 = vpop.f32.mrb[21].mxu1 }
 0xb7f   : > { %v22566_v14 = vpop.f32.mrb[22].mxu1 }
 0xb80   : > { %v22570_v41 = vadd.f32 %v22566_v14, %v22491_v62  ;;  %v27926_v51 = vpop.f32.mrb[23].mxu1 }
 0xb83   : > { %v22645_v17 = vpop.f32.mrb[24].mxu1 }
 0xb84   : > { %v22649_v46 = vadd.f32 %v22645_v17, %v22570_v41  ;;  %v27931_v13 = vpop.f32.mrb[25].mxu1 }
 0xb87   : > { %v22724_v55 = vpop.f32.mrb[26].mxu1 }
 0xb88   : > { %v22728_v59 = vadd.f32 %v22724_v55, %v22649_v46  ;;  %v27936_v28 = vpop.f32.mrb[27].mxu1 }
 0xb8b   : > { %v22803_v34 = vpop.f32.mrb[28].mxu1 }
 0xb8c   : > { %v22807_v50 = vadd.f32 %v22803_v34, %v22728_v59  ;;  %v27941_v36 = vpop.f32.mrb[29].mxu1 }
 0xb8e   : > { %v22815_v31 = vadd.f32 %v22813_v48, %v22807_v50 }
 0xb90   : > { %v22816_v3 = vmax.f32 %v22815_v31, 0.0 }
 0xb92   : > { %v32628_v29 = vmul.f32 %v27479_v44, %v22816_v3 }
 0xb94   : > { %22828 = vrot.lane.b32.xlu1 %v32628_v29, %s32990_s11 }
 0xb98   : > { %22979 = vrot.lane.b32.xlu1 %v32628_v29, %s33016_s15 }
 0xb9c   : > { %23058 = vrot.lane.b32.xlu1 %v32628_v29, %s29134_s2  ;;  %s33036_s2 = sld [smem:[#allocation14_spill]] }
 0xba0   : > { %23137 = vrot.lane.b32.xlu1 %v32628_v29, %s29135_s23  ;;  %s33037_s23 = sld [smem:[#allocation15_spill]] }
 0xba2   : > { %v23538_v6 = vld [vmem:[%s33036_s2] sm:$0x3f]  ;;  %s29137_s2 = smov 125  }
 0xba4   : > { %23216 = vrot.lane.b32.xlu1 %v32628_v29, %s32987_s27  ;;  %s33040_s27 = sld [smem:[#allocation17_spill]] }
 0xba6   : > { %v23617_v51 = vld [vmem:[%s33037_s23] sm:$0xff]  ;;  %v23618_v17 = vld [vmem:[%s33037_s23 + $0x8] sm:$0xff] }
 0xba7   : > { %v28388_v55 = vpack.c.bf16 %v23618_v17, %v23617_v51 }
 0xba8   : > { %23295 = vrot.lane.b32.xlu1 %v32628_v29, %s33030_s18 }
 0xbaa   : > { %v24950_v36 = vld [vmem:[%s33040_s27] sm:$0xff]  ;;  %v24951_v31 = vld [vmem:[%s33040_s27 + $0x8] sm:$0xff]  ;;  %v24952_v44 = vld [vmem:[%s33040_s27 + $0x10] sm:$0xff] }
 0xbab   : > { %v28391_v3 = vpack.c.bf16 %v24951_v31, %v24950_v36 }
 0xbac   : > { %23374 = vrot.lane.b32.xlu1 %v32628_v29, %s33031_s0 }
 0xbad   : > { %28392 = vmatpush3.bf16.msra.mxu0 %v28391_v3 }
 0xbae   : > { %28393 = vmatprep.subr.bf16.mxu0 %v29136_v22 }
 0xbb0   : > { %23453 = vrot.lane.b32.xlu1 %v32628_v29, %s33032_s7 }
 0xbb4   : > { %23533 = vperm.xlu1 %29022, %v23530_v8  }
 0xc06   : > { %v22829_v5 = vpop.permute.xlu1 %22828 }
 0xc07   : > { %27943 = vmatpush3.msra.mxu1 %v22829_v5 }
 0xc08   : > { %27945 = vmatmul.mubr.msk.f32.vlgmr.msra.gmra.mrb[30].mxu1 %vm15178_vm3, %v27480_v30  ;;  %27947 = vmatprep.subr.mxu1 %v29069_v16  ;;  %v27500_v30 = vld [vmem:[%s33045_s6 + $0x4] sm:$0xf] }
 0xc09   : > { %27948 = vmatpush3.msra.mxu1 %v32628_v29  ;;  %27949 = vmatprep.mubr.msk.f32.mxu1 %vm29104_vm10, %v29069_v16 }
 0xc0a   : > { %v22980_v38 = vpop.permute.xlu1 %22979  ;;  %27952 = vmatprep.subr.mxu1 %v29069_v16 }
 0xc0c   : > { %27950 = vmatmul.mubr.msk.f32.vlgmr.msra.gmra.mrb[32].mxu1 %vm15178_vm3, %v22824_v57  ;;  %v23691_v57 = vld [vmem:[%s33045_s6] sm:$0xf] }
 0xc0d   : > { %27953 = vmatpush3.msra.mxu1 %v22980_v38  ;;  %27954 = vmatprep.mubr.msk.f32.mxu1 %vm29104_vm10, %v29069_v16 }
 0xc0e   : > { %v23059_v4 = vpop.permute.xlu1 %23058  ;;  %27957 = vmatprep.subr.mxu1 %v29069_v16 }
 0xc10   : > { %27955 = vmatmul.mubr.msk.f32.vlgmr.msra.gmra.mrb[34].mxu1 %vm15178_vm3, %v27483_v40  ;;  %v27503_v40 = vld [vmem:[%s33045_s6 + $0x8] sm:$0xf] }
 0xc11   : > { %27958 = vmatpush3.msra.mxu1 %v23059_v4  ;;  %27959 = vmatprep.mubr.msk.f32.mxu1 %vm29104_vm10, %v29069_v16 }
 0xc12   : > { %v23138_v61 = vpop.permute.xlu1 %23137  ;;  %27962 = vmatprep.subr.mxu1 %v29069_v16 }
 0xc14   : > { %27960 = vmatmul.mubr.msk.f32.vlgmr.msra.gmra.mrb[36].mxu1 %vm15178_vm3, %v27485_v47  ;;  %v27505_v47 = vld [vmem:[%s33045_s6 + $0xc] sm:$0xf] }
 0xc15   : > { %27963 = vmatpush3.msra.mxu1 %v23138_v61  ;;  %27964 = vmatprep.mubr.msk.f32.mxu1 %vm29104_vm10, %v29069_v16 }
 0xc16   : > { %v23217_v7 = vpop.permute.xlu1 %23216  ;;  %27967 = vmatprep.subr.mxu1 %v29069_v16 }
 0xc18   : > { %27965 = vmatmul.mubr.msk.f32.vlgmr.msra.gmra.mrb[38].mxu1 %vm15178_vm3, %v27487_v63  ;;  %v27507_v63 = vld [vmem:[%s33045_s6 + $0x10] sm:$0xf] }
 0xc19   : > { %27968 = vmatpush3.msra.mxu1 %v23217_v7  ;;  %27969 = vmatprep.mubr.msk.f32.mxu1 %vm29104_vm10, %v29069_v16 }
 0xc1a   : > { %v23296_v10 = vpop.permute.xlu1 %23295  ;;  %27972 = vmatprep.subr.mxu1 %v29069_v16 }
 0xc1c   : > { %27970 = vmatmul.mubr.msk.f32.vlgmr.msra.gmra.mrb[40].mxu1 %vm15178_vm3, %v27489_v39  ;;  %v27509_v39 = vld [vmem:[%s33045_s6 + $0x14] sm:$0xf] }
 0xc1d   : > { %27973 = vmatpush3.msra.mxu1 %v23296_v10  ;;  %27974 = vmatprep.mubr.msk.f32.mxu1 %vm29104_vm10, %v29069_v16 }
 0xc1e   : > { %v23375_v18 = vpop.permute.xlu1 %23374  ;;  %27977 = vmatprep.subr.mxu1 %v29069_v16 }
 0xc20   : > { %27975 = vmatmul.mubr.msk.f32.vlgmr.msra.gmra.mrb[42].mxu1 %vm15178_vm3, %v27491_v19  ;;  %v27511_v19 = vld [vmem:[%s33045_s6 + $0x18] sm:$0xf] }
 0xc21   : > { %27978 = vmatpush3.msra.mxu1 %v23375_v18  ;;  %27979 = vmatprep.mubr.msk.f32.mxu1 %vm29104_vm10, %v29069_v16 }
 0xc22   : > { %v23454_v0 = vpop.permute.xlu1 %23453  ;;  %27982 = vmatprep.subr.mxu1 %v29069_v16 }
 0xc24   : > { %27980 = vmatmul.mubr.msk.f32.vlgmr.msra.gmra.mrb[44].mxu1 %vm15178_vm3, %v27493_v12  ;;  %v27513_v12 = vld [vmem:[%s33045_s6 + $0x1c] sm:$0xf] }
 0xc25   : > { %27983 = vmatpush3.msra.mxu1 %v23454_v0  ;;  %27984 = vmatprep.mubr.msk.f32.mxu1 %vm29104_vm10, %v29069_v16 }
 0xc26   : > { %27987 = vmatprep.subr.mxu1 %v29069_v16 }
 0xc28   : > { %27985 = vmatmul.mubr.msk.f32.vlgmr.msra.gmra.mrb[46].mxu1 %vm15178_vm3, %v27495_v35  ;;  %v27515_v35 = vld [vmem:[%s33045_s6 + $0x20] sm:$0xf] }
 0xc29   : > { %27989 = vmatprep.mubr.msk.f32.mxu1 %vm29104_vm10, %v29069_v16  ;;  %27988 = vmatpush3.msk.msra.mxu1 %vm22027_vm5, %v23538_v6 }
 0xc2a   : > { %28387 = vmatprep.subr.bf16.mxu1 %v29136_v22 }
 0xc33   : > { %v23534_v46 = vpop.permute.xlu1 %23533 }
 0xcdb   : > { %v22900_v20 = vpop.f32.mrb[30].mxu1 }
 0xcdc   : > { %v27946_v2 = vpop.f32.mrb[31].mxu1 }
 0xcdf   : > { %v22973_v54 = vpop.f32.mrb[32].mxu1 }
 0xce0   : > { %v22974_v53 = vadd.f32 %v22973_v54, %v22900_v20  ;;  %v27951_v60 = vpop.f32.mrb[33].mxu1  ;;  %v27517_v20 = vld [vmem:[%s33045_s6 + $0x24] sm:$0xf]  ;;  %v27519_v54 = vld [vmem:[%s33045_s6 + $0x28] sm:$0xf] }
 0xce1   : > { %v27521_v60 = vld [vmem:[%s33045_s6 + $0x2c] sm:$0xf] }
 0xce3   : > { %v23051_v23 = vpop.f32.mrb[34].mxu1 }
 0xce4   : > { %v23055_v25 = vadd.f32 %v23051_v23, %v22974_v53  ;;  %v27956_v11 = vpop.f32.mrb[35].mxu1 }
 0xce7   : > { %v23130_v45 = vpop.f32.mrb[36].mxu1 }
 0xce8   : > { %v23134_v58 = vadd.f32 %v23130_v45, %v23055_v25  ;;  %v27961_v15 = vpop.f32.mrb[37].mxu1  ;;  %v27523_v25 = vld [vmem:[%s33045_s6 + $0x30] sm:$0xf]  ;;  %v27525_v45 = vld [vmem:[%s33045_s6 + $0x34] sm:$0xf] }
 0xce9   : > { %v27527_v15 = vld [vmem:[%s33045_s6 + $0x38] sm:$0xf] }
 0xceb   : > { %v23209_v33 = vpop.f32.mrb[38].mxu1 }
 0xcec   : > { %v23213_v24 = vadd.f32 %v23209_v33, %v23134_v58  ;;  %v27966_v26 = vpop.f32.mrb[39].mxu1 }
 0xcef   : > { %v23288_v37 = vpop.f32.mrb[40].mxu1 }
 0xcf0   : > { %v23292_v21 = vadd.f32 %v23288_v37, %v23213_v24  ;;  %v27971_v43 = vpop.f32.mrb[41].mxu1  ;;  %v27529_v24 = vld [vmem:[%s33045_s6 + $0x3c] sm:$0xf] }
 0xcf3   : > { %v23367_v32 = vpop.f32.mrb[42].mxu1 }
 0xcf4   : > { %v23371_v42 = vadd.f32 %v23367_v32, %v23292_v21  ;;  %v27976_v56 = vpop.f32.mrb[43].mxu1 }
 0xcf7   : > { %v23446_v52 = vpop.f32.mrb[44].mxu1 }
 0xcf8   : > { %v23450_v49 = vadd.f32 %v23446_v52, %v23371_v42  ;;  %v27981_v62 = vpop.f32.mrb[45].mxu1 }
 0xcfb   : > { %v23525_v1 = vpop.f32.mrb[46].mxu1 }
 0xcfc   : > { %v23529_v14 = vadd.f32 %v23525_v1, %v23450_v49  ;;  %v27986_v41 = vpop.f32.mrb[47].mxu1 }
 0xcfe   : > { %v23536_v13 = vadd.f32 %v23534_v46, %v23529_v14 }
 0xd00   : > { %v23537_v59 = vmax.f32 %v23536_v13, 0.0 }
 0xd02   : > { %27990 = vmatmul.mubr.msk.f32.vlgmr.msra.gmra.mrb[48].mxu1 %vm33038_vm14, %v23537_v59 }
 0xd03   : > { %28389 = vmatpush3.bf16.msra.mxu1 %v28388_v55  ;;  %27996 = vmatprep.mubr.msk.f32.mxu1 %vm29104_vm10, %v29069_v16 }
 0xd04   : > { %27999 = vmatprep.subr.mxu1 %v29069_v16 }
 0xd06   : > { %27997 = vmatmul.mubr.msk.f32.vlgmr.msra.gmra.mrb[50].mxu1 %vm33039_vm0, %v32628_v29  ;;  %v24953_v29 = vld [vmem:[%s33040_s27 + $0x18] sm:$0x1] }
 0xd07   : > { %28001 = vmatprep.mubr.msk.f32.mxu1 %vm29104_vm10, %v29069_v16  ;;  %v28394_v8 = vpack.c.bf16 %v24953_v29, %v24952_v44 }
 0xd09   : > { %28396 = vmatpush3.bf16.msk.msra.mxu0 %vm28395_vm13, %v28394_v8 }
 0xd0a   : > { %28090 = vmatprep.subr.mxu0 %v29069_v16 }
 0xdd5   : > { %v23611_v28 = vpop.f32.mrb[48].mxu1 }
 0xdd6   : > { %23616 = vst.msk [vmem:[%s1002_s10] sm:$0x7] %vm23615_vm12, %v23611_v28  ;;  %v27991_v34 = vpop.f32.mrb[49].mxu1  ;;  %s33042_s10 = smov 111  }
 0xdd9   : > { %v23687_v48 = vpop.f32.mrb[50].mxu1 }
 0xdda   : > { %23925 = vrot.lane.b32.xlu0 %v23687_v48, %s29137_s2  ;;  %23695 = vrot.lane.b32.xlu1 %v23687_v48, %s32990_s11  ;;  %v27998_v50 = vpop.f32.mrb[51].mxu1  ;;  %s33043_s2 = smov 114   ;;  %s33044_s11 = smov 106  }
 0xdde   : > { %24083 = vrot.lane.b32.xlu0 %v23687_v48, %s33030_s18  ;;  %23846 = vrot.lane.b32.xlu1 %v23687_v48, %s33016_s15 }
 0xde2   : > { %24241 = vrot.lane.b32.xlu0 %v23687_v48, %s33032_s7  ;;  %24004 = vrot.lane.b32.xlu1 %v23687_v48, %s33041_s3  ;;  %s33046_s7 = smov 107  }
 0xde6   : > { %24399 = vrot.lane.b32.xlu0 %v23687_v48, %s29138_s26  ;;  %24162 = vrot.lane.b32.xlu1 %v23687_v48, %s33031_s0  ;;  %s33051_s0 = smov 122   ;;  %s33052_s26 = smov 116  }
 0xdea   : > { %24557 = vrot.lane.b32.xlu0 %v23687_v48, %s33042_s10  ;;  %24320 = vrot.lane.b32.xlu1 %v23687_v48, %s33043_s2  ;;  %s33053_s10 = smov 115  }
 0xdee   : > { %24715 = vrot.lane.b32.xlu0 %v23687_v48, %s33044_s11  ;;  %24478 = vrot.lane.b32.xlu1 %v23687_v48, %s29139_s5  ;;  %s33047_s5 = sld [smem:[#allocation18_spill]]  ;;  %s33050_s11 = smov 127  }
 0xdf2   : > { %24873 = vrot.lane.b32.xlu0 %v23687_v48, %s29140_s8  ;;  %24636 = vrot.lane.b32.xlu1 %v23687_v48, %s33046_s7  ;;  %s33049_s8 = sld [smem:[#allocation19_spill]]  ;;  %s33054_s7 = sld [smem:[#allocation21_spill]] }
 0xdf4   : > { %v24954_v21 = vld [vmem:[%s33047_s5] sm:$0xf]  ;;  %s33055_s5 = sld [smem:[#allocation22_spill]] }
 0xdf6   : > { %24794 = vrot.lane.b32.xlu1 %v23687_v48, %s29141_s9  ;;  %s33048_s9 = sld [smem:[#allocation20_spill]] }
 0xdf8   : > { %v27533_v52 = vld [vmem:[%s33049_s8 + $0x4] sm:$0xf]  ;;  %v25033_v62 = vld [vmem:[%s33049_s8] sm:$0xf]  ;;  %v27538_v14 = vld [vmem:[%s33049_s8 + $0x8] sm:$0xf] }
 0xdf9   : > { %v27541_v51 = vld [vmem:[%s33049_s8 + $0xc] sm:$0xf]  ;;  %v27544_v46 = vld [vmem:[%s33049_s8 + $0x10] sm:$0xf]  ;;  %v27547_v55 = vld [vmem:[%s33049_s8 + $0x14] sm:$0xf] }
 0xdfa   : > { %v27550_v28 = vld [vmem:[%s33049_s8 + $0x18] sm:$0xf]  ;;  %v27556_v36 = vld [vmem:[%s33049_s8 + $0x20] sm:$0xf] }
 0xdfc   : > { %v25750_v56 = vld [vmem:[%s33048_s9] sm:$0xf] }
 0xe4c   : > { %v23696_v5 = vpop.permute.xlu1 %23695  ;;  %v23926_v4 = vpop.permute.xlu0 %23925 }
 0xe4d   : > { %28000 = vmatpush3.msra.mxu1 %v23696_v5 }
 0xe4e   : > { %28002 = vmatmul.mubr.msk.f32.vlgmr.msra.gmra.mrb[52].mxu1 %vm15178_vm3, %v27500_v30  ;;  %28004 = vmatprep.subr.mxu1 %v29069_v16 }
 0xe4f   : > { %28005 = vmatpush3.msra.mxu1 %v23687_v48  ;;  %28006 = vmatprep.mubr.msk.f32.mxu1 %vm29104_vm10, %v29069_v16  ;;  %v27553_v48 = vld [vmem:[%s33049_s8 + $0x1c] sm:$0xf] }
 0xe50   : > { %28009 = vmatprep.subr.mxu1 %v29069_v16  ;;  %v23847_v38 = vpop.permute.xlu1 %23846  ;;  %v24084_v7 = vpop.permute.xlu0 %24083 }
 0xe54   : > { %v24005_v61 = vpop.permute.xlu1 %24004  ;;  %v24242_v18 = vpop.permute.xlu0 %24241 }
 0xe56   : > { %28007 = vmatmul.mubr.msk.f32.vlgmr.msra.gmra.mrb[52].mxu1 %vm15178_vm3, %v23691_v57 }
 0xe57   : > { %28010 = vmatpush3.msra.mxu1 %v23847_v38  ;;  %28011 = vmatprep.mubr.msk.f32.mxu1 %vm29104_vm10, %v29069_v16 }
 0xe58   : > { %28014 = vmatprep.subr.mxu1 %v29069_v16  ;;  %v24163_v10 = vpop.permute.xlu1 %24162  ;;  %v24400_v6 = vpop.permute.xlu0 %24399 }
 0xe5c   : > { %v24321_v0 = vpop.permute.xlu1 %24320  ;;  %v24558_v53 = vpop.permute.xlu0 %24557 }
 0xe5e   : > { %28012 = vmatmul.mubr.msk.f32.vlgmr.msra.gmra.mrb[52].mxu1 %vm15178_vm3, %v27503_v40 }
 0xe5f   : > { %28015 = vmatpush3.msra.mxu1 %v23926_v4  ;;  %28016 = vmatprep.mubr.msk.f32.mxu1 %vm29104_vm10, %v29069_v16 }
 0xe60   : > { %28019 = vmatprep.subr.mxu1 %v29069_v16  ;;  %v24479_v2 = vpop.permute.xlu1 %24478  ;;  %v24716_v11 = vpop.permute.xlu0 %24715 }
 0xe64   : > { %v24637_v23 = vpop.permute.xlu1 %24636  ;;  %v24874_v33 = vpop.permute.xlu0 %24873 }
 0xe66   : > { %28017 = vmatmul.mubr.msk.f32.vlgmr.msra.gmra.mrb[52].mxu1 %vm15178_vm3, %v27505_v47 }
 0xe67   : > { %28020 = vmatpush3.msra.mxu1 %v24005_v61  ;;  %28021 = vmatprep.mubr.msk.f32.mxu1 %vm29104_vm10, %v29069_v16 }
 0xe68   : > { %28024 = vmatprep.subr.mxu1 %v29069_v16  ;;  %v24795_v58 = vpop.permute.xlu1 %24794 }
 0xe6e   : > { %28022 = vmatmul.mubr.msk.f32.vlgmr.msra.gmra.mrb[52].mxu1 %vm15178_vm3, %v27507_v63 }
 0xe6f   : > { %28025 = vmatpush3.msra.mxu1 %v24084_v7  ;;  %28026 = vmatprep.mubr.msk.f32.mxu1 %vm29104_vm10, %v29069_v16 }
 0xe70   : > { %28029 = vmatprep.subr.mxu1 %v29069_v16 }
 0xe76   : > { %28027 = vmatmul.mubr.msk.f32.vlgmr.msra.gmra.mrb[52].mxu1 %vm15178_vm3, %v27509_v39 }
 0xe77   : > { %28030 = vmatpush3.msra.mxu1 %v24163_v10  ;;  %28031 = vmatprep.mubr.msk.f32.mxu1 %vm29104_vm10, %v29069_v16 }
 0xe78   : > { %28034 = vmatprep.subr.mxu1 %v29069_v16 }
 0xe7e   : > { %28032 = vmatmul.mubr.msk.f32.vlgmr.msra.gmra.mrb[52].mxu1 %vm15178_vm3, %v27511_v19 }
 0xe7f   : > { %28035 = vmatpush3.msra.mxu1 %v24242_v18  ;;  %28036 = vmatprep.mubr.msk.f32.mxu1 %vm29104_vm10, %v29069_v16 }
 0xe80   : > { %28039 = vmatprep.subr.mxu1 %v29069_v16 }
 0xe86   : > { %28037 = vmatmul.mubr.msk.f32.vlgmr.msra.gmra.mrb[52].mxu1 %vm15178_vm3, %v27513_v12 }
 0xe87   : > { %28040 = vmatpush3.msra.mxu1 %v24321_v0  ;;  %28041 = vmatprep.mubr.msk.f32.mxu1 %vm29104_vm10, %v29069_v16 }
 0xe88   : > { %28044 = vmatprep.subr.mxu1 %v29069_v16 }
 0xe8e   : > { %28042 = vmatmul.mubr.msk.f32.vlgmr.msra.gmra.mrb[52].mxu1 %vm15178_vm3, %v27515_v35 }
 0xe8f   : > { %28045 = vmatpush3.msra.mxu1 %v24400_v6  ;;  %28046 = vmatprep.mubr.msk.f32.mxu1 %vm29104_vm10, %v29069_v16 }
 0xe90   : > { %28049 = vmatprep.subr.mxu1 %v29069_v16 }
 0xe96   : > { %28047 = vmatmul.mubr.msk.f32.vlgmr.msra.gmra.mrb[52].mxu1 %vm15178_vm3, %v27517_v20 }
 0xe97   : > { %28050 = vmatpush3.msra.mxu1 %v24479_v2  ;;  %28051 = vmatprep.mubr.msk.f32.mxu1 %vm29104_vm10, %v29069_v16 }
 0xe98   : > { %28054 = vmatprep.subr.mxu1 %v29069_v16 }
 0xe9e   : > { %28052 = vmatmul.mubr.msk.f32.vlgmr.msra.gmra.mrb[52].mxu1 %vm15178_vm3, %v27519_v54 }
 0xe9f   : > { %28055 = vmatpush3.msra.mxu1 %v24558_v53  ;;  %28056 = vmatprep.mubr.msk.f32.mxu1 %vm29104_vm10, %v29069_v16 }
 0xea0   : > { %28059 = vmatprep.subr.mxu1 %v29069_v16 }
 0xea6   : > { %28057 = vmatmul.mubr.msk.f32.vlgmr.msra.gmra.mrb[52].mxu1 %vm15178_vm3, %v27521_v60 }
 0xea7   : > { %28060 = vmatpush3.msra.mxu1 %v24637_v23  ;;  %28061 = vmatprep.mubr.msk.f32.mxu1 %vm29104_vm10, %v29069_v16  ;;  %v27559_v23 = vld [vmem:[%s33054_s7] ss:$0 sm:$0xff] }
 0xea8   : > { %28064 = vmatprep.subr.mxu1 %v29069_v16 }
 0xeae   : > { %28062 = vmatmul.mubr.msk.f32.vlgmr.msra.gmra.mrb[52].mxu1 %vm15178_vm3, %v27523_v25 }
 0xeaf   : > { %28065 = vmatpush3.msra.mxu1 %v24716_v11  ;;  %28066 = vmatprep.mubr.msk.f32.mxu1 %vm29104_vm10, %v29069_v16 }
 0xeb0   : > { %28069 = vmatprep.subr.mxu1 %v29069_v16 }
 0xeb6   : > { %28067 = vmatmul.mubr.msk.f32.vlgmr.msra.gmra.mrb[52].mxu1 %vm15178_vm3, %v27525_v45  ;;  %v26481_v45 = vld [vmem:[#allocation2] sm:$0x1] }
 0xeb7   : > { %28070 = vmatpush3.msra.mxu1 %v24795_v58  ;;  %28071 = vmatprep.mubr.msk.f32.mxu1 %vm29104_vm10, %v29069_v16  ;;  %v27560_v58 = vld [vmem:[%s33055_s5 + $0x1] sm:$0x1] }
 0xeb8   : > { %28074 = vmatprep.subr.mxu1 %v29069_v16 }
 0xebe   : > { %28072 = vmatmul.mubr.msk.f32.vlgmr.msra.gmra.mrb[52].mxu1 %vm15178_vm3, %v27527_v15 }
 0xebf   : > { %28075 = vmatpush3.msra.mxu1 %v24874_v33  ;;  %28076 = vmatprep.mubr.msk.f32.mxu1 %vm29104_vm10, %v29069_v16  ;;  %v25765_v33 = vld [vmem:[%s33055_s5] sm:$0x1] }
 0xec0   : > { %28160 = vmatprep.subr.mxu1 %v29069_v16 }
 0xec6   : > { %28077 = vmatmul.mubr.msk.f32.vlgmr.msra.gmra.mrb[52].mxu1 %vm15178_vm3, %v27529_v24  ;;  %vm22036_vm3 = vcmask 5120  }
 0xec7   : > { %28162 = vmatprep.mubr.msk.f32.mxu1 %vm29104_vm10, %v29069_v16 }
 0xf99   : > { %v24945_v26 = vpop.f32.mrb[52].mxu1 }
 0xf9a   : > { %v28078_v37 = vpop.f32.mrb[53].mxu1  ;;  %28088 = vmatmul.mubr.msk.f32.vlgmr.msra.gmra.mrb[10].mxu0 %vm24955_vm2, %v24945_v26 }
 0xf9b   : > { %28092 = vmatprep.mubr.msk.f32.mxu0 %vm29104_vm10, %v29069_v16 }
0x106d   : > { %v25029_v43 = vpop.f32.mrb[10].mxu0 }
0x106e   : > { %v25030_v32 = vadd.f32 %v25029_v43, %v24954_v21  ;;  %v28089_v42 = vpop.f32.mrb[11].mxu0  ;;  %v27574_v21 = vld [vmem:[%s33055_s5 + $0x5] sm:$0x1] }
0x1070   : > { %25191 = vrot.lane.b32.xlu0 %v25030_v32, %s33016_s15  ;;  %25037 = vrot.lane.b32.xlu1 %v25030_v32, %s33050_s11 }
0x1074   : > { %25351 = vrot.lane.b32.xlu0 %v25030_v32, %s33041_s3  ;;  %25271 = vrot.lane.b32.xlu1 %v25030_v32, %s33051_s0 }
0x1078   : > { %25511 = vrot.lane.b32.xlu0 %v25030_v32, %s33052_s26  ;;  %25431 = vrot.lane.b32.xlu1 %v25030_v32, %s33030_s18 }
0x107c   : > { %25671 = vrot.lane.b32.xlu0 %v25030_v32, %s33043_s2  ;;  %25591 = vrot.lane.b32.xlu1 %v25030_v32, %s33053_s10 }
0x1080   : > { %25753 = vperm.xlu1 %29022, %v25750_v56   ;;  %v27580_v56 = vld [vmem:[%s33055_s5 + $0x7] sm:$0x1] }
0x10e2   : > { %v25038_v49 = vpop.permute.xlu1 %25037  ;;  %v25192_v1 = vpop.permute.xlu0 %25191 }
0x10e3   : > { %28091 = vmatpush3.msk.msra.mxu0 %vm10277_vm6, %v25038_v49 }
0x10e4   : > { %28093 = vmatmul.mubr.msk.f32.vlgmr.msra.gmra.mrb[12].mxu0 %vm10273_vm7, %v27533_v52  ;;  %28095 = vmatprep.subr.mxu0 %v29069_v16  ;;  %v27571_v52 = vld [vmem:[%s33055_s5 + $0x4] sm:$0x1] }
0x10e5   : > { %28096 = vmatpush3.msk.msra.mxu0 %vm10277_vm6, %v25030_v32  ;;  %28097 = vmatprep.mubr.msk.f32.mxu0 %vm29104_vm10, %v29069_v16  ;;  %v27568_v32 = vld [vmem:[%s33055_s5 + $0x3] sm:$0x1] }
0x10e6   : > { %28100 = vmatprep.subr.mxu0 %v29069_v16  ;;  %v25272_v41 = vpop.permute.xlu1 %25271  ;;  %v25352_v17 = vpop.permute.xlu0 %25351 }
0x10e8   : > { %28098 = vmatmul.mubr.msk.f32.vlgmr.msra.gmra.mrb[14].mxu0 %vm10273_vm7, %v25033_v62 }
0x10e9   : > { %28101 = vmatpush3.msk.msra.mxu0 %vm10277_vm6, %v25192_v1  ;;  %28102 = vmatprep.mubr.msk.f32.mxu0 %vm29104_vm10, %v29069_v16  ;;  %v27583_v1 = vld [vmem:[%s33055_s5 + $0x8] sm:$0x1] }
0x10ea   : > { %28105 = vmatprep.subr.mxu0 %v29069_v16  ;;  %v25432_v13 = vpop.permute.xlu1 %25431  ;;  %v25512_v59 = vpop.permute.xlu0 %25511 }
0x10ec   : > { %28103 = vmatmul.mubr.msk.f32.vlgmr.msra.gmra.mrb[16].mxu0 %vm10273_vm7, %v27538_v14 }
0x10ed   : > { %28106 = vmatpush3.msk.msra.mxu0 %vm10277_vm6, %v25272_v41  ;;  %28107 = vmatprep.mubr.msk.f32.mxu0 %vm29104_vm10, %v29069_v16 }
0x10ee   : > { %28110 = vmatprep.subr.mxu0 %v29069_v16  ;;  %v25592_v34 = vpop.permute.xlu1 %25591  ;;  %v25672_v50 = vpop.permute.xlu0 %25671 }
0x10f0   : > { %28108 = vmatmul.mubr.msk.f32.vlgmr.msra.gmra.mrb[18].mxu0 %vm10273_vm7, %v27541_v51 }
0x10f1   : > { %28111 = vmatpush3.msk.msra.mxu0 %vm10277_vm6, %v25352_v17  ;;  %28112 = vmatprep.mubr.msk.f32.mxu0 %vm29104_vm10, %v29069_v16  ;;  %v26493_v17 = vld [vmem:[%s29293_s4] sm:$0xff] }
0x10f2   : > { %28115 = vmatprep.subr.mxu0 %v29069_v16 }
0x10f4   : > { %28113 = vmatmul.mubr.msk.f32.vlgmr.msra.gmra.mrb[20].mxu0 %vm10273_vm7, %v27544_v46  ;;  %v26494_v46 = vld [vmem:[%s29293_s4 + $0x8] sm:$0xff] }
0x10f5   : > { %28116 = vmatpush3.msk.msra.mxu0 %vm10277_vm6, %v25432_v13  ;;  %28117 = vmatprep.mubr.msk.f32.mxu0 %vm29104_vm10, %v29069_v16  ;;  %v28398_v13 = vpack.c.bf16 %v26494_v46, %v26493_v17 }
0x10f6   : > { %28120 = vmatprep.subr.mxu0 %v29069_v16 }
0x10f8   : > { %28118 = vmatmul.mubr.msk.f32.vlgmr.msra.gmra.mrb[22].mxu0 %vm10273_vm7, %v27547_v55  ;;  %v26495_v55 = vld [vmem:[%s29293_s4 + $0x10] sm:$0x3f] }
0x10f9   : > { %28121 = vmatpush3.msk.msra.mxu0 %vm10277_vm6, %v25512_v59  ;;  %28122 = vmatprep.mubr.msk.f32.mxu0 %vm29104_vm10, %v29069_v16 }
0x10fa   : > { %28125 = vmatprep.subr.mxu0 %v29069_v16 }
0x10fc   : > { %28123 = vmatmul.mubr.msk.f32.vlgmr.msra.gmra.mrb[24].mxu0 %vm10273_vm7, %v27550_v28 }
0x10fd   : > { %28126 = vmatpush3.msk.msra.mxu0 %vm10277_vm6, %v25592_v34  ;;  %28127 = vmatprep.mubr.msk.f32.mxu0 %vm29104_vm10, %v29069_v16 }
0x10fe   : > { %28130 = vmatprep.subr.mxu0 %v29069_v16 }
0x10ff   : > { %v25754_v53 = vpop.permute.xlu1 %25753 }
0x1100   : > { %28128 = vmatmul.mubr.msk.f32.vlgmr.msra.gmra.mrb[26].mxu0 %vm10273_vm7, %v27553_v48 }
0x1101   : > { %28131 = vmatpush3.msk.msra.mxu0 %vm10277_vm6, %v25672_v50  ;;  %28132 = vmatprep.mubr.msk.f32.mxu0 %vm29104_vm10, %v29069_v16 }
0x1102   : > { %28135 = vmatprep.subr.mxu0 %v29069_v16 }
0x1104   : > { %28133 = vmatmul.mubr.msk.f32.vlgmr.msra.gmra.mrb[28].mxu0 %vm10273_vm7, %v27556_v36 }
0x1105   : > { %28137 = vmatprep.mubr.msk.f32.mxu0 %vm29104_vm10, %v29069_v16 }
0x11b7   : > { %v25110_v31 = vpop.f32.mrb[12].mxu0 }
0x11b8   : > { %v28094_v44 = vpop.f32.mrb[13].mxu0 }
0x11bb   : > { %v25185_v3 = vpop.f32.mrb[14].mxu0 }
0x11bc   : > { %v25186_v29 = vadd.f32 %v25185_v3, %v25110_v31  ;;  %v28099_v8 = vpop.f32.mrb[15].mxu0 }
0x11bf   : > { %v25264_v30 = vpop.f32.mrb[16].mxu0 }
0x11c0   : > { %v25268_v5 = vadd.f32 %v25264_v30, %v25186_v29  ;;  %v28104_v57 = vpop.f32.mrb[17].mxu0 }
0x11c3   : > { %v25344_v38 = vpop.f32.mrb[18].mxu0 }
0x11c4   : > { %v25348_v40 = vadd.f32 %v25344_v38, %v25268_v5  ;;  %v28109_v4 = vpop.f32.mrb[19].mxu0 }
0x11c7   : > { %v25424_v47 = vpop.f32.mrb[20].mxu0 }
0x11c8   : > { %v25428_v61 = vadd.f32 %v25424_v47, %v25348_v40  ;;  %v28114_v63 = vpop.f32.mrb[21].mxu0 }
0x11cb   : > { %v25504_v7 = vpop.f32.mrb[22].mxu0 }
0x11cc   : > { %v25508_v39 = vadd.f32 %v25504_v7, %v25428_v61  ;;  %v28119_v10 = vpop.f32.mrb[23].mxu0 }
0x11cf   : > { %v25584_v19 = vpop.f32.mrb[24].mxu0 }
0x11d0   : > { %v25588_v18 = vadd.f32 %v25584_v19, %v25508_v39  ;;  %v28124_v12 = vpop.f32.mrb[25].mxu0 }
0x11d3   : > { %v25664_v0 = vpop.f32.mrb[26].mxu0 }
0x11d4   : > { %v25668_v35 = vadd.f32 %v25664_v0, %v25588_v18  ;;  %v28129_v6 = vpop.f32.mrb[27].mxu0 }
0x11d7   : > { %v25744_v20 = vpop.f32.mrb[28].mxu0 }
0x11d8   : > { %v25748_v2 = vadd.f32 %v25744_v20, %v25668_v35  ;;  %v28134_v54 = vpop.f32.mrb[29].mxu0 }
0x11da   : > { %v25756_v60 = vadd.f32 %v25754_v53, %v25748_v2 }
0x11dc   : > { %v25757_v25 = vmax.f32 %v25756_v60, 0.0 }
0x11de   : > { %v25764_v11 = vmul.f32 %v27559_v23, %v25757_v25 }
0x11e0   : > { %25923 = vrot.lane.b32.xlu1 %v25764_v11, %s33016_s15  ;;  %25769 = vrot.lane.b32.xlu0 %v25764_v11, %s33050_s11  ;;  %s26722_s15 = sshll.u32 %s33058_s28, 3 }
0x11e4   : > { %26083 = vrot.lane.b32.xlu1 %v25764_v11, %s33041_s3  ;;  %26003 = vrot.lane.b32.xlu0 %v25764_v11, %s33051_s0  ;;  %s33056_s3 = sld [smem:[#allocation7_spill]] }
0x11e8   : > { %26243 = vrot.lane.b32.xlu1 %v25764_v11, %s33052_s26  ;;  %26163 = vrot.lane.b32.xlu0 %v25764_v11, %s33030_s18  ;;  %s998_s18 = scalar_lea.vmem %s29298_s24, %s26722_s15 }
0x11ea   : > { %v22034_v14 = vld [vmem:[%s33056_s3] sm:$0x3f] }
0x11ec   : > { %26403 = vrot.lane.b32.xlu1 %v25764_v11, %s33043_s2  ;;  %26323 = vrot.lane.b32.xlu0 %v25764_v11, %s33053_s10  ;;  %s1005_s2 = scalar_lea.vmem %s29308_s20, %s33058_s28 }
0x11f0   : > { %26484 = vperm.xlu0 %29023, %v26481_v45  }
0x1210   : > { %22032 = vadd.xlane.f32.xlu1 %v32586_v27  ;;  %v27565_v27 = vld [vmem:[%s33055_s5 + $0x2] sm:$0x1] }
0x1252   : > { %v25770_v15 = vpop.permute.xlu0 %25769  ;;  %v25924_v24 = vpop.permute.xlu1 %25923 }
0x1253   : > { %28136 = vmatpush3.msk.msra.mxu0 %vm10277_vm6, %v25770_v15 }
0x1254   : > { %28138 = vmatmul.mubr.msk.f32.vlgmr.msra.gmra.mrb[30].mxu0 %vm10273_vm7, %v27560_v58  ;;  %28140 = vmatprep.subr.mxu0 %v29069_v16 }
0x1255   : > { %28141 = vmatpush3.msk.msra.mxu0 %vm10277_vm6, %v25764_v11  ;;  %28142 = vmatprep.mubr.msk.f32.mxu0 %vm29104_vm10, %v29069_v16 }
0x1256   : > { %v26004_v26 = vpop.permute.xlu0 %26003  ;;  %28145 = vmatprep.subr.mxu0 %v29069_v16  ;;  %v26084_v43 = vpop.permute.xlu1 %26083 }
0x1258   : > { %28143 = vmatmul.mubr.msk.f32.vlgmr.msra.gmra.mrb[32].mxu0 %vm10273_vm7, %v25765_v33 }
0x1259   : > { %28146 = vmatpush3.msk.msra.mxu0 %vm10277_vm6, %v25924_v24  ;;  %28147 = vmatprep.mubr.msk.f32.mxu0 %vm29104_vm10, %v29069_v16 }
0x125a   : > { %v26164_v37 = vpop.permute.xlu0 %26163  ;;  %28150 = vmatprep.subr.mxu0 %v29069_v16  ;;  %v26244_v49 = vpop.permute.xlu1 %26243 }
0x125b   : > { %28161 = vmatpush3.msk.msra.mxu1 %vm10277_vm6, %v26164_v37 }
0x125c   : > { %28148 = vmatmul.mubr.msk.f32.vlgmr.msra.gmra.mrb[34].mxu0 %vm10273_vm7, %v27565_v27  ;;  %28170 = vmatprep.subr.mxu1 %v29069_v16 }
0x125d   : > { %28151 = vmatpush3.msk.msra.mxu0 %vm10277_vm6, %v26004_v26  ;;  %28152 = vmatprep.mubr.msk.f32.mxu0 %vm29104_vm10, %v29069_v16 }
0x125e   : > { %v26324_v42 = vpop.permute.xlu0 %26323  ;;  %28155 = vmatprep.subr.mxu0 %v29069_v16  ;;  %28163 = vmatmul.mubr.msk.f32.vlgmr.msra.gmra.mrb[54].mxu1 %vm10273_vm7, %v27574_v21  ;;  %v26404_v62 = vpop.permute.xlu1 %26403 }
0x125f   : > { %28171 = vmatpush3.msk.msra.mxu1 %vm10277_vm6, %v26324_v42  ;;  %28172 = vmatprep.mubr.msk.f32.mxu1 %vm29104_vm10, %v29069_v16 }
0x1260   : > { %28153 = vmatmul.mubr.msk.f32.vlgmr.msra.gmra.mrb[36].mxu0 %vm10273_vm7, %v27568_v32  ;;  %28397 = vmatprep.subr.bf16.mxu1 %v29136_v22  ;;  %v27577_v22 = vld [vmem:[%s33055_s5 + $0x6] sm:$0x1] }
0x1261   : > { %28156 = vmatpush3.msk.msra.mxu0 %vm10277_vm6, %v26084_v43  ;;  %28157 = vmatprep.mubr.msk.f32.mxu0 %vm29104_vm10, %v29069_v16 }
0x1262   : > { %28165 = vmatprep.subr.mxu0 %v29069_v16  ;;  %28173 = vmatmul.mubr.msk.f32.vlgmr.msra.gmra.mrb[56].mxu1 %vm10273_vm7, %v27580_v56 }
0x1263   : > { %28186 = vmatprep.mubr.msk.f32.mxu1 %vm29104_vm10, %v29069_v16  ;;  %28399 = vmatpush3.bf16.msra.mxu1 %v28398_v13 }
0x1264   : > { %28158 = vmatmul.mubr.msk.f32.vlgmr.msra.gmra.mrb[38].mxu0 %vm10273_vm7, %v27571_v52  ;;  %28184 = vmatprep.subr.mxu1 %v29069_v16 }
0x1265   : > { %28166 = vmatpush3.msk.msra.mxu0 %vm10277_vm6, %v26244_v49  ;;  %28167 = vmatprep.mubr.msk.f32.mxu0 %vm29104_vm10, %v29069_v16 }
0x1266   : > { %28175 = vmatprep.subr.mxu0 %v29069_v16 }
0x1267   : > { %28185 = vmatpush3.msk.msra.mxu1 %vm22027_vm5, %v26495_v55 }
0x1268   : > { %28168 = vmatmul.mubr.msk.f32.vlgmr.msra.gmra.mrb[40].mxu0 %vm10273_vm7, %v27577_v22 }
0x1269   : > { %28176 = vmatpush3.msk.msra.mxu0 %vm10277_vm6, %v26404_v62  ;;  %28177 = vmatprep.mubr.msk.f32.mxu0 %vm29104_vm10, %v29069_v16  ;;  %vm26496_vm6 = vcmask 179200  }
0x126c   : > { %28178 = vmatmul.mubr.msk.f32.vlgmr.msra.gmra.mrb[42].mxu0 %vm10273_vm7, %v27583_v1  ;;  %vm26573_vm7 = vcmask 122880  }
0x126f   : > { %v26485_v39 = vpop.permute.xlu0 %26484 }
0x1270   : > { %v26490_v18 = vrot.slane %v26485_v39, %v30446_v9 }
0x129d   : > { %v22033_v41 = vpop.xlane.xlu1 %22032 }
0x129e   : > { %v22035_v51 = vadd.f32 %v22034_v14, %v22033_v41 }
0x12a0   : > { %22037 = vst.msk [vmem:[%s998_s18] sm:$0x3f] %vm22036_vm3, %v22035_v51 }
0x1327   : > { %v25842_v59 = vpop.f32.mrb[30].mxu0 }
0x1328   : > { %v28139_v28 = vpop.f32.mrb[31].mxu0 }
0x132b   : > { %v25917_v34 = vpop.f32.mrb[32].mxu0 }
0x132c   : > { %v25918_v48 = vadd.f32 %v25917_v34, %v25842_v59  ;;  %v28144_v50 = vpop.f32.mrb[33].mxu0 }
0x132f   : > { %v25996_v36 = vpop.f32.mrb[34].mxu0 }
0x1330   : > { %v26000_v31 = vadd.f32 %v25996_v36, %v25918_v48  ;;  %v28149_v44 = vpop.f32.mrb[35].mxu0 }
0x1331   : > { %v26236_v3 = vpop.f32.mrb[54].mxu1 }
0x1332   : > { %v28164_v29 = vpop.f32.mrb[55].mxu1 }
0x1333   : > { %v26076_v8 = vpop.f32.mrb[36].mxu0 }
0x1334   : > { %v26080_v30 = vadd.f32 %v26076_v8, %v26000_v31  ;;  %v28154_v5 = vpop.f32.mrb[37].mxu0 }
0x1335   : > { %v26396_v57 = vpop.f32.mrb[56].mxu1 }
0x1336   : > { %v28174_v38 = vpop.f32.mrb[57].mxu1 }
0x1337   : > { %v26156_v40 = vpop.f32.mrb[38].mxu0 }
0x1338   : > { %v26160_v16 = vadd.f32 %v26156_v40, %v26080_v30  ;;  %v28159_v4 = vpop.f32.mrb[39].mxu0 }
0x133a   : > { %v26240_v47 = vadd.f32 %v26236_v3, %v26160_v16 }
0x133b   : > { %v26316_v61 = vpop.f32.mrb[40].mxu0 }
0x133c   : > { %v26320_v63 = vadd.f32 %v26316_v61, %v26240_v47  ;;  %v28169_v7 = vpop.f32.mrb[41].mxu0 }
0x133e   : > { %v26400_v10 = vadd.f32 %v26396_v57, %v26320_v63 }
0x133f   : > { %v26476_v19 = vpop.f32.mrb[42].mxu0 }
0x1340   : > { %v26480_v12 = vadd.f32 %v26476_v19, %v26400_v10  ;;  %v28179_v0 = vpop.f32.mrb[43].mxu0 }
0x1342   : > { %v26491_v35 = vadd.f32 %v26490_v18, %v26480_v12 }
0x1344   : > { %v26492_v6 = vmax.f32 %v26491_v35, 0.0 }
0x1346   : > { %28187 = vmatmul.mubr.msk.f32.vlgmr.msra.gmra.mrb[58].mxu1 %vm26496_vm6, %v26492_v6 }
0x1419   : > { %v26569_v20 = vpop.f32.mrb[58].mxu1 }
0x141a   : > { %26574 = vst.msk [vmem:[%s1005_s2] sm:$0x1] %vm26573_vm7, %v26569_v20  ;;  %v28188_v2 = vpop.f32.mrb[59].mxu1 }
0x141b PF: > { %s78_s1 = sadd.s32 1, %s29033_s1  }
0x141c   : > { %p75_p4 = scmp.ge.s32.totalorder %s78_s1, 4  }
0x141e   :  { %77 = sbr.rel (!%p75_p4) target bundleno = 58 (0x3a), region = 358 }

</bundles_post_ra>
